<compile_context>
chip_gen: v5e
topology: v5e:2x2
jax: 0.10.0
libtpu: 0.0.40
codegen_flags: <defaults>
</compile_context>

<pallas_src>
import functools

import jax
import jax.numpy as jnp
from jax.experimental import pallas as pl
from jax.experimental.pallas import tpu as pltpu


def _round_up(x, m):
    return (x + m - 1) // m * m


# ----------------------------------------------------------------------------
# Fused kernel: one sample per grid step.
#   conv1 (9 shifted matmuls) -> GN1(+bias) -> LeakyReLU -> (VMEM scratch) ->
#   conv2 (9 shifted matmuls) -> GN2(+bias) -> LeakyReLU -> out
# ----------------------------------------------------------------------------
def _conv_block_kernel(x_ref, w1_ref, b1_ref, g1_ref, be1_ref, m1_ref, mt1_ref,
                       w2_ref, b2_ref, g2_ref, be2_ref, m2_ref, mt2_ref,
                       o_ref, xs_ref, h1s_ref,
                       *, H, W, pad, Cin, eps, neg_slope, compute_dtype):
    HW = H * W
    HWp = HW + 2 * pad
    Cin_p = xs_ref.shape[1]
    Cmid_p = h1s_ref.shape[1]
    Cout = o_ref.shape[2]

    # ---- stage the input tile (HBM carries only the real Cin channels) ----
    # Zero-fill doubles as both the row halo and the lane (K) padding of the
    # lhs; only the (HW, Cin) sub-region is overwritten with real data.
    if Cin < Cin_p:
        xs_ref[...] = jnp.zeros((HWp, Cin_p), compute_dtype)
    else:
        xs_ref[0:pad, :] = jnp.zeros((pad, Cin_p), compute_dtype)
        xs_ref[pad + HW:HWp, :] = jnp.zeros((pad, Cin_p), compute_dtype)
    xs_ref[pad:pad + HW, 0:Cin] = x_ref[0]

    # Zero only the halo rows of the stage-1 staging buffer (its data rows are
    # fully overwritten below).
    h1s_ref[0:pad, :] = jnp.zeros((pad, Cmid_p), compute_dtype)
    h1s_ref[pad + HW:HWp, :] = jnp.zeros((pad, Cmid_p), compute_dtype)

    # Horizontal-edge predicates (vertical out-of-image taps hit the zero halo
    # rows, so only the left/right image edges need masking).
    col = jax.lax.broadcasted_iota(jnp.int32, (HW, 1), 0) % W
    not_left = col > 0          # tap at w-1 is inside the image
    not_right = col < (W - 1)   # tap at w+1 is inside the image

    def conv3x3(src_ref, w_ref):
        """3x3 'SAME' conv: 3 aligned row-window loads, 9 MXU matmuls.

        The rx=+/-1 taps are produced by masking + rolling the f32 matmul
        product (a row shift of the lhs commutes exactly with the matmul), so
        no sublane-misaligned slices / VMEM copies and no bf16 rolls.
        """
        cout = w_ref.shape[2]
        keep_l = jnp.broadcast_to(not_left, (HW, cout))    # hoisted out of loop
        keep_r = jnp.broadcast_to(not_right, (HW, cout))
        acc = jnp.zeros((HW, cout), jnp.float32)
        for t, ry in enumerate((-1, 0, 1)):
            start = pad + ry * W                 # multiple of 8 when W % 8 == 0
            base = src_ref[start:start + HW, :]  # aligned (HW, Cin_p) load
            # rx = 0 (center column tap)
            acc = acc + jnp.dot(base, w_ref[3 * t + 1],
                                preferred_element_type=jnp.float32)
            # rx = -1: mask the w==W-1 rows, then rotate rows down by one.
            p_m1 = jnp.dot(base, w_ref[3 * t + 0],
                           preferred_element_type=jnp.float32)
            acc = acc + pltpu.roll(jnp.where(keep_r, p_m1, 0.0), shift=1, axis=0)
            # rx = +1: mask the w==0 rows, then rotate rows up by one.
            p_p1 = jnp.dot(base, w_ref[3 * t + 2],
                           preferred_element_type=jnp.float32)
            acc = acc + pltpu.roll(jnp.where(keep_l, p_p1, 0.0),
                                   shift=HW - 1, axis=0)
        return acc

    def gn_lrelu(acc, b_ref, g_ref, be_ref, m_ref, mt_ref):
        """GroupNorm + LeakyReLU with the conv bias folded into the stats."""
        ch_sum = jnp.sum(acc, axis=0, keepdims=True)          # (1, C) raw sums
        ch_sq = jnp.sum(acc * acc, axis=0, keepdims=True)
        b = b_ref[...]
        # sum(a+b) = sum(a)+HW*b ; sum((a+b)^2) = sum(a^2)+2b*sum(a)+HW*b^2
        ch_sum_b = ch_sum + HW * b
        ch_sq_b = ch_sq + 2.0 * b * ch_sum + HW * (b * b)
        # m_ref is the one-hot channel->group matrix pre-scaled by 1/count, so
        # these tiny dots give E[x], E[x^2] per group directly.
        mean_g = jnp.dot(ch_sum_b, m_ref[...], preferred_element_type=jnp.float32)
        ex2_g = jnp.dot(ch_sq_b, m_ref[...], preferred_element_type=jnp.float32)
        var_g = jnp.maximum(ex2_g - mean_g * mean_g, 0.0)      # cancellation guard
        inv_g = jax.lax.rsqrt(var_g + eps)
        mean_c = jnp.dot(mean_g, mt_ref[...], preferred_element_type=jnp.float32)
        inv_c = jnp.dot(inv_g, mt_ref[...], preferred_element_type=jnp.float32)
        scale = inv_c * g_ref[...]
        shift = be_ref[...] + (b - mean_c) * scale             # bias folded here
        y = acc * scale + shift
        return jnp.where(y > 0, y, neg_slope * y)

    # ---- stage 1: conv1 + gn1 + act1 ----
    y1 = gn_lrelu(conv3x3(xs_ref, w1_ref), b1_ref, g1_ref, be1_ref, m1_ref, mt1_ref)
    # Stage the activation (compute dtype) for the second conv: the
    # intermediate never round-trips HBM.
    h1s_ref[pad:pad + HW, :] = y1.astype(compute_dtype)

    # ---- stage 2: conv2 + gn2 + act2 ----
    y2 = gn_lrelu(conv3x3(h1s_ref, w2_ref), b2_ref, g2_ref, be2_ref, m2_ref, mt2_ref)

    # Dropout2d is identity in eval mode.
    o_ref[0] = y2[:, 0:Cout].astype(o_ref.dtype)


# ----------------------------------------------------------------------------
# Wrapper glue (layout only: NCHW -> flattened NHWC; weights padded host-side).
# ----------------------------------------------------------------------------
def _membership(c_real, c_pad, groups, count):
    """One-hot channel->group matrix; zero rows for padded channels."""
    cpg = c_real // groups
    ch = jnp.arange(c_pad)
    onehot = ((ch[:, None] // cpg) == jnp.arange(groups)[None, :]) & (ch[:, None] < c_real)
    onehot = onehot.astype(jnp.float32)
    return onehot / float(count), onehot.T


def conv_block_forward(x_nchw, params, *, eps=1e-5,
                       compute_dtype=jnp.bfloat16, out_dtype=None):
    """ConvBlock forward (NCHW in / NCHW out), fused into one Pallas kernel."""
    if out_dtype is None:
        out_dtype = compute_dtype
    N, Cin, H, W = x_nchw.shape
    HW = H * W
    pad = _round_up(W, 8)        # halo rows (>= W); multiple of 8 keeps tap loads aligned
    HWp = HW + 2 * pad

    w1, w2 = params["w1_hwio"], params["w2_hwio"]
    Cmid, Cout = w1.shape[-1], w2.shape[-1]
    G1, G2 = params["groups1"], params["groups2"]
    Cin_p, Cmid_p, Cout_p = (_round_up(c, 128) for c in (Cin, Cmid, Cout))

    # Activations stay at their REAL channel count (and without halo rows) in
    # HBM; all padding happens in VMEM inside the kernel.
    x = jnp.transpose(x_nchw, (0, 2, 3, 1)).reshape(N, HW, Cin).astype(compute_dtype)

    # Weights / per-channel vectors are tiny -> pad them host-side.
    w1_t = jnp.pad(w1, ((0, 0), (0, 0), (0, Cin_p - Cin), (0, Cmid_p - Cmid)))
    w1_t = w1_t.reshape(9, Cin_p, Cmid_p).astype(compute_dtype)
    w2_t = jnp.pad(w2, ((0, 0), (0, 0), (0, Cmid_p - Cmid), (0, Cout_p - Cout)))
    w2_t = w2_t.reshape(9, Cmid_p, Cout_p).astype(compute_dtype)

    def row(v, c_pad):
        return jnp.pad(v, (0, c_pad - v.shape[0])).reshape(1, c_pad).astype(jnp.float32)

    b1, g1, be1 = (row(params[k], Cmid_p) for k in ("b1_vec", "g1_vec", "be1_vec"))
    b2, g2, be2 = (row(params[k], Cout_p) for k in ("b2_vec", "g2_vec", "be2_vec"))
    m1, mt1 = _membership(Cmid, Cmid_p, G1, HW * (Cmid // G1))
    m2, mt2 = _membership(Cout, Cout_p, G2, HW * (Cout // G2))

    kern = functools.partial(_conv_block_kernel, H=H, W=W, pad=pad, Cin=Cin,
                             eps=eps, neg_slope=0.01, compute_dtype=compute_dtype)

    cbytes = jnp.dtype(compute_dtype).itemsize
    obytes = jnp.dtype(out_dtype).itemsize
    # Resident VMEM footprint (scratch + double-buffered blocks) plus a
    # generous allowance for f32 temporaries; keep well under v7x's 64 MiB.
    resident = (HWp * (Cin_p + Cmid_p) * cbytes
                + 2 * HW * (Cin * cbytes + Cout * obytes)
                + 2 * 9 * (Cin_p * Cmid_p + Cmid_p * Cout_p) * cbytes
                + 8 * HW * max(Cmid_p, Cout_p) * 4)
    vmem_limit = int(min(96 * 1024 * 1024, resident + 16 * 1024 * 1024))

    cost = pl.CostEstimate(
        flops=2 * N * HW * 9 * (Cin_p * Cmid_p + Cmid_p * Cout_p),
        transcendentals=N * (G1 + G2),
        bytes_accessed=(x.size + w1_t.size + w2_t.size) * cbytes
                       + N * HW * Cout * obytes,
    )

    out = pl.pallas_call(
        kern,
        out_shape=jax.ShapeDtypeStruct((N, HW, Cout), out_dtype),
        grid=(N,),
        in_specs=[
            pl.BlockSpec((1, HW, Cin), lambda n: (n, 0, 0)),        # x (real Cin)
            pl.BlockSpec((9, Cin_p, Cmid_p), lambda n: (0, 0, 0)),  # conv1 taps
            pl.BlockSpec((1, Cmid_p), lambda n: (0, 0)),            # bias1
            pl.BlockSpec((1, Cmid_p), lambda n: (0, 0)),            # gamma1
            pl.BlockSpec((1, Cmid_p), lambda n: (0, 0)),            # beta1
            pl.BlockSpec((Cmid_p, G1), lambda n: (0, 0)),           # ch->group / count
            pl.BlockSpec((G1, Cmid_p), lambda n: (0, 0)),           # group -> channel
            pl.BlockSpec((9, Cmid_p, Cout_p), lambda n: (0, 0, 0)), # conv2 taps
            pl.BlockSpec((1, Cout_p), lambda n: (0, 0)),            # bias2
            pl.BlockSpec((1, Cout_p), lambda n: (0, 0)),            # gamma2
            pl.BlockSpec((1, Cout_p), lambda n: (0, 0)),            # beta2
            pl.BlockSpec((Cout_p, G2), lambda n: (0, 0)),
            pl.BlockSpec((G2, Cout_p), lambda n: (0, 0)),
        ],
        out_specs=pl.BlockSpec((1, HW, Cout), lambda n: (n, 0, 0)),  # real Cout
        scratch_shapes=[
            pltpu.VMEM((HWp, Cin_p), compute_dtype),   # staged input (+halo, +K pad)
            pltpu.VMEM((HWp, Cmid_p), compute_dtype),  # staged stage-1 act (+halo)
        ],
        compiler_params=pltpu.CompilerParams(
            dimension_semantics=("parallel",),
            vmem_limit_bytes=vmem_limit),
        cost_estimate=cost,
    )(x, w1_t, b1, g1, be1, m1, mt1, w2_t, b2, g2, be2, m2, mt2)

    out = out.reshape(N, H, W, Cout)
    return jnp.transpose(out, (0, 3, 1, 2))               # NHWC -> NCHW


# ----------------------------------------------------------------------------
# Deterministic parameter init (shapes match nn.Conv2d / nn.GroupNorm).
# ----------------------------------------------------------------------------
def init_params(key, in_channels, out_channels):
    mid = out_channels // 2
    k1, k2, k3, k4 = jax.random.split(key, 4)
    w1 = jax.random.normal(k1, (3, 3, in_channels, mid), jnp.float32) * 0.1
    w2 = jax.random.normal(k2, (3, 3, mid, out_channels), jnp.float32) * 0.1
    b1 = jax.random.normal(k3, (mid,), jnp.float32) * 0.05
    b2 = jax.random.normal(k4, (out_channels,), jnp.float32) * 0.05
    return {
        "w1_hwio": w1, "w2_hwio": w2,
        "b1_vec": b1, "b2_vec": b2,
        "g1_vec": jnp.ones((mid,), jnp.float32),
        "be1_vec": jnp.zeros((mid,), jnp.float32),
        "g2_vec": jnp.ones((out_channels,), jnp.float32),
        "be2_vec": jnp.zeros((out_channels,), jnp.float32),
        "groups1": min(8, mid), "groups2": min(8, out_channels),
    }


# ----------------------------------------------------------------------------
# Pure-JAX reference (PyTorch semantics) for the correctness check.
# ----------------------------------------------------------------------------
def reference_forward(x_nchw, params, eps=1e-5):
    def conv(x, w_hwio, b):
        y = jax.lax.conv_general_dilated(
            x, w_hwio, (1, 1), "SAME",
            dimension_numbers=("NCHW", "HWIO", "NCHW"))
        return y + b[None, :, None, None]

    def gn(x, gamma, beta, groups):
        N, C, H, W = x.shape
        xg = x.reshape(N, groups, C // groups, H, W)
        mean = xg.mean(axis=(2, 3, 4), keepdims=True)
        var = xg.var(axis=(2, 3, 4), keepdims=True)
        xn = ((xg - mean) / jnp.sqrt(var + eps)).reshape(N, C, H, W)
        return xn * gamma[None, :, None, None] + beta[None, :, None, None]

    def lrelu(x):
        return jnp.where(x > 0, x, 0.01 * x)

    h = lrelu(gn(conv(x_nchw, params["w1_hwio"], params["b1_vec"]),
                 params["g1_vec"], params["be1_vec"], params["groups1"]))
    h = lrelu(gn(conv(h, params["w2_hwio"], params["b2_vec"]),
                 params["g2_vec"], params["be2_vec"], params["groups2"]))
    return h  # dropout is identity in eval


if __name__ == "__main__":
    key = jax.random.PRNGKey(0)
    kx, kp = jax.random.split(key)

    N, IN_CH, OUT_CH, H, W = 2, 4, 8, 16, 16
    x = jax.random.normal(kx, (N, IN_CH, H, W), jnp.float32)
    params = init_params(kp, IN_CH, OUT_CH)

    ref = jax.block_until_ready(reference_forward(x, params))

    # f32-compute path: tight check that the fused conv/GN/LeakyReLU structure
    # matches the PyTorch-equivalent reference.
    out_f32 = jax.block_until_ready(
        conv_block_forward(x, params, compute_dtype=jnp.float32))
    assert out_f32.shape == (N, OUT_CH, H, W), out_f32.shape
    assert jnp.allclose(out_f32, ref, rtol=2e-3, atol=2e-3), \
        float(jnp.max(jnp.abs(out_f32 - ref)))

    # bf16 fast path (bf16 matmul operands, bf16 staging, bf16 output);
    # reference is pure f32, so use a loose tolerance.
    out_bf16 = jax.block_until_ready(
        conv_block_forward(x, params, compute_dtype=jnp.bfloat16))
    assert out_bf16.shape == (N, OUT_CH, H, W), out_bf16.shape
    out_bf16_f32 = out_bf16.astype(jnp.float32)
    assert jnp.allclose(out_bf16_f32, ref, rtol=5e-2, atol=1e-1), \
        float(jnp.max(jnp.abs(out_bf16_f32 - ref)))

    print("KERNEL_OK")
</pallas_src>

<mosaic_0001>
module attributes {stable_mosaic.version = 11 : i64} {
  func.func @_conv_block_kernel(%arg0: i32, %arg1: memref<1x256x4xf32, #tpu.memory_space<vmem>>, %arg2: memref<9x128x128xf32, #tpu.memory_space<vmem>>, %arg3: memref<1x128xf32, #tpu.memory_space<vmem>>, %arg4: memref<1x128xf32, #tpu.memory_space<vmem>>, %arg5: memref<1x128xf32, #tpu.memory_space<vmem>>, %arg6: memref<128x4xf32, #tpu.memory_space<vmem>>, %arg7: memref<4x128xf32, #tpu.memory_space<vmem>>, %arg8: memref<9x128x128xf32, #tpu.memory_space<vmem>>, %arg9: memref<1x128xf32, #tpu.memory_space<vmem>>, %arg10: memref<1x128xf32, #tpu.memory_space<vmem>>, %arg11: memref<1x128xf32, #tpu.memory_space<vmem>>, %arg12: memref<128x8xf32, #tpu.memory_space<vmem>>, %arg13: memref<8x128xf32, #tpu.memory_space<vmem>>, %arg14: memref<1x256x8xf32, #tpu.memory_space<vmem>>, %arg15: memref<288x128xf32, #tpu.memory_space<vmem>>, %arg16: memref<288x128xf32, #tpu.memory_space<vmem>>) attributes {dimension_semantics = [#tpu.dimension_semantics<parallel>], iteration_bounds = array<i64: 2>, scalar_prefetch = 0 : i64, scratch_operands = 2 : i64, tpu.core_type = #tpu.core_type<tc>, window_params = [{transform_indices = @transform_0, window_bounds = array<i64: 1, 256, 4>}, {pipeline_mode = #tpu.pipeline_mode<synchronous>, transform_indices = @transform_1, window_bounds = array<i64: 9, 128, 128>}, {pipeline_mode = #tpu.pipeline_mode<synchronous>, transform_indices = @transform_2, window_bounds = array<i64: 1, 128>}, {pipeline_mode = #tpu.pipeline_mode<synchronous>, transform_indices = @transform_3, window_bounds = array<i64: 1, 128>}, {pipeline_mode = #tpu.pipeline_mode<synchronous>, transform_indices = @transform_4, window_bounds = array<i64: 1, 128>}, {pipeline_mode = #tpu.pipeline_mode<synchronous>, transform_indices = @transform_5, window_bounds = array<i64: 128, 4>}, {pipeline_mode = #tpu.pipeline_mode<synchronous>, transform_indices = @transform_6, window_bounds = array<i64: 4, 128>}, {pipeline_mode = #tpu.pipeline_mode<synchronous>, transform_indices = @transform_7, window_bounds = array<i64: 9, 128, 128>}, {pipeline_mode = #tpu.pipeline_mode<synchronous>, transform_indices = @transform_8, window_bounds = array<i64: 1, 128>}, {pipeline_mode = #tpu.pipeline_mode<synchronous>, transform_indices = @transform_9, window_bounds = array<i64: 1, 128>}, {pipeline_mode = #tpu.pipeline_mode<synchronous>, transform_indices = @transform_10, window_bounds = array<i64: 1, 128>}, {pipeline_mode = #tpu.pipeline_mode<synchronous>, transform_indices = @transform_11, window_bounds = array<i64: 128, 8>}, {pipeline_mode = #tpu.pipeline_mode<synchronous>, transform_indices = @transform_12, window_bounds = array<i64: 8, 128>}, {transform_indices = @transform_13, window_bounds = array<i64: 1, 256, 8>}]} {
    %cst = arith.constant 0.000000e+00 : f32
    %0 = vector.broadcast %cst : f32 to vector<288x128xf32>
    %c0 = arith.constant 0 : index
    %c0_0 = arith.constant 0 : index
    %1 = vector.load %arg15[%c0, %c0_0] : memref<288x128xf32, #tpu.memory_space<vmem>>, vector<288x128xf32>
    tpu.vector_store %arg15[%c0, %c0_0], %0 {strides = array<i32>} : memref<288x128xf32, #tpu.memory_space<vmem>>, vector<288x128xf32>,
    %c0_1 = arith.constant 0 : index
    %c0_2 = arith.constant 0 : index
    %c0_3 = arith.constant 0 : index
    %2 = vector.load %arg1[%c0_1, %c0_2, %c0_3] : memref<1x256x4xf32, #tpu.memory_space<vmem>>, vector<1x256x4xf32>
    %3 = vector.shape_cast %2 : vector<1x256x4xf32> to vector<256x4xf32>
    %c16 = arith.constant 16 : index
    %c0_4 = arith.constant 0 : index
    %4 = vector.load %arg15[%c16, %c0_4] : memref<288x128xf32, #tpu.memory_space<vmem>>, vector<256x4xf32>
    tpu.vector_store %arg15[%c16, %c0_4], %3 {strides = array<i32>} : memref<288x128xf32, #tpu.memory_space<vmem>>, vector<256x4xf32>,
    %cst_5 = arith.constant 0.000000e+00 : f32
    %5 = vector.broadcast %cst_5 : f32 to vector<16x128xf32>
    %c0_6 = arith.constant 0 : index
    %c0_7 = arith.constant 0 : index
    %6 = vector.load %arg16[%c0_6, %c0_7] : memref<288x128xf32, #tpu.memory_space<vmem>>, vector<16x128xf32>
    tpu.vector_store %arg16[%c0_6, %c0_7], %5 {strides = array<i32>} : memref<288x128xf32, #tpu.memory_space<vmem>>, vector<16x128xf32>,
    %cst_8 = arith.constant 0.000000e+00 : f32
    %7 = vector.broadcast %cst_8 : f32 to vector<16x128xf32>
    %c272 = arith.constant 272 : index
    %c0_9 = arith.constant 0 : index
    %8 = vector.load %arg16[%c272, %c0_9] : memref<288x128xf32, #tpu.memory_space<vmem>>, vector<16x128xf32>
    tpu.vector_store %arg16[%c272, %c0_9], %7 {strides = array<i32>} : memref<288x128xf32, #tpu.memory_space<vmem>>, vector<16x128xf32>,
    %9 = tpu.iota {dimensions = array<i32: 0>} : vector<256x1xi32>
    %c16_i32 = arith.constant 16 : i32
    %c0_i32 = arith.constant 0 : i32
    %10 = arith.cmpi eq, %c16_i32, %c0_i32 : i32
    %c1_i32 = arith.constant 1 : i32
    %11 = arith.select %10, %c1_i32, %c16_i32 : i32
    %12 = vector.broadcast %11 : i32 to vector<256x1xi32>
    %13 = arith.remsi %9, %12 : vector<256x1xi32>
    %c0_i32_10 = arith.constant 0 : i32
    %14 = vector.broadcast %c0_i32_10 : i32 to vector<256x1xi32>
    %15 = arith.cmpi ne, %13, %14 : vector<256x1xi32>
    %c0_i32_11 = arith.constant 0 : i32
    %16 = vector.broadcast %c0_i32_11 : i32 to vector<256x1xi32>
    %17 = arith.cmpi slt, %13, %16 : vector<256x1xi32>
    %c0_i32_12 = arith.constant 0 : i32
    %18 = arith.cmpi slt, %11, %c0_i32_12 : i32
    %19 = vector.broadcast %18 : i1 to vector<256x1xi1>
    %20 = vector.broadcast %19 : vector<256x1xi1> to vector<256x1xi1>
    %21 = arith.xori %17, %20 : vector<256x1xi1>
    %22 = arith.andi %21, %15 : vector<256x1xi1>
    %23 = vector.broadcast %11 : i32 to vector<256x1xi32>
    %24 = arith.addi %13, %23 : vector<256x1xi32>
    %25 = arith.select %22, %24, %13 : vector<256x1xi1>, vector<256x1xi32>
    %c0_i32_13 = arith.constant 0 : i32
    %26 = vector.broadcast %c0_i32_13 : i32 to vector<256x1xi32>
    %27 = arith.cmpi sgt, %25, %26 : vector<256x1xi32>
    %c15_i32 = arith.constant 15 : i32
    %28 = vector.broadcast %c15_i32 : i32 to vector<256x1xi32>
    %29 = arith.cmpi slt, %25, %28 : vector<256x1xi32>
    %30 = vector.shape_cast %27 : vector<256x1xi1> to vector<256x1xi1>
    %31 = vector.broadcast %30 : vector<256x1xi1> to vector<256x128xi1>
    %32 = vector.shape_cast %29 : vector<256x1xi1> to vector<256x1xi1>
    %33 = vector.broadcast %32 : vector<256x1xi1> to vector<256x128xi1>
    %cst_14 = arith.constant 0.000000e+00 : f32
    %34 = vector.broadcast %cst_14 : f32 to vector<256x128xf32>
    %c0_15 = arith.constant 0 : index
    %c0_16 = arith.constant 0 : index
    %35 = vector.load %arg15[%c0_15, %c0_16] : memref<288x128xf32, #tpu.memory_space<vmem>>, vector<256x128xf32>
    %c1 = arith.constant 1 : index
    %c0_17 = arith.constant 0 : index
    %c0_18 = arith.constant 0 : index
    %36 = vector.load %arg2[%c1, %c0_17, %c0_18] : memref<9x128x128xf32, #tpu.memory_space<vmem>>, vector<1x128x128xf32>
    %37 = vector.shape_cast %36 : vector<1x128x128xf32> to vector<128x128xf32>
    %cst_19 = arith.constant dense<0.000000e+00> : vector<256x128xf32>
    %38 = tpu.matmul %35, %37, %cst_19 {dimension_numbers = #tpu.dot_dimension_numbers<[1], [0], [0], [1], [0, 0, 1, 1], [], []>} : vector<256x128xf32>, vector<128x128xf32>, vector<256x128xf32> -> vector<256x128xf32>
    %39 = arith.addf %34, %38 : vector<256x128xf32>
    %c0_20 = arith.constant 0 : index
    %c0_21 = arith.constant 0 : index
    %c0_22 = arith.constant 0 : index
    %40 = vector.load %arg2[%c0_20, %c0_21, %c0_22] : memref<9x128x128xf32, #tpu.memory_space<vmem>>, vector<1x128x128xf32>
    %41 = vector.shape_cast %40 : vector<1x128x128xf32> to vector<128x128xf32>
    %cst_23 = arith.constant dense<0.000000e+00> : vector<256x128xf32>
    %42 = tpu.matmul %35, %41, %cst_23 {dimension_numbers = #tpu.dot_dimension_numbers<[1], [0], [0], [1], [0, 0, 1, 1], [], []>} : vector<256x128xf32>, vector<128x128xf32>, vector<256x128xf32> -> vector<256x128xf32>
    %cst_24 = arith.constant 0.000000e+00 : f32
    %43 = vector.broadcast %cst_24 : f32 to vector<256x128xf32>
    %44 = arith.select %33, %42, %43 : vector<256x128xi1>, vector<256x128xf32>
    %c1_i32_25 = arith.constant 1 : i32
    %45 = tpu.dynamic_rotate %44 by %c1_i32_25 dim 0 : vector<256x128xf32>, i32 -> vector<256x128xf32>
    %46 = arith.addf %39, %45 : vector<256x128xf32>
    %c2 = arith.constant 2 : index
    %c0_26 = arith.constant 0 : index
    %c0_27 = arith.constant 0 : index
    %47 = vector.load %arg2[%c2, %c0_26, %c0_27] : memref<9x128x128xf32, #tpu.memory_space<vmem>>, vector<1x128x128xf32>
    %48 = vector.shape_cast %47 : vector<1x128x128xf32> to vector<128x128xf32>
    %cst_28 = arith.constant dense<0.000000e+00> : vector<256x128xf32>
    %49 = tpu.matmul %35, %48, %cst_28 {dimension_numbers = #tpu.dot_dimension_numbers<[1], [0], [0], [1], [0, 0, 1, 1], [], []>} : vector<256x128xf32>, vector<128x128xf32>, vector<256x128xf32> -> vector<256x128xf32>
    %cst_29 = arith.constant 0.000000e+00 : f32
    %50 = vector.broadcast %cst_29 : f32 to vector<256x128xf32>
    %51 = arith.select %31, %49, %50 : vector<256x128xi1>, vector<256x128xf32>
    %c255_i32 = arith.constant 255 : i32
    %52 = tpu.dynamic_rotate %51 by %c255_i32 dim 0 : vector<256x128xf32>, i32 -> vector<256x128xf32>
    %53 = arith.addf %46, %52 : vector<256x128xf32>
    %c16_30 = arith.constant 16 : index
    %c0_31 = arith.constant 0 : index
    %54 = vector.load %arg15[%c16_30, %c0_31] : memref<288x128xf32, #tpu.memory_space<vmem>>, vector<256x128xf32>
    %c4 = arith.constant 4 : index
    %c0_32 = arith.constant 0 : index
    %c0_33 = arith.constant 0 : index
    %55 = vector.load %arg2[%c4, %c0_32, %c0_33] : memref<9x128x128xf32, #tpu.memory_space<vmem>>, vector<1x128x128xf32>
    %56 = vector.shape_cast %55 : vector<1x128x128xf32> to vector<128x128xf32>
    %cst_34 = arith.constant dense<0.000000e+00> : vector<256x128xf32>
    %57 = tpu.matmul %54, %56, %cst_34 {dimension_numbers = #tpu.dot_dimension_numbers<[1], [0], [0], [1], [0, 0, 1, 1], [], []>} : vector<256x128xf32>, vector<128x128xf32>, vector<256x128xf32> -> vector<256x128xf32>
    %58 = arith.addf %53, %57 : vector<256x128xf32>
    %c3 = arith.constant 3 : index
    %c0_35 = arith.constant 0 : index
    %c0_36 = arith.constant 0 : index
    %59 = vector.load %arg2[%c3, %c0_35, %c0_36] : memref<9x128x128xf32, #tpu.memory_space<vmem>>, vector<1x128x128xf32>
    %60 = vector.shape_cast %59 : vector<1x128x128xf32> to vector<128x128xf32>
    %cst_37 = arith.constant dense<0.000000e+00> : vector<256x128xf32>
    %61 = tpu.matmul %54, %60, %cst_37 {dimension_numbers = #tpu.dot_dimension_numbers<[1], [0], [0], [1], [0, 0, 1, 1], [], []>} : vector<256x128xf32>, vector<128x128xf32>, vector<256x128xf32> -> vector<256x128xf32>
    %cst_38 = arith.constant 0.000000e+00 : f32
    %62 = vector.broadcast %cst_38 : f32 to vector<256x128xf32>
    %63 = arith.select %33, %61, %62 : vector<256x128xi1>, vector<256x128xf32>
    %c1_i32_39 = arith.constant 1 : i32
    %64 = tpu.dynamic_rotate %63 by %c1_i32_39 dim 0 : vector<256x128xf32>, i32 -> vector<256x128xf32>
    %65 = arith.addf %58, %64 : vector<256x128xf32>
    %c5 = arith.constant 5 : index
    %c0_40 = arith.constant 0 : index
    %c0_41 = arith.constant 0 : index
    %66 = vector.load %arg2[%c5, %c0_40, %c0_41] : memref<9x128x128xf32, #tpu.memory_space<vmem>>, vector<1x128x128xf32>
    %67 = vector.shape_cast %66 : vector<1x128x128xf32> to vector<128x128xf32>
    %cst_42 = arith.constant dense<0.000000e+00> : vector<256x128xf32>
    %68 = tpu.matmul %54, %67, %cst_42 {dimension_numbers = #tpu.dot_dimension_numbers<[1], [0], [0], [1], [0, 0, 1, 1], [], []>} : vector<256x128xf32>, vector<128x128xf32>, vector<256x128xf32> -> vector<256x128xf32>
    %cst_43 = arith.constant 0.000000e+00 : f32
    %69 = vector.broadcast %cst_43 : f32 to vector<256x128xf32>
    %70 = arith.select %31, %68, %69 : vector<256x128xi1>, vector<256x128xf32>
    %c255_i32_44 = arith.constant 255 : i32
    %71 = tpu.dynamic_rotate %70 by %c255_i32_44 dim 0 : vector<256x128xf32>, i32 -> vector<256x128xf32>
    %72 = arith.addf %65, %71 : vector<256x128xf32>
    %c32 = arith.constant 32 : index
    %c0_45 = arith.constant 0 : index
    %73 = vector.load %arg15[%c32, %c0_45] : memref<288x128xf32, #tpu.memory_space<vmem>>, vector<256x128xf32>
    %c7 = arith.constant 7 : index
    %c0_46 = arith.constant 0 : index
    %c0_47 = arith.constant 0 : index
    %74 = vector.load %arg2[%c7, %c0_46, %c0_47] : memref<9x128x128xf32, #tpu.memory_space<vmem>>, vector<1x128x128xf32>
    %75 = vector.shape_cast %74 : vector<1x128x128xf32> to vector<128x128xf32>
    %cst_48 = arith.constant dense<0.000000e+00> : vector<256x128xf32>
    %76 = tpu.matmul %73, %75, %cst_48 {dimension_numbers = #tpu.dot_dimension_numbers<[1], [0], [0], [1], [0, 0, 1, 1], [], []>} : vector<256x128xf32>, vector<128x128xf32>, vector<256x128xf32> -> vector<256x128xf32>
    %77 = arith.addf %72, %76 : vector<256x128xf32>
    %c6 = arith.constant 6 : index
    %c0_49 = arith.constant 0 : index
    %c0_50 = arith.constant 0 : index
    %78 = vector.load %arg2[%c6, %c0_49, %c0_50] : memref<9x128x128xf32, #tpu.memory_space<vmem>>, vector<1x128x128xf32>
    %79 = vector.shape_cast %78 : vector<1x128x128xf32> to vector<128x128xf32>
    %cst_51 = arith.constant dense<0.000000e+00> : vector<256x128xf32>
    %80 = tpu.matmul %73, %79, %cst_51 {dimension_numbers = #tpu.dot_dimension_numbers<[1], [0], [0], [1], [0, 0, 1, 1], [], []>} : vector<256x128xf32>, vector<128x128xf32>, vector<256x128xf32> -> vector<256x128xf32>
    %cst_52 = arith.constant 0.000000e+00 : f32
    %81 = vector.broadcast %cst_52 : f32 to vector<256x128xf32>
    %82 = arith.select %33, %80, %81 : vector<256x128xi1>, vector<256x128xf32>
    %c1_i32_53 = arith.constant 1 : i32
    %83 = tpu.dynamic_rotate %82 by %c1_i32_53 dim 0 : vector<256x128xf32>, i32 -> vector<256x128xf32>
    %84 = arith.addf %77, %83 : vector<256x128xf32>
    %c8 = arith.constant 8 : index
    %c0_54 = arith.constant 0 : index
    %c0_55 = arith.constant 0 : index
    %85 = vector.load %arg2[%c8, %c0_54, %c0_55] : memref<9x128x128xf32, #tpu.memory_space<vmem>>, vector<1x128x128xf32>
    %86 = vector.shape_cast %85 : vector<1x128x128xf32> to vector<128x128xf32>
    %cst_56 = arith.constant dense<0.000000e+00> : vector<256x128xf32>
    %87 = tpu.matmul %73, %86, %cst_56 {dimension_numbers = #tpu.dot_dimension_numbers<[1], [0], [0], [1], [0, 0, 1, 1], [], []>} : vector<256x128xf32>, vector<128x128xf32>, vector<256x128xf32> -> vector<256x128xf32>
    %cst_57 = arith.constant 0.000000e+00 : f32
    %88 = vector.broadcast %cst_57 : f32 to vector<256x128xf32>
    %89 = arith.select %31, %87, %88 : vector<256x128xi1>, vector<256x128xf32>
    %c255_i32_58 = arith.constant 255 : i32
    %90 = tpu.dynamic_rotate %89 by %c255_i32_58 dim 0 : vector<256x128xf32>, i32 -> vector<256x128xf32>
    %91 = arith.addf %84, %90 : vector<256x128xf32>
    %cst_59 = arith.constant dense<0.000000e+00> : vector<128xf32>
    %92 = vector.multi_reduction <add>, %91, %cst_59 [0] : vector<256x128xf32> to vector<128xf32>
    %93 = vector.shape_cast %92 : vector<128xf32> to vector<1x128xf32>
    %94 = arith.mulf %91, %91 : vector<256x128xf32>
    %cst_60 = arith.constant dense<0.000000e+00> : vector<128xf32>
    %95 = vector.multi_reduction <add>, %94, %cst_60 [0] : vector<256x128xf32> to vector<128xf32>
    %96 = vector.shape_cast %95 : vector<128xf32> to vector<1x128xf32>
    %c0_61 = arith.constant 0 : index
    %c0_62 = arith.constant 0 : index
    %97 = vector.load %arg3[%c0_61, %c0_62] : memref<1x128xf32, #tpu.memory_space<vmem>>, vector<1x128xf32>
    %cst_63 = arith.constant 2.560000e+02 : f32
    %98 = vector.broadcast %cst_63 : f32 to vector<1x128xf32>
    %99 = arith.mulf %98, %97 : vector<1x128xf32>
    %100 = arith.addf %93, %99 : vector<1x128xf32>
    %cst_64 = arith.constant 2.000000e+00 : f32
    %101 = vector.broadcast %cst_64 : f32 to vector<1x128xf32>
    %102 = arith.mulf %101, %97 : vector<1x128xf32>
    %103 = arith.mulf %102, %93 : vector<1x128xf32>
    %104 = arith.addf %96, %103 : vector<1x128xf32>
    %105 = arith.mulf %97, %97 : vector<1x128xf32>
    %cst_65 = arith.constant 2.560000e+02 : f32
    %106 = vector.broadcast %cst_65 : f32 to vector<1x128xf32>
    %107 = arith.mulf %106, %105 : vector<1x128xf32>
    %108 = arith.addf %104, %107 : vector<1x128xf32>
    %c0_66 = arith.constant 0 : index
    %c0_67 = arith.constant 0 : index
    %109 = vector.load %arg6[%c0_66, %c0_67] : memref<128x4xf32, #tpu.memory_space<vmem>>, vector<128x4xf32>
    %cst_68 = arith.constant dense<0.000000e+00> : vector<1x4xf32>
    %110 = tpu.matmul %100, %109, %cst_68 {dimension_numbers = #tpu.dot_dimension_numbers<[1], [0], [0], [1], [0, 0, 1, 1], [], []>} : vector<1x128xf32>, vector<128x4xf32>, vector<1x4xf32> -> vector<1x4xf32>
    %c0_69 = arith.constant 0 : index
    %c0_70 = arith.constant 0 : index
    %111 = vector.load %arg6[%c0_69, %c0_70] : memref<128x4xf32, #tpu.memory_space<vmem>>, vector<128x4xf32>
    %cst_71 = arith.constant dense<0.000000e+00> : vector<1x4xf32>
    %112 = tpu.matmul %108, %111, %cst_71 {dimension_numbers = #tpu.dot_dimension_numbers<[1], [0], [0], [1], [0, 0, 1, 1], [], []>} : vector<1x128xf32>, vector<128x4xf32>, vector<1x4xf32> -> vector<1x4xf32>
    %113 = arith.mulf %110, %110 : vector<1x4xf32>
    %114 = arith.subf %112, %113 : vector<1x4xf32>
    %cst_72 = arith.constant 0.000000e+00 : f32
    %115 = vector.broadcast %cst_72 : f32 to vector<1x4xf32>
    %116 = arith.maximumf %114, %115 : vector<1x4xf32>
    %cst_73 = arith.constant 9.99999974E-6 : f32
    %117 = vector.broadcast %cst_73 : f32 to vector<1x4xf32>
    %118 = arith.addf %116, %117 : vector<1x4xf32>
    %119 = math.rsqrt %118 : vector<1x4xf32>
    %c0_74 = arith.constant 0 : index
    %c0_75 = arith.constant 0 : index
    %120 = vector.load %arg7[%c0_74, %c0_75] : memref<4x128xf32, #tpu.memory_space<vmem>>, vector<4x128xf32>
    %cst_76 = arith.constant dense<0.000000e+00> : vector<1x128xf32>
    %121 = tpu.matmul %110, %120, %cst_76 {dimension_numbers = #tpu.dot_dimension_numbers<[1], [0], [0], [1], [0, 0, 1, 1], [], []>} : vector<1x4xf32>, vector<4x128xf32>, vector<1x128xf32> -> vector<1x128xf32>
    %c0_77 = arith.constant 0 : index
    %c0_78 = arith.constant 0 : index
    %122 = vector.load %arg7[%c0_77, %c0_78] : memref<4x128xf32, #tpu.memory_space<vmem>>, vector<4x128xf32>
    %cst_79 = arith.constant dense<0.000000e+00> : vector<1x128xf32>
    %123 = tpu.matmul %119, %122, %cst_79 {dimension_numbers = #tpu.dot_dimension_numbers<[1], [0], [0], [1], [0, 0, 1, 1], [], []>} : vector<1x4xf32>, vector<4x128xf32>, vector<1x128xf32> -> vector<1x128xf32>
    %c0_80 = arith.constant 0 : index
    %c0_81 = arith.constant 0 : index
    %124 = vector.load %arg4[%c0_80, %c0_81] : memref<1x128xf32, #tpu.memory_space<vmem>>, vector<1x128xf32>
    %125 = arith.mulf %123, %124 : vector<1x128xf32>
    %c0_82 = arith.constant 0 : index
    %c0_83 = arith.constant 0 : index
    %126 = vector.load %arg5[%c0_82, %c0_83] : memref<1x128xf32, #tpu.memory_space<vmem>>, vector<1x128xf32>
    %127 = arith.subf %97, %121 : vector<1x128xf32>
    %128 = arith.mulf %127, %125 : vector<1x128xf32>
    %129 = arith.addf %126, %128 : vector<1x128xf32>
    %130 = vector.broadcast %125 : vector<1x128xf32> to vector<256x128xf32>
    %131 = arith.mulf %91, %130 : vector<256x128xf32>
    %132 = vector.broadcast %129 : vector<1x128xf32> to vector<256x128xf32>
    %133 = arith.addf %131, %132 : vector<256x128xf32>
    %cst_84 = arith.constant 0.000000e+00 : f32
    %134 = vector.broadcast %cst_84 : f32 to vector<256x128xf32>
    %135 = arith.cmpf ogt, %133, %134 : vector<256x128xf32>
    %cst_85 = arith.constant 0.00999999977 : f32
    %136 = vector.broadcast %cst_85 : f32 to vector<256x128xf32>
    %137 = arith.mulf %136, %133 : vector<256x128xf32>
    %138 = arith.select %135, %133, %137 : vector<256x128xi1>, vector<256x128xf32>
    %c16_86 = arith.constant 16 : index
    %c0_87 = arith.constant 0 : index
    %139 = vector.load %arg16[%c16_86, %c0_87] : memref<288x128xf32, #tpu.memory_space<vmem>>, vector<256x128xf32>
    tpu.vector_store %arg16[%c16_86, %c0_87], %138 {strides = array<i32>} : memref<288x128xf32, #tpu.memory_space<vmem>>, vector<256x128xf32>,
    %140 = vector.shape_cast %27 : vector<256x1xi1> to vector<256x1xi1>
    %141 = vector.broadcast %140 : vector<256x1xi1> to vector<256x128xi1>
    %142 = vector.shape_cast %29 : vector<256x1xi1> to vector<256x1xi1>
    %143 = vector.broadcast %142 : vector<256x1xi1> to vector<256x128xi1>
    %cst_88 = arith.constant 0.000000e+00 : f32
    %144 = vector.broadcast %cst_88 : f32 to vector<256x128xf32>
    %c0_89 = arith.constant 0 : index
    %c0_90 = arith.constant 0 : index
    %145 = vector.load %arg16[%c0_89, %c0_90] : memref<288x128xf32, #tpu.memory_space<vmem>>, vector<256x128xf32>
    %c1_91 = arith.constant 1 : index
    %c0_92 = arith.constant 0 : index
    %c0_93 = arith.constant 0 : index
    %146 = vector.load %arg8[%c1_91, %c0_92, %c0_93] : memref<9x128x128xf32, #tpu.memory_space<vmem>>, vector<1x128x128xf32>
    %147 = vector.shape_cast %146 : vector<1x128x128xf32> to vector<128x128xf32>
    %cst_94 = arith.constant dense<0.000000e+00> : vector<256x128xf32>
    %148 = tpu.matmul %145, %147, %cst_94 {dimension_numbers = #tpu.dot_dimension_numbers<[1], [0], [0], [1], [0, 0, 1, 1], [], []>} : vector<256x128xf32>, vector<128x128xf32>, vector<256x128xf32> -> vector<256x128xf32>
    %149 = arith.addf %144, %148 : vector<256x128xf32>
    %c0_95 = arith.constant 0 : index
    %c0_96 = arith.constant 0 : index
    %c0_97 = arith.constant 0 : index
    %150 = vector.load %arg8[%c0_95, %c0_96, %c0_97] : memref<9x128x128xf32, #tpu.memory_space<vmem>>, vector<1x128x128xf32>
    %151 = vector.shape_cast %150 : vector<1x128x128xf32> to vector<128x128xf32>
    %cst_98 = arith.constant dense<0.000000e+00> : vector<256x128xf32>
    %152 = tpu.matmul %145, %151, %cst_98 {dimension_numbers = #tpu.dot_dimension_numbers<[1], [0], [0], [1], [0, 0, 1, 1], [], []>} : vector<256x128xf32>, vector<128x128xf32>, vector<256x128xf32> -> vector<256x128xf32>
    %cst_99 = arith.constant 0.000000e+00 : f32
    %153 = vector.broadcast %cst_99 : f32 to vector<256x128xf32>
    %154 = arith.select %143, %152, %153 : vector<256x128xi1>, vector<256x128xf32>
    %c1_i32_100 = arith.constant 1 : i32
    %155 = tpu.dynamic_rotate %154 by %c1_i32_100 dim 0 : vector<256x128xf32>, i32 -> vector<256x128xf32>
    %156 = arith.addf %149, %155 : vector<256x128xf32>
    %c2_101 = arith.constant 2 : index
    %c0_102 = arith.constant 0 : index
    %c0_103 = arith.constant 0 : index
    %157 = vector.load %arg8[%c2_101, %c0_102, %c0_103] : memref<9x128x128xf32, #tpu.memory_space<vmem>>, vector<1x128x128xf32>
    %158 = vector.shape_cast %157 : vector<1x128x128xf32> to vector<128x128xf32>
    %cst_104 = arith.constant dense<0.000000e+00> : vector<256x128xf32>
    %159 = tpu.matmul %145, %158, %cst_104 {dimension_numbers = #tpu.dot_dimension_numbers<[1], [0], [0], [1], [0, 0, 1, 1], [], []>} : vector<256x128xf32>, vector<128x128xf32>, vector<256x128xf32> -> vector<256x128xf32>
    %cst_105 = arith.constant 0.000000e+00 : f32
    %160 = vector.broadcast %cst_105 : f32 to vector<256x128xf32>
    %161 = arith.select %141, %159, %160 : vector<256x128xi1>, vector<256x128xf32>
    %c255_i32_106 = arith.constant 255 : i32
    %162 = tpu.dynamic_rotate %161 by %c255_i32_106 dim 0 : vector<256x128xf32>, i32 -> vector<256x128xf32>
    %163 = arith.addf %156, %162 : vector<256x128xf32>
    %c16_107 = arith.constant 16 : index
    %c0_108 = arith.constant 0 : index
    %164 = vector.load %arg16[%c16_107, %c0_108] : memref<288x128xf32, #tpu.memory_space<vmem>>, vector<256x128xf32>
    %c4_109 = arith.constant 4 : index
    %c0_110 = arith.constant 0 : index
    %c0_111 = arith.constant 0 : index
    %165 = vector.load %arg8[%c4_109, %c0_110, %c0_111] : memref<9x128x128xf32, #tpu.memory_space<vmem>>, vector<1x128x128xf32>
    %166 = vector.shape_cast %165 : vector<1x128x128xf32> to vector<128x128xf32>
    %cst_112 = arith.constant dense<0.000000e+00> : vector<256x128xf32>
    %167 = tpu.matmul %164, %166, %cst_112 {dimension_numbers = #tpu.dot_dimension_numbers<[1], [0], [0], [1], [0, 0, 1, 1], [], []>} : vector<256x128xf32>, vector<128x128xf32>, vector<256x128xf32> -> vector<256x128xf32>
    %168 = arith.addf %163, %167 : vector<256x128xf32>
    %c3_113 = arith.constant 3 : index
    %c0_114 = arith.constant 0 : index
    %c0_115 = arith.constant 0 : index
    %169 = vector.load %arg8[%c3_113, %c0_114, %c0_115] : memref<9x128x128xf32, #tpu.memory_space<vmem>>, vector<1x128x128xf32>
    %170 = vector.shape_cast %169 : vector<1x128x128xf32> to vector<128x128xf32>
    %cst_116 = arith.constant dense<0.000000e+00> : vector<256x128xf32>
    %171 = tpu.matmul %164, %170, %cst_116 {dimension_numbers = #tpu.dot_dimension_numbers<[1], [0], [0], [1], [0, 0, 1, 1], [], []>} : vector<256x128xf32>, vector<128x128xf32>, vector<256x128xf32> -> vector<256x128xf32>
    %cst_117 = arith.constant 0.000000e+00 : f32
    %172 = vector.broadcast %cst_117 : f32 to vector<256x128xf32>
    %173 = arith.select %143, %171, %172 : vector<256x128xi1>, vector<256x128xf32>
    %c1_i32_118 = arith.constant 1 : i32
    %174 = tpu.dynamic_rotate %173 by %c1_i32_118 dim 0 : vector<256x128xf32>, i32 -> vector<256x128xf32>
    %175 = arith.addf %168, %174 : vector<256x128xf32>
    %c5_119 = arith.constant 5 : index
    %c0_120 = arith.constant 0 : index
    %c0_121 = arith.constant 0 : index
    %176 = vector.load %arg8[%c5_119, %c0_120, %c0_121] : memref<9x128x128xf32, #tpu.memory_space<vmem>>, vector<1x128x128xf32>
    %177 = vector.shape_cast %176 : vector<1x128x128xf32> to vector<128x128xf32>
    %cst_122 = arith.constant dense<0.000000e+00> : vector<256x128xf32>
    %178 = tpu.matmul %164, %177, %cst_122 {dimension_numbers = #tpu.dot_dimension_numbers<[1], [0], [0], [1], [0, 0, 1, 1], [], []>} : vector<256x128xf32>, vector<128x128xf32>, vector<256x128xf32> -> vector<256x128xf32>
    %cst_123 = arith.constant 0.000000e+00 : f32
    %179 = vector.broadcast %cst_123 : f32 to vector<256x128xf32>
    %180 = arith.select %141, %178, %179 : vector<256x128xi1>, vector<256x128xf32>
    %c255_i32_124 = arith.constant 255 : i32
    %181 = tpu.dynamic_rotate %180 by %c255_i32_124 dim 0 : vector<256x128xf32>, i32 -> vector<256x128xf32>
    %182 = arith.addf %175, %181 : vector<256x128xf32>
    %c32_125 = arith.constant 32 : index
    %c0_126 = arith.constant 0 : index
    %183 = vector.load %arg16[%c32_125, %c0_126] : memref<288x128xf32, #tpu.memory_space<vmem>>, vector<256x128xf32>
    %c7_127 = arith.constant 7 : index
    %c0_128 = arith.constant 0 : index
    %c0_129 = arith.constant 0 : index
    %184 = vector.load %arg8[%c7_127, %c0_128, %c0_129] : memref<9x128x128xf32, #tpu.memory_space<vmem>>, vector<1x128x128xf32>
    %185 = vector.shape_cast %184 : vector<1x128x128xf32> to vector<128x128xf32>
    %cst_130 = arith.constant dense<0.000000e+00> : vector<256x128xf32>
    %186 = tpu.matmul %183, %185, %cst_130 {dimension_numbers = #tpu.dot_dimension_numbers<[1], [0], [0], [1], [0, 0, 1, 1], [], []>} : vector<256x128xf32>, vector<128x128xf32>, vector<256x128xf32> -> vector<256x128xf32>
    %187 = arith.addf %182, %186 : vector<256x128xf32>
    %c6_131 = arith.constant 6 : index
    %c0_132 = arith.constant 0 : index
    %c0_133 = arith.constant 0 : index
    %188 = vector.load %arg8[%c6_131, %c0_132, %c0_133] : memref<9x128x128xf32, #tpu.memory_space<vmem>>, vector<1x128x128xf32>
    %189 = vector.shape_cast %188 : vector<1x128x128xf32> to vector<128x128xf32>
    %cst_134 = arith.constant dense<0.000000e+00> : vector<256x128xf32>
    %190 = tpu.matmul %183, %189, %cst_134 {dimension_numbers = #tpu.dot_dimension_numbers<[1], [0], [0], [1], [0, 0, 1, 1], [], []>} : vector<256x128xf32>, vector<128x128xf32>, vector<256x128xf32> -> vector<256x128xf32>
    %cst_135 = arith.constant 0.000000e+00 : f32
    %191 = vector.broadcast %cst_135 : f32 to vector<256x128xf32>
    %192 = arith.select %143, %190, %191 : vector<256x128xi1>, vector<256x128xf32>
    %c1_i32_136 = arith.constant 1 : i32
    %193 = tpu.dynamic_rotate %192 by %c1_i32_136 dim 0 : vector<256x128xf32>, i32 -> vector<256x128xf32>
    %194 = arith.addf %187, %193 : vector<256x128xf32>
    %c8_137 = arith.constant 8 : index
    %c0_138 = arith.constant 0 : index
    %c0_139 = arith.constant 0 : index
    %195 = vector.load %arg8[%c8_137, %c0_138, %c0_139] : memref<9x128x128xf32, #tpu.memory_space<vmem>>, vector<1x128x128xf32>
    %196 = vector.shape_cast %195 : vector<1x128x128xf32> to vector<128x128xf32>
    %cst_140 = arith.constant dense<0.000000e+00> : vector<256x128xf32>
    %197 = tpu.matmul %183, %196, %cst_140 {dimension_numbers = #tpu.dot_dimension_numbers<[1], [0], [0], [1], [0, 0, 1, 1], [], []>} : vector<256x128xf32>, vector<128x128xf32>, vector<256x128xf32> -> vector<256x128xf32>
    %cst_141 = arith.constant 0.000000e+00 : f32
    %198 = vector.broadcast %cst_141 : f32 to vector<256x128xf32>
    %199 = arith.select %141, %197, %198 : vector<256x128xi1>, vector<256x128xf32>
    %c255_i32_142 = arith.constant 255 : i32
    %200 = tpu.dynamic_rotate %199 by %c255_i32_142 dim 0 : vector<256x128xf32>, i32 -> vector<256x128xf32>
    %201 = arith.addf %194, %200 : vector<256x128xf32>
    %cst_143 = arith.constant dense<0.000000e+00> : vector<128xf32>
    %202 = vector.multi_reduction <add>, %201, %cst_143 [0] : vector<256x128xf32> to vector<128xf32>
    %203 = vector.shape_cast %202 : vector<128xf32> to vector<1x128xf32>
    %204 = arith.mulf %201, %201 : vector<256x128xf32>
    %cst_144 = arith.constant dense<0.000000e+00> : vector<128xf32>
    %205 = vector.multi_reduction <add>, %204, %cst_144 [0] : vector<256x128xf32> to vector<128xf32>
    %206 = vector.shape_cast %205 : vector<128xf32> to vector<1x128xf32>
    %c0_145 = arith.constant 0 : index
    %c0_146 = arith.constant 0 : index
    %207 = vector.load %arg9[%c0_145, %c0_146] : memref<1x128xf32, #tpu.memory_space<vmem>>, vector<1x128xf32>
    %cst_147 = arith.constant 2.560000e+02 : f32
    %208 = vector.broadcast %cst_147 : f32 to vector<1x128xf32>
    %209 = arith.mulf %208, %207 : vector<1x128xf32>
    %210 = arith.addf %203, %209 : vector<1x128xf32>
    %cst_148 = arith.constant 2.000000e+00 : f32
    %211 = vector.broadcast %cst_148 : f32 to vector<1x128xf32>
    %212 = arith.mulf %211, %207 : vector<1x128xf32>
    %213 = arith.mulf %212, %203 : vector<1x128xf32>
    %214 = arith.addf %206, %213 : vector<1x128xf32>
    %215 = arith.mulf %207, %207 : vector<1x128xf32>
    %cst_149 = arith.constant 2.560000e+02 : f32
    %216 = vector.broadcast %cst_149 : f32 to vector<1x128xf32>
    %217 = arith.mulf %216, %215 : vector<1x128xf32>
    %218 = arith.addf %214, %217 : vector<1x128xf32>
    %c0_150 = arith.constant 0 : index
    %c0_151 = arith.constant 0 : index
    %219 = vector.load %arg12[%c0_150, %c0_151] : memref<128x8xf32, #tpu.memory_space<vmem>>, vector<128x8xf32>
    %cst_152 = arith.constant dense<0.000000e+00> : vector<1x8xf32>
    %220 = tpu.matmul %210, %219, %cst_152 {dimension_numbers = #tpu.dot_dimension_numbers<[1], [0], [0], [1], [0, 0, 1, 1], [], []>} : vector<1x128xf32>, vector<128x8xf32>, vector<1x8xf32> -> vector<1x8xf32>
    %c0_153 = arith.constant 0 : index
    %c0_154 = arith.constant 0 : index
    %221 = vector.load %arg12[%c0_153, %c0_154] : memref<128x8xf32, #tpu.memory_space<vmem>>, vector<128x8xf32>
    %cst_155 = arith.constant dense<0.000000e+00> : vector<1x8xf32>
    %222 = tpu.matmul %218, %221, %cst_155 {dimension_numbers = #tpu.dot_dimension_numbers<[1], [0], [0], [1], [0, 0, 1, 1], [], []>} : vector<1x128xf32>, vector<128x8xf32>, vector<1x8xf32> -> vector<1x8xf32>
    %223 = arith.mulf %220, %220 : vector<1x8xf32>
    %224 = arith.subf %222, %223 : vector<1x8xf32>
    %cst_156 = arith.constant 0.000000e+00 : f32
    %225 = vector.broadcast %cst_156 : f32 to vector<1x8xf32>
    %226 = arith.maximumf %224, %225 : vector<1x8xf32>
    %cst_157 = arith.constant 9.99999974E-6 : f32
    %227 = vector.broadcast %cst_157 : f32 to vector<1x8xf32>
    %228 = arith.addf %226, %227 : vector<1x8xf32>
    %229 = math.rsqrt %228 : vector<1x8xf32>
    %c0_158 = arith.constant 0 : index
    %c0_159 = arith.constant 0 : index
    %230 = vector.load %arg13[%c0_158, %c0_159] : memref<8x128xf32, #tpu.memory_space<vmem>>, vector<8x128xf32>
    %cst_160 = arith.constant dense<0.000000e+00> : vector<1x128xf32>
    %231 = tpu.matmul %220, %230, %cst_160 {dimension_numbers = #tpu.dot_dimension_numbers<[1], [0], [0], [1], [0, 0, 1, 1], [], []>} : vector<1x8xf32>, vector<8x128xf32>, vector<1x128xf32> -> vector<1x128xf32>
    %c0_161 = arith.constant 0 : index
    %c0_162 = arith.constant 0 : index
    %232 = vector.load %arg13[%c0_161, %c0_162] : memref<8x128xf32, #tpu.memory_space<vmem>>, vector<8x128xf32>
    %cst_163 = arith.constant dense<0.000000e+00> : vector<1x128xf32>
    %233 = tpu.matmul %229, %232, %cst_163 {dimension_numbers = #tpu.dot_dimension_numbers<[1], [0], [0], [1], [0, 0, 1, 1], [], []>} : vector<1x8xf32>, vector<8x128xf32>, vector<1x128xf32> -> vector<1x128xf32>
    %c0_164 = arith.constant 0 : index
    %c0_165 = arith.constant 0 : index
    %234 = vector.load %arg10[%c0_164, %c0_165] : memref<1x128xf32, #tpu.memory_space<vmem>>, vector<1x128xf32>
    %235 = arith.mulf %233, %234 : vector<1x128xf32>
    %c0_166 = arith.constant 0 : index
    %c0_167 = arith.constant 0 : index
    %236 = vector.load %arg11[%c0_166, %c0_167] : memref<1x128xf32, #tpu.memory_space<vmem>>, vector<1x128xf32>
    %237 = arith.subf %207, %231 : vector<1x128xf32>
    %238 = arith.mulf %237, %235 : vector<1x128xf32>
    %239 = arith.addf %236, %238 : vector<1x128xf32>
    %240 = vector.broadcast %235 : vector<1x128xf32> to vector<256x128xf32>
    %241 = arith.mulf %201, %240 : vector<256x128xf32>
    %242 = vector.broadcast %239 : vector<1x128xf32> to vector<256x128xf32>
    %243 = arith.addf %241, %242 : vector<256x128xf32>
    %cst_168 = arith.constant 0.000000e+00 : f32
    %244 = vector.broadcast %cst_168 : f32 to vector<256x128xf32>
    %245 = arith.cmpf ogt, %243, %244 : vector<256x128xf32>
    %cst_169 = arith.constant 0.00999999977 : f32
    %246 = vector.broadcast %cst_169 : f32 to vector<256x128xf32>
    %247 = arith.mulf %246, %243 : vector<256x128xf32>
    %248 = arith.select %245, %243, %247 : vector<256x128xi1>, vector<256x128xf32>
    %249 = vector.extract_strided_slice %248 {offsets = [0, 0], sizes = [256, 8], strides = [1, 1]} : vector<256x128xf32> to vector<256x8xf32>
    %c0_170 = arith.constant 0 : index
    %c0_171 = arith.constant 0 : index
    %c0_172 = arith.constant 0 : index
    %250 = vector.load %arg14[%c0_170, %c0_171, %c0_172] : memref<1x256x8xf32, #tpu.memory_space<vmem>>, vector<1x256x8xf32>
    %251 = vector.shape_cast %250 : vector<1x256x8xf32> to vector<256x8xf32>
    %252 = vector.shape_cast %249 : vector<256x8xf32> to vector<1x256x8xf32>
    tpu.vector_store %arg14[%c0_170, %c0_171, %c0_172], %252 {strides = array<i32>} : memref<1x256x8xf32, #tpu.memory_space<vmem>>, vector<1x256x8xf32>,
    return
  }
  func.func @transform_0(%arg0: i32) -> (i32, i32, i32) {
    %c0_i32 = arith.constant 0 : i32
    %c0_i32_0 = arith.constant 0 : i32
    %c0_i32_1 = arith.constant 0 : i32
    return %arg0, %c0_i32, %c0_i32_0 : i32, i32, i32
  }
  func.func @transform_1(%arg0: i32) -> (i32, i32, i32) {
    %c0_i32 = arith.constant 0 : i32
    %c0_i32_0 = arith.constant 0 : i32
    %c0_i32_1 = arith.constant 0 : i32
    %c0_i32_2 = arith.constant 0 : i32
    return %c0_i32, %c0_i32_0, %c0_i32_1 : i32, i32, i32
  }
  func.func @transform_2(%arg0: i32) -> (i32, i32) {
    %c0_i32 = arith.constant 0 : i32
    %c0_i32_0 = arith.constant 0 : i32
    %c0_i32_1 = arith.constant 0 : i32
    return %c0_i32, %c0_i32_0 : i32, i32
  }
  func.func @transform_3(%arg0: i32) -> (i32, i32) {
    %c0_i32 = arith.constant 0 : i32
    %c0_i32_0 = arith.constant 0 : i32
    %c0_i32_1 = arith.constant 0 : i32
    return %c0_i32, %c0_i32_0 : i32, i32
  }
  func.func @transform_4(%arg0: i32) -> (i32, i32) {
    %c0_i32 = arith.constant 0 : i32
    %c0_i32_0 = arith.constant 0 : i32
    %c0_i32_1 = arith.constant 0 : i32
    return %c0_i32, %c0_i32_0 : i32, i32
  }
  func.func @transform_5(%arg0: i32) -> (i32, i32) {
    %c0_i32 = arith.constant 0 : i32
    %c0_i32_0 = arith.constant 0 : i32
    %c0_i32_1 = arith.constant 0 : i32
    return %c0_i32, %c0_i32_0 : i32, i32
  }
  func.func @transform_6(%arg0: i32) -> (i32, i32) {
    %c0_i32 = arith.constant 0 : i32
    %c0_i32_0 = arith.constant 0 : i32
    %c0_i32_1 = arith.constant 0 : i32
    return %c0_i32, %c0_i32_0 : i32, i32
  }
  func.func @transform_7(%arg0: i32) -> (i32, i32, i32) {
    %c0_i32 = arith.constant 0 : i32
    %c0_i32_0 = arith.constant 0 : i32
    %c0_i32_1 = arith.constant 0 : i32
    %c0_i32_2 = arith.constant 0 : i32
    return %c0_i32, %c0_i32_0, %c0_i32_1 : i32, i32, i32
  }
  func.func @transform_8(%arg0: i32) -> (i32, i32) {
    %c0_i32 = arith.constant 0 : i32
    %c0_i32_0 = arith.constant 0 : i32
    %c0_i32_1 = arith.constant 0 : i32
    return %c0_i32, %c0_i32_0 : i32, i32
  }
  func.func @transform_9(%arg0: i32) -> (i32, i32) {
    %c0_i32 = arith.constant 0 : i32
    %c0_i32_0 = arith.constant 0 : i32
    %c0_i32_1 = arith.constant 0 : i32
    return %c0_i32, %c0_i32_0 : i32, i32
  }
  func.func @transform_10(%arg0: i32) -> (i32, i32) {
    %c0_i32 = arith.constant 0 : i32
    %c0_i32_0 = arith.constant 0 : i32
    %c0_i32_1 = arith.constant 0 : i32
    return %c0_i32, %c0_i32_0 : i32, i32
  }
  func.func @transform_11(%arg0: i32) -> (i32, i32) {
    %c0_i32 = arith.constant 0 : i32
    %c0_i32_0 = arith.constant 0 : i32
    %c0_i32_1 = arith.constant 0 : i32
    return %c0_i32, %c0_i32_0 : i32, i32
  }
  func.func @transform_12(%arg0: i32) -> (i32, i32) {
    %c0_i32 = arith.constant 0 : i32
    %c0_i32_0 = arith.constant 0 : i32
    %c0_i32_1 = arith.constant 0 : i32
    return %c0_i32, %c0_i32_0 : i32, i32
  }
  func.func @transform_13(%arg0: i32) -> (i32, i32, i32) {
    %c0_i32 = arith.constant 0 : i32
    %c0_i32_0 = arith.constant 0 : i32
    %c0_i32_1 = arith.constant 0 : i32
    return %arg0, %c0_i32, %c0_i32_0 : i32, i32, i32
  }
}

</mosaic_0001>

<bundles_post_ra>
// kernel: tpu_custom_call.1
= control target key start
LH: loop header
LB: loop body
LE: loop exit
PB: predicated region body
PF: predicated region fallthrough
CT: control target
= control target key end

     0   :  { %18 = vsyncpa [#allocation5], 0  ;;  %s11226_s0 = inlined_call_operand.vmem [shape: f32[2,256,4], index: 0, kind: input, shape index: {}]   ;;  %s11227_s1 = inlined_call_operand.hbm [shape: f32[9,128,128], index: 1, kind: input, shape index: {}]   ;;  %s11228_s2 = inlined_call_operand.vmem [shape: f32[1,128], index: 2, kind: input, shape index: {}]   ;;  %s11229_s3 = inlined_call_operand.vmem [shape: f32[1,128], index: 3, kind: input, shape index: {}]   ;;  %s11230_s4 = inlined_call_operand.vmem [shape: f32[1,128], index: 4, kind: input, shape index: {}]   ;;  %s11231_s5 = inlined_call_operand.vmem [shape: f32[128,4], index: 5, kind: input, shape index: {}]   ;;  %s11232_s6 = inlined_call_operand.vmem [shape: f32[4,128], index: 6, kind: input, shape index: {}]   ;;  %s11233_s7 = inlined_call_operand.hbm [shape: f32[9,128,128], index: 7, kind: input, shape index: {}]   ;;  %s11234_s8 = inlined_call_operand.vmem [shape: f32[1,128], index: 8, kind: input, shape index: {}]   ;;  %s11235_s9 = inlined_call_operand.vmem [shape: f32[1,128], index: 9, kind: input, shape index: {}]   ;;  %s11236_s10 = inlined_call_operand.vmem [shape: f32[1,128], index: 10, kind: input, shape index: {}]   ;;  %s11237_s11 = inlined_call_operand.vmem [shape: f32[128,8], index: 11, kind: input, shape index: {}]   ;;  %s11238_s12 = inlined_call_operand.vmem [shape: f32[8,128], index: 12, kind: input, shape index: {}]   ;;  %s11239_s13 = inlined_call_operand.vmem [shape: f32[2,256,8], index: 13, kind: output, shape index: {}]  }
   0x1   :  { %19 = vsyncpa [#allocation7], 0  ;;  %s6546_s25 = smov 0  }
   0x2 LB: > { %s345_s28 = sshll.u32 %s11227_s1, 4  ;;  %s6555_s29 = sadd.s32 4294967295, %s6469_s25   ;;  %s6469_s25 = sphi %s6546_s25, %s25_s25   ;;  %s346_s28 = int_to_ptr.hbm [resolvable:$true] %s345_s28 }
   0x3   : > { %p6273_p0 = scmp.ge.s32.totalorder %s6469_s25, 1  ;;  %p334_p1 = scmp.lt.s32.totalorder %s6469_s25, 3 }
   0x4   : > { %p6341_p2 = scmp.eq.s32.totalorder %s6555_s29, 0  ;;  %s6471_s14 = smov [#allocation4]  }
   0x5   : > { %p6560_p3 = pnand %p6273_p0, %p334_p1  ;;  %s347_s15 = sshll.u32 %s6471_s14, 4  ;;  %s348_s15 = int_to_ptr.vmem [resolvable:$true] %s347_s15 }
   0x6   : > { %s374_s18 = sshll.u32 %s11233_s7, 4  ;;  %s6472_s19 = smov [#allocation6]   ;;  %s375_s18 = int_to_ptr.hbm [resolvable:$true] %s374_s18 }
   0x7   : > { %p6334_p4 = pneg %p6560_p3  ;;  %s376_s20 = sshll.u32 %s6472_s19, 4  ;;  %s377_s20 = int_to_ptr.vmem [resolvable:$true] %s376_s20 }
   0x8   : > { %s6473_s21 = smov 128   ;;  %s6474_s22 = smov 8  }
   0x9   : > { %p6335_p5 = pnand %p6341_p2, %p6334_p4  ;;  %415 = sbr.rel (%p6560_p3) target bundleno = 2450 (0x992), region = 72 }
   0xb   : > { %6337 = dma.hbm_to_vmem [thread:$0]  (!%p6335_p5), %s346_s28, 18432, %s348_s15, [#allocation5], %s6473_s21, %s6473_s21, %s6474_s22  }
   0xc   : > { %6340 = dma.hbm_to_vmem [thread:$0]  (!%p6335_p5), %s375_s18, 18432, %s377_s20, [#allocation7], %s6473_s21, %s6473_s21, %s6474_s22  }
   0xe   : > { %6460 = dma.done.wait (%p6341_p2), [#allocation5], 18432  }
   0xf   : > { %6462 = vsyncadd (%p6341_p2), [#allocation5], 4294948864 }
  0x10   : > { %6464 = dma.done.wait (%p6341_p2), [#allocation7], 18432  }
  0x11   : > { %6466 = vsyncadd (%p6341_p2), [#allocation7], 4294948864  ;;  %v6475_v0 = vmov 0.0   ;;  %v1253_v1 = vld [vmem:[#allocation4 + $0x78] sm:$0xff]  ;;  %v1252_v3 = vld [vmem:[#allocation4 + $0x70] sm:$0xff]  ;;  %p465_p6 = scmp.lt.s32.totalorder %s6555_s29, 1 }
  0x12   : > { %475 = vst [vmem:[#allocation2] sm:$0xff] %v6475_v0  ;;  %v1593_v2 = vld [vmem:[#allocation4 + $0x178] sm:$0xff]  ;;  %1254 = vmatpush.msra.mxu0 %v1253_v1  ;;  %6294 = vmatpush.msra.mxu1 %v1253_v1  ;;  %v1592_v4 = vld [vmem:[#allocation4 + $0x170] sm:$0xff]  ;;  %v1251_v5 = vld [vmem:[#allocation4 + $0x68] sm:$0xff]  ;;  %vm11280_vm0 = vcmask 31744  }
  0x13   : > { %477 = vst [vmem:[#allocation2 + $0x10] sm:$0xff] %v6475_v0  ;;  %1594 = vmatpush.msra.mxu2 %v1593_v2  ;;  %6310 = vmatpush.msra.mxu3 %v1593_v2  ;;  %v1591_v6 = vld [vmem:[#allocation4 + $0x168] sm:$0xff]  ;;  %v1250_v7 = vld [vmem:[#allocation4 + $0x60] sm:$0xff]  ;;  %v1249_v9 = vld [vmem:[#allocation4 + $0x58] sm:$0xff]  ;;  %s12638_s29 = smov (!%p465_p6, %s6555_s29), 1 }
  0x14   : > { %478 = vst [vmem:[#allocation2 + $0x18] sm:$0xff] %v6475_v0  ;;  %1255 = vmatpush.msra.mxu0 %v1252_v3  ;;  %6295 = vmatpush.msra.mxu1 %v1252_v3  ;;  %v1590_v8 = vld [vmem:[#allocation4 + $0x160] sm:$0xff]  ;;  %v1589_v10 = vld [vmem:[#allocation4 + $0x158] sm:$0xff]  ;;  %v1248_v11 = vld [vmem:[#allocation4 + $0x50] sm:$0xff]  ;;  %s6292_s23 = sshll.u32 %s12638_s29, 8 }
  0x15   : > { %479 = vst [vmem:[#allocation2 + $0x20] sm:$0xff] %v6475_v0  ;;  %1595 = vmatpush.msra.mxu2 %v1592_v4  ;;  %6311 = vmatpush.msra.mxu3 %v1592_v4  ;;  %v1588_v12 = vld [vmem:[#allocation4 + $0x150] sm:$0xff]  ;;  %v1247_v13 = vld [vmem:[#allocation4 + $0x48] sm:$0xff]  ;;  %v1246_v15 = vld [vmem:[#allocation4 + $0x40] sm:$0xff]  ;;  %s6623_s27 = scalar_lea.vmem %s11226_s0, %s6292_s23  ;;  %s11096_s26 = scalar_lea.vmem %s11239_s13, %s6292_s23 }
  0x16   : > { %480 = vst [vmem:[#allocation2 + $0x28] sm:$0xff] %v6475_v0  ;;  %1256 = vmatpush.msra.mxu0 %v1251_v5  ;;  %6296 = vmatpush.msra.mxu1 %v1251_v5  ;;  %v1587_v14 = vld [vmem:[#allocation4 + $0x148] sm:$0xff]  ;;  %v1586_v16 = vld [vmem:[#allocation4 + $0x140] sm:$0xff]  ;;  %v1245_v17 = vld [vmem:[#allocation4 + $0x38] sm:$0xff] }
  0x17   : > { %481 = vst [vmem:[#allocation2 + $0x30] sm:$0xff] %v6475_v0  ;;  %1596 = vmatpush.msra.mxu2 %v1591_v6  ;;  %6312 = vmatpush.msra.mxu3 %v1591_v6  ;;  %v1585_v18 = vld [vmem:[#allocation4 + $0x138] sm:$0xff]  ;;  %v1244_v19 = vld [vmem:[#allocation4 + $0x30] sm:$0xff]  ;;  %v1243_v21 = vld [vmem:[#allocation4 + $0x28] sm:$0xff] }
  0x18   : > { %482 = vst [vmem:[#allocation2 + $0x38] sm:$0xff] %v6475_v0  ;;  %1257 = vmatpush.msra.mxu0 %v1250_v7  ;;  %6297 = vmatpush.msra.mxu1 %v1250_v7  ;;  %v1584_v20 = vld [vmem:[#allocation4 + $0x130] sm:$0xff]  ;;  %v1583_v22 = vld [vmem:[#allocation4 + $0x128] sm:$0xff]  ;;  %v1242_v23 = vld [vmem:[#allocation4 + $0x20] sm:$0xff] }
  0x19   : > { %483 = vst [vmem:[#allocation2 + $0x40] sm:$0xff] %v6475_v0  ;;  %1597 = vmatpush.msra.mxu2 %v1590_v8  ;;  %6313 = vmatpush.msra.mxu3 %v1590_v8  ;;  %v1582_v24 = vld [vmem:[#allocation4 + $0x120] sm:$0xff]  ;;  %v1241_v25 = vld [vmem:[#allocation4 + $0x18] sm:$0xff]  ;;  %v1240_v27 = vld [vmem:[#allocation4 + $0x10] sm:$0xff] }
  0x1a   : > { %484 = vst [vmem:[#allocation2 + $0x48] sm:$0xff] %v6475_v0  ;;  %1258 = vmatpush.msra.mxu0 %v1249_v9  ;;  %6298 = vmatpush.msra.mxu1 %v1249_v9  ;;  %v1581_v26 = vld [vmem:[#allocation4 + $0x118] sm:$0xff]  ;;  %v1580_v28 = vld [vmem:[#allocation4 + $0x110] sm:$0xff]  ;;  %v1239_v29 = vld [vmem:[#allocation4 + $0x8] sm:$0xff] }
  0x1b   : > { %485 = vst [vmem:[#allocation2 + $0x50] sm:$0xff] %v6475_v0  ;;  %1598 = vmatpush.msra.mxu2 %v1589_v10  ;;  %6314 = vmatpush.msra.mxu3 %v1589_v10  ;;  %v1579_v30 = vld [vmem:[#allocation4 + $0x108] sm:$0xff]  ;;  %v530_v31 = vld [vmem:[%s6623_s27 + $0x98] sm:$0xff]  ;;  %v1238_v32 = vld [vmem:[#allocation4] sm:$0xff] }
  0x1c   : > { %486 = vst [vmem:[#allocation2 + $0x58] sm:$0xff] %v6475_v0  ;;  %1259 = vmatpush.msra.mxu0 %v1248_v11  ;;  %6299 = vmatpush.msra.mxu1 %v1248_v11  ;;  %v526_v33 = vld [vmem:[%s6623_s27 + $0x78] sm:$0xff]  ;;  %v1578_v34 = vld [vmem:[#allocation4 + $0x100] sm:$0xff]  ;;  %v532_v40 = vld [vmem:[%s6623_s27 + $0xa8] sm:$0xff] }
  0x1d   : > { %487 = vst [vmem:[#allocation2 + $0x60] sm:$0xff] %v6475_v0  ;;  %1599 = vmatpush.msra.mxu2 %v1588_v12  ;;  %6315 = vmatpush.msra.mxu3 %v1588_v12  ;;  %v531_v35 = vld [vmem:[%s6623_s27 + $0xa0] sm:$0xff]  ;;  %v1884_v37 = vld [vmem:[#allocation4 + $0x278] sm:$0xff]  ;;  %v1883_v41 = vld [vmem:[#allocation4 + $0x270] sm:$0xff] }
  0x1e   : > { %488 = vst [vmem:[#allocation2 + $0x68] sm:$0xff] %v6475_v0  ;;  %1260 = vmatpush.msra.mxu0 %v1247_v13  ;;  %6300 = vmatpush.msra.mxu1 %v1247_v13  ;;  %v527_v36 = vld [vmem:[%s6623_s27 + $0x80] sm:$0xff]  ;;  %v2046_v39 = vld [vmem:[#allocation4 + $0x1f8] sm:$0xff]  ;;  %v528_v42 = vld [vmem:[%s6623_s27 + $0x88] sm:$0xff] }
  0x1f   : > { %489 = vst [vmem:[#allocation2 + $0x70] sm:$0xff] %v6475_v0  ;;  %1600 = vmatpush.msra.mxu2 %v1587_v14  ;;  %6316 = vmatpush.msra.mxu3 %v1587_v14  ;;  %v511_v38 = vld [vmem:[%s6623_s27] sm:$0xff]  ;;  %v2045_v43 = vld [vmem:[#allocation4 + $0x1f0] sm:$0xff]  ;;  %v512_v44 = vld [vmem:[%s6623_s27 + $0x8] sm:$0xff] }
  0x20   : > { %490 = vst [vmem:[#allocation2 + $0x78] sm:$0xff] %v6475_v0  ;;  %1261 = vmatpush.msra.mxu0 %v1246_v15  ;;  %6301 = vmatpush.msra.mxu1 %v1246_v15  ;;  %v1882_v45 = vld [vmem:[#allocation4 + $0x268] sm:$0xff]  ;;  %v533_v46 = vld [vmem:[%s6623_s27 + $0xb0] sm:$0xff]  ;;  %v1881_v49 = vld [vmem:[#allocation4 + $0x260] sm:$0xff] }
  0x21   : > { %491 = vst [vmem:[#allocation2 + $0x80] sm:$0xff] %v6475_v0  ;;  %1601 = vmatpush.msra.mxu2 %v1586_v16  ;;  %6317 = vmatpush.msra.mxu3 %v1586_v16  ;;  %v529_v47 = vld [vmem:[%s6623_s27 + $0x90] sm:$0xff]  ;;  %v534_v52 = vld [vmem:[%s6623_s27 + $0xb8] sm:$0xff]  ;;  %v535_v55 = vld [vmem:[%s6623_s27 + $0xc0] sm:$0xff] }
  0x22   : > { %492 = vst [vmem:[#allocation2 + $0x88] sm:$0xff] %v6475_v0  ;;  %1262 = vmatpush.msra.mxu0 %v1245_v17  ;;  %6302 = vmatpush.msra.mxu1 %v1245_v17  ;;  %v513_v50 = vld [vmem:[%s6623_s27 + $0x10] sm:$0xff]  ;;  %v1880_v53 = vld [vmem:[#allocation4 + $0x258] sm:$0xff]  ;;  %v515_v60 = vld [vmem:[%s6623_s27 + $0x20] sm:$0xff] }
  0x23   : > { %493 = vst [vmem:[#allocation2 + $0x90] sm:$0xff] %v6475_v0  ;;  %1602 = vmatpush.msra.mxu2 %v1585_v18  ;;  %6318 = vmatpush.msra.mxu3 %v1585_v18  ;;  %v514_v54 = vld [vmem:[%s6623_s27 + $0x18] sm:$0xff]  ;;  %v1879_v56 = vld [vmem:[#allocation4 + $0x250] sm:$0xff]  ;;  %v536_v61 = vld [vmem:[%s6623_s27 + $0xc8] sm:$0xff] }
  0x24   : > { %494 = vst [vmem:[#allocation2 + $0x98] sm:$0xff] %v6475_v0  ;;  %1263 = vmatpush.msra.mxu0 %v1244_v19  ;;  %6303 = vmatpush.msra.mxu1 %v1244_v19  ;;  %v2044_v62 = vld [vmem:[#allocation4 + $0x1e8] sm:$0xff]  ;;  %v537_v5 = vld [vmem:[%s6623_s27 + $0xd0] sm:$0xff]  ;;  %v2043_v6 = vld [vmem:[#allocation4 + $0x1e0] sm:$0xff] }
  0x25   : > { %495 = vst [vmem:[#allocation2 + $0xa0] sm:$0xff] %v6475_v0  ;;  %1603 = vmatpush.msra.mxu2 %v1584_v20  ;;  %6319 = vmatpush.msra.mxu3 %v1584_v20  ;;  %v1878_v63 = vld [vmem:[#allocation4 + $0x248] sm:$0xff]  ;;  %v1877_v7 = vld [vmem:[#allocation4 + $0x240] sm:$0xff]  ;;  %v517_v11 = vld [vmem:[%s6623_s27 + $0x30] sm:$0xff] }
  0x26   : > { %496 = vst [vmem:[#allocation2 + $0xa8] sm:$0xff] %v6475_v0  ;;  %1264 = vmatpush.msra.mxu0 %v1243_v21  ;;  %6304 = vmatpush.msra.mxu1 %v1243_v21  ;;  %v516_v4 = vld [vmem:[%s6623_s27 + $0x28] sm:$0xff]  ;;  %v538_v12 = vld [vmem:[%s6623_s27 + $0xd8] sm:$0xff]  ;;  %v1236_v14 = vld [vmem:[#allocation4 + $0xf0] sm:$0xff] }
  0x27   : > { %497 = vst [vmem:[#allocation2 + $0xb0] sm:$0xff] %v6475_v0  ;;  %1604 = vmatpush.msra.mxu2 %v1583_v22  ;;  %6320 = vmatpush.msra.mxu3 %v1583_v22  ;;  %v1237_v13 = vld [vmem:[#allocation4 + $0xf8] sm:$0xff]  ;;  %v1235_v17 = vld [vmem:[#allocation4 + $0xe8] sm:$0xff]  ;;  %v1234_v19 = vld [vmem:[#allocation4 + $0xe0] sm:$0xff] }
  0x28   : > { %498 = vst [vmem:[#allocation2 + $0xb8] sm:$0xff] %v6475_v0  ;;  %1265 = vmatpush.msra.mxu0 %v1242_v23  ;;  %6305 = vmatpush.msra.mxu1 %v1242_v23  ;;  %v1876_v15 = vld [vmem:[#allocation4 + $0x238] sm:$0xff]  ;;  %v539_v22 = vld [vmem:[%s6623_s27 + $0xe0] sm:$0xff] }
  0x29   : > { %499 = vst [vmem:[#allocation2 + $0xc0] sm:$0xff] %v6475_v0  ;;  %1605 = vmatpush.msra.mxu2 %v1582_v24  ;;  %6321 = vmatpush.msra.mxu3 %v1582_v24  ;;  %v2042_v16 = vld [vmem:[#allocation4 + $0x1d8] sm:$0xff]  ;;  %v1875_v24 = vld [vmem:[#allocation4 + $0x230] sm:$0xff] }
  0x2a   : > { %500 = vst [vmem:[#allocation2 + $0xc8] sm:$0xff] %v6475_v0  ;;  %1266 = vmatpush.msra.mxu0 %v1241_v25  ;;  %6306 = vmatpush.msra.mxu1 %v1241_v25  ;;  %v518_v21 = vld [vmem:[%s6623_s27 + $0x38] sm:$0xff]  ;;  %v1232_v25 = vld [vmem:[#allocation4 + $0xd0] sm:$0xff] }
  0x2b   : > { %501 = vst [vmem:[#allocation2 + $0xd0] sm:$0xff] %v6475_v0  ;;  %1606 = vmatpush.msra.mxu2 %v1581_v26  ;;  %6322 = vmatpush.msra.mxu3 %v1581_v26  ;;  %v1233_v23 = vld [vmem:[#allocation4 + $0xd8] sm:$0xff] }
  0x2c   : > { %502 = vst [vmem:[#allocation2 + $0xd8] sm:$0xff] %v6475_v0  ;;  %1267 = vmatpush.msra.mxu0 %v1240_v27  ;;  %6307 = vmatpush.msra.mxu1 %v1240_v27  ;;  %v1231_v27 = vld [vmem:[#allocation4 + $0xc8] sm:$0xff] }
  0x2d   : > { %503 = vst [vmem:[#allocation2 + $0xe0] sm:$0xff] %v6475_v0  ;;  %1607 = vmatpush.msra.mxu2 %v1580_v28  ;;  %6323 = vmatpush.msra.mxu3 %v1580_v28 }
  0x2e   : > { %504 = vst [vmem:[#allocation2 + $0xe8] sm:$0xff] %v6475_v0  ;;  %1268 = vmatpush.msra.mxu0 %v1239_v29  ;;  %6308 = vmatpush.msra.mxu1 %v1239_v29  ;;  %v519_v29 = vld [vmem:[%s6623_s27 + $0x40] sm:$0xff] }
  0x2f   : > { %505 = vst [vmem:[#allocation2 + $0xf0] sm:$0xff] %v6475_v0  ;;  %1608 = vmatpush.msra.mxu2 %v1579_v30  ;;  %6324 = vmatpush.msra.mxu3 %v1579_v30  ;;  %v540_v30 = vld [vmem:[%s6623_s27 + $0xe8] sm:$0xff] }
  0x30   : > { %506 = vst [vmem:[#allocation2 + $0xf8] sm:$0xff] %v6475_v0  ;;  %1269 = vmatpush.msra.mxu0 %v1238_v32  ;;  %6309 = vmatpush.msra.mxu1 %v1238_v32  ;;  %v2041_v32 = vld [vmem:[#allocation4 + $0x1d0] sm:$0xff] }
  0x31   : > { %507 = vst [vmem:[#allocation2 + $0x100] sm:$0xff] %v6475_v0  ;;  %1609 = vmatpush.msra.mxu2 %v1578_v34  ;;  %6325 = vmatpush.msra.mxu3 %v1578_v34  ;;  %v1229_v34 = vld [vmem:[#allocation4 + $0xb8] sm:$0xff] }
  0x32   : > { %508 = vst [vmem:[#allocation2 + $0x108] sm:$0xff] %v6475_v0  ;;  %1270 = vmatmul.f32.vlgmr.msra.gmra.mxu0 %v6475_v0  ;;  %1610 = vmatmul.f32.vlgmr.msra.gmra.mxu2 %v6475_v0 }
  0x33   : > { %563 = vst.msk [vmem:[#allocation2 + $0xa8] sm:$0xff] %vm11280_vm0, %v530_v31  ;;  %1885 = vmatpush.msrb.mxu3 %v1884_v37  ;;  %2047 = vmatpush.msrb.mxu0 %v2046_v39  ;;  %v1230_v31 = vld [vmem:[#allocation4 + $0xc0] sm:$0xff]  ;;  %v1227_v39 = vld [vmem:[#allocation4 + $0xa8] sm:$0xff] }
  0x34   : > { %559 = vst.msk [vmem:[#allocation2 + $0x88] sm:$0xff] %vm11280_vm0, %v526_v33  ;;  %1464 = vmatpush.msrb.mxu1 %v1237_v13  ;;  %v1874_v33 = vld [vmem:[#allocation4 + $0x228] sm:$0xff]  ;;  %v2037_v13 = vld [vmem:[#allocation4 + $0x1b0] sm:$0xff] }
  0x35   : > { %564 = vst.msk [vmem:[#allocation2 + $0xb0] sm:$0xff] %vm11280_vm0, %v531_v35  ;;  %1886 = vmatpush.msrb.mxu3 %v1883_v41  ;;  %2048 = vmatpush.msrb.mxu0 %v2045_v43  ;;  %v1873_v41 = vld [vmem:[#allocation4 + $0x220] sm:$0xff] }
  0x36   : > { %560 = vst.msk [vmem:[#allocation2 + $0x90] sm:$0xff] %vm11280_vm0, %v527_v36  ;;  %1465 = vmatpush.msrb.mxu1 %v1236_v14  ;;  %v1228_v36 = vld [vmem:[#allocation4 + $0xb0] sm:$0xff] }
  0x37   : > { %544 = vst.msk [vmem:[#allocation2 + $0x10] sm:$0xff] %vm11280_vm0, %v511_v38  ;;  %1887 = vmatpush.msrb.mxu3 %v1882_v45  ;;  %2049 = vmatpush.msrb.mxu0 %v2044_v62  ;;  %v520_v38 = vld [vmem:[%s6623_s27 + $0x48] sm:$0xff] }
  0x38   : > { %565 = vst.msk [vmem:[#allocation2 + $0xb8] sm:$0xff] %vm11280_vm0, %v532_v40  ;;  %1466 = vmatpush.msrb.mxu1 %v1235_v17  ;;  %v2040_v40 = vld [vmem:[#allocation4 + $0x1c8] sm:$0xff] }
  0x39   : > { %561 = vst.msk [vmem:[#allocation2 + $0x98] sm:$0xff] %vm11280_vm0, %v528_v42  ;;  %1888 = vmatpush.msrb.mxu3 %v1881_v49  ;;  %2050 = vmatpush.msrb.mxu0 %v2043_v6  ;;  %v1226_v42 = vld [vmem:[#allocation4 + $0xa0] sm:$0xff]  ;;  %v1872_v49 = vld [vmem:[#allocation4 + $0x218] sm:$0xff]  ;;  %v2036_v17 = vld [vmem:[#allocation4 + $0x1a8] sm:$0xff] }
  0x3a   : > { %v6647_v48 = vld [vmem:[#allocation2 + $0xa8] sm:$0xff]  ;;  %545 = vst.msk [vmem:[#allocation2 + $0x18] sm:$0xff] %vm11280_vm0, %v512_v44  ;;  %1273 = vmatmul.f32.gmra.mxu0 %v6475_v0  ;;  %1613 = vmatmul.f32.gmra.mxu2 %v6475_v0  ;;  %v1225_v44 = vld [vmem:[#allocation4 + $0x98] sm:$0xff] }
  0x3b   : > { %1333 = vmatmul.f32.vlgmr.msra.gmra.mxu1 %v6647_v48  ;;  %v6652_v51 = vld [vmem:[#allocation2 + $0x88] sm:$0xff]  ;;  %566 = vst.msk [vmem:[#allocation2 + $0xc0] sm:$0xff] %vm11280_vm0, %v533_v46  ;;  %1889 = vmatpush.msrb.mxu3 %v1880_v53  ;;  %v521_v46 = vld [vmem:[%s6623_s27 + $0x50] sm:$0xff] }
  0x3c   : > { %1661 = vmatmul.f32.vlgmr.msra.gmra.mxu3 %v6652_v51  ;;  %562 = vst.msk [vmem:[#allocation2 + $0xa0] sm:$0xff] %vm11280_vm0, %v529_v47  ;;  %v6665_v57 = vld [vmem:[#allocation2 + $0xb0] sm:$0xff]  ;;  %2051 = vmatpush.msrb.mxu0 %v2042_v16  ;;  %v2756_v16 = vld [vmem:[#allocation4 + $0x378] sm:$0xff] }
  0x3d   : > { %546 = vst.msk [vmem:[#allocation2 + $0x20] sm:$0xff] %vm11280_vm0, %v513_v50  ;;  %v6668_v58 = vld [vmem:[#allocation2 + $0x90] sm:$0xff]  ;;  %1890 = vmatpush.msrb.mxu3 %v1879_v56  ;;  %1467 = vmatpush.msrb.mxu1 %v1234_v19  ;;  %v2039_v50 = vld [vmem:[#allocation4 + $0x1c0] sm:$0xff]  ;;  %v522_v56 = vld [vmem:[%s6623_s27 + $0x58] sm:$0xff] }
  0x3e   : > { %567 = vst.msk [vmem:[#allocation2 + $0xc8] sm:$0xff] %vm11280_vm0, %v534_v52  ;;  %v6671_v59 = vld [vmem:[#allocation2 + $0x10] sm:$0xff]  ;;  %2052 = vmatpush.msrb.mxu0 %v2041_v32  ;;  %v1223_v52 = vld [vmem:[#allocation4 + $0x88] sm:$0xff] }
  0x3f   : > { %547 = vst.msk [vmem:[#allocation2 + $0x28] sm:$0xff] %vm11280_vm0, %v514_v54  ;;  %1891 = vmatpush.msrb.mxu3 %v1878_v63  ;;  %v6680_v1 = vld [vmem:[#allocation2 + $0xb8] sm:$0xff]  ;;  %1468 = vmatpush.msrb.mxu1 %v1233_v23  ;;  %v1224_v47 = vld [vmem:[#allocation4 + $0x90] sm:$0xff]  ;;  %v1222_v54 = vld [vmem:[#allocation4 + $0x80] sm:$0xff] }
  0x40   : > { %568 = vst.msk [vmem:[#allocation2 + $0xd0] sm:$0xff] %vm11280_vm0, %v535_v55  ;;  %v6682_v2 = vld [vmem:[#allocation2 + $0x98] sm:$0xff]  ;;  %2053 = vmatpush.msrb.mxu0 %v2040_v40  ;;  %v2755_v23 = vld [vmem:[#allocation4 + $0x370] sm:$0xff]  ;;  %v2032_v40 = vld [vmem:[#allocation4 + $0x188] sm:$0xff] }
  0x41   : > { %548 = vst.msk [vmem:[#allocation2 + $0x30] sm:$0xff] %vm11280_vm0, %v515_v60  ;;  %v6685_v3 = vld [vmem:[#allocation2 + $0x18] sm:$0xff]  ;;  %1892 = vmatpush.msrb.mxu3 %v1877_v7  ;;  %1469 = vmatpush.msrb.mxu1 %v1232_v25  ;;  %v1871_v60 = vld [vmem:[#allocation4 + $0x210] sm:$0xff] }
  0x42   : > { %569 = vst.msk [vmem:[#allocation2 + $0xd8] sm:$0xff] %vm11280_vm0, %v536_v61  ;;  %1276 = vmatmul.f32.gmra.mxu0 %v6671_v59  ;;  %1616 = vmatmul.f32.gmra.mxu2 %v6671_v59  ;;  %v6694_v8 = vld [vmem:[#allocation2 + $0xc0] sm:$0xff]  ;;  %v2038_v61 = vld [vmem:[#allocation4 + $0x1b8] sm:$0xff] }
  0x43   : > { %1336 = vmatmul.f32.gmra.mxu1 %v6665_v57  ;;  %549 = vst.msk [vmem:[#allocation2 + $0x38] sm:$0xff] %vm11280_vm0, %v516_v4  ;;  %v6696_v9 = vld [vmem:[#allocation2 + $0xa0] sm:$0xff]  ;;  %1893 = vmatpush.msrb.mxu3 %v1876_v15  ;;  %v525_v15 = vld [vmem:[%s6623_s27 + $0x70] sm:$0xff] }
  0x44   : > { %1664 = vmatmul.f32.gmra.mxu3 %v6668_v58  ;;  %570 = vst.msk [vmem:[#allocation2 + $0xe0] sm:$0xff] %vm11280_vm0, %v537_v5  ;;  %v6699_v10 = vld [vmem:[#allocation2 + $0x20] sm:$0xff]  ;;  %1470 = vmatpush.msrb.mxu1 %v1231_v27  ;;  %v1870_v5 = vld [vmem:[#allocation4 + $0x208] sm:$0xff] }
  0x45   : > { %550 = vst.msk [vmem:[#allocation2 + $0x40] sm:$0xff] %vm11280_vm0, %v517_v11  ;;  %v6708_v18 = vld [vmem:[#allocation2 + $0xc8] sm:$0xff]  ;;  %1894 = vmatpush.msrb.mxu3 %v1875_v24  ;;  %2054 = vmatpush.msrb.mxu0 %v2039_v50  ;;  %v523_v4 = vld [vmem:[%s6623_s27 + $0x60] sm:$0xff]  ;;  %v2034_v24 = vld [vmem:[#allocation4 + $0x198] sm:$0xff] }
  0x46   : > { %571 = vst.msk [vmem:[#allocation2 + $0xe8] sm:$0xff] %vm11280_vm0, %v538_v12  ;;  %v6711_v20 = vld [vmem:[#allocation2 + $0x28] sm:$0xff]  ;;  %1471 = vmatpush.msrb.mxu1 %v1230_v31  ;;  %v1869_v12 = vld [vmem:[#allocation4 + $0x200] sm:$0xff] }
  0x47   : > { %551 = vst.msk [vmem:[#allocation2 + $0x48] sm:$0xff] %vm11280_vm0, %v518_v21  ;;  %v6720_v26 = vld [vmem:[#allocation2 + $0xd0] sm:$0xff]  ;;  %1895 = vmatpush.msrb.mxu3 %v1874_v33  ;;  %2055 = vmatpush.msrb.mxu0 %v2038_v61  ;;  %v524_v11 = vld [vmem:[%s6623_s27 + $0x68] sm:$0xff]  ;;  %v2035_v21 = vld [vmem:[#allocation4 + $0x1a0] sm:$0xff] }
  0x48   : > { %572 = vst.msk [vmem:[#allocation2 + $0xf0] sm:$0xff] %vm11280_vm0, %v539_v22  ;;  %v6723_v28 = vld [vmem:[#allocation2 + $0x30] sm:$0xff]  ;;  %1472 = vmatpush.msrb.mxu1 %v1229_v34 }
  0x49   : > { %552 = vst.msk [vmem:[#allocation2 + $0x50] sm:$0xff] %vm11280_vm0, %v519_v29  ;;  %v6732_v35 = vld [vmem:[#allocation2 + $0xd8] sm:$0xff]  ;;  %1896 = vmatpush.msrb.mxu3 %v1873_v41  ;;  %2056 = vmatpush.msrb.mxu0 %v2037_v13  ;;  %v2754_v29 = vld [vmem:[#allocation4 + $0x368] sm:$0xff]  ;;  %v2033_v33 = vld [vmem:[#allocation4 + $0x190] sm:$0xff] }
  0x4a   : > { %1279 = vmatmul.f32.gmra.mxu0 %v6685_v3  ;;  %1619 = vmatmul.f32.gmra.mxu2 %v6685_v3  ;;  %573 = vst.msk [vmem:[#allocation2 + $0xf8] sm:$0xff] %vm11280_vm0, %v540_v30  ;;  %v6735_v37 = vld [vmem:[#allocation2 + $0x38] sm:$0xff]  ;;  %v580_v30 = vlaneseq }
  0x4b   : > { %1339 = vmatmul.f32.gmra.mxu1 %v6680_v1  ;;  %553 = vst.msk [vmem:[#allocation2 + $0x58] sm:$0xff] %vm11280_vm0, %v520_v38  ;;  %v6742_v43 = vld [vmem:[#allocation2 + $0xe0] sm:$0xff]  ;;  %1897 = vmatpush.msrb.mxu3 %v1872_v49 }
  0x4c   : > { %1667 = vmatmul.f32.gmra.mxu3 %v6682_v2  ;;  %1473 = vmatpush.msrb.mxu1 %v1228_v36  ;;  %v6745_v45 = vld [vmem:[#allocation2 + $0x40] sm:$0xff]  ;;  %554 = vst.msk [vmem:[#allocation2 + $0x60] sm:$0xff] %vm11280_vm0, %v521_v46  ;;  %v6818_v32 = vshrl.u32 %v580_v30, 7 }
  0x4d   : > { %v6752_v53 = vld [vmem:[#allocation2 + $0xe8] sm:$0xff]  ;;  %555 = vst.msk [vmem:[#allocation2 + $0x68] sm:$0xff] %vm11280_vm0, %v522_v56  ;;  %1898 = vmatpush.msrb.mxu3 %v1871_v60  ;;  %2057 = vmatpush.msrb.mxu0 %v2036_v17  ;;  %v2753_v46 = vld [vmem:[#allocation4 + $0x360] sm:$0xff] }
  0x4e   : > { %1474 = vmatpush.msrb.mxu1 %v1227_v39  ;;  %v6755_v55 = vld [vmem:[#allocation2 + $0x48] sm:$0xff]  ;;  %556 = vst.msk [vmem:[#allocation2 + $0x70] sm:$0xff] %vm11280_vm0, %v523_v4  ;;  %v599_v36 = vadd.s32 144, %v6818_v32  ;;  %vm11281_vm2 = vcmp.lt.s32.totalorder %v6818_v32, 7  ;;  %v601_v4 = vadd.s32 160, %v6818_v32  ;;  %vm11282_vm12 = vcmp.lt.s32.totalorder %v6818_v32, 1 }
  0x4f   : > { %v6762_v62 = vld [vmem:[#allocation2 + $0xf0] sm:$0xff]  ;;  %1899 = vmatpush.msrb.mxu3 %v1870_v5  ;;  %557 = vst.msk [vmem:[#allocation2 + $0x78] sm:$0xff] %vm11280_vm0, %v524_v11  ;;  %2058 = vmatpush.msrb.mxu0 %v2035_v21  ;;  %v2752_v21 = vld [vmem:[#allocation4 + $0x358] sm:$0xff] }
  0x50   : > { %1475 = vmatpush.msrb.mxu1 %v1226_v42  ;;  %v6765_v63 = vld [vmem:[#allocation2 + $0x50] sm:$0xff]  ;;  %558 = vst.msk [vmem:[#allocation2 + $0x80] sm:$0xff] %vm11280_vm0, %v525_v15  ;;  %v743_v41 = vand.u32 15, %v599_v36  ;;  %v2031_v42 = vld [vmem:[#allocation4 + $0x180] sm:$0xff]  ;;  %v757_v13 = vand.u32 15, %v601_v4  ;;  %v2304_v15 = vld [vmem:[#allocation4 + $0x2f8] sm:$0xff] }
  0x51   : > { %v6772_v6 = vld [vmem:[#allocation2 + $0xf8] sm:$0xff]  ;;  %1900 = vmatpush.msrb.mxu3 %v1869_v12  ;;  %2059 = vmatpush.msrb.mxu0 %v2034_v24  ;;  %v2303_v4 = vld [vmem:[#allocation4 + $0x2f0] sm:$0xff] }
  0x52   : > { %1282 = vmatmul.f32.gmra.mxu0 %v6699_v10  ;;  %1622 = vmatmul.f32.gmra.mxu2 %v6699_v10  ;;  %v6775_v7 = vld [vmem:[#allocation2 + $0x58] sm:$0xff]  ;;  %vm6834_vm1 = vcmp.gt.s32.totalorder %v743_v41, 0  ;;  %vm6867_vm3 = vcmp.gt.s32.totalorder %v757_v13, 0  ;;  %v2751_v13 = vld [vmem:[#allocation4 + $0x350] sm:$0xff] }
  0x53   : > { %1342 = vmatmul.f32.gmra.mxu1 %v6694_v8  ;;  %v6783_v14 = vld [vmem:[#allocation2 + $0x60] sm:$0xff]  ;;  %2757 = vmatpush.msra.mxu3 %v2756_v16  ;;  %v3014_v36 = vld [vmem:[#allocation4 + $0x478] sm:$0xff] }
  0x54   : > { %1670 = vmatmul.f32.gmra.mxu3 %v6696_v9  ;;  %1476 = vmatpush.msrb.mxu1 %v1225_v44  ;;  %v6791_v19 = vld [vmem:[#allocation2 + $0x68] sm:$0xff] }
  0x55   : > { %v6797_v22 = vld [vmem:[#allocation2 + $0x70] sm:$0xff]  ;;  %2758 = vmatpush.msra.mxu3 %v2755_v23  ;;  %2060 = vmatpush.msrb.mxu0 %v2033_v33  ;;  %v11469_v23 = vmov 0 }
  0x56   : > { %1477 = vmatpush.msrb.mxu1 %v1224_v47  ;;  %v11464_v47 = vmov 0  ;;  %v11470_v23 = vsel %vm6867_vm3, 4294967295, %v11469_v23 }
  0x57   : > { %v6811_v27 = vld [vmem:[#allocation2 + $0x80] sm:$0xff]  ;;  %2759 = vmatpush.msra.mxu3 %v2754_v29  ;;  %2061 = vmatpush.msrb.mxu0 %v2032_v40  ;;  %v11465_v47 = vsel %vm6834_vm1, 4294967295, %v11464_v47  ;;  %11471 = vst [vmem:[#allocation15_spill] sm:$0xff] %v11470_v23 }
  0x58   : > { %1478 = vmatpush.msrb.mxu1 %v1223_v52  ;;  %11466 = vst [vmem:[#allocation12_spill] sm:$0xff] %v11465_v47  ;;  %v2749_v47 = vld [vmem:[#allocation4 + $0x340] sm:$0xff] }
  0x59   : > { %2062 = vmatpush.msrb.mxu0 %v2031_v42  ;;  %2760 = vmatpush.msra.mxu3 %v2753_v46  ;;  %v603_v42 = vadd.s32 176, %v6818_v32 }
  0x5a   : > { %1285 = vmatmul.f32.gmra.mxu0 %v6711_v20  ;;  %1625 = vmatmul.f32.gmra.mxu2 %v6711_v20 }
  0x5b   : > { %1345 = vmatmul.f32.gmra.mxu1 %v6708_v18  ;;  %2761 = vmatpush.msra.mxu3 %v2752_v21 }
  0x5c   : > { %1673 = vmatmul.f32.gmra.mxu3 %v6647_v48  ;;  %1479 = vmatpush.msrb.mxu1 %v1222_v54 }
  0x5d   : > { %3015 = vmatpush.msra.mxu0 %v3014_v36  ;;  %2762 = vmatpush.msra.mxu3 %v2751_v13 }
  0x5e   : > { %2305 = vmatpush.msra.mxu1 %v2304_v15 }
  0x60   : > { %2306 = vmatpush.msra.mxu1 %v2303_v4 }
  0x62   : > { %1288 = vmatmul.f32.gmra.mxu0 %v6723_v28  ;;  %1628 = vmatmul.f32.gmra.mxu2 %v6723_v28 }
  0x63   : > { %1348 = vmatmul.f32.gmra.mxu1 %v6720_v26 }
  0x64   : > { %1676 = vmatmul.f32.gmra.mxu3 %v6665_v57 }
  0x6a   : > { %1291 = vmatmul.f32.gmra.mxu0 %v6735_v37  ;;  %1631 = vmatmul.f32.gmra.mxu2 %v6735_v37 }
  0x6b   : > { %1351 = vmatmul.f32.gmra.mxu1 %v6732_v35 }
  0x6c   : > { %1679 = vmatmul.f32.gmra.mxu3 %v6680_v1 }
  0x72   : > { %1294 = vmatmul.f32.gmra.mxu0 %v6745_v45  ;;  %1634 = vmatmul.f32.gmra.mxu2 %v6745_v45 }
  0x73   : > { %1354 = vmatmul.f32.gmra.mxu1 %v6742_v43 }
  0x74   : > { %1682 = vmatmul.f32.gmra.mxu3 %v6694_v8 }
  0x7a   : > { %1297 = vmatmul.f32.gmra.mxu0 %v6755_v55  ;;  %1637 = vmatmul.f32.gmra.mxu2 %v6755_v55 }
  0x7b   : > { %1357 = vmatmul.f32.gmra.mxu1 %v6752_v53 }
  0x7c   : > { %1685 = vmatmul.f32.gmra.mxu3 %v6708_v18 }
  0x82   : > { %1300 = vmatmul.f32.gmra.mxu0 %v6765_v63  ;;  %1640 = vmatmul.f32.gmra.mxu2 %v6765_v63 }
  0x83   : > { %1360 = vmatmul.f32.gmra.mxu1 %v6762_v62 }
  0x84   : > { %1688 = vmatmul.f32.gmra.mxu3 %v6720_v26 }
  0x8a   : > { %1303 = vmatmul.f32.gmra.mxu0 %v6775_v7  ;;  %1643 = vmatmul.f32.gmra.mxu2 %v6775_v7 }
  0x8b   : > { %1363 = vmatmul.f32.gmra.mxu1 %v6772_v6 }
  0x8c   : > { %1691 = vmatmul.f32.gmra.mxu3 %v6732_v35 }
  0x92   : > { %1306 = vmatmul.f32.gmra.mxu0 %v6783_v14  ;;  %1646 = vmatmul.f32.gmra.mxu2 %v6783_v14 }
  0x93   : > { %1480 = vmatmul.f32.vlgmr.msrb.gmra.mxu1 %v6475_v0 }
  0x94   : > { %1694 = vmatmul.f32.gmra.mxu3 %v6742_v43 }
  0x9a   : > { %1309 = vmatmul.f32.gmra.mxu0 %v6791_v19  ;;  %1649 = vmatmul.f32.gmra.mxu2 %v6791_v19 }
  0x9b   : > { %1483 = vmatmul.f32.gmra.mxu1 %v6475_v0  ;;  %v6803_v0 = vld [vmem:[#allocation2 + $0x78] sm:$0xff] }
  0x9c   : > { %1697 = vmatmul.f32.gmra.mxu3 %v6752_v53 }
  0xa2   : > { %1312 = vmatmul.f32.gmra.mxu0 %v6797_v22  ;;  %1652 = vmatmul.f32.gmra.mxu2 %v6797_v22 }
  0xa3   : > { %1486 = vmatmul.f32.gmra.mxu1 %v6671_v59 }
  0xa4   : > { %1700 = vmatmul.f32.gmra.mxu3 %v6762_v62 }
  0xaa   : > { %1315 = vmatmul.f32.gmra.mxu0 %v6803_v0  ;;  %1655 = vmatmul.f32.gmra.mxu2 %v6803_v0 }
  0xab   : > { %1489 = vmatmul.f32.gmra.mxu1 %v6685_v3 }
  0xac   : > { %1703 = vmatmul.f32.gmra.mxu3 %v6772_v6 }
  0xaf   : > { %v6809_v25 = vpop.f32.mrf.mxu0 }
  0xb0   : > { %11462 = vst [vmem:[#allocation10_spill] sm:$0xff] %v6809_v25  ;;  %v6365_v25 = vld [vmem:[#allocation2 + $0x28] sm:$0xff] }
  0xb2   : > { %1318 = vmatmul.f32.gmra.mxu0 %v6811_v27  ;;  %1658 = vmatmul.f32.gmra.mxu2 %v6811_v27 }
  0xb3   : > { %1492 = vmatmul.f32.gmra.mxu1 %v6699_v10 }
  0xb4   : > { %1901 = vmatmul.f32.vlgmr.msrb.gmra.mxu3 %v6671_v59 }
  0xb7   : > { %v6821_v34 = vpop.f32.mrf.mxu0 }
  0xb8   : > { %v6816_v31 = vpop.f32.mrf.mxu1 }
  0xba   : > { %1321 = vmatmul.f32.gmra.mxu0 %v6652_v51 }
  0xbb   : > { %1495 = vmatmul.f32.gmra.mxu1 %v6711_v20 }
  0xbc   : > { %1904 = vmatmul.f32.gmra.mxu3 %v6685_v3 }
  0xbf   : > { %v6826_v38 = vpop.f32.mrf.mxu3  ;;  %v6831_v44 = vpop.f32.mrf.mxu0 }
  0xc0   : > { %v6828_v39 = vpop.f32.mrf.mxu1  ;;  %11463 = vst [vmem:[#allocation11_spill] sm:$0xff] %v6831_v44  ;;  %v11240_v54 = vrot.slane %v6826_v38, 1  ;;  %v7252_v44 = vld [vmem:[#allocation2 + $0x50] sm:$0xff] }
  0xc2   : > { %1324 = vmatmul.f32.gmra.mxu0 %v6668_v58 }
  0xc3   : > { %1498 = vmatmul.f32.gmra.mxu1 %v6723_v28 }
  0xc4   : > { %1907 = vmatmul.f32.gmra.mxu3 %v6699_v10 }
  0xc7   : > { %v1665_v49 = vpop.f32.mrf.mxu3  ;;  %v6846_v60 = vpop.f32.mrf.mxu0 }
  0xc8   : > { %v1725_v50 = vsel %vm6834_vm1, %v1665_v49, 0.0  ;;  %v6841_v52 = vpop.f32.mrf.mxu1  ;;  %11467 = vst [vmem:[#allocation13_spill] sm:$0xff] %v6846_v60 }
  0xc9   : > { %v1757_v56 = vrot.slane %v1725_v50, 1 }
  0xca   : > { %1327 = vmatmul.f32.gmra.mxu0 %v6682_v2 }
  0xcb   : > { %1501 = vmatmul.f32.gmra.mxu1 %v6735_v37  ;;  %v6852_v61 = vsel %vm11281_vm2, %v11240_v54, %v1757_v56  ;;  %v3012_v54 = vld [vmem:[#allocation4 + $0x468] sm:$0xff] }
  0xcc   : > { %1910 = vmatmul.f32.gmra.mxu3 %v6711_v20 }
  0xcf   : > { %v1668_v5 = vpop.f32.mrf.mxu3  ;;  %v6864_v17 = vpop.f32.mrf.mxu0 }
  0xd0   : > { %v1758_v11 = vrot.slane %v1668_v5, 1  ;;  %v6857_v12 = vpop.f32.mrf.mxu1  ;;  %11468 = vst [vmem:[#allocation14_spill] sm:$0xff] %v6864_v17  ;;  %v7029_v17 = vld [vmem:[#allocation2 + $0x88] sm:$0xff] }
  0xd2   : > { %v6861_v16 = vsel %vm11281_vm2, %v1757_v56, %v1758_v11  ;;  %1330 = vmatmul.f32.gmra.mxu0 %v6696_v9  ;;  %v771_v56 = vand.u32 15, %v603_v42 }
  0xd3   : > { %1504 = vmatmul.f32.gmra.mxu1 %v6745_v45 }
  0xd4   : > { %1913 = vmatmul.f32.gmra.mxu3 %v6723_v28  ;;  %vm6896_vm4 = vcmp.gt.s32.totalorder %v771_v56, 0 }
  0xd7   : > { %v1671_v24 = vpop.f32.mrf.mxu3  ;;  %v6877_v40 = vpop.f32.mrf.mxu0 }
  0xd8   : > { %v1727_v29 = vsel %vm6867_vm3, %v1671_v24, 0.0  ;;  %v6874_v30 = vpop.f32.mrf.mxu1  ;;  %11472 = vst [vmem:[#allocation16_spill] sm:$0xff] %v6877_v40  ;;  %v11502_v40 = vmov 0 }
  0xd9   : > { %v1759_v33 = vrot.slane %v1727_v29, 1 }
  0xda   : > { %2063 = vmatmul.f32.vlgmr.msrb.gmra.mxu0 %v6671_v59  ;;  %v11474_v59 = vmov 0 }
  0xdb   : > { %1507 = vmatmul.f32.gmra.mxu1 %v6755_v55  ;;  %v6881_v41 = vsel %vm11281_vm2, %v1758_v11, %v1759_v33  ;;  %v11475_v59 = vsel %vm6896_vm4, 4294967295, %v11474_v59 }
  0xdc   : > { %1916 = vmatmul.f32.gmra.mxu3 %v6735_v37  ;;  %11476 = vst [vmem:[#allocation18_spill] sm:$0xff] %v11475_v59 }
  0xdf   : > { %v1674_v46 = vpop.f32.mrf.mxu3  ;;  %v6893_v11 = vpop.f32.mrf.mxu0 }
  0xe0   : > { %v1760_v49 = vrot.slane %v1674_v46, 1  ;;  %v6886_v50 = vpop.f32.mrf.mxu1  ;;  %11473 = vst [vmem:[#allocation17_spill] sm:$0xff] %v6893_v11 }
  0xe2   : > { %v6890_v5 = vsel %vm11281_vm2, %v1759_v33, %v1760_v49  ;;  %2066 = vmatmul.f32.gmra.mxu0 %v6685_v3  ;;  %v3013_v33 = vld [vmem:[#allocation4 + $0x470] sm:$0xff]  ;;  %v605_v3 = vadd.s32 192, %v6818_v32 }
  0xe3   : > { %1510 = vmatmul.f32.gmra.mxu1 %v6765_v63  ;;  %3016 = vmatpush.msra.mxu0 %v3013_v33  ;;  %v2750_v33 = vld [vmem:[#allocation4 + $0x348] sm:$0xff] }
  0xe4   : > { %1919 = vmatmul.f32.gmra.mxu3 %v6745_v45  ;;  %v785_v13 = vand.u32 15, %v605_v3 }
  0xe5   : > { %2763 = vmatpush.msra.mxu3 %v2750_v33  ;;  %3017 = vmatpush.msra.mxu0 %v3012_v54  ;;  %v2301_v54 = vld [vmem:[#allocation4 + $0x2e0] sm:$0xff] }
  0xe6   : > { %vm6925_vm5 = vcmp.gt.s32.totalorder %v785_v13, 0 }
  0xe7   : > { %v1677_v15 = vpop.f32.mrf.mxu3  ;;  %v6906_v36 = vpop.f32.mrf.mxu0  ;;  %2764 = vmatpush.msra.mxu3 %v2749_v47 }
  0xe8   : > { %v1729_v21 = vsel %vm6896_vm4, %v1677_v15, 0.0  ;;  %v6903_v24 = vpop.f32.mrf.mxu1  ;;  %11477 = vst [vmem:[#allocation19_spill] sm:$0xff] %v6906_v36  ;;  %v2302_v15 = vld [vmem:[#allocation4 + $0x2e8] sm:$0xff]  ;;  %v2748_v36 = vld [vmem:[#allocation4 + $0x338] sm:$0xff] }
  0xe9   : > { %v1761_v29 = vrot.slane %v1729_v21, 1  ;;  %2307 = vmatpush.msra.mxu1 %v2302_v15  ;;  %2765 = vmatpush.msra.mxu3 %v2748_v36 }
  0xea   : > { %2069 = vmatmul.f32.gmra.mxu0 %v6699_v10  ;;  %v11479_v10 = vmov 0 }
  0xeb   : > { %1513 = vmatmul.f32.gmra.mxu1 %v6775_v7  ;;  %v6910_v42 = vsel %vm11281_vm2, %v1760_v49, %v1761_v29  ;;  %v11480_v10 = vsel %vm6925_vm5, 4294967295, %v11479_v10 }
  0xec   : > { %1922 = vmatmul.f32.gmra.mxu3 %v6755_v55  ;;  %11481 = vst [vmem:[#allocation21_spill] sm:$0xff] %v11480_v10  ;;  %2308 = vmatpush.msra.mxu1 %v2301_v54 }
  0xef   : > { %v1680_v46 = vpop.f32.mrf.mxu3  ;;  %v6922_v49 = vpop.f32.mrf.mxu0 }
  0xf0   : > { %v1762_v56 = vrot.slane %v1680_v46, 1  ;;  %v6915_v4 = vpop.f32.mrf.mxu1  ;;  %11478 = vst [vmem:[#allocation20_spill] sm:$0xff] %v6922_v49  ;;  %v2300_v49 = vld [vmem:[#allocation4 + $0x2d8] sm:$0xff] }
  0xf1   : > { %2309 = vmatpush.msra.mxu1 %v2300_v49 }
  0xf2   : > { %v6919_v21 = vsel %vm11281_vm2, %v1761_v29, %v1762_v56  ;;  %2072 = vmatmul.f32.gmra.mxu0 %v6711_v20  ;;  %v607_v20 = vadd.s32 208, %v6818_v32 }
  0xf3   : > { %1516 = vmatmul.f32.gmra.mxu1 %v6783_v14 }
  0xf4   : > { %1925 = vmatmul.f32.gmra.mxu3 %v6765_v63 }
  0xf7   : > { %v1683_v3 = vpop.f32.mrf.mxu3  ;;  %v6935_v59 = vpop.f32.mrf.mxu0 }
  0xf8   : > { %v1731_v46 = vsel %vm6925_vm5, %v1683_v3, 0.0  ;;  %v6932_v29 = vpop.f32.mrf.mxu1  ;;  %11482 = vst [vmem:[#allocation22_spill] sm:$0xff] %v6935_v59  ;;  %v3011_v59 = vld [vmem:[#allocation4 + $0x460] sm:$0xff] }
  0xf9   : > { %v1763_v15 = vrot.slane %v1731_v46, 1  ;;  %v799_v46 = vand.u32 15, %v607_v20  ;;  %3018 = vmatpush.msra.mxu0 %v3011_v59 }
  0xfa   : > { %2075 = vmatmul.f32.gmra.mxu0 %v6723_v28  ;;  %v11485_v28 = vmov 0 }
  0xfb   : > { %1519 = vmatmul.f32.gmra.mxu1 %v6791_v19  ;;  %v6939_v13 = vsel %vm11281_vm2, %v1762_v56, %v1763_v15  ;;  %vm6954_vm6 = vcmp.gt.s32.totalorder %v799_v46, 0 }
  0xfc   : > { %1928 = vmatmul.f32.gmra.mxu3 %v6775_v7  ;;  %v11486_v28 = vsel %vm6954_vm6, 4294967295, %v11485_v28 }
  0xfd   : > { %11487 = vst [vmem:[#allocation25_spill] sm:$0xff] %v11486_v28 }
  0xff   : > { %v1686_v33 = vpop.f32.mrf.mxu3  ;;  %v6951_v56 = vpop.f32.mrf.mxu0 }
 0x100   : > { %v1764_v3 = vrot.slane %v1686_v33, 1  ;;  %v6944_v10 = vpop.f32.mrf.mxu1  ;;  %11484 = vst [vmem:[#allocation24_spill] sm:$0xff] %v6951_v56  ;;  %v6963_v56 = vpop.f32.mrf.mxu2 }
 0x101   : > { %11483 = vst [vmem:[#allocation23_spill] sm:$0xff] %v6944_v10  ;;  %v7236_v10 = vld [vmem:[#allocation2 + $0x48] sm:$0xff] }
 0x102   : > { %v6948_v23 = vsel %vm11281_vm2, %v1763_v15, %v1764_v3  ;;  %2078 = vmatmul.f32.gmra.mxu0 %v6735_v37  ;;  %11489 = vst [vmem:[#allocation27_spill] sm:$0xff] %v6963_v56  ;;  %v609_v37 = vadd.s32 224, %v6818_v32  ;;  %v7064_v56 = vld [vmem:[#allocation2 + $0x98] sm:$0xff] }
 0x103   : > { %1522 = vmatmul.f32.gmra.mxu1 %v6797_v22  ;;  %11514 = vst [vmem:[#allocation48_spill] sm:$0xff] %v7064_v56 }
 0x104   : > { %1931 = vmatmul.f32.gmra.mxu3 %v6783_v14  ;;  %v813_v59 = vand.u32 15, %v609_v37 }
 0x106   : > { %vm6987_vm7 = vcmp.gt.s32.totalorder %v813_v59, 0 }
 0x107   : > { %v1689_v20 = vpop.f32.mrf.mxu3  ;;  %v6966_v46 = vpop.f32.mrf.mxu0 }
 0x108   : > { %v1733_v33 = vsel %vm6954_vm6, %v1689_v20, 0.0  ;;  %v6961_v15 = vpop.f32.mrf.mxu1  ;;  %11490 = vst [vmem:[#allocation28_spill] sm:$0xff] %v6966_v46  ;;  %v6985_v11 = vpop.f32.mrf.mxu2 }
 0x109   : > { %11488 = vst [vmem:[#allocation26_spill] sm:$0xff] %v6961_v15  ;;  %v1765_v54 = vrot.slane %v1733_v33, 1 }
 0x10a   : > { %2081 = vmatmul.f32.gmra.mxu0 %v6745_v45  ;;  %11493 = vst [vmem:[#allocation31_spill] sm:$0xff] %v6985_v11  ;;  %v11494_v45 = vmov 0 }
 0x10b   : > { %1525 = vmatmul.f32.gmra.mxu1 %v6803_v0  ;;  %v6970_v47 = vsel %vm11281_vm2, %v1764_v3, %v1765_v54  ;;  %v11495_v45 = vsel %vm6987_vm7, 4294967295, %v11494_v45 }
 0x10c   : > { %1934 = vmatmul.f32.gmra.mxu3 %v6791_v19  ;;  %11496 = vst [vmem:[#allocation32_spill] sm:$0xff] %v11495_v45 }
 0x10f   : > { %v1692_v20 = vpop.f32.mrf.mxu3  ;;  %v6982_v3 = vpop.f32.mrf.mxu0 }
 0x110   : > { %v1766_v33 = vrot.slane %v1692_v20, 1  ;;  %v6975_v28 = vpop.f32.mrf.mxu1  ;;  %11492 = vst [vmem:[#allocation30_spill] sm:$0xff] %v6982_v3  ;;  %v3010_v20 = vld [vmem:[#allocation4 + $0x458] sm:$0xff]  ;;  %v7006_v59 = vpop.f32.mrf.mxu2 }
 0x111   : > { %11491 = vst [vmem:[#allocation29_spill] sm:$0xff] %v6975_v28  ;;  %3019 = vmatpush.msra.mxu0 %v3010_v20 }
 0x112   : > { %v6979_v46 = vsel %vm11281_vm2, %v1765_v54, %v1766_v33  ;;  %2084 = vmatmul.f32.gmra.mxu0 %v6755_v55  ;;  %v611_v55 = vadd.s32 240, %v6818_v32 }
 0x113   : > { %1528 = vmatmul.f32.gmra.mxu1 %v6811_v27 }
 0x114   : > { %1937 = vmatmul.f32.gmra.mxu3 %v6797_v22  ;;  %v827_v20 = vand.u32 15, %v611_v55 }
 0x116   : > { %vm7018_vm8 = vcmp.gt.s32.totalorder %v827_v20, 0 }
 0x117   : > { %v1695_v49 = vpop.f32.mrf.mxu3  ;;  %v6997_v28 = vpop.f32.mrf.mxu0  ;;  %v11503_v40 = vsel %vm7018_vm8, 4294967295, %v11502_v40 }
 0x118   : > { %v1735_v54 = vsel %vm6987_vm7, %v1695_v49, 0.0  ;;  %v6994_v37 = vpop.f32.mrf.mxu1  ;;  %11498 = vst [vmem:[#allocation34_spill] sm:$0xff] %v6997_v28  ;;  %vm11616_vm7 = vcmp.lt.s32.totalorder %v6818_v32, 1 }
 0x119   : > { %11497 = vst [vmem:[#allocation33_spill] sm:$0xff] %v6994_v37  ;;  %v1767_v3 = vrot.slane %v1735_v54, 1  ;;  %vm11626_vm5 = vmmov %vm11616_vm7 }
 0x11a   : > { %2087 = vmatmul.f32.gmra.mxu0 %v6765_v63  ;;  %v2747_v63 = vld [vmem:[#allocation4 + $0x330] sm:$0xff]  ;;  %11504 = vst [vmem:[#allocation38_spill] sm:$0xff] %v11503_v40 }
 0x11b   : > { %1531 = vmatmul.f32.gmra.mxu1 %v6652_v51  ;;  %v7002_v36 = vsel %vm11281_vm2, %v1766_v33, %v1767_v3  ;;  %v2299_v51 = vld [vmem:[#allocation4 + $0x2d0] sm:$0xff]  ;;  %2766 = vmatpush.msra.mxu3 %v2747_v63 }
 0x11c   : > { %1940 = vmatmul.f32.gmra.mxu3 %v6803_v0  ;;  %2310 = vmatpush.msra.mxu1 %v2299_v51  ;;  %v3009_v51 = vld [vmem:[#allocation4 + $0x450] sm:$0xff] }
 0x11d   : > { %3020 = vmatpush.msra.mxu0 %v3009_v51  ;;  %v7045_v40 = vld [vmem:[#allocation2 + $0x90] sm:$0xff]  ;;  %v2298_v51 = vld [vmem:[#allocation4 + $0x2c8] sm:$0xff] }
 0x11e   : > { %2311 = vmatpush.msra.mxu1 %v2298_v51 }
 0x11f   : > { %v1698_v49 = vpop.f32.mrf.mxu3  ;;  %v7015_v33 = vpop.f32.mrf.mxu0 }
 0x120   : > { %v1768_v45 = vrot.slane %v1698_v49, 1  ;;  %v7008_v54 = vpop.f32.mrf.mxu1  ;;  %11501 = vst [vmem:[#allocation37_spill] sm:$0xff] %v7015_v33 }
 0x121   : > { %11499 = vst [vmem:[#allocation35_spill] sm:$0xff] %v7008_v54  ;;  %v7140_v54 = vld [vmem:[#allocation2 + $0xc8] sm:$0xff] }
 0x122   : > { %v7012_v28 = vsel %vm11281_vm2, %v1767_v3, %v1768_v45  ;;  %2090 = vmatmul.f32.gmra.mxu0 %v6775_v7  ;;  %11534 = vst [vmem:[#allocation68_spill] sm:$0xff] %v7140_v54 }
 0x123   : > { %11500 = vst [vmem:[#allocation36_spill] sm:$0xff] %v7012_v28  ;;  %1534 = vmatmul.f32.gmra.mxu1 %v6668_v58  ;;  %v7027_v58 = vpop.f32.mrf.mxu2  ;;  %v11564_v28 = vmov 0 }
 0x124   : > { %1943 = vmatmul.f32.gmra.mxu3 %v6811_v27  ;;  %11506 = vst [vmem:[#allocation40_spill] sm:$0xff] %v7027_v58  ;;  %v2289_v58 = vld [vmem:[#allocation4 + $0x280] sm:$0xff] }
 0x127   : > { %v1701_v55 = vpop.f32.mrf.mxu3  ;;  %v7032_v20 = vpop.f32.mrf.mxu0 }
 0x128   : > { %v1737_v49 = vsel %vm7018_vm8, %v1701_v55, 0.0  ;;  %v7025_v3 = vpop.f32.mrf.mxu1 }
 0x129   : > { %11505 = vst [vmem:[#allocation39_spill] sm:$0xff] %v7025_v3  ;;  %v1769_v33 = vrot.slane %v1737_v49, 1  ;;  %v2746_v3 = vld [vmem:[#allocation4 + $0x328] sm:$0xff] }
 0x12a   : > { %2093 = vmatmul.f32.gmra.mxu0 %v6783_v14  ;;  %2767 = vmatpush.msra.mxu3 %v2746_v3 }
 0x12b   : > { %1537 = vmatmul.f32.gmra.mxu1 %v6682_v2  ;;  %v7036_v7 = vsel %vm11281_vm2, %v1768_v45, %v1769_v33  ;;  %v7053_v45 = vpop.f32.mrf.mxu2 }
 0x12c   : > { %11507 = vst [vmem:[#allocation41_spill] sm:$0xff] %v7036_v7  ;;  %1946 = vmatmul.f32.gmra.mxu3 %v7029_v17  ;;  %v7234_v7 = vld [vmem:[#allocation2 + $0xf8] sm:$0xff] }
 0x12d   : > { %11511 = vst [vmem:[#allocation45_spill] sm:$0xff] %v7053_v45  ;;  %v7114_v45 = vld [vmem:[#allocation2 + $0xb8] sm:$0xff] }
 0x12f   : > { %v7040_v63 = vpop.f32.mrf.mxu3  ;;  %v7056_v14 = vpop.f32.mrf.mxu0 }
 0x130   : > { %11508 = vst [vmem:[#allocation42_spill] sm:$0xff] %v7040_v63  ;;  %v11257_v55 = vrot.slane %v7040_v63, 1  ;;  %v7043_v49 = vpop.f32.mrf.mxu1  ;;  %v3008_v63 = vld [vmem:[#allocation4 + $0x448] sm:$0xff] }
 0x131   : > { %11509 = vst [vmem:[#allocation43_spill] sm:$0xff] %v7043_v49  ;;  %3021 = vmatpush.msra.mxu0 %v3008_v63 }
 0x132   : > { %v7051_v2 = vsel %vm11281_vm2, %v1769_v33, %v11257_v55  ;;  %2096 = vmatmul.f32.gmra.mxu0 %v6791_v19  ;;  %v7077_v55 = vld [vmem:[#allocation2 + $0xa0] sm:$0xff] }
 0x133   : > { %11510 = vst [vmem:[#allocation44_spill] sm:$0xff] %v7051_v2  ;;  %1540 = vmatmul.f32.gmra.mxu1 %v6696_v9  ;;  %v7070_v9 = vpop.f32.mrf.mxu2  ;;  %v7090_v2 = vld [vmem:[#allocation2 + $0xa8] sm:$0xff] }
 0x134   : > { %1949 = vmatmul.f32.gmra.mxu3 %v7045_v40  ;;  %11515 = vst [vmem:[#allocation49_spill] sm:$0xff] %v7070_v9 }
 0x137   : > { %v7060_v49 = vpop.f32.mrf.mxu3  ;;  %v7067_v33 = vpop.f32.mrf.mxu0 }
 0x138   : > { %11512 = vst [vmem:[#allocation46_spill] sm:$0xff] %v7060_v49  ;;  %v7062_v51 = vpop.f32.mrf.mxu1  ;;  %v2297_v49 = vld [vmem:[#allocation4 + $0x2c0] sm:$0xff] }
 0x139   : > { %11513 = vst [vmem:[#allocation47_spill] sm:$0xff] %v7062_v51  ;;  %2312 = vmatpush.msra.mxu1 %v2297_v49  ;;  %v2594_v49 = vld [vmem:[#allocation4 + $0x3f8] sm:$0xff] }
 0x13a   : > { %2099 = vmatmul.f32.gmra.mxu0 %v6797_v22  ;;  %2595 = vmatpush.msrb.mxu2 %v2594_v49  ;;  %v2744_v49 = vld [vmem:[#allocation4 + $0x318] sm:$0xff] }
 0x13b   : > { %1543 = vmatmul.f32.gmra.mxu1 %v6647_v48  ;;  %v2745_v48 = vld [vmem:[#allocation4 + $0x320] sm:$0xff]  ;;  %v7084_v51 = vpop.f32.mrf.mxu2 }
 0x13c   : > { %1952 = vmatmul.f32.gmra.mxu3 %v7064_v56  ;;  %11518 = vst [vmem:[#allocation52_spill] sm:$0xff] %v7084_v51 }
 0x13d   : > { %2768 = vmatpush.msra.mxu3 %v2745_v48 }
 0x13f   : > { %v7073_v3 = vpop.f32.mrf.mxu3  ;;  %v7080_v63 = vpop.f32.mrf.mxu0  ;;  %2769 = vmatpush.msra.mxu3 %v2744_v49  ;;  %v2590_v49 = vld [vmem:[#allocation4 + $0x3d8] sm:$0xff] }
 0x140   : > { %11516 = vst [vmem:[#allocation50_spill] sm:$0xff] %v7073_v3  ;;  %v7075_v19 = vpop.f32.mrf.mxu1  ;;  %v2293_v3 = vld [vmem:[#allocation4 + $0x2a0] sm:$0xff] }
 0x141   : > { %11517 = vst [vmem:[#allocation51_spill] sm:$0xff] %v7075_v19  ;;  %v3007_v19 = vld [vmem:[#allocation4 + $0x440] sm:$0xff] }
 0x142   : > { %2102 = vmatmul.f32.gmra.mxu0 %v6803_v0 }
 0x143   : > { %1546 = vmatmul.f32.gmra.mxu1 %v6665_v57  ;;  %3022 = vmatpush.msra.mxu0 %v3007_v19  ;;  %v7101_v51 = vpop.f32.mrf.mxu2  ;;  %v2593_v19 = vld [vmem:[#allocation4 + $0x3f0] sm:$0xff] }
 0x144   : > { %1955 = vmatmul.f32.gmra.mxu3 %v7077_v55  ;;  %11523 = vst [vmem:[#allocation57_spill] sm:$0xff] %v7101_v51  ;;  %2596 = vmatpush.msrb.mxu2 %v2593_v19 }
 0x147   : > { %v7086_v22 = vpop.f32.mrf.mxu3  ;;  %v7093_v57 = vpop.f32.mrf.mxu0 }
 0x148   : > { %11519 = vst [vmem:[#allocation53_spill] sm:$0xff] %v7086_v22  ;;  %v7088_v9 = vpop.f32.mrf.mxu1  ;;  %v2296_v22 = vld [vmem:[#allocation4 + $0x2b8] sm:$0xff] }
 0x149   : > { %11520 = vst [vmem:[#allocation54_spill] sm:$0xff] %v7088_v9  ;;  %v7103_v9 = vld [vmem:[#allocation2 + $0xb0] sm:$0xff]  ;;  %2313 = vmatpush.msra.mxu1 %v2296_v22  ;;  %v2591_v22 = vld [vmem:[#allocation4 + $0x3e0] sm:$0xff] }
 0x14a   : > { %2105 = vmatmul.f32.gmra.mxu0 %v6811_v27 }
 0x14b   : > { %1549 = vmatmul.f32.gmra.mxu1 %v6680_v1 }
 0x14c   : > { %1958 = vmatmul.f32.gmra.mxu3 %v7090_v2 }
 0x14f   : > { %v7097_v0 = vpop.f32.mrf.mxu3  ;;  %v7106_v1 = vpop.f32.mrf.mxu0 }
 0x150   : > { %11521 = vst [vmem:[#allocation55_spill] sm:$0xff] %v7097_v0  ;;  %v7099_v48 = vpop.f32.mrf.mxu1  ;;  %v3006_v0 = vld [vmem:[#allocation4 + $0x438] sm:$0xff] }
 0x151   : > { %11522 = vst [vmem:[#allocation56_spill] sm:$0xff] %v7099_v48  ;;  %v2592_v48 = vld [vmem:[#allocation4 + $0x3e8] sm:$0xff]  ;;  %3023 = vmatpush.msra.mxu0 %v3006_v0 }
 0x152   : > { %2108 = vmatmul.f32.gmra.mxu0 %v7029_v17  ;;  %2597 = vmatpush.msrb.mxu2 %v2592_v48 }
 0x153   : > { %1552 = vmatmul.f32.gmra.mxu1 %v6694_v8  ;;  %v7116_v8 = vpop.f32.mrf.mxu2 }
 0x154   : > { %1961 = vmatmul.f32.gmra.mxu3 %v7103_v9  ;;  %2598 = vmatpush.msrb.mxu2 %v2591_v22  ;;  %11526 = vst [vmem:[#allocation60_spill] sm:$0xff] %v7116_v8  ;;  %v7127_v22 = vld [vmem:[#allocation2 + $0xc0] sm:$0xff]  ;;  %v2295_v8 = vld [vmem:[#allocation4 + $0x2b0] sm:$0xff] }
 0x155   : > { %2314 = vmatpush.msra.mxu1 %v2295_v8  ;;  %v2584_v8 = vld [vmem:[#allocation4 + $0x3a8] sm:$0xff] }
 0x156   : > { %2599 = vmatpush.msrb.mxu2 %v2590_v49  ;;  %v2586_v49 = vld [vmem:[#allocation4 + $0x3b8] sm:$0xff] }
 0x157   : > { %v7110_v27 = vpop.f32.mrf.mxu3  ;;  %v7119_v19 = vpop.f32.mrf.mxu0 }
 0x158   : > { %11524 = vst [vmem:[#allocation58_spill] sm:$0xff] %v7110_v27  ;;  %v7112_v51 = vpop.f32.mrf.mxu1  ;;  %v2589_v27 = vld [vmem:[#allocation4 + $0x3d0] sm:$0xff] }
 0x159   : > { %11525 = vst [vmem:[#allocation59_spill] sm:$0xff] %v7112_v51  ;;  %2600 = vmatpush.msrb.mxu2 %v2589_v27  ;;  %v2588_v51 = vld [vmem:[#allocation4 + $0x3c8] sm:$0xff]  ;;  %v2743_v27 = vld [vmem:[#allocation4 + $0x310] sm:$0xff] }
 0x15a   : > { %11527 = vst [vmem:[#allocation61_spill] sm:$0xff] %v7119_v19  ;;  %2111 = vmatmul.f32.gmra.mxu0 %v7045_v40  ;;  %2770 = vmatpush.msra.mxu3 %v2743_v27 }
 0x15b   : > { %1555 = vmatmul.f32.gmra.mxu1 %v6708_v18  ;;  %2601 = vmatpush.msrb.mxu2 %v2588_v51  ;;  %v2587_v18 = vld [vmem:[#allocation4 + $0x3c0] sm:$0xff]  ;;  %v7133_v60 = vpop.f32.mrf.mxu2 }
 0x15c   : > { %1964 = vmatmul.f32.gmra.mxu3 %v7114_v45  ;;  %11531 = vst [vmem:[#allocation65_spill] sm:$0xff] %v7133_v60  ;;  %v2292_v60 = vld [vmem:[#allocation4 + $0x298] sm:$0xff] }
 0x15d   : > { %2602 = vmatpush.msrb.mxu2 %v2587_v18 }
 0x15f   : > { %v7123_v48 = vpop.f32.mrf.mxu3  ;;  %v7130_v15 = vpop.f32.mrf.mxu0  ;;  %2603 = vmatpush.msrb.mxu2 %v2586_v49  ;;  %v2583_v49 = vld [vmem:[#allocation4 + $0x3a0] sm:$0xff] }
 0x160   : > { %11528 = vst [vmem:[#allocation62_spill] sm:$0xff] %v7123_v48  ;;  %v7125_v0 = vpop.f32.mrf.mxu1  ;;  %v2585_v48 = vld [vmem:[#allocation4 + $0x3b0] sm:$0xff] }
 0x161   : > { %11529 = vst [vmem:[#allocation63_spill] sm:$0xff] %v7125_v0  ;;  %2604 = vmatpush.msrb.mxu2 %v2585_v48  ;;  %v2294_v0 = vld [vmem:[#allocation4 + $0x2a8] sm:$0xff]  ;;  %v2582_v48 = vld [vmem:[#allocation4 + $0x398] sm:$0xff] }
 0x162   : > { %11530 = vst [vmem:[#allocation64_spill] sm:$0xff] %v7130_v15  ;;  %2114 = vmatmul.f32.gmra.mxu0 %v7064_v56  ;;  %2315 = vmatpush.msra.mxu1 %v2294_v0  ;;  %v3001_v15 = vld [vmem:[#allocation4 + $0x410] sm:$0xff] }
 0x163   : > { %1558 = vmatmul.f32.gmra.mxu1 %v6720_v26  ;;  %v3005_v26 = vld [vmem:[#allocation4 + $0x430] sm:$0xff]  ;;  %2605 = vmatpush.msrb.mxu2 %v2584_v8 }
 0x164   : > { %1967 = vmatmul.f32.gmra.mxu3 %v7127_v22  ;;  %3024 = vmatpush.msra.mxu0 %v3005_v26  ;;  %v2291_v8 = vld [vmem:[#allocation4 + $0x290] sm:$0xff]  ;;  %v7147_v26 = vpop.f32.mrf.mxu2 }
 0x165   : > { %2606 = vmatpush.msrb.mxu2 %v2583_v49  ;;  %2316 = vmatpush.msra.mxu1 %v2293_v3  ;;  %11536 = vst [vmem:[#allocation70_spill] sm:$0xff] %v7147_v26  ;;  %v2580_v49 = vld [vmem:[#allocation4 + $0x388] sm:$0xff]  ;;  %v2579_v3 = vld [vmem:[#allocation4 + $0x380] sm:$0xff]  ;;  %v7187_v26 = vld [vmem:[#allocation2 + $0x30] sm:$0xff] }
 0x167   : > { %v7136_v51 = vpop.f32.mrf.mxu3  ;;  %v7143_v27 = vpop.f32.mrf.mxu0  ;;  %2607 = vmatpush.msrb.mxu2 %v2582_v48  ;;  %2317 = vmatpush.msra.mxu1 %v2292_v60  ;;  %v7155_v48 = vld [vmem:[#allocation2 + $0x20] sm:$0xff] }
 0x168   : > { %11532 = vst [vmem:[#allocation66_spill] sm:$0xff] %v7136_v51  ;;  %v7138_v18 = vpop.f32.mrf.mxu1  ;;  %v2290_v51 = vld [vmem:[#allocation4 + $0x288] sm:$0xff] }
 0x169   : > { %11533 = vst [vmem:[#allocation67_spill] sm:$0xff] %v7138_v18  ;;  %v2581_v18 = vld [vmem:[#allocation4 + $0x390] sm:$0xff]  ;;  %2318 = vmatpush.msra.mxu1 %v2291_v8 }
 0x16a   : > { %11535 = vst [vmem:[#allocation69_spill] sm:$0xff] %v7143_v27  ;;  %2117 = vmatmul.f32.gmra.mxu0 %v7077_v55  ;;  %2608 = vmatpush.msrb.mxu2 %v2581_v18  ;;  %v7153_v27 = vld [vmem:[#allocation2 + $0xd0] sm:$0xff]  ;;  %v2742_v18 = vld [vmem:[#allocation4 + $0x308] sm:$0xff] }
 0x16b   : > { %1561 = vmatmul.f32.gmra.mxu1 %v6732_v35  ;;  %11539 = vst [vmem:[#allocation73_spill] sm:$0xff] %v7153_v27  ;;  %2771 = vmatpush.msra.mxu3 %v2742_v18  ;;  %v541_v18 = vld [vmem:[%s6623_s27 + $0xf0] sm:$0xff] }
 0x16c   : > { %1970 = vmatmul.f32.gmra.mxu3 %v7140_v54  ;;  %2609 = vmatpush.msrb.mxu2 %v2580_v49  ;;  %v3004_v49 = vld [vmem:[#allocation4 + $0x428] sm:$0xff]  ;;  %574 = vst.msk [vmem:[#allocation2 + $0x100] sm:$0xff] %vm11280_vm0, %v541_v18  ;;  %v2741_v18 = vld [vmem:[#allocation4 + $0x300] sm:$0xff] }
 0x16d   : > { %2319 = vmatpush.msra.mxu1 %v2290_v51  ;;  %3025 = vmatpush.msra.mxu0 %v3004_v49  ;;  %v7185_v49 = vld [vmem:[#allocation2 + $0xe0] sm:$0xff] }
 0x16e   : > { %2610 = vmatpush.msrb.mxu2 %v2579_v3  ;;  %v7171_v3 = vld [vmem:[#allocation2 + $0x28] sm:$0xff]  ;;  %11548 = vst [vmem:[#allocation82_spill] sm:$0xff] %v7185_v49  ;;  %2772 = vmatpush.msra.mxu3 %v2741_v18 }
 0x16f   : > { %v7149_v0 = vpop.f32.mrf.mxu3  ;;  %v7158_v60 = vpop.f32.mrf.mxu0  ;;  %2320 = vmatpush.msra.mxu1 %v2289_v58  ;;  %2611 = vmatmul.f32.vlgmr.msrb.gmra.mxu2 %v7155_v48 }
 0x170   : > { %11537 = vst [vmem:[#allocation71_spill] sm:$0xff] %v7149_v0  ;;  %v7151_v35 = vpop.f32.mrf.mxu1  ;;  %v542_v0 = vld [vmem:[%s6623_s27 + $0xf8] sm:$0xff] }
 0x171   : > { %11538 = vst [vmem:[#allocation72_spill] sm:$0xff] %v7151_v35  ;;  %v7167_v35 = vpop.f32.mrf.mxu2 }
 0x172   : > { %11540 = vst [vmem:[#allocation74_spill] sm:$0xff] %v7158_v60  ;;  %2120 = vmatmul.f32.gmra.mxu0 %v7090_v2  ;;  %v6362_v60 = vld [vmem:[#allocation2 + $0x10] sm:$0xff] }
 0x173   : > { %1564 = vmatmul.f32.gmra.mxu1 %v6742_v43  ;;  %11543 = vst [vmem:[#allocation77_spill] sm:$0xff] %v7167_v35  ;;  %v7169_v43 = vld [vmem:[#allocation2 + $0xd8] sm:$0xff] }
 0x174   : > { %1973 = vmatmul.f32.gmra.mxu3 %v7153_v27  ;;  %11544 = vst [vmem:[#allocation78_spill] sm:$0xff] %v7169_v43 }
 0x175   : > { %575 = vst.msk [vmem:[#allocation2 + $0x108] sm:$0xff] %vm11280_vm0, %v542_v0 }
 0x177   : > { %v7163_v8 = vpop.f32.mrf.mxu3  ;;  %v7174_v58 = vpop.f32.mrf.mxu0  ;;  %2614 = vmatmul.f32.gmra.mxu2 %v7171_v3 }
 0x178   : > { %11541 = vst [vmem:[#allocation75_spill] sm:$0xff] %v7163_v8  ;;  %v7165_v51 = vpop.f32.mrf.mxu1 }
 0x179   : > { %11542 = vst [vmem:[#allocation76_spill] sm:$0xff] %v7165_v51 }
 0x17a   : > { %11545 = vst [vmem:[#allocation79_spill] sm:$0xff] %v7174_v58  ;;  %2123 = vmatmul.f32.gmra.mxu0 %v7103_v9  ;;  %v7203_v58 = vld [vmem:[#allocation2 + $0xe8] sm:$0xff] }
 0x17b   : > { %1567 = vmatmul.f32.gmra.mxu1 %v6752_v53  ;;  %v7189_v53 = vpop.f32.mrf.mxu2 }
 0x17c   : > { %1976 = vmatmul.f32.gmra.mxu3 %v7169_v43  ;;  %11549 = vst [vmem:[#allocation83_spill] sm:$0xff] %v7189_v53  ;;  %v3003_v53 = vld [vmem:[#allocation4 + $0x420] sm:$0xff] }
 0x17d   : > { %3026 = vmatpush.msra.mxu0 %v3003_v53  ;;  %v7221_v53 = vld [vmem:[#allocation2 + $0x40] sm:$0xff] }
 0x17f   : > { %v7181_v51 = vpop.f32.mrf.mxu3  ;;  %v7192_v8 = vpop.f32.mrf.mxu0  ;;  %2617 = vmatmul.f32.gmra.mxu2 %v7187_v26 }
 0x180   : > { %11546 = vst [vmem:[#allocation80_spill] sm:$0xff] %v7181_v51  ;;  %v7183_v35 = vpop.f32.mrf.mxu1 }
 0x181   : > { %11547 = vst [vmem:[#allocation81_spill] sm:$0xff] %v7183_v35 }
 0x182   : > { %11550 = vst [vmem:[#allocation84_spill] sm:$0xff] %v7192_v8  ;;  %2126 = vmatmul.f32.gmra.mxu0 %v7114_v45 }
 0x183   : > { %1570 = vmatmul.f32.gmra.mxu1 %v6762_v62  ;;  %v7205_v62 = vld [vmem:[#allocation2 + $0x38] sm:$0xff]  ;;  %v7211_v0 = vpop.f32.mrf.mxu2 }
 0x184   : > { %1979 = vmatmul.f32.gmra.mxu3 %v7185_v49  ;;  %11554 = vst [vmem:[#allocation88_spill] sm:$0xff] %v7211_v0 }
 0x187   : > { %v7199_v51 = vpop.f32.mrf.mxu3  ;;  %v7208_v8 = vpop.f32.mrf.mxu0  ;;  %2620 = vmatmul.f32.gmra.mxu2 %v7205_v62 }
 0x188   : > { %11551 = vst [vmem:[#allocation85_spill] sm:$0xff] %v7199_v51  ;;  %v7201_v35 = vpop.f32.mrf.mxu1 }
 0x189   : > { %11552 = vst [vmem:[#allocation86_spill] sm:$0xff] %v7201_v35  ;;  %v7219_v35 = vld [vmem:[#allocation2 + $0xf0] sm:$0xff] }
 0x18a   : > { %11553 = vst [vmem:[#allocation87_spill] sm:$0xff] %v7208_v8  ;;  %2129 = vmatmul.f32.gmra.mxu0 %v7127_v22  ;;  %v3002_v8 = vld [vmem:[#allocation4 + $0x418] sm:$0xff] }
 0x18b   : > { %1573 = vmatmul.f32.gmra.mxu1 %v6772_v6  ;;  %v7228_v0 = vpop.f32.mrf.mxu2  ;;  %3027 = vmatpush.msra.mxu0 %v3002_v8  ;;  %v7250_v8 = vld [vmem:[#allocation2 + $0x100] sm:$0xff] }
 0x18c   : > { %1982 = vmatmul.f32.gmra.mxu3 %v7203_v58  ;;  %11557 = vst [vmem:[#allocation91_spill] sm:$0xff] %v7228_v0 }
 0x18d   : > { %3028 = vmatpush.msra.mxu0 %v3001_v15  ;;  %v1415_v15 = vrot.slane %v7056_v14, 7 }
 0x18f   : > { %v7215_v18 = vpop.f32.mrf.mxu3  ;;  %v7223_v6 = vpop.f32.mrf.mxu0  ;;  %2623 = vmatmul.f32.gmra.mxu2 %v7221_v53 }
 0x190   : > { %11555 = vst [vmem:[#allocation89_spill] sm:$0xff] %v7215_v18  ;;  %v7217_v51 = vpop.f32.mrf.mxu1 }
 0x191   : > { %11556 = vst [vmem:[#allocation90_spill] sm:$0xff] %v7223_v6 }
 0x192   : > { %2132 = vmatmul.f32.gmra.mxu0 %v7140_v54  ;;  %v596_v54 = vadd.s32 120, %v6818_v32 }
 0x193   : > { %2321 = vmatmul.f32.vlgmr.msra.gmra.mxu1 %v6362_v60  ;;  %v6363_v60 = vld [vmem:[#allocation2 + $0x18] sm:$0xff]  ;;  %v7248_v19 = vpop.f32.mrf.mxu2 }
 0x194   : > { %1985 = vmatmul.f32.gmra.mxu3 %v7219_v35  ;;  %11561 = vst [vmem:[#allocation95_spill] sm:$0xff] %v7248_v19  ;;  %v598_v19 = vadd.s32 136, %v6818_v32 }
 0x197   : > { %v7230_v22 = vpop.f32.mrf.mxu3  ;;  %v7238_v6 = vpop.f32.mrf.mxu0  ;;  %2626 = vmatmul.f32.gmra.mxu2 %v7236_v10 }
 0x198   : > { %11558 = vst [vmem:[#allocation92_spill] sm:$0xff] %v7230_v22  ;;  %v7232_v18 = vpop.f32.mrf.mxu1 }
 0x199   : > { %11559 = vst [vmem:[#allocation93_spill] sm:$0xff] %v7238_v6  ;;  %v6364_v6 = vld [vmem:[#allocation2 + $0x20] sm:$0xff] }
 0x19a   : > { %2135 = vmatmul.f32.gmra.mxu0 %v7153_v27  ;;  %v722_v27 = vand.u32 15, %v596_v54  ;;  %v7271_v54 = vld [vmem:[#allocation2 + $0x58] sm:$0xff] }
 0x19b   : > { %2324 = vmatmul.f32.gmra.mxu1 %v6363_v60  ;;  %v597_v60 = vadd.s32 128, %v6818_v32 }
 0x19c   : > { %1988 = vmatmul.f32.gmra.mxu3 %v7234_v7  ;;  %vm7265_vm9 = vcmp.lt.s32.totalorder %v722_v27, 15 }
 0x19d   : > { %v11565_v28 = vsel %vm7265_vm9, 4294967295, %v11564_v28  ;;  %v1382_v27 = vsel %vm7265_vm9, %v7032_v20, 0.0 }
 0x19e   : > { %11566 = vst [vmem:[#allocation98_spill] sm:$0xff] %v11565_v28  ;;  %v6366_v28 = vld [vmem:[#allocation2 + $0x30] sm:$0xff] }
 0x19f   : > { %v7243_v0 = vpop.f32.mrf.mxu3  ;;  %v7255_v56 = vpop.f32.mrf.mxu0  ;;  %2629 = vmatmul.f32.gmra.mxu2 %v7252_v44 }
 0x1a0   : > { %11560 = vst [vmem:[#allocation94_spill] sm:$0xff] %v7243_v0  ;;  %v7245_v22 = vpop.f32.mrf.mxu1  ;;  %v729_v0 = vand.u32 15, %v597_v60  ;;  %v1659_v60 = vpop.f32.mrf.mxu2 }
 0x1a1   : > { %11562 = vst [vmem:[#allocation96_spill] sm:$0xff] %v7255_v56  ;;  %v11567_v56 = vmov 0 }
 0x1a2   : > { %2138 = vmatmul.f32.gmra.mxu0 %v7169_v43  ;;  %vm7273_vm10 = vcmp.gt.s32.totalorder %v729_v0, 0  ;;  %v736_v43 = vand.u32 15, %v598_v19  ;;  %v7288_v19 = vrot.slane %v1382_v27, 7 }
 0x1a3   : > { %2327 = vmatmul.f32.gmra.mxu1 %v6364_v6  ;;  %v7269_v6 = vld [vmem:[#allocation2 + $0x108] sm:$0xff]  ;;  %v11568_v56 = vsel %vm7273_vm10, 4294967295, %v11567_v56  ;;  %v1723_v0 = vsel %vm7273_vm10, %v1659_v60, 0.0 }
 0x1a4   : > { %1991 = vmatmul.f32.gmra.mxu3 %v7250_v8  ;;  %11569 = vst [vmem:[#allocation99_spill] sm:$0xff] %v11568_v56  ;;  %vm7290_vm11 = vcmp.lt.s32.totalorder %v736_v43, 15  ;;  %v7299_v14 = vrot.slane %v1723_v0, 1  ;;  %v1447_v60 = vsel %vm11282_vm12, %v7288_v19, %v1415_v15  ;;  %v7308_v56 = vld [vmem:[#allocation2 + $0x60] sm:$0xff] }
 0x1a5   : > { %11571 = vst [vmem:[#allocation101_spill] sm:$0xff] %v7288_v19  ;;  %v1384_v27 = vsel %vm7290_vm11, %v7067_v33, 0.0  ;;  %v1530_v43 = vadd.f32 %v7217_v51, %v1447_v60  ;;  %v600_v51 = vadd.s32 152, %v6818_v32 }
 0x1a6   : > { %11576 = vst [vmem:[#allocation104_spill] sm:$0xff] %v7299_v14  ;;  %v1416_v0 = vrot.slane %v1384_v27, 7 }
 0x1a7   : > { %v7261_v37 = vpop.f32.mrf.mxu3  ;;  %2632 = vmatmul.f32.gmra.mxu2 %v7271_v54 }
 0x1a8   : > { %11563 = vst [vmem:[#allocation97_spill] sm:$0xff] %v7261_v37  ;;  %v7263_v11 = vpop.f32.mrf.mxu1  ;;  %v7277_v37 = vpop.f32.mrf.mxu0 }
 0x1a9   : > { %11570 = vst [vmem:[#allocation100_spill] sm:$0xff] %v7277_v37 }
 0x1aa   : > { %2141 = vmatmul.f32.gmra.mxu0 %v7185_v49  ;;  %v11578_v49 = vrot.slane %v6826_v38, 1  ;;  %v1446_v38 = vsel %vm11282_vm12, %v1415_v15, %v1416_v0 }
 0x1ab   : > { %2330 = vmatmul.f32.gmra.mxu1 %v6365_v25  ;;  %v11572_v25 = vmov 0  ;;  %v1533_v27 = vadd.f32 %v7232_v18, %v1446_v38 }
 0x1ac   : > { %1994 = vmatmul.f32.gmra.mxu3 %v7269_v6  ;;  %v11573_v25 = vsel %vm7290_vm11, 4294967295, %v11572_v25  ;;  %v1786_v19 = vsel %vm11281_vm2, %v7299_v14, %v11578_v49  ;;  %v7328_v49 = vld [vmem:[#allocation2 + $0x68] sm:$0xff]  ;;  %v750_v14 = vand.u32 15, %v600_v51 }
 0x1ad   : > { %11574 = vst [vmem:[#allocation102_spill] sm:$0xff] %v11573_v25  ;;  %v1820_v33 = vadd.f32 %v1786_v19, %v1530_v43  ;;  %v6367_v19 = vld [vmem:[#allocation2 + $0x38] sm:$0xff] }
 0x1ae   : > { %vm7337_vm13 = vcmp.lt.s32.totalorder %v750_v14, 15  ;;  %v6368_v14 = vld [vmem:[#allocation2 + $0x40] sm:$0xff] }
 0x1af   : > { %v7294_v37 = vpop.f32.mrf.mxu3  ;;  %2635 = vmatmul.f32.gmra.mxu2 %v7308_v56 }
 0x1b0   : > { %11575 = vst [vmem:[#allocation103_spill] sm:$0xff] %v7294_v37  ;;  %v7297_v20 = vpop.f32.mrf.mxu1  ;;  %v7310_v37 = vpop.f32.mrf.mxu0 }
 0x1b1   : > { %11577 = vst [vmem:[#allocation105_spill] sm:$0xff] %v7310_v37  ;;  %v3000_v37 = vld [vmem:[#allocation4 + $0x408] sm:$0xff] }
 0x1b2   : > { %2144 = vmatmul.f32.gmra.mxu0 %v7203_v58 }
 0x1b3   : > { %2333 = vmatmul.f32.gmra.mxu1 %v6366_v28  ;;  %3029 = vmatpush.msra.mxu0 %v3000_v37  ;;  %v11580_v37 = vmov 0 }
 0x1b4   : > { %2773 = vmatmul.f32.vlgmr.msra.gmra.mxu3 %v7155_v48  ;;  %v11581_v37 = vsel %vm7337_vm13, 4294967295, %v11580_v37 }
 0x1b5   : > { %11582 = vst [vmem:[#allocation107_spill] sm:$0xff] %v11581_v37 }
 0x1b7   : > { %v1950_v60 = vpop.f32.mrf.mxu3  ;;  %2638 = vmatmul.f32.gmra.mxu2 %v7328_v49 }
 0x1b8   : > { %v7321_v28 = vadd.f32 %v1950_v60, %v1820_v33  ;;  %v7323_v25 = vpop.f32.mrf.mxu1  ;;  %v7330_v43 = vpop.f32.mrf.mxu0  ;;  %v1417_v33 = vrot.slane %v7080_v63, 7  ;;  %v1821_v60 = vadd.f32 %v6852_v61, %v1533_v27  ;;  %v1386_v63 = vsel %vm7337_vm13, %v7093_v57, 0.0  ;;  %v7351_v27 = vld [vmem:[#allocation2 + $0x70] sm:$0xff] }
 0x1ba   : > { %11579 = vst [vmem:[#allocation106_spill] sm:$0xff] %v7321_v28  ;;  %2147 = vmatmul.f32.gmra.mxu0 %v7219_v35  ;;  %v1445_v38 = vsel %vm11282_vm12, %v1416_v0, %v1417_v33 }
 0x1bb   : > { %2336 = vmatmul.f32.gmra.mxu1 %v6367_v19  ;;  %v2999_v19 = vld [vmem:[#allocation4 + $0x400] sm:$0xff]  ;;  %v1536_v61 = vadd.f32 %v7245_v22, %v1445_v38  ;;  %v602_v38 = vadd.s32 168, %v6818_v32 }
 0x1bc   : > { %2776 = vmatmul.f32.gmra.mxu3 %v7171_v3  ;;  %3030 = vmatpush.msra.mxu0 %v2999_v19 }
 0x1bd   : > { %v1822_v0 = vadd.f32 %v6861_v16, %v1536_v61  ;;  %v764_v16 = vand.u32 15, %v602_v38 }
 0x1bf   : > { %v1953_v18 = vpop.f32.mrf.mxu3  ;;  %2641 = vmatmul.f32.gmra.mxu2 %v7351_v27  ;;  %vm7380_vm14 = vcmp.lt.s32.totalorder %v764_v16, 15 }
 0x1c0   : > { %v7341_v15 = vadd.f32 %v1953_v18, %v1821_v60  ;;  %v7343_v51 = vpop.f32.mrf.mxu1  ;;  %v7353_v28 = vpop.f32.mrf.mxu0  ;;  %v1418_v60 = vrot.slane %v1386_v63, 7  ;;  %v6369_v63 = vld [vmem:[#allocation2 + $0x48] sm:$0xff] }
 0x1c2   : > { %11583 = vst [vmem:[#allocation108_spill] sm:$0xff] %v7341_v15  ;;  %2150 = vmatmul.f32.gmra.mxu0 %v7234_v7  ;;  %v1444_v19 = vsel %vm11282_vm12, %v1417_v33, %v1418_v60  ;;  %v7367_v15 = vld [vmem:[#allocation2 + $0x78] sm:$0xff] }
 0x1c3   : > { %2339 = vmatmul.f32.gmra.mxu1 %v6368_v14  ;;  %v1539_v14 = vadd.f32 %v7263_v11, %v1444_v19  ;;  %v11587_v19 = vmov 0 }
 0x1c4   : > { %2779 = vmatmul.f32.gmra.mxu3 %v7187_v26  ;;  %v11588_v19 = vsel %vm7380_vm14, 4294967295, %v11587_v19 }
 0x1c5   : > { %v1823_v61 = vadd.f32 %v6881_v41, %v1539_v14  ;;  %11589 = vst [vmem:[#allocation112_spill] sm:$0xff] %v11588_v19  ;;  %v6370_v41 = vld [vmem:[#allocation2 + $0x50] sm:$0xff] }
 0x1c7   : > { %v1956_v18 = vpop.f32.mrf.mxu3  ;;  %2644 = vmatmul.f32.gmra.mxu2 %v7367_v15 }
 0x1c8   : > { %v7359_v57 = vadd.f32 %v1956_v18, %v1822_v0  ;;  %v7361_v22 = vpop.f32.mrf.mxu1  ;;  %v7369_v37 = vpop.f32.mrf.mxu0  ;;  %v1419_v0 = vrot.slane %v7106_v1, 7  ;;  %v1388_v1 = vsel %vm7380_vm14, %v6816_v31, 0.0 }
 0x1c9   : > { %11585 = vst [vmem:[#allocation110_spill] sm:$0xff] %v7369_v37  ;;  %v6371_v37 = vld [vmem:[#allocation2 + $0x58] sm:$0xff] }
 0x1ca   : > { %11584 = vst [vmem:[#allocation109_spill] sm:$0xff] %v7359_v57  ;;  %2153 = vmatmul.f32.gmra.mxu0 %v7250_v8  ;;  %v1443_v38 = vsel %vm11282_vm12, %v1418_v60, %v1419_v0  ;;  %v7387_v57 = vld [vmem:[#allocation2 + $0x80] sm:$0xff]  ;;  %v1420_v60 = vrot.slane %v1388_v1, 7 }
 0x1cb   : > { %2342 = vmatmul.f32.gmra.mxu1 %v6369_v63  ;;  %v1542_v63 = vadd.f32 %v7297_v20, %v1443_v38  ;;  %v604_v20 = vadd.s32 184, %v6818_v32 }
 0x1cc   : > { %2782 = vmatmul.f32.gmra.mxu3 %v7205_v62 }
 0x1cd   : > { %v1824_v16 = vadd.f32 %v6890_v5, %v1542_v63  ;;  %v778_v19 = vand.u32 15, %v604_v20  ;;  %v1421_v63 = vrot.slane %v6828_v39, 7 }
 0x1cf   : > { %v1959_v33 = vpop.f32.mrf.mxu3  ;;  %2647 = vmatmul.f32.gmra.mxu2 %v7387_v57  ;;  %vm7415_vm15 = vcmp.lt.s32.totalorder %v778_v19, 15  ;;  %v1441_v20 = vsel %vm11282_vm12, %v1420_v60, %v1421_v63 }
 0x1d0   : > { %v7376_v18 = vadd.f32 %v1959_v33, %v1823_v61  ;;  %v7378_v11 = vpop.f32.mrf.mxu1  ;;  %v7389_v14 = vpop.f32.mrf.mxu0  ;;  %v1390_v39 = vsel %vm7415_vm15, %v6841_v52, 0.0 }
 0x1d2   : > { %11586 = vst [vmem:[#allocation111_spill] sm:$0xff] %v7376_v18  ;;  %2156 = vmatmul.f32.gmra.mxu0 %v7269_v6  ;;  %v7406_v18 = vld [vmem:[#allocation2 + $0x88] sm:$0xff] }
 0x1d3   : > { %2345 = vmatmul.f32.gmra.mxu1 %v6370_v41  ;;  %v1442_v41 = vsel %vm11282_vm12, %v1419_v0, %v1420_v60  ;;  %v11591_v0 = vmov 0  ;;  %v606_v60 = vadd.s32 200, %v6818_v32 }
 0x1d4   : > { %2785 = vmatmul.f32.gmra.mxu3 %v7221_v53  ;;  %v1545_v31 = vadd.f32 %v7323_v25, %v1442_v41  ;;  %v11592_v0 = vsel %vm7415_vm15, 4294967295, %v11591_v0  ;;  %v1422_v41 = vrot.slane %v1390_v39, 7 }
 0x1d5   : > { %11593 = vst [vmem:[#allocation114_spill] sm:$0xff] %v11592_v0  ;;  %v792_v39 = vand.u32 15, %v606_v60 }
 0x1d6   : > { %v1825_v1 = vadd.f32 %v6910_v42, %v1545_v31  ;;  %v1548_v42 = vadd.f32 %v7343_v51, %v1441_v20 }
 0x1d7   : > { %v1962_v61 = vpop.f32.mrf.mxu3  ;;  %2650 = vmatmul.f32.gmra.mxu2 %v7406_v18  ;;  %vm7454_vm0 = vcmp.lt.s32.totalorder %v792_v39, 15 }
 0x1d8   : > { %v7399_v33 = vadd.f32 %v1962_v61, %v1824_v16  ;;  %v7401_v38 = vpop.f32.mrf.mxu1  ;;  %v7408_v5 = vpop.f32.mrf.mxu0  ;;  %v7429_v61 = vld [vmem:[#allocation2 + $0x90] sm:$0xff]  ;;  %v1826_v31 = vadd.f32 %v6919_v21, %v1548_v42 }
 0x1da   : > { %11590 = vst [vmem:[#allocation113_spill] sm:$0xff] %v7399_v33  ;;  %3031 = vmatmul.f32.vlgmr.msra.gmra.mxu0 %v7155_v48  ;;  %v6372_v48 = vld [vmem:[#allocation2 + $0x60] sm:$0xff] }
 0x1db   : > { %2348 = vmatmul.f32.gmra.mxu1 %v6371_v37 }
 0x1dc   : > { %2788 = vmatmul.f32.gmra.mxu3 %v7236_v10 }
 0x1df   : > { %v1965_v25 = vpop.f32.mrf.mxu3  ;;  %2653 = vmatmul.f32.gmra.mxu2 %v7429_v61 }
 0x1e0   : > { %v7419_v16 = vadd.f32 %v1965_v25, %v1825_v1  ;;  %v7421_v37 = vpop.f32.mrf.mxu1  ;;  %v7431_v19 = vpop.f32.mrf.mxu0  ;;  %v1440_v25 = vsel %vm11282_vm12, %v1421_v63, %v1422_v41  ;;  %v11596_v63 = vmov 0 }
 0x1e1   : > { %v1551_v20 = vadd.f32 %v7361_v22, %v1440_v25  ;;  %v11597_v63 = vsel %vm7454_vm0, 4294967295, %v11596_v63 }
 0x1e2   : > { %11594 = vst [vmem:[#allocation115_spill] sm:$0xff] %v7419_v16  ;;  %3034 = vmatmul.f32.gmra.mxu0 %v7171_v3  ;;  %v6373_v16 = vld [vmem:[#allocation2 + $0x68] sm:$0xff]  ;;  %v1423_v3 = vrot.slane %v6857_v12, 7  ;;  %v1392_v12 = vsel %vm7454_vm0, %v6874_v30, 0.0 }
 0x1e3   : > { %2351 = vmatmul.f32.gmra.mxu1 %v6372_v48  ;;  %v7445_v48 = vld [vmem:[#allocation2 + $0x98] sm:$0xff]  ;;  %v1827_v42 = vadd.f32 %v6939_v13, %v1551_v20  ;;  %11598 = vst [vmem:[#allocation117_spill] sm:$0xff] %v11597_v63  ;;  %v1424_v25 = vrot.slane %v1392_v12, 7 }
 0x1e4   : > { %2791 = vmatmul.f32.gmra.mxu3 %v7252_v44  ;;  %v1439_v60 = vsel %vm11282_vm12, %v1422_v41, %v1423_v3  ;;  %v608_v41 = vadd.s32 216, %v6818_v32  ;;  %v6375_v12 = vld [vmem:[#allocation2 + $0x78] sm:$0xff] }
 0x1e5   : > { %v1554_v13 = vadd.f32 %v7378_v11, %v1439_v60  ;;  %v1438_v11 = vsel %vm11282_vm12, %v1423_v3, %v1424_v25  ;;  %v11910_v63 = vld [vmem:[#allocation109_spill] sm:$0xff] }
 0x1e6   : > { %v806_v60 = vand.u32 15, %v608_v41 }
 0x1e7   : > { %v1968_v52 = vpop.f32.mrf.mxu3  ;;  %2656 = vmatmul.f32.gmra.mxu2 %v7445_v48  ;;  %v1828_v20 = vadd.f32 %v6948_v23, %v1554_v13  ;;  %v1425_v23 = vrot.slane %v6886_v50, 7  ;;  %v11601_v13 = vmov 0 }
 0x1e8   : > { %v7438_v1 = vadd.f32 %v1968_v52, %v1826_v31  ;;  %v7440_v51 = vpop.f32.mrf.mxu1  ;;  %v7447_v21 = vpop.f32.mrf.mxu0  ;;  %v6374_v52 = vld [vmem:[#allocation2 + $0x70] sm:$0xff]  ;;  %vm7489_vm2 = vcmp.lt.s32.totalorder %v806_v60, 15 }
 0x1e9   : > { %v11602_v13 = vsel %vm7489_vm2, 4294967295, %v11601_v13  ;;  %v1437_v41 = vsel %vm11282_vm12, %v1424_v25, %v1425_v23  ;;  %v1394_v50 = vsel %vm7489_vm2, %v6903_v24, 0.0  ;;  %v610_v25 = vadd.s32 232, %v6818_v32 }
 0x1ea   : > { %11595 = vst [vmem:[#allocation116_spill] sm:$0xff] %v7438_v1  ;;  %3037 = vmatmul.f32.gmra.mxu0 %v7187_v26  ;;  %v582_v24 = vadd.s32 8, %v6818_v32  ;;  %v11632_v1 = vld [vmem:[#allocation61_spill] sm:$0xff] }
 0x1eb   : > { %2354 = vmatmul.f32.gmra.mxu1 %v6373_v16  ;;  %11603 = vst [vmem:[#allocation120_spill] sm:$0xff] %v11602_v13 }
 0x1ec   : > { %2794 = vmatmul.f32.gmra.mxu3 %v7271_v54 }
 0x1ef   : > { %v1971_v22 = vpop.f32.mrf.mxu3  ;;  %2659 = vmatmul.f32.gmra.mxu2 %v7077_v55 }
 0x1f0   : > { %v7458_v31 = vadd.f32 %v1971_v22, %v1827_v42  ;;  %v7460_v16 = vpop.f32.mrf.mxu1  ;;  %v7468_v26 = vpop.f32.mrf.mxu0  ;;  %v1557_v22 = vadd.f32 %v7401_v38, %v1438_v11  ;;  %v1426_v11 = vrot.slane %v1394_v50, 7  ;;  %v1427_v50 = vrot.slane %v6915_v4, 7 }
 0x1f2   : > { %11599 = vst [vmem:[#allocation118_spill] sm:$0xff] %v7458_v31  ;;  %3040 = vmatmul.f32.gmra.mxu0 %v7205_v62  ;;  %v1829_v62 = vadd.f32 %v6970_v47, %v1557_v22  ;;  %v1560_v47 = vadd.f32 %v7421_v37, %v1437_v41  ;;  %v820_v41 = vand.u32 15, %v610_v25  ;;  %v7539_v4 = vpop.f32.mrf.mxu2 }
 0x1f3   : > { %2357 = vmatmul.f32.gmra.mxu1 %v6374_v52  ;;  %11615 = vst [vmem:[#allocation128_spill] sm:$0xff] %v7539_v4 }
 0x1f4   : > { %2797 = vmatmul.f32.gmra.mxu3 %v7308_v56  ;;  %v1830_v22 = vadd.f32 %v6979_v46, %v1560_v47  ;;  %v624_v46 = vand.u32 15, %v582_v24 }
 0x1f6   : > { %vm7531_vm8 = vcmp.lt.s32.totalorder %v624_v46, 15  ;;  %v11621_v46 = vld [vmem:[#allocation36_spill] sm:$0xff] }
 0x1f7   : > { %v1974_v39 = vpop.f32.mrf.mxu3  ;;  %2662 = vmatmul.f32.gmra.mxu2 %v7090_v2  ;;  %v1368_v24 = vsel %vm7531_vm8, %v6821_v34, 0.0 }
 0x1f8   : > { %v7475_v42 = vadd.f32 %v1974_v39, %v1828_v20  ;;  %v7477_v30 = vpop.f32.mrf.mxu1  ;;  %v7482_v52 = vpop.f32.mrf.mxu0  ;;  %v6376_v39 = vld [vmem:[#allocation2 + $0x80] sm:$0xff] }
 0x1fa   : > { %11600 = vst [vmem:[#allocation119_spill] sm:$0xff] %v7475_v42  ;;  %3043 = vmatmul.f32.gmra.mxu0 %v7221_v53 }
 0x1fb   : > { %2360 = vmatmul.f32.gmra.mxu1 %v6375_v12 }
 0x1fc   : > { %2800 = vmatmul.f32.gmra.mxu3 %v7328_v49 }
 0x1ff   : > { %v1977_v38 = vpop.f32.mrf.mxu3  ;;  %2665 = vmatmul.f32.gmra.mxu2 %v7103_v9 }
 0x200   : > { %v7493_v3 = vadd.f32 %v1977_v38, %v1829_v62  ;;  %v7495_v20 = vpop.f32.mrf.mxu1  ;;  %v7503_v53 = vpop.f32.mrf.mxu0  ;;  %v1436_v62 = vsel %vm11282_vm12, %v1425_v23, %v1426_v11  ;;  %v583_v38 = vadd.s32 16, %v6818_v32  ;;  %vm7527_vm12 = vcmp.lt.s32.totalorder %v820_v41, 15 }
 0x201   : > { %v1563_v9 = vadd.f32 %v7440_v51, %v1436_v62  ;;  %v11607_v23 = vmov 0  ;;  %v1400_v41 = vrot.slane %v1368_v24, 7 }
 0x202   : > { %11604 = vst [vmem:[#allocation121_spill] sm:$0xff] %v7493_v3  ;;  %3046 = vmatmul.f32.gmra.mxu0 %v7236_v10  ;;  %v631_v47 = vand.u32 15, %v583_v38  ;;  %v11608_v23 = vsel %vm7527_vm12, 4294967295, %v11607_v23  ;;  %v7557_v38 = vld [vmem:[#allocation2 + $0xc0] sm:$0xff]  ;;  %v11628_v3 = vld [vmem:[#allocation48_spill] sm:$0xff] }
 0x203   : > { %2363 = vmatmul.f32.gmra.mxu1 %v6376_v39  ;;  %v1831_v39 = vadd.f32 %v7002_v36, %v1563_v9  ;;  %11609 = vst [vmem:[#allocation124_spill] sm:$0xff] %v11608_v23  ;;  %v1435_v36 = vsel %vm11616_vm7, %v1426_v11, %v1427_v50 }
 0x204   : > { %2803 = vmatmul.f32.gmra.mxu3 %v7351_v27  ;;  %vm7543_vm6 = vcmp.gt.s32.totalorder %v631_v47, 0 }
 0x205   : > { %v1709_v11 = vsel %vm7543_vm6, %v7006_v59, 0.0  ;;  %v612_v59 = vadd.s32 248, %v6818_v32 }
 0x207   : > { %v1980_v60 = vpop.f32.mrf.mxu3  ;;  %2668 = vmatmul.f32.gmra.mxu2 %v7114_v45  ;;  %v1396_v45 = vsel %vm7527_vm12, %v6932_v29, 0.0  ;;  %v11620_v29 = vld [vmem:[#allocation10_spill] sm:$0xff] }
 0x208   : > { %v7511_v12 = vadd.f32 %v1980_v60, %v1830_v22  ;;  %v7513_v37 = vpop.f32.mrf.mxu1  ;;  %v7520_v10 = vpop.f32.mrf.mxu0  ;;  %v1566_v60 = vadd.f32 %v7460_v16, %v1435_v36  ;;  %v1428_v9 = vrot.slane %v1396_v45, 7  ;;  %v11293_v16 = vrot.slane %v11620_v29, 7  ;;  %v11624_v45 = vld [vmem:[#allocation64_spill] sm:$0xff] }
 0x209   : > { %11606 = vst [vmem:[#allocation123_spill] sm:$0xff] %v7520_v10  ;;  %v2161_v4 = vsel %vm7531_vm8, %v11624_v45, 0.0 }
 0x20a   : > { %11605 = vst [vmem:[#allocation122_spill] sm:$0xff] %v7511_v12  ;;  %3049 = vmatmul.f32.gmra.mxu0 %v7252_v44  ;;  %v11617_v44 = vmov 0  ;;  %v1832_v34 = vadd.f32 %v11621_v46, %v1566_v60  ;;  %v1434_v24 = vsel %vm11616_vm7, %v1427_v50, %v1428_v9  ;;  %v11625_v60 = vld [vmem:[#allocation31_spill] sm:$0xff]  ;;  %vm11631_vm7 = vcmp.lt.s32.totalorder %v6818_v32, 7 }
 0x20b   : > { %2366 = vmatmul.f32.gmra.mxu1 %v7029_v17  ;;  %v11610_v17 = vmov 0  ;;  %v11618_v44 = vsel %vm7543_vm6, 4294967295, %v11617_v44  ;;  %v11294_v46 = vrot.slane %v11625_v60, 1  ;;  %v11630_v50 = vld [vmem:[#allocation11_spill] sm:$0xff] }
 0x20c   : > { %2806 = vmatmul.f32.gmra.mxu3 %v7367_v15  ;;  %v11611_v17 = vsel %vm7531_vm8, 4294967295, %v11610_v17  ;;  %11619 = vst [vmem:[#allocation129_spill] sm:$0xff] %v11618_v44  ;;  %v1401_v42 = vrot.slane %v11630_v50, 7  ;;  %v617_v50 = vand.u32 15, %v6818_v32 }
 0x20d   : > { %11612 = vst [vmem:[#allocation125_spill] sm:$0xff] %v11611_v17 }
 0x20f   : > { %v1983_v51 = vpop.f32.mrf.mxu3  ;;  %2671 = vmatmul.f32.gmra.mxu2 %v7557_v38 }
 0x210   : > { %v7535_v22 = vadd.f32 %v1983_v51, %v1831_v39  ;;  %v7537_v25 = vpop.f32.mrf.mxu1  ;;  %v7555_v62 = vpop.f32.mrf.mxu0  ;;  %v1741_v39 = vrot.slane %v1709_v11, 1  ;;  %v1462_v11 = vsel %vm11626_vm5, %v11293_v16, %v1400_v41  ;;  %v2193_v16 = vrot.slane %v2161_v4, 7 }
 0x211   : > { %11614 = vst [vmem:[#allocation127_spill] sm:$0xff] %v7537_v25 }
 0x212   : > { %11613 = vst [vmem:[#allocation126_spill] sm:$0xff] %v7535_v22  ;;  %3052 = vmatmul.f32.gmra.mxu0 %v7271_v54  ;;  %v585_v54 = vadd.s32 32, %v6818_v32  ;;  %v11627_v22 = vld [vmem:[#allocation33_spill] sm:$0xff]  ;;  %v1801_v31 = vsel %vm11631_vm7, %v11294_v46, %v1741_v39  ;;  %v11639_v46 = vld [vmem:[#allocation40_spill] sm:$0xff]  ;;  %vm11640_vm7 = vcmp.lt.s32.totalorder %v6818_v32, 1 }
 0x213   : > { %2369 = vmatmul.f32.gmra.mxu1 %v7045_v40  ;;  %v584_v40 = vadd.s32 24, %v6818_v32  ;;  %v1485_v12 = vadd.f32 %v11627_v22, %v1462_v11  ;;  %v11634_v22 = vld [vmem:[#allocation68_spill] sm:$0xff]  ;;  %v11635_v11 = vld [vmem:[#allocation41_spill] sm:$0xff]  ;;  %v1742_v4 = vrot.slane %v11639_v46, 1  ;;  %vm11642_vm4 = vmmov %vm11640_vm7 }
 0x214   : > { %2809 = vmatmul.f32.gmra.mxu3 %v7387_v57  ;;  %v11647_v46 = vld [vmem:[#allocation50_spill] sm:$0xff]  ;;  %vm11648_vm1 = vmmov %vm11642_vm4 }
 0x215   : > { %v1805_v23 = vadd.f32 %v1801_v31, %v1485_v12 }
 0x217   : > { %v1986_v47 = vpop.f32.mrf.mxu3  ;;  %2674 = vmatmul.f32.gmra.mxu2 %v11634_v22  ;;  %v11644_v22 = vmov 0  ;;  %v1999_v31 = vadd.f32 %v11647_v46, %v1805_v23  ;;  %v11655_v46 = vld [vmem:[#allocation69_spill] sm:$0xff] }
 0x218   : > { %v7568_v51 = vadd.f32 %v1986_v47, %v1832_v34  ;;  %v7570_v36 = vpop.f32.mrf.mxu1  ;;  %v1569_v34 = vadd.f32 %v7477_v30, %v1434_v24  ;;  %v2615_v47 = vpop.f32.mrf.mxu2  ;;  %v11633_v30 = vld [vmem:[#allocation23_spill] sm:$0xff]  ;;  %v834_v24 = vand.u32 15, %v612_v59  ;;  %v1461_v59 = vsel %vm11640_vm7, %v1400_v41, %v1401_v42 }
 0x219   : > { %11623 = vst [vmem:[#allocation36_spill] sm:$0xff] %v7570_v36  ;;  %v7587_v45 = vpop.f32.mrf.mxu0  ;;  %v2194_v44 = vrot.slane %v11655_v46, 7  ;;  %v11664_v46 = vld [vmem:[#allocation44_spill] sm:$0xff] }
 0x21a   : > { %11622 = vst [vmem:[#allocation10_spill] sm:$0xff] %v7568_v51  ;;  %v638_v51 = vand.u32 15, %v584_v40  ;;  %v1429_v40 = vrot.slane %v11633_v30, 7  ;;  %v1833_v33 = vadd.f32 %v11635_v11, %v1569_v34  ;;  %3055 = vmatmul.f32.gmra.mxu0 %v7308_v56  ;;  %v11641_v30 = vrot.slane %v11632_v1, 7  ;;  %v11653_v56 = vld [vmem:[#allocation13_spill] sm:$0xff] }
 0x21b   : > { %2372 = vmatmul.f32.gmra.mxu1 %v11628_v3  ;;  %11629 = vst [vmem:[#allocation64_spill] sm:$0xff] %v7587_v45  ;;  %v645_v3 = vand.u32 15, %v585_v54  ;;  %v11636_v45 = vmov 0  ;;  %vm7615_vm3 = vcmp.lt.s32.totalorder %v834_v24, 15  ;;  %v11649_v11 = vmov 0 }
 0x21c   : > { %2812 = vmatmul.f32.gmra.mxu3 %v7406_v18  ;;  %vm7601_vm5 = vcmp.lt.s32.totalorder %v638_v51, 15  ;;  %v2254_v54 = vsel %vm11642_vm4, %v11641_v30, %v2193_v16  ;;  %v11645_v22 = vsel %vm7615_vm3, 4294967295, %v11644_v22  ;;  %v1433_v12 = vsel %vm11648_vm1, %v1428_v9, %v1429_v40  ;;  %v11652_v30 = vld [vmem:[#allocation35_spill] sm:$0xff] }
 0x21d   : > { %v11637_v45 = vsel %vm7601_vm5, 4294967295, %v11636_v45  ;;  %11646 = vst [vmem:[#allocation48_spill] sm:$0xff] %v11645_v22  ;;  %vm7624_vm7 = vcmp.gt.s32.totalorder %v645_v3, 0  ;;  %vm11654_vm4 = vcmp.lt.s32.totalorder %v6818_v32, 7  ;;  %v2257_v9 = vadd.f32 %v2254_v54, %v1999_v31  ;;  %v11662_v31 = vld [vmem:[#allocation45_spill] sm:$0xff] }
 0x21e   : > { %11638 = vst [vmem:[#allocation31_spill] sm:$0xff] %v11637_v45  ;;  %v11650_v11 = vsel %vm7624_vm7, 4294967295, %v11649_v11  ;;  %v1800_v23 = vsel %vm11654_vm4, %v1741_v39, %v1742_v4  ;;  %vm7639_vm1 = vcmp.gt.s32.totalorder %v617_v50, 0  ;;  %vm11661_vm10 = vmmov %vm11654_vm4 }
 0x21f   : > { %v1989_v25 = vpop.f32.mrf.mxu3  ;;  %11651 = vst [vmem:[#allocation11_spill] sm:$0xff] %v11650_v11  ;;  %v11702_v11 = vld [vmem:[#allocation58_spill] sm:$0xff] }
 0x220   : > { %v7613_v34 = vadd.f32 %v1989_v25, %v1833_v33  ;;  %v2328_v51 = vpop.f32.mrf.mxu1  ;;  %v1488_v33 = vadd.f32 %v11652_v30, %v1461_v59  ;;  %v1572_v25 = vadd.f32 %v7495_v20, %v1433_v12  ;;  %v11659_v20 = vld [vmem:[#allocation26_spill] sm:$0xff]  ;;  %v2618_v54 = vpop.f32.mrf.mxu2  ;;  %v11663_v12 = vld [vmem:[#allocation73_spill] sm:$0xff] }
 0x221   : > { %v2420_v41 = vsel %vm7543_vm6, %v2328_v51, 0.0  ;;  %v7637_v3 = vpop.f32.mrf.mxu0  ;;  %v11656_v51 = vmov 0  ;;  %v1398_v59 = vsel %vm7615_vm3, %v11659_v20, 0.0  ;;  %2677 = vmatmul.f32.gmra.mxu2 %v11663_v12  ;;  %v11665_v20 = vld [vmem:[#allocation27_spill] sm:$0xff]  ;;  %vm11673_vm6 = vcmp.lt.s32.totalorder %v6818_v32, 7 }
 0x222   : > { %11643 = vst [vmem:[#allocation33_spill] sm:$0xff] %v7613_v34  ;;  %v2452_v24 = vrot.slane %v2420_v41, 1  ;;  %v1370_v34 = vsel %vm7601_vm5, %v11653_v56, 0.0  ;;  %v11657_v51 = vsel %vm7639_vm1, 4294967295, %v11656_v51  ;;  %v11660_v56 = vrot.slane %v7570_v36, 1  ;;  %3058 = vmatmul.f32.gmra.mxu0 %v7328_v49 }
 0x223   : > { %2375 = vmatmul.f32.gmra.mxu1 %v7077_v55  ;;  %11658 = vst [vmem:[#allocation23_spill] sm:$0xff] %v11657_v51  ;;  %v1711_v55 = vsel %vm7624_vm7, %v11662_v31, 0.0  ;;  %v1402_v41 = vrot.slane %v1370_v34, 7  ;;  %v1806_v30 = vadd.f32 %v1800_v23, %v1488_v33  ;;  %v1834_v1 = vadd.f32 %v11664_v46, %v1572_v25  ;;  %v11667_v33 = vld [vmem:[#allocation53_spill] sm:$0xff]  ;;  %v11705_v51 = vld [vmem:[#allocation47_spill] sm:$0xff] }
 0x224   : > { %v2511_v39 = vsel %vm11661_vm10, %v11660_v56, %v2452_v24  ;;  %2815 = vmatmul.f32.gmra.mxu3 %v7429_v61  ;;  %v1707_v56 = vsel %vm7639_vm1, %v11665_v20, 0.0  ;;  %v7660_v36 = vrot.slane %v1398_v59, 7  ;;  %vm11666_vm10 = vcmp.lt.s32.totalorder %v6818_v32, 1 }
 0x225   : > { %v2515_v50 = vadd.f32 %v2511_v39, %v2257_v9  ;;  %v2253_v13 = vsel %vm11666_vm10, %v2193_v16, %v2194_v44  ;;  %v1743_v9 = vrot.slane %v1711_v55, 1  ;;  %v586_v34 = vadd.s32 40, %v6818_v32  ;;  %v11669_v39 = vld [vmem:[#allocation74_spill] sm:$0xff]  ;;  %vm11670_vm4 = vmmov %vm11666_vm10 }
 0x226   : > { %v2000_v23 = vadd.f32 %v11667_v33, %v1806_v30  ;;  %v2163_v12 = vsel %vm7601_vm5, %v11669_v39, 0.0  ;;  %v1432_v59 = vsel %vm11670_vm4, %v1429_v40, %v7660_v36  ;;  %vm11671_vm10 = vmmov %vm11670_vm4 }
 0x227   : > { %v1992_v10 = vpop.f32.mrf.mxu3  ;;  %v7664_v31 = vadd.f32 %v2615_v47, %v2515_v50  ;;  %v587_v47 = vadd.s32 48, %v6818_v32  ;;  %v1460_v55 = vsel %vm11671_vm10, %v1401_v42, %v1402_v41  ;;  %v1575_v30 = vadd.f32 %v7513_v37, %v1432_v59  ;;  %vm11675_vm4 = vmmov %vm11673_vm6  ;;  %v11680_v59 = vld [vmem:[#allocation78_spill] sm:$0xff] }
 0x228   : > { %v7668_v25 = vadd.f32 %v1992_v10, %v1834_v1  ;;  %v2331_v49 = vpop.f32.mrf.mxu1  ;;  %v2258_v50 = vadd.f32 %v2253_v13, %v2000_v23  ;;  %v7680_v1 = vrot.slane %v1707_v56, 1  ;;  %v11672_v10 = vld [vmem:[#allocation39_spill] sm:$0xff]  ;;  %v652_v40 = vand.u32 15, %v586_v34  ;;  %v11676_v13 = vld [vmem:[#allocation14_spill] sm:$0xff]  ;;  %vm11679_vm10 = vmmov %vm11675_vm4 }
 0x229   : > { %v2453_v16 = vrot.slane %v2331_v49, 1  ;;  %v1491_v46 = vadd.f32 %v11672_v10, %v1460_v55  ;;  %v7686_v33 = vpop.f32.mrf.mxu0  ;;  %v1799_v49 = vsel %vm11675_vm4, %v1742_v4, %v1743_v9  ;;  %v2195_v39 = vrot.slane %v2163_v12, 7  ;;  %v11677_v56 = vld [vmem:[#allocation42_spill] sm:$0xff]  ;;  %2680 = vmatmul.f32.gmra.mxu2 %v11680_v59  ;;  %v2621_v55 = vpop.f32.mrf.mxu2  ;;  %v11681_v12 = vld [vmem:[#allocation49_spill] sm:$0xff]  ;;  %v11693_v59 = vld [vmem:[#allocation16_spill] sm:$0xff] }
 0x22a   : > { %11668 = vst [vmem:[#allocation68_spill] sm:$0xff] %v7668_v25  ;;  %v1403_v37 = vrot.slane %v11676_v13, 7  ;;  %v11678_v23 = vrot.slane %v11677_v56, 1  ;;  %3061 = vmatmul.f32.gmra.mxu0 %v7351_v27  ;;  %v11682_v13 = vmov 0  ;;  %vm11685_vm4 = vcmp.lt.s32.totalorder %v6818_v32, 1  ;;  %v11688_v27 = vld [vmem:[#allocation55_spill] sm:$0xff] }
 0x22b   : > { %v2510_v20 = vsel %vm11673_vm6, %v2452_v24, %v2453_v16  ;;  %2378 = vmatmul.f32.gmra.mxu1 %v7090_v2  ;;  %11674 = vst [vmem:[#allocation41_spill] sm:$0xff] %v7686_v33  ;;  %v659_v2 = vand.u32 15, %v587_v47  ;;  %v1807_v10 = vadd.f32 %v1799_v49, %v1491_v46  ;;  %vm7702_vm6 = vcmp.lt.s32.totalorder %v652_v40, 15  ;;  %v11692_v40 = vld [vmem:[#allocation43_spill] sm:$0xff] }
 0x22c   : > { %v2516_v42 = vadd.f32 %v2510_v20, %v2258_v50  ;;  %2818 = vmatmul.f32.gmra.mxu3 %v7445_v48  ;;  %v1803_v24 = vsel %vm11679_vm10, %v11678_v23, %v7680_v1  ;;  %v1744_v50 = vrot.slane %v11681_v12, 1  ;;  %v11683_v13 = vsel %vm7702_vm6, 4294967295, %v11682_v13  ;;  %vm11687_vm10 = vmmov %vm11685_vm4  ;;  %v11695_v12 = vld [vmem:[#allocation79_spill] sm:$0xff] }
 0x22d   : > { %v1835_v34 = vadd.f32 %v1803_v24, %v1575_v30  ;;  %11684 = vst [vmem:[#allocation40_spill] sm:$0xff] %v11683_v13  ;;  %v2252_v56 = vsel %vm11685_vm4, %v2194_v44, %v2195_v39  ;;  %v1459_v30 = vsel %vm11687_vm10, %v1402_v41, %v1403_v37  ;;  %vm7715_vm12 = vcmp.gt.s32.totalorder %v659_v2, 0 }
 0x22e   : > { %v7699_v4 = vadd.f32 %v2618_v54, %v2516_v42  ;;  %v2001_v54 = vadd.f32 %v11688_v27, %v1807_v10  ;;  %v11689_v46 = vmov 0  ;;  %v1494_v49 = vadd.f32 %v11692_v40, %v1459_v30  ;;  %v7733_v30 = vld [vmem:[#allocation2 + $0xa0] sm:$0xff]  ;;  %v11698_v27 = vld [vmem:[#allocation52_spill] sm:$0xff] }
 0x22f   : > { %v1995_v20 = vpop.f32.mrf.mxu3  ;;  %v11690_v46 = vsel %vm7715_vm12, 4294967295, %v11689_v46  ;;  %v1372_v44 = vsel %vm7702_vm6, %v11693_v59, 0.0  ;;  %vm11694_vm4 = vcmp.lt.s32.totalorder %v6818_v32, 7  ;;  %v2196_v10 = vrot.slane %v11695_v12, 7 }
 0x230   : > { %v7708_v23 = vadd.f32 %v1995_v20, %v1835_v34  ;;  %v2334_v47 = vpop.f32.mrf.mxu1  ;;  %11691 = vst [vmem:[#allocation35_spill] sm:$0xff] %v11690_v46  ;;  %v1798_v34 = vsel %vm11694_vm4, %v1743_v9, %v1744_v50  ;;  %v2259_v41 = vadd.f32 %v2252_v56, %v2001_v54  ;;  %v7726_v20 = vld [vmem:[#allocation2 + $0xb0] sm:$0xff]  ;;  %vm11697_vm10 = vmmov %vm11694_vm4  ;;  %v1713_v9 = vsel %vm7715_vm12, %v11698_v27, 0.0  ;;  %v11699_v54 = vld [vmem:[#allocation82_spill] sm:$0xff] }
 0x231   : > { %v2422_v42 = vsel %vm7624_vm7, %v2334_v47, 0.0  ;;  %v7729_v2 = vpop.f32.mrf.mxu0  ;;  %2683 = vmatmul.f32.gmra.mxu2 %v11699_v54  ;;  %v1808_v40 = vadd.f32 %v1798_v34, %v1494_v49  ;;  %v588_v59 = vadd.s32 56, %v6818_v32  ;;  %vm11700_vm4 = vcmp.lt.s32.totalorder %v6818_v32, 1  ;;  %v2624_v27 = vpop.f32.mrf.mxu2 }
 0x232   : > { %11686 = vst [vmem:[#allocation50_spill] sm:$0xff] %v7708_v23  ;;  %v2454_v24 = vrot.slane %v2422_v42, 1  ;;  %v1404_v42 = vrot.slane %v1372_v44, 7  ;;  %3064 = vmatmul.f32.gmra.mxu0 %v7367_v15  ;;  %v1745_v25 = vrot.slane %v1713_v9, 1  ;;  %v589_v15 = vadd.s32 64, %v6818_v32 }
 0x233   : > { %2381 = vmatmul.f32.gmra.mxu1 %v7726_v20  ;;  %11696 = vst [vmem:[#allocation13_spill] sm:$0xff] %v7729_v2  ;;  %v2002_v33 = vadd.f32 %v11702_v11, %v1808_v40  ;;  %v666_v54 = vand.u32 15, %v588_v59  ;;  %v7758_v11 = vld [vmem:[#allocation2 + $0xb8] sm:$0xff]  ;;  %v11710_v59 = vmov 0 }
 0x234   : > { %v2509_v47 = vsel %vm11697_vm10, %v2453_v16, %v2454_v24  ;;  %2821 = vmatmul.f32.gmra.mxu3 %v7733_v30  ;;  %v2251_v16 = vsel %vm11700_vm4, %v2195_v39, %v2196_v10  ;;  %vm11704_vm10 = vmmov %vm11700_vm4  ;;  %vm11706_vm4 = vcmp.lt.s32.totalorder %v6818_v32, 7  ;;  %v11708_v40 = vld [vmem:[#allocation17_spill] sm:$0xff] }
 0x235   : > { %v2517_v56 = vadd.f32 %v2509_v47, %v2259_v41  ;;  %v11703_v47 = vld [vmem:[#allocation84_spill] sm:$0xff]  ;;  %v1458_v34 = vsel %vm11704_vm10, %v1403_v37, %v1404_v42  ;;  %v2260_v39 = vadd.f32 %v2251_v16, %v2002_v33  ;;  %vm11709_vm7 = vmmov %vm11706_vm4  ;;  %v7766_v33 = vld [vmem:[#allocation2 + $0xa8] sm:$0xff]  ;;  %vm7773_vm10 = vcmp.lt.s32.totalorder %v666_v54, 15 }
 0x236   : > { %v2165_v49 = vsel %vm7702_vm6, %v11703_v47, 0.0  ;;  %v1797_v47 = vsel %vm11709_vm7, %v1744_v50, %v1745_v25  ;;  %v11711_v59 = vsel %vm7773_vm10, 4294967295, %v11710_v59  ;;  %v11713_v16 = vld [vmem:[#allocation57_spill] sm:$0xff]  ;;  %vm11714_vm7 = vcmp.lt.s32.totalorder %v6818_v32, 1 }
 0x237   : > { %v7744_v12 = vpop.f32.mrf.mxu3  ;;  %v7746_v23 = vadd.f32 %v2621_v55, %v2517_v56  ;;  %v1497_v55 = vadd.f32 %v11705_v51, %v1458_v34  ;;  %v2197_v2 = vrot.slane %v2165_v49, 7  ;;  %v673_v51 = vand.u32 15, %v589_v15  ;;  %11712 = vst [vmem:[#allocation45_spill] sm:$0xff] %v11711_v59 }
 0x238   : > { %11701 = vst [vmem:[#allocation69_spill] sm:$0xff] %v7744_v12  ;;  %v2337_v41 = vpop.f32.mrf.mxu1  ;;  %v1746_v34 = vrot.slane %v11713_v16, 1 }
 0x239   : > { %v2455_v44 = vrot.slane %v2337_v41, 1  ;;  %v7761_v56 = vpop.f32.mrf.mxu0  ;;  %v1405_v41 = vrot.slane %v11708_v40, 7  ;;  %2686 = vmatmul.f32.gmra.mxu2 %v7203_v58  ;;  %v1809_v50 = vadd.f32 %v1797_v47, %v1497_v55  ;;  %v11717_v55 = vld [vmem:[#allocation19_spill] sm:$0xff] }
 0x23a   : > { %11707 = vst [vmem:[#allocation26_spill] sm:$0xff] %v7761_v56  ;;  %3067 = vmatmul.f32.gmra.mxu0 %v7387_v57  ;;  %v1374_v47 = vsel %vm7773_vm10, %v11717_v55, 0.0  ;;  %v6381_v55 = vld [vmem:[#allocation2 + $0xc0] sm:$0xff] }
 0x23b   : > { %v2508_v9 = vsel %vm11706_vm4, %v2454_v24, %v2455_v44  ;;  %2384 = vmatmul.f32.gmra.mxu1 %v7758_v11  ;;  %vm11715_vm4 = vmmov %vm11714_vm7 }
 0x23c   : > { %v2518_v37 = vadd.f32 %v2508_v9, %v2260_v39  ;;  %2824 = vmatmul.f32.gmra.mxu3 %v7766_v33  ;;  %v1457_v39 = vsel %vm11714_vm7, %v1404_v42, %v1405_v41  ;;  %v2250_v9 = vsel %vm11715_vm4, %v2196_v10, %v2197_v2  ;;  %vm7791_vm7 = vcmp.gt.s32.totalorder %v673_v51, 0  ;;  %v11721_v10 = vld [vmem:[#allocation51_spill] sm:$0xff] }
 0x23d   : > { %v11718_v42 = vmov 0  ;;  %v1500_v16 = vadd.f32 %v11721_v10, %v1457_v39  ;;  %vm11722_vm4 = vcmp.lt.s32.totalorder %v6818_v32, 7 }
 0x23e   : > { %v7771_v24 = vadd.f32 %v2624_v27, %v2518_v37  ;;  %v11716_v27 = vld [vmem:[#allocation62_spill] sm:$0xff]  ;;  %v11719_v42 = vsel %vm7791_vm7, 4294967295, %v11718_v42 }
 0x23f   : > { %v2777_v49 = vpop.f32.mrf.mxu3  ;;  %v2003_v15 = vadd.f32 %v11716_v27, %v1809_v50  ;;  %11720 = vst [vmem:[#allocation73_spill] sm:$0xff] %v11719_v42  ;;  %v1796_v50 = vsel %vm11722_vm4, %v1745_v25, %v1746_v34  ;;  %v11728_v25 = vld [vmem:[#allocation60_spill] sm:$0xff] }
 0x240   : > { %v2871_v58 = vsel %vm7531_vm8, %v2777_v49, 0.0  ;;  %v2340_v57 = vpop.f32.mrf.mxu1  ;;  %v2627_v49 = vpop.f32.mrf.mxu2  ;;  %vm11725_vm8 = vcmp.lt.s32.totalorder %v6818_v32, 1  ;;  %v1810_v10 = vadd.f32 %v1796_v50, %v1500_v16 }
 0x241   : > { %v2903_v40 = vrot.slane %v2871_v58, 7  ;;  %v2424_v37 = vsel %vm7715_vm12, %v2340_v57, 0.0  ;;  %v2261_v27 = vadd.f32 %v2250_v9, %v2003_v15  ;;  %v11723_v58 = vld [vmem:[#allocation87_spill] sm:$0xff]  ;;  %v11724_v57 = vrot.slane %v7744_v12, 7  ;;  %v7803_v51 = vpop.f32.mrf.mxu0  ;;  %vm11727_vm12 = vmmov %vm11722_vm4  ;;  %2689 = vmatmul.f32.gmra.mxu2 %v7219_v35 }
 0x242   : > { %v2456_v17 = vrot.slane %v2424_v37, 1  ;;  %v2198_v54 = vrot.slane %v11723_v58, 7  ;;  %v1715_v9 = vsel %vm7791_vm7, %v11728_v25, 0.0  ;;  %v7815_v37 = vrot.slane %v1374_v47, 7  ;;  %3070 = vmatmul.f32.gmra.mxu0 %v7406_v18  ;;  %vm11732_vm4 = vmmov %vm11725_vm8 }
 0x243   : > { %v2964_v46 = vsel %vm11725_vm8, %v11724_v57, %v2903_v40  ;;  %2387 = vmatmul.f32.gmra.mxu1 %v6381_v55  ;;  %v11729_v57 = vld [vmem:[#allocation66_spill] sm:$0xff] }
 0x244   : > { %v7806_v56 = vadd.f32 %v2964_v46, %v7664_v31  ;;  %v2507_v39 = vsel %vm11727_vm12, %v2455_v44, %v2456_v17  ;;  %2827 = vmatmul.f32.gmra.mxu3 %v7726_v20  ;;  %v2249_v31 = vsel %vm11725_vm8, %v2197_v2, %v2198_v54  ;;  %v7822_v44 = vrot.slane %v1715_v9, 1  ;;  %vm11731_vm12 = vmmov %vm11725_vm8 }
 0x245   : > { %v2519_v15 = vadd.f32 %v2507_v39, %v2261_v27  ;;  %v2004_v55 = vadd.f32 %v11729_v57, %v1810_v10  ;;  %v11730_v27 = vld [vmem:[#allocation90_spill] sm:$0xff]  ;;  %v1456_v18 = vsel %vm11731_vm12, %v1405_v41, %v7815_v37  ;;  %vm11735_vm8 = vcmp.lt.s32.totalorder %v6818_v32, 7 }
 0x246   : > { %11726 = vst [vmem:[#allocation44_spill] sm:$0xff] %v7806_v56  ;;  %v2167_v35 = vsel %vm7773_vm10, %v11730_v27, 0.0  ;;  %vm11736_vm12 = vmmov %vm11735_vm8  ;;  %v11737_v27 = vld [vmem:[#allocation71_spill] sm:$0xff] }
 0x247   : > { %v2780_v46 = vpop.f32.mrf.mxu3  ;;  %v7820_v58 = vadd.f32 %v2627_v49, %v2519_v15  ;;  %v2262_v16 = vadd.f32 %v2249_v31, %v2004_v55  ;;  %v11733_v49 = vld [vmem:[#allocation54_spill] sm:$0xff]  ;;  %v7839_v15 = vld [vmem:[#allocation2 + $0xc8] sm:$0xff]  ;;  %v1795_v41 = vsel %vm11736_vm12, %v1746_v34, %v7822_v44  ;;  %v7847_v31 = vrot.slane %v2167_v35, 7 }
 0x248   : > { %v2904_v12 = vrot.slane %v2780_v46, 7  ;;  %v2343_v25 = vpop.f32.mrf.mxu1  ;;  %v1503_v50 = vadd.f32 %v11733_v49, %v1456_v18  ;;  %v7864_v49 = vld [vmem:[#allocation2 + $0xd0] sm:$0xff] }
 0x249   : > { %v2457_v47 = vrot.slane %v2343_v25, 1  ;;  %v7842_v10 = vpop.f32.mrf.mxu0  ;;  %2692 = vmatmul.f32.gmra.mxu2 %v7234_v7  ;;  %v2248_v55 = vsel %vm11732_vm4, %v2198_v54, %v7847_v31 }
 0x24a   : > { %v2963_v2 = vsel %vm11732_vm4, %v2903_v40, %v2904_v12  ;;  %v2630_v40 = vpop.f32.mrf.mxu2  ;;  %3073 = vmatmul.f32.gmra.mxu0 %v7429_v61 }
 0x24b   : > { %v7835_v39 = vadd.f32 %v2963_v2, %v7699_v4  ;;  %v2506_v9 = vsel %vm11735_vm8, %v2456_v17, %v2457_v47  ;;  %2390 = vmatmul.f32.gmra.mxu1 %v7839_v15  ;;  %v1811_v4 = vadd.f32 %v1795_v41, %v1503_v50  ;;  %vm11738_vm8 = vmmov %vm11732_vm4 }
 0x24c   : > { %v2520_v46 = vadd.f32 %v2506_v9, %v2262_v16  ;;  %2830 = vmatmul.f32.gmra.mxu3 %v7758_v11 }
 0x24d   : > { %11734 = vst [vmem:[#allocation27_spill] sm:$0xff] %v7835_v39  ;;  %v2005_v35 = vadd.f32 %v11737_v27, %v1811_v4 }
 0x24e   : > { %v2714_v17 = vadd.f32 %v2630_v40, %v2520_v46 }
 0x24f   : > { %v2783_v57 = vpop.f32.mrf.mxu3  ;;  %v2263_v61 = vadd.f32 %v2248_v55, %v2005_v35  ;;  %v7883_v55 = vld [vmem:[#allocation2 + $0xd8] sm:$0xff] }
 0x250   : > { %v2873_v34 = vsel %vm7601_vm5, %v2783_v57, 0.0  ;;  %v2346_v25 = vpop.f32.mrf.mxu1  ;;  %vm11821_vm5 = vcmp.lt.s32.totalorder %v6818_v32, 1 }
 0x251   : > { %v2905_v18 = vrot.slane %v2873_v34, 7  ;;  %v2426_v16 = vsel %vm7791_vm7, %v2346_v25, 0.0  ;;  %v7867_v54 = vpop.f32.mrf.mxu0  ;;  %2695 = vmatmul.f32.gmra.mxu2 %v7250_v8  ;;  %v7895_v25 = vld [vmem:[#allocation2 + $0xe0] sm:$0xff] }
 0x252   : > { %v7860_v7 = vrot.slane %v2426_v16, 1  ;;  %v2633_v40 = vpop.f32.mrf.mxu2  ;;  %3076 = vmatmul.f32.gmra.mxu0 %v7445_v48 }
 0x253   : > { %v2962_v2 = vsel %vm11738_vm8, %v2904_v12, %v2905_v18  ;;  %2393 = vmatmul.f32.gmra.mxu1 %v7864_v49  ;;  %vm11741_vm8 = vmmov %vm11732_vm4 }
 0x254   : > { %v7870_v50 = vadd.f32 %v2962_v2, %v7746_v23  ;;  %v2505_v9 = vsel %vm11736_vm12, %v2457_v47, %v7860_v7  ;;  %2833 = vmatmul.f32.gmra.mxu3 %v7557_v38  ;;  %vm11745_vm12 = vmmov %vm11732_vm4 }
 0x255   : > { %v2521_v41 = vadd.f32 %v2505_v9, %v2263_v61  ;;  %v11744_v61 = vld [vmem:[#allocation65_spill] sm:$0xff] }
 0x256   : > { %11739 = vst [vmem:[#allocation53_spill] sm:$0xff] %v7870_v50  ;;  %v11328_v2 = vrot.slane %v11744_v61, 1  ;;  %v11826_v50 = vld [vmem:[#allocation29_spill] sm:$0xff] }
 0x257   : > { %v2786_v12 = vpop.f32.mrf.mxu3  ;;  %v2715_v46 = vadd.f32 %v2633_v40, %v2521_v41  ;;  %v11746_v40 = vld [vmem:[#allocation56_spill] sm:$0xff] }
 0x258   : > { %v2906_v4 = vrot.slane %v2786_v12, 7 }
 0x259   : > { %v7886_v47 = vpop.f32.mrf.mxu0  ;;  %2698 = vmatmul.f32.gmra.mxu2 %v7269_v6  ;;  %v7904_v6 = vld [vmem:[#allocation2] sm:$0xff] }
 0x25a   : > { %v2961_v57 = vsel %vm11732_vm4, %v2905_v18, %v2906_v4  ;;  %3079 = vmatmul.f32.gmra.mxu0 %v7733_v30  ;;  %v11743_v30 = vld [vmem:[#allocation20_spill] sm:$0xff] }
 0x25b   : > { %v7881_v23 = vadd.f32 %v2961_v57, %v7771_v24  ;;  %2396 = vmatmul.f32.gmra.mxu1 %v7883_v55  ;;  %v11329_v18 = vrot.slane %v11743_v30, 7 }
 0x25c   : > { %2836 = vmatmul.f32.gmra.mxu3 %v7839_v15 }
 0x25d   : > { %11740 = vst [vmem:[#allocation74_spill] sm:$0xff] %v7881_v23 }
 0x25f   : > { %v2789_v8 = vpop.f32.mrf.mxu3 }
 0x260   : > { %v2875_v48 = vsel %vm7702_vm6, %v2789_v8, 0.0 }
 0x261   : > { %v2907_v34 = vrot.slane %v2875_v48, 7  ;;  %v7898_v27 = vpop.f32.mrf.mxu0  ;;  %2701 = vmatmul.f32.gmra.mxu2 %v7904_v6  ;;  %v3386_v48 = vld [vmem:[%s11231_s5 + $0x78] sm:$0xff] }
 0x262   : > { %3082 = vmatmul.f32.gmra.mxu0 %v7766_v33  ;;  %v7922_v33 = vld [vmem:[#allocation2 + $0xe8] sm:$0xff]  ;;  %3407 = vmatpush.msra.mxu2 %v3386_v48 }
 0x263   : > { %v2960_v24 = vsel %vm11741_vm8, %v2906_v4, %v2907_v34  ;;  %2399 = vmatmul.f32.gmra.mxu1 %v7895_v25  ;;  %v7918_v4 = vpop.f32.mrf.mxu1  ;;  %vm11748_vm8 = vcmp.lt.s32.totalorder %v6818_v32, 7 }
 0x264   : > { %v7901_v35 = vadd.f32 %v2960_v24, %v7820_v58  ;;  %2839 = vmatmul.f32.gmra.mxu3 %v7864_v49  ;;  %v1455_v58 = vsel %vm11745_vm12, %v7815_v37, %v11329_v18  ;;  %v1794_v37 = vsel %vm11748_vm8, %v7822_v44, %v11328_v2  ;;  %3387 = vmatpush.msrb.mxu1 %v3386_v48  ;;  %vm11750_vm12 = vmmov %vm11732_vm4 }
 0x265   : > { %v1506_v12 = vadd.f32 %v11746_v40, %v1455_v58  ;;  %v11751_v40 = vld [vmem:[#allocation75_spill] sm:$0xff] }
 0x266   : > { %11742 = vst [vmem:[#allocation39_spill] sm:$0xff] %v7901_v35 }
 0x267   : > { %v2792_v16 = vpop.f32.mrf.mxu3 }
 0x268   : > { %v2908_v9 = vrot.slane %v2792_v16, 7  ;;  %v1812_v16 = vadd.f32 %v1794_v37, %v1506_v12  ;;  %v7955_v37 = vld [vmem:[#allocation2 + $0xf0] sm:$0xff] }
 0x269   : > { %v7925_v8 = vpop.f32.mrf.mxu0  ;;  %2704 = vmatmul.f32.gmra.mxu2 %v7904_v6 }
 0x26a   : > { %v2959_v41 = vsel %vm11732_vm4, %v2907_v34, %v2908_v9  ;;  %v11749_v34 = vld [vmem:[#allocation93_spill] sm:$0xff]  ;;  %3085 = vmatmul.f32.gmra.mxu0 %v7726_v20  ;;  %v2006_v2 = vadd.f32 %v11751_v40, %v1812_v16  ;;  %vm11752_vm4 = vmmov %vm11748_vm8 }
 0x26b   : > { %v7920_v57 = vadd.f32 %v2959_v41, %v2714_v17  ;;  %2402 = vmatmul.f32.gmra.mxu1 %v7922_v33  ;;  %v11332_v24 = vrot.slane %v11749_v34, 7  ;;  %v11331_v17 = vrot.slane %v7918_v4, 1  ;;  %vm11753_vm8 = vmmov %vm11750_vm12 }
 0x26c   : > { %2842 = vmatmul.f32.gmra.mxu3 %v7883_v55 }
 0x26d   : > { %11747 = vst [vmem:[#allocation14_spill] sm:$0xff] %v7920_v57  ;;  %v2247_v44 = vsel %vm11750_vm12, %v7847_v31, %v11332_v24  ;;  %v2504_v20 = vsel %vm11752_vm4, %v7860_v7, %v11331_v17  ;;  %v2636_v7 = vpop.f32.mrf.mxu2  ;;  %vm11756_vm12 = vmmov %vm11753_vm8 }
 0x26e   : > { %v2264_v12 = vadd.f32 %v2247_v44, %v2006_v2 }
 0x26f   : > { %v2795_v58 = vpop.f32.mrf.mxu3 }
 0x270   : > { %v2877_v41 = vsel %vm7773_vm10, %v2795_v58, 0.0  ;;  %v2522_v16 = vadd.f32 %v2504_v20, %v2264_v12  ;;  %v7979_v20 = vpop.f32.mrf.mxu1 }
 0x271   : > { %v2909_v18 = vrot.slane %v2877_v41, 7  ;;  %v7958_v31 = vpop.f32.mrf.mxu0 }
 0x272   : > { %3088 = vmatmul.f32.gmra.mxu0 %v7758_v11  ;;  %v2716_v44 = vadd.f32 %v2636_v7, %v2522_v16  ;;  %v3385_v11 = vld [vmem:[%s11231_s5 + $0x70] sm:$0xff] }
 0x273   : > { %v2958_v48 = vsel %vm11753_vm8, %v2908_v9, %v2909_v18  ;;  %2405 = vmatmul.f32.gmra.mxu1 %v7955_v37  ;;  %3408 = vmatpush.msra.mxu2 %v3385_v11 }
 0x274   : > { %v7960_v58 = vadd.f32 %v2958_v48, %v2715_v46  ;;  %2845 = vmatmul.f32.gmra.mxu3 %v7895_v25  ;;  %v6389_v46 = vld [vmem:[#allocation2 + $0xf8] sm:$0xff]  ;;  %3388 = vmatpush.msrb.mxu1 %v3385_v11 }
 0x276   : > { %11754 = vst [vmem:[#allocation42_spill] sm:$0xff] %v7960_v58 }
 0x277   : > { %v7964_v41 = vpop.f32.mrf.mxu3 }
 0x278   : > { %11755 = vst [vmem:[#allocation78_spill] sm:$0xff] %v7964_v41  ;;  %v11330_v2 = vrot.slane %v7964_v41, 7 }
 0x279   : > { %v7973_v48 = vpop.f32.mrf.mxu0 }
 0x27a   : > { %v2957_v9 = vsel %vm11756_vm12, %v2909_v18, %v11330_v2  ;;  %3091 = vmatmul.f32.gmra.mxu0 %v7557_v38  ;;  %v6390_v18 = vld [vmem:[#allocation2 + $0x100] sm:$0xff]  ;;  %v3384_v38 = vld [vmem:[%s11231_s5 + $0x68] sm:$0xff]  ;;  %v7997_v2 = vpop.f32.mrf.mxu2 }
 0x27b   : > { %v7971_v40 = vadd.f32 %v2957_v9, %v2716_v44  ;;  %2408 = vmatmul.f32.gmra.mxu1 %v6389_v46  ;;  %v7990_v44 = vpop.f32.mrf.mxu1  ;;  %v6391_v9 = vld [vmem:[#allocation2 + $0x108] sm:$0xff]  ;;  %11762 = vst [vmem:[#allocation52_spill] sm:$0xff] %v7997_v2  ;;  %3409 = vmatpush.msra.mxu2 %v3384_v38 }
 0x27c   : > { %2848 = vmatmul.f32.gmra.mxu3 %v7922_v33  ;;  %3389 = vmatpush.msrb.mxu1 %v3384_v38  ;;  %v3383_v38 = vld [vmem:[%s11231_s5 + $0x60] sm:$0xff] }
 0x27d   : > { %11757 = vst [vmem:[#allocation49_spill] sm:$0xff] %v7971_v40  ;;  %3410 = vmatpush.msra.mxu2 %v3383_v38 }
 0x27e   : > { %3390 = vmatpush.msrb.mxu1 %v3383_v38 }
 0x27f   : > { %v7982_v12 = vpop.f32.mrf.mxu3 }
 0x280   : > { %11758 = vst [vmem:[#allocation55_spill] sm:$0xff] %v7982_v12  ;;  %v11851_v12 = vrot.slane %v11744_v61, 1 }
 0x281   : > { %v7984_v16 = vpop.f32.mrf.mxu0 }
 0x282   : > { %11759 = vst [vmem:[#allocation43_spill] sm:$0xff] %v7984_v16  ;;  %3094 = vmatmul.f32.gmra.mxu0 %v7839_v15  ;;  %v8006_v59 = vpop.f32.mrf.mxu2 }
 0x283   : > { %2411 = vmatmul.f32.gmra.mxu1 %v6390_v18  ;;  %v8002_v17 = vpop.f32.mrf.mxu1  ;;  %11765 = vst [vmem:[#allocation84_spill] sm:$0xff] %v8006_v59 }
 0x284   : > { %2851 = vmatmul.f32.gmra.mxu3 %v7955_v37 }
 0x287   : > { %v7988_v7 = vpop.f32.mrf.mxu3 }
 0x288   : > { %11760 = vst [vmem:[#allocation16_spill] sm:$0xff] %v7988_v7 }
 0x289   : > { %v7992_v11 = vpop.f32.mrf.mxu0 }
 0x28a   : > { %11761 = vst [vmem:[#allocation79_spill] sm:$0xff] %v7992_v11  ;;  %3097 = vmatmul.f32.gmra.mxu0 %v7864_v49  ;;  %v8021_v58 = vpop.f32.mrf.mxu2  ;;  %v11848_v11 = vld [vmem:[#allocation63_spill] sm:$0xff] }
 0x28b   : > { %2414 = vmatmul.f32.gmra.mxu1 %v6391_v9  ;;  %v8016_v49 = vpop.f32.mrf.mxu1  ;;  %11769 = vst [vmem:[#allocation62_spill] sm:$0xff] %v8021_v58 }
 0x28c   : > { %2854 = vmatmul.f32.gmra.mxu3 %v6389_v46 }
 0x28f   : > { %v8000_v15 = vpop.f32.mrf.mxu3 }
 0x290   : > { %11763 = vst [vmem:[#allocation82_spill] sm:$0xff] %v8000_v15  ;;  %v11822_v15 = vmov 0 }
 0x291   : > { %v8004_v24 = vpop.f32.mrf.mxu0 }
 0x292   : > { %11764 = vst [vmem:[#allocation58_spill] sm:$0xff] %v8004_v24  ;;  %3100 = vmatmul.f32.gmra.mxu0 %v7883_v55  ;;  %v8031_v35 = vpop.f32.mrf.mxu2 }
 0x293   : > { %v8026_v57 = vpop.f32.mrf.mxu1  ;;  %11772 = vst [vmem:[#allocation87_spill] sm:$0xff] %v8031_v35  ;;  %v595_v35 = vadd.s32 112, %v6818_v32 }
 0x294   : > { %2857 = vmatmul.f32.gmra.mxu3 %v6390_v18 }
 0x297   : > { %v8009_v13 = vpop.f32.mrf.mxu3 }
 0x298   : > { %11766 = vst [vmem:[#allocation47_spill] sm:$0xff] %v8009_v13 }
 0x299   : > { %v8011_v45 = vpop.f32.mrf.mxu0 }
 0x29a   : > { %11767 = vst [vmem:[#allocation17_spill] sm:$0xff] %v8011_v45  ;;  %3103 = vmatmul.f32.gmra.mxu0 %v7895_v25  ;;  %v3382_v25 = vld [vmem:[%s11231_s5 + $0x58] sm:$0xff] }
 0x29b   : > { %3411 = vmatpush.msra.mxu2 %v3382_v25  ;;  %3391 = vmatpush.msrb.mxu1 %v3382_v25  ;;  %v3381_v25 = vld [vmem:[%s11231_s5 + $0x50] sm:$0xff] }
 0x29c   : > { %2860 = vmatmul.f32.gmra.mxu3 %v6391_v9 }
 0x29d   : > { %3412 = vmatpush.msra.mxu2 %v3381_v25  ;;  %3392 = vmatpush.msrb.mxu1 %v3381_v25  ;;  %v3380_v25 = vld [vmem:[%s11231_s5 + $0x48] sm:$0xff] }
 0x29f   : > { %v8019_v40 = vpop.f32.mrf.mxu3  ;;  %3413 = vmatpush.msra.mxu2 %v3380_v25  ;;  %3393 = vmatpush.msrb.mxu1 %v3380_v25  ;;  %v3379_v25 = vld [vmem:[%s11231_s5 + $0x40] sm:$0xff] }
 0x2a0   : > { %11768 = vst [vmem:[#allocation57_spill] sm:$0xff] %v8019_v40 }
 0x2a1   : > { %v8023_v55 = vpop.f32.mrf.mxu0  ;;  %3414 = vmatpush.msra.mxu2 %v3379_v25  ;;  %3394 = vmatpush.msrb.mxu1 %v3379_v25  ;;  %v11799_v25 = vmov 0 }
 0x2a2   : > { %11770 = vst [vmem:[#allocation19_spill] sm:$0xff] %v8023_v55  ;;  %3106 = vmatmul.f32.gmra.mxu0 %v7922_v33  ;;  %v8042_v55 = vpop.f32.mrf.mxu1 }
 0x2a3   : > { %11775 = vst [vmem:[#allocation90_spill] sm:$0xff] %v8042_v55  ;;  %v11830_v55 = vld [vmem:[#allocation37_spill] sm:$0xff] }
 0x2a4   : > { %2863 = vmatmul.f32.gmra.mxu3 %v7904_v6  ;;  %v1413_v2 = vrot.slane %v11830_v55, 7 }
 0x2a7   : > { %v8029_v13 = vpop.f32.mrf.mxu3 }
 0x2a8   : > { %11771 = vst [vmem:[#allocation51_spill] sm:$0xff] %v8029_v13  ;;  %v8046_v13 = vpop.f32.mrf.mxu2 }
 0x2a9   : > { %v8033_v42 = vpop.f32.mrf.mxu0  ;;  %11777 = vst [vmem:[#allocation71_spill] sm:$0xff] %v8046_v13 }
 0x2aa   : > { %11773 = vst [vmem:[#allocation60_spill] sm:$0xff] %v8033_v42  ;;  %3109 = vmatmul.f32.gmra.mxu0 %v7955_v37  ;;  %v8050_v40 = vpop.f32.mrf.mxu1 }
 0x2ab   : > { %11779 = vst [vmem:[#allocation65_spill] sm:$0xff] %v8050_v40  ;;  %v11835_v40 = vld [vmem:[#allocation77_spill] sm:$0xff] }
 0x2ac   : > { %2866 = vmatmul.f32.gmra.mxu3 %v7904_v6 }
 0x2af   : > { %v8040_v38 = vpop.f32.mrf.mxu3 }
 0x2b0   : > { %11774 = vst [vmem:[#allocation66_spill] sm:$0xff] %v8040_v38  ;;  %v8057_v37 = vpop.f32.mrf.mxu2 }
 0x2b1   : > { %v8044_v33 = vpop.f32.mrf.mxu0  ;;  %11781 = vst [vmem:[#allocation93_spill] sm:$0xff] %v8057_v37  ;;  %v590_v37 = vadd.s32 72, %v6818_v32 }
 0x2b2   : > { %11776 = vst [vmem:[#allocation54_spill] sm:$0xff] %v8044_v33  ;;  %3112 = vmatmul.f32.gmra.mxu0 %v6389_v46  ;;  %v8063_v46 = vpop.f32.mrf.mxu1 }
 0x2b3   : > { %11784 = vst [vmem:[#allocation131_spill] sm:$0xff] %v8063_v46 }
 0x2b7   : > { %v8048_v42 = vpop.f32.mrf.mxu3 }
 0x2b8   : > { %11778 = vst [vmem:[#allocation20_spill] sm:$0xff] %v8048_v42  ;;  %v8067_v13 = vpop.f32.mrf.mxu2 }
 0x2b9   : > { %v8052_v45 = vpop.f32.mrf.mxu0  ;;  %11786 = vst [vmem:[#allocation133_spill] sm:$0xff] %v8067_v13 }
 0x2ba   : > { %11780 = vst [vmem:[#allocation56_spill] sm:$0xff] %v8052_v45  ;;  %3115 = vmatmul.f32.gmra.mxu0 %v6390_v18  ;;  %v8074_v18 = vpop.f32.mrf.mxu1 }
 0x2bb   : > { %11788 = vst [vmem:[#allocation135_spill] sm:$0xff] %v8074_v18 }
 0x2bf   : > { %v8059_v38 = vpop.f32.mrf.mxu3 }
 0x2c0   : > { %11782 = vst [vmem:[#allocation75_spill] sm:$0xff] %v8059_v38  ;;  %v8079_v38 = vpop.f32.mrf.mxu2 }
 0x2c1   : > { %v8061_v33 = vpop.f32.mrf.mxu0  ;;  %11790 = vst [vmem:[#allocation137_spill] sm:$0xff] %v8079_v38  ;;  %v591_v38 = vadd.s32 80, %v6818_v32 }
 0x2c2   : > { %11783 = vst [vmem:[#allocation130_spill] sm:$0xff] %v8061_v33  ;;  %3118 = vmatmul.f32.gmra.mxu0 %v6391_v9 }
 0x2c3   : > { %v687_v23 = vand.u32 15, %v591_v38  ;;  %v11811_v38 = vmov 0 }
 0x2c5   : > { %vm8126_vm10 = vcmp.gt.s32.totalorder %v687_v23, 0  ;;  %v11820_v23 = vrot.slane %v11620_v29, 7  ;;  %v3378_v29 = vld [vmem:[%s11231_s5 + $0x38] sm:$0xff] }
 0x2c6   : > { %v11812_v38 = vsel %vm8126_vm10, 4294967295, %v11811_v38  ;;  %3415 = vmatpush.msra.mxu2 %v3378_v29  ;;  %3395 = vmatpush.msrb.mxu1 %v3378_v29 }
 0x2c7   : > { %v8065_v42 = vpop.f32.mrf.mxu3  ;;  %11813 = vst [vmem:[#allocation150_spill] sm:$0xff] %v11812_v38 }
 0x2c8   : > { %11785 = vst [vmem:[#allocation132_spill] sm:$0xff] %v8065_v42  ;;  %v8094_v46 = vpop.f32.mrf.mxu2 }
 0x2c9   : > { %v8069_v45 = vpop.f32.mrf.mxu0  ;;  %11795 = vst [vmem:[#allocation142_spill] sm:$0xff] %v8094_v46 }
 0x2ca   : > { %11787 = vst [vmem:[#allocation134_spill] sm:$0xff] %v8069_v45  ;;  %3121 = vmatmul.f32.gmra.mxu0 %v7904_v6  ;;  %v8086_v45 = vpop.f32.mrf.mxu1 }
 0x2cb   : > { %11793 = vst [vmem:[#allocation140_spill] sm:$0xff] %v8086_v45  ;;  %v593_v45 = vadd.s32 96, %v6818_v32 }
 0x2cf   : > { %v8077_v33 = vpop.f32.mrf.mxu3 }
 0x2d0   : > { %11789 = vst [vmem:[#allocation136_spill] sm:$0xff] %v8077_v33  ;;  %v8119_v7 = vpop.f32.mrf.mxu2 }
 0x2d1   : > { %v8081_v9 = vpop.f32.mrf.mxu0  ;;  %11808 = vst [vmem:[#allocation149_spill] sm:$0xff] %v8119_v7 }
 0x2d2   : > { %11791 = vst [vmem:[#allocation138_spill] sm:$0xff] %v8081_v9  ;;  %3124 = vmatmul.f32.gmra.mxu0 %v7904_v6  ;;  %v592_v9 = vadd.s32 88, %v6818_v32  ;;  %v594_v6 = vadd.s32 104, %v6818_v32  ;;  %v8103_v58 = vpop.f32.mrf.mxu1 }
 0x2d3   : > { %11797 = vst [vmem:[#allocation144_spill] sm:$0xff] %v8103_v58  ;;  %v11809_v58 = vld [vmem:[#allocation22_spill] sm:$0xff] }
 0x2d4   : > { %v708_v18 = vand.u32 15, %v594_v6  ;;  %v715_v6 = vand.u32 15, %v595_v35  ;;  %v11818_v35 = vld [vmem:[#allocation34_spill] sm:$0xff] }
 0x2d6   : > { %vm8115_vm12 = vcmp.lt.s32.totalorder %v708_v18, 15  ;;  %v11815_v18 = vmov 0  ;;  %vm8146_vm7 = vcmp.gt.s32.totalorder %v715_v6, 0 }
 0x2d7   : > { %v8084_v42 = vpop.f32.mrf.mxu3  ;;  %v1380_v7 = vsel %vm8115_vm12, %v11818_v35, 0.0  ;;  %v11823_v15 = vsel %vm8146_vm7, 4294967295, %v11822_v15 }
 0x2d8   : > { %11792 = vst [vmem:[#allocation139_spill] sm:$0xff] %v8084_v42  ;;  %v680_v42 = vand.u32 15, %v590_v37  ;;  %v701_v37 = vand.u32 15, %v593_v45 }
 0x2d9   : > { %v8088_v13 = vpop.f32.mrf.mxu0  ;;  %11824 = vst [vmem:[#allocation34_spill] sm:$0xff] %v11823_v15 }
 0x2da   : > { %11794 = vst [vmem:[#allocation141_spill] sm:$0xff] %v8088_v13  ;;  %v694_v13 = vand.u32 15, %v592_v9  ;;  %vm8107_vm4 = vcmp.lt.s32.totalorder %v680_v42, 15  ;;  %v11805_v9 = vmov 0  ;;  %vm8133_vm6 = vcmp.gt.s32.totalorder %v701_v37, 0  ;;  %v11825_v37 = vld [vmem:[#allocation70_spill] sm:$0xff] }
 0x2db   : > { %v11800_v25 = vsel %vm8107_vm4, 4294967295, %v11799_v25  ;;  %v11806_v9 = vsel %vm8115_vm12, 4294967295, %v11805_v9  ;;  %v1376_v42 = vsel %vm8107_vm4, %v11809_v58, 0.0  ;;  %v11816_v18 = vsel %vm8133_vm6, 4294967295, %v11815_v18  ;;  %v11819_v58 = vld [vmem:[#allocation24_spill] sm:$0xff] }
 0x2dc   : > { %11801 = vst [vmem:[#allocation146_spill] sm:$0xff] %v11800_v25  ;;  %vm8111_vm8 = vcmp.lt.s32.totalorder %v694_v13, 15  ;;  %v11814_v13 = vld [vmem:[#allocation28_spill] sm:$0xff]  ;;  %v1408_v24 = vrot.slane %v1376_v42, 7  ;;  %v1409_v41 = vrot.slane %v11819_v58, 7  ;;  %v11827_v42 = vld [vmem:[#allocation30_spill] sm:$0xff] }
 0x2dd   : > { %11807 = vst [vmem:[#allocation148_spill] sm:$0xff] %v11806_v9  ;;  %v1378_v45 = vsel %vm8111_vm8, %v11814_v13, 0.0  ;;  %v1717_v13 = vsel %vm8126_vm10, %v11825_v37, 0.0  ;;  %v1411_v39 = vrot.slane %v11827_v42, 7  ;;  %v11831_v37 = vrot.slane %v11625_v60, 1  ;;  %v11880_v9 = vld [vmem:[#allocation97_spill] sm:$0xff] }
 0x2de   : > { %11817 = vst [vmem:[#allocation28_spill] sm:$0xff] %v11816_v18  ;;  %v1410_v59 = vrot.slane %v1378_v45, 7  ;;  %v11834_v45 = vld [vmem:[#allocation91_spill] sm:$0xff] }
 0x2df   : > { %v8098_v33 = vpop.f32.mrf.mxu3  ;;  %v1721_v42 = vsel %vm8146_vm7, %v11834_v45, 0.0 }
 0x2e0   : > { %11796 = vst [vmem:[#allocation143_spill] sm:$0xff] %v8098_v33  ;;  %v11802_v33 = vmov 0  ;;  %v1753_v56 = vrot.slane %v1721_v42, 1 }
 0x2e1   : > { %v8105_v46 = vpop.f32.mrf.mxu0  ;;  %v11803_v33 = vsel %vm8111_vm8, 4294967295, %v11802_v33 }
 0x2e2   : > { %11798 = vst [vmem:[#allocation145_spill] sm:$0xff] %v8105_v46 }
 0x2e3   : > { %11804 = vst [vmem:[#allocation147_spill] sm:$0xff] %v11803_v33  ;;  %v12000_v33 = vld [vmem:[#allocation62_spill] sm:$0xff] }
 0x2e7   : > { %v8124_v46 = vpop.f32.mrf.mxu3 }
 0x2e8   : > { %11810 = vst [vmem:[#allocation22_spill] sm:$0xff] %v8124_v46  ;;  %v1463_v46 = vsel %vm11821_vm5, %v7660_v36, %v11820_v23  ;;  %v11829_v36 = vld [vmem:[#allocation83_spill] sm:$0xff]  ;;  %v1412_v23 = vrot.slane %v1380_v7, 7  ;;  %vm11832_vm5 = vcmp.lt.s32.totalorder %v6818_v32, 7  ;;  %v11836_v7 = vrot.slane %v11743_v30, 7 }
 0x2e9   : > { %v1482_v35 = vadd.f32 %v11826_v50, %v1463_v46  ;;  %v8155_v58 = vpop.f32.mrf.mxu0  ;;  %v1719_v6 = vsel %vm8133_vm6, %v11829_v36, 0.0  ;;  %v1802_v50 = vsel %vm11832_vm5, %v7680_v1, %v11831_v37  ;;  %v8169_v46 = vpop.f32.mrf.mxu1  ;;  %v1750_v36 = vrot.slane %v11835_v40, 1 }
 0x2ea   : > { %11828 = vst [vmem:[#allocation24_spill] sm:$0xff] %v8155_v58  ;;  %v1749_v58 = vrot.slane %v1717_v13, 1  ;;  %vm11837_vm6 = vcmp.lt.s32.totalorder %v6818_v32, 1  ;;  %v1751_v1 = vrot.slane %v1719_v6, 1  ;;  %v11842_v13 = vld [vmem:[#allocation88_spill] sm:$0xff] }
 0x2eb   : > { %11833 = vst [vmem:[#allocation70_spill] sm:$0xff] %v8169_v46  ;;  %v1454_v60 = vsel %vm11837_vm6, %v11836_v7, %v1408_v24  ;;  %vm11838_vm10 = vmmov %vm11837_vm6  ;;  %v1804_v37 = vadd.f32 %v1802_v50, %v1482_v35  ;;  %v1752_v40 = vrot.slane %v11842_v13, 1  ;;  %v11846_v35 = vld [vmem:[#allocation95_spill] sm:$0xff] }
 0x2ec   : > { %v1453_v55 = vsel %vm11838_vm10, %v1408_v24, %v1409_v41  ;;  %vm11839_vm5 = vmmov %vm11837_vm6  ;;  %v8192_v24 = vpop.f32.mrf.mxu2  ;;  %v1754_v6 = vrot.slane %v11846_v35, 1  ;;  %v11847_v50 = vld [vmem:[#allocation59_spill] sm:$0xff]  ;;  %v11856_v35 = vld [vmem:[#allocation46_spill] sm:$0xff] }
 0x2ed   : > { %v1452_v29 = vsel %vm11839_vm5, %v1409_v41, %v1410_v59  ;;  %vm11840_vm1 = vmmov %vm11839_vm5  ;;  %11845 = vst [vmem:[#allocation30_spill] sm:$0xff] %v8192_v24  ;;  %v1509_v41 = vadd.f32 %v11847_v50, %v1454_v60  ;;  %v1512_v16 = vadd.f32 %v11848_v11, %v1453_v55  ;;  %v11850_v13 = vld [vmem:[#allocation67_spill] sm:$0xff]  ;;  %v11854_v24 = vld [vmem:[#allocation101_spill] sm:$0xff]  ;;  %v8211_v11 = vadd.f32 %v11856_v35, %v1804_v37 }
 0x2ee   : > { %v1451_v46 = vsel %vm11840_vm1, %v1410_v59, %v1411_v39  ;;  %vm11843_vm7 = vmmov %vm11840_vm1  ;;  %v11849_v59 = vld [vmem:[#allocation96_spill] sm:$0xff]  ;;  %v1515_v42 = vadd.f32 %v11850_v13, %v1452_v29 }
 0x2ef   : > { %v8185_v45 = vpop.f32.mrf.mxu3  ;;  %v1450_v30 = vsel %vm11843_vm7, %v1411_v39, %v1412_v23  ;;  %vm11844_vm6 = vmmov %vm11840_vm1  ;;  %vm11852_vm1 = vcmp.lt.s32.totalorder %v6818_v32, 7  ;;  %v11857_v55 = vld [vmem:[#allocation72_spill] sm:$0xff] }
 0x2f0   : > { %11841 = vst [vmem:[#allocation29_spill] sm:$0xff] %v8185_v45  ;;  %v1449_v7 = vsel %vm11844_vm6, %v1412_v23, %v1413_v2  ;;  %v2169_v45 = vsel %vm8107_vm4, %v11849_v59, 0.0  ;;  %v1793_v39 = vsel %vm11852_vm1, %v11851_v12, %v1749_v58  ;;  %vm11853_vm10 = vmmov %vm11852_vm1  ;;  %v1518_v50 = vadd.f32 %v11857_v55, %v1451_v46  ;;  %v11858_v59 = vld [vmem:[#allocation76_spill] sm:$0xff]  ;;  %v11861_v12 = vld [vmem:[#allocation81_spill] sm:$0xff] }
 0x2f1   : > { %v1792_v23 = vsel %vm11853_vm10, %v1749_v58, %v1750_v36  ;;  %vm11855_vm7 = vmmov %vm11839_vm5  ;;  %v1521_v25 = vadd.f32 %v11858_v59, %v1450_v30  ;;  %v8217_v29 = vpop.f32.mrf.mxu0  ;;  %v1524_v13 = vadd.f32 %v11861_v12, %v1449_v7  ;;  %v1813_v37 = vadd.f32 %v1793_v39, %v1509_v41  ;;  %v11864_v30 = vld [vmem:[#allocation105_spill] sm:$0xff]  ;;  %v11865_v55 = vld [vmem:[#allocation86_spill] sm:$0xff] }
 0x2f2   : > { %v1448_v60 = vsel %vm11855_vm7, %v1413_v2, %v11854_v24  ;;  %vm11859_vm5 = vmmov %vm11852_vm1  ;;  %11860 = vst [vmem:[#allocation83_spill] sm:$0xff] %v8217_v29  ;;  %v1789_v2 = vsel %vm11852_vm1, %v1752_v40, %v1753_v56  ;;  %v2201_v24 = vrot.slane %v2169_v45, 7  ;;  %v1814_v35 = vadd.f32 %v1792_v23, %v1512_v16  ;;  %v11868_v16 = vld [vmem:[#allocation80_spill] sm:$0xff]  ;;  %v11879_v7 = vld [vmem:[#allocation94_spill] sm:$0xff] }
 0x2f3   : > { %v1791_v61 = vsel %vm11859_vm5, %v1750_v36, %v1751_v1  ;;  %vm11862_vm6 = vmmov %vm11852_vm1  ;;  %v2171_v36 = vsel %vm8111_vm8, %v11864_v30, 0.0  ;;  %v1527_v59 = vadd.f32 %v11865_v55, %v1448_v60  ;;  %v2175_v45 = vsel %vm7265_vm9, %v7389_v14, 0.0  ;;  %v11869_v23 = vld [vmem:[#allocation104_spill] sm:$0xff] }
 0x2f4   : > { %v1790_v58 = vsel %vm11862_vm6, %v1751_v1, %v1752_v40  ;;  %vm11863_vm10 = vmmov %vm11852_vm1  ;;  %v1815_v29 = vadd.f32 %v1791_v61, %v1515_v42  ;;  %v2173_v1 = vsel %vm8115_vm12, %v7353_v28, 0.0  ;;  %v8236_v40 = vpop.f32.mrf.mxu1  ;;  %v2007_v41 = vadd.f32 %v11868_v16, %v1813_v37  ;;  %v11874_v30 = vld [vmem:[#allocation100_spill] sm:$0xff] }
 0x2f5   : > { %v1788_v46 = vsel %vm11863_vm10, %v1753_v56, %v1754_v6  ;;  %11867 = vst [vmem:[#allocation37_spill] sm:$0xff] %v8236_v40  ;;  %v1816_v56 = vadd.f32 %v1790_v58, %v1518_v50  ;;  %v1817_v39 = vadd.f32 %v1789_v2, %v1521_v25  ;;  %vm11870_vm7 = vmmov %vm11852_vm1  ;;  %v11872_v61 = vrot.slane %v11749_v34, 7  ;;  %v11875_v50 = vld [vmem:[#allocation110_spill] sm:$0xff]  ;;  %v11876_v2 = vld [vmem:[#allocation85_spill] sm:$0xff]  ;;  %v8254_v34 = vpop.f32.mrf.mxu2 }
 0x2f6   : > { %v1787_v12 = vsel %vm11870_vm7, %v1754_v6, %v11869_v23  ;;  %v1818_v42 = vadd.f32 %v1788_v46, %v1524_v13  ;;  %vm11873_vm5 = vcmp.lt.s32.totalorder %v6818_v32, 1  ;;  %v2202_v14 = vrot.slane %v11874_v30, 7  ;;  %v11877_v6 = vld [vmem:[#allocation89_spill] sm:$0xff] }
 0x2f7   : > { %v8242_v60 = vpop.f32.mrf.mxu3  ;;  %v2246_v28 = vsel %vm11873_vm5, %v11872_v61, %v2201_v24  ;;  %v2203_v55 = vrot.slane %v2171_v36, 7  ;;  %v2204_v40 = vrot.slane %v7330_v43, 7  ;;  %v2205_v37 = vrot.slane %v2173_v1, 7  ;;  %vm11884_vm1 = vmmov %vm11873_vm5  ;;  %v12066_v36 = vld [vmem:[#allocation130_spill] sm:$0xff] }
 0x2f8   : > { %11871 = vst [vmem:[#allocation91_spill] sm:$0xff] %v8242_v60  ;;  %v2206_v25 = vrot.slane %v11875_v50, 7  ;;  %v2207_v58 = vrot.slane %v2175_v45, 7  ;;  %v2008_v16 = vadd.f32 %v11876_v2, %v1814_v35  ;;  %v2009_v23 = vadd.f32 %v11877_v6, %v1815_v29  ;;  %v11878_v60 = vld [vmem:[#allocation92_spill] sm:$0xff]  ;;  %v8269_v29 = vld [vmem:[%s11232_s6] sm:$0xf]  ;;  %vm11885_vm10 = vmmov %vm11884_vm1 }
 0x2f9   : > { %v2010_v13 = vadd.f32 %v11878_v60, %v1816_v56  ;;  %v1819_v46 = vadd.f32 %v1787_v12, %v1527_v59  ;;  %v2011_v61 = vadd.f32 %v11879_v7, %v1817_v39  ;;  %v2012_v30 = vadd.f32 %v11880_v9, %v1818_v42  ;;  %v8261_v1 = vpop.f32.mrf.mxu0  ;;  %v3377_v35 = vld [vmem:[%s11231_s5 + $0x30] sm:$0xff]  ;;  %11883 = vst [vmem:[#allocation88_spill] sm:$0xff] %v8269_v29  ;;  %vm11887_vm7 = vmmov %vm11884_vm1 }
 0x2fa   : > { %v2177_v43 = vsel %vm7290_vm11, %v7431_v19, 0.0  ;;  %11882 = vst [vmem:[#allocation77_spill] sm:$0xff] %v8261_v1  ;;  %v8271_v59 = vadd.f32 %v2246_v28, %v2007_v41  ;;  %v2245_v9 = vsel %vm11884_vm1, %v2201_v24, %v2202_v14  ;;  %v2244_v19 = vsel %vm11885_vm10, %v2202_v14, %v2203_v55  ;;  %3416 = vmatpush.msra.mxu2 %v3377_v35  ;;  %vm11888_vm5 = vmmov %vm11884_vm1  ;;  %v11892_v14 = vld [vmem:[#allocation103_spill] sm:$0xff] }
 0x2fb   : > { %v2179_v45 = vsel %vm7337_vm13, %v7468_v26, 0.0  ;;  %3396 = vmatpush.msrb.mxu1 %v3377_v35  ;;  %v2243_v56 = vsel %vm11887_vm7, %v2203_v55, %v2204_v40  ;;  %v2242_v39 = vsel %vm11888_vm5, %v2204_v40, %v2205_v37  ;;  %vm11889_vm6 = vmmov %vm11884_vm1  ;;  %v2240_v24 = vsel %vm11884_vm1, %v2206_v25, %v2207_v58 }
 0x2fc   : > { %v2241_v41 = vsel %vm11889_vm6, %v2205_v37, %v2206_v25  ;;  %vm11890_vm10 = vcmask 1043456   ;;  %v2208_v12 = vrot.slane %v7408_v5, 7  ;;  %v2209_v26 = vrot.slane %v2177_v43, 7  ;;  %v8309_v43 = vpop.f32.mrf.mxu1  ;;  %vm11894_vm6 = vmmov %vm11884_vm1 }
 0x2fd   : > { %6284 = vmatpush.msk.msrb.mxu3 %vm11890_vm10, %v8269_v29  ;;  %v2210_v60 = vrot.slane %v7447_v21, 7  ;;  %v2181_v28 = vsel %vm7380_vm14, %v7503_v53, 0.0  ;;  %v2013_v40 = vadd.f32 %v11892_v14, %v1819_v46  ;;  %v8296_v55 = vadd.f32 %v2245_v9, %v2008_v16  ;;  %vm11895_vm7 = vmmov %vm11884_vm1  ;;  %v11906_v14 = vld [vmem:[#allocation106_spill] sm:$0xff] }
 0x2fe   : > { %v2211_v37 = vrot.slane %v2179_v45, 7  ;;  %v2212_v50 = vrot.slane %v7482_v52, 7  ;;  %v8301_v2 = vadd.f32 %v2244_v19, %v2009_v23  ;;  %v8303_v6 = vadd.f32 %v2243_v56, %v2010_v13  ;;  %vm11896_vm5 = vmmov %vm11884_vm1  ;;  %v11899_v19 = vld [vmem:[#allocation13_spill] sm:$0xff] }
 0x2ff   : > { %v8299_v25 = vpop.f32.mrf.mxu3  ;;  %v8305_v5 = vadd.f32 %v2242_v39, %v2011_v61  ;;  %v8307_v21 = vadd.f32 %v2241_v41, %v2012_v30  ;;  %v8311_v53 = vadd.f32 %v2240_v24, %v2013_v40  ;;  %v2213_v46 = vrot.slane %v2181_v28, 7  ;;  %vm11897_vm10 = vmmov %vm11884_vm1  ;;  %v11902_v39 = vld [vmem:[#allocation127_spill] sm:$0xff] }
 0x300   : > { %11893 = vst [vmem:[#allocation95_spill] sm:$0xff] %v8299_v25  ;;  %v2183_v16 = vsel %vm7415_vm15, %v7555_v62, 0.0  ;;  %v2191_v52 = vsel %vm7615_vm3, %v7867_v54, 0.0  ;;  %v2239_v23 = vsel %vm11894_vm6, %v2207_v58, %v2208_v12  ;;  %v2238_v13 = vsel %vm11895_vm7, %v2208_v12, %v2209_v26  ;;  %v11898_v54 = vld [vmem:[#allocation123_spill] sm:$0xff]  ;;  %vm11907_vm7 = vmmov %vm11884_vm1  ;;  %v11909_v58 = vld [vmem:[#allocation108_spill] sm:$0xff] }
 0x301   : > { %v2237_v61 = vsel %vm11896_vm5, %v2209_v26, %v2210_v60  ;;  %v2185_v30 = vsel %vm7454_vm0, %v7637_v3, 0.0  ;;  %v2236_v62 = vsel %vm11884_vm1, %v2210_v60, %v2211_v37  ;;  %v2235_v35 = vsel %vm11897_vm10, %v2211_v37, %v2212_v50  ;;  %v8336_v56 = vpop.f32.mrf.mxu0  ;;  %v11903_v41 = vld [vmem:[#allocation23_spill] sm:$0xff]  ;;  %v11905_v3 = vld [vmem:[#allocation64_spill] sm:$0xff]  ;;  %v8342_v60 = vpop.f32.mrf.mxu2  ;;  %v11912_v25 = vld [vmem:[#allocation113_spill] sm:$0xff] }
 0x302   : > { %v2214_v9 = vrot.slane %v11898_v54, 7  ;;  %v2187_v45 = vsel %vm7489_vm2, %v11899_v19, 0.0  ;;  %11901 = vst [vmem:[#allocation59_spill] sm:$0xff] %v8336_v56  ;;  %vm11904_vm6 = vnez %v11903_v41  ;;  %v2215_v12 = vrot.slane %v2183_v16, 7  ;;  %v11908_v19 = vld [vmem:[#allocation41_spill] sm:$0xff]  ;;  %v11911_v16 = vld [vmem:[#allocation111_spill] sm:$0xff]  ;;  %vm11913_vm5 = vmmov %vm11884_vm1 }
 0x303   : > { %v2418_v24 = vsel %vm11904_vm6, %v11902_v39, 0.0  ;;  %v2216_v26 = vrot.slane %v11905_v3, 7  ;;  %v2223_v28 = vrot.slane %v2191_v52, 7  ;;  %v8345_v40 = vadd.f32 %v2239_v23, %v11906_v14  ;;  %vm11919_vm10 = vmmov %vm11913_vm5  ;;  %v11925_v14 = vld [vmem:[#allocation26_spill] sm:$0xff] }
 0x304   : > { %v2234_v37 = vsel %vm11907_vm7, %v2212_v50, %v2213_v46  ;;  %v2217_v54 = vrot.slane %v2185_v30, 7  ;;  %v2218_v29 = vrot.slane %v11908_v19, 7  ;;  %v8351_v56 = vadd.f32 %v2238_v13, %v11909_v58  ;;  %v11915_v30 = vld [vmem:[#allocation124_spill] sm:$0xff]  ;;  %vm11920_vm7 = vmmov %vm11913_vm5 }
 0x305   : > { %v8354_v39 = vadd.f32 %v2237_v61, %v11910_v63  ;;  %v8357_v3 = vadd.f32 %v2236_v62, %v11911_v16  ;;  %v2219_v52 = vrot.slane %v2187_v45, 7  ;;  %v8360_v1 = vadd.f32 %v2235_v35, %v11912_v25  ;;  %v11918_v63 = vld [vmem:[#allocation115_spill] sm:$0xff]  ;;  %v11921_v35 = vld [vmem:[#allocation61_spill] sm:$0xff]  ;;  %vm11923_vm2 = vmmov %vm11913_vm5 }
 0x306   : > { %v2233_v23 = vsel %vm11913_vm5, %v2213_v46, %v2214_v9  ;;  %v8364_v50 = vrot.slane %v2418_v24, 1  ;;  %vm11916_vm1 = vnez %v11915_v30  ;;  %v8372_v61 = vadd.f32 %v2234_v37, %v11918_v63  ;;  %v11927_v19 = vld [vmem:[#allocation116_spill] sm:$0xff] }
 0x307   : > { %v2189_v13 = vsel %vm11916_vm1, %v7803_v51, 0.0  ;;  %v8369_v58 = vpop.f32.mrf.mxu3  ;;  %v2232_v62 = vsel %vm11919_vm10, %v2214_v9, %v2215_v12  ;;  %v2231_v25 = vsel %vm11920_vm7, %v2215_v12, %v2216_v26  ;;  %v11922_v45 = vrot.slane %v11921_v35, 7  ;;  %vm11924_vm1 = vmmov %vm11923_vm2 }
 0x308   : > { %11914 = vst [vmem:[#allocation63_spill] sm:$0xff] %v8364_v50  ;;  %v2230_v24 = vsel %vm11923_vm2, %v2216_v26, %v2217_v54  ;;  %v2229_v51 = vsel %vm11924_vm1, %v2217_v54, %v2218_v29  ;;  %v2220_v37 = vrot.slane %v11925_v14, 7  ;;  %vm11926_vm0 = vnez %v11812_v38  ;;  %vm11928_vm10 = vmmov %vm11924_vm1  ;;  %v11929_v26 = vld [vmem:[#allocation118_spill] sm:$0xff]  ;;  %v11930_v54 = vld [vmem:[#allocation36_spill] sm:$0xff] }
 0x309   : > { %11917 = vst [vmem:[#allocation96_spill] sm:$0xff] %v8369_v58  ;;  %v2255_v46 = vsel %vm11913_vm5, %v2223_v28, %v11922_v45  ;;  %v2428_v9 = vsel %vm11926_vm0, %v7979_v20, 0.0  ;;  %v8391_v16 = vadd.f32 %v2233_v23, %v11927_v19  ;;  %v2228_v12 = vsel %vm11928_vm10, %v2218_v29, %v2219_v52  ;;  %v8396_v45 = vpop.f32.mrf.mxu1  ;;  %v11933_v58 = vld [vmem:[#allocation119_spill] sm:$0xff]  ;;  %v8410_v29 = vpop.f32.mrf.mxu0  ;;  %vm11944_vm7 = vmmov %vm11913_vm5 }
 0x30a   : > { %v2221_v63 = vrot.slane %v2189_v13, 7  ;;  %v2222_v35 = vrot.slane %v7842_v10, 7  ;;  %v8399_v30 = vadd.f32 %v2232_v62, %v11929_v26  ;;  %v11931_v14 = vrot.slane %v11930_v54, 1  ;;  %11935 = vst [vmem:[#allocation101_spill] sm:$0xff] %v8410_v29  ;;  %v3376_v10 = vld [vmem:[%s11231_s5 + $0x28] sm:$0xff]  ;;  %v11936_v13 = vld [vmem:[#allocation121_spill] sm:$0xff]  ;;  %vm11946_vm10 = vmmov %vm11944_vm7 }
 0x30b   : > { %vm11932_vm2 = vcmp.lt.s32.totalorder %v6818_v32, 7  ;;  %v8407_v23 = vadd.f32 %v2231_v25, %v11933_v58  ;;  %v2256_v19 = vadd.f32 %v2255_v46, %v8211_v11  ;;  %v8416_v62 = vadd.f32 %v2230_v24, %v11936_v13  ;;  %v11938_v26 = vld [vmem:[#allocation122_spill] sm:$0xff]  ;;  %3417 = vmatpush.msra.mxu2 %v3376_v10  ;;  %3397 = vmatpush.msrb.mxu1 %v3376_v10 }
 0x30c   : > { %v2512_v20 = vsel %vm11932_vm2, %v8364_v50, %v11931_v14  ;;  %v8419_v54 = vadd.f32 %v2229_v51, %v11938_v26  ;;  %v2460_v0 = vrot.slane %v2428_v9, 1  ;;  %v11940_v14 = vld [vmem:[#allocation129_spill] sm:$0xff]  ;;  %v11942_v11 = vld [vmem:[#allocation126_spill] sm:$0xff]  ;;  %v2227_v46 = vsel %vm11944_vm7, %v2219_v52, %v2220_v37  ;;  %vm11947_vm2 = vmmov %vm11944_vm7  ;;  %v8442_v52 = vpop.f32.mrf.mxu2 }
 0x30d   : > { %11934 = vst [vmem:[#allocation67_spill] sm:$0xff] %v8407_v23  ;;  %vm11941_vm1 = vnez %v11940_v14  ;;  %v8425_v25 = vadd.f32 %v2228_v12, %v11942_v11  ;;  %v3128_v24 = vsel %vm11904_vm6, %v7886_v47, 0.0  ;;  %vm11945_vm5 = vnez %v11816_v18  ;;  %v11950_v11 = vld [vmem:[#allocation11_spill] sm:$0xff]  ;;  %v12057_v18 = vld [vmem:[#allocation137_spill] sm:$0xff] }
 0x30e   : > { %11937 = vst [vmem:[#allocation46_spill] sm:$0xff] %v8416_v62  ;;  %v3130_v58 = vsel %vm11941_vm1, %v7925_v8, 0.0  ;;  %v2430_v51 = vsel %vm11945_vm5, %v8002_v17, 0.0  ;;  %v2226_v9 = vsel %vm11946_vm10, %v2220_v37, %v2221_v63  ;;  %v2225_v8 = vsel %vm11947_vm2, %v2221_v63, %v2222_v35  ;;  %vm11948_vm1 = vmmov %vm11947_vm2 }
 0x30f   : > { %11939 = vst [vmem:[#allocation72_spill] sm:$0xff] %v8419_v54  ;;  %v2224_v12 = vsel %vm11948_vm1, %v2222_v35, %v2223_v28  ;;  %v2461_v10 = vrot.slane %v7990_v44, 1  ;;  %v2514_v13 = vadd.f32 %v2512_v20, %v2256_v19  ;;  %v3161_v47 = vrot.slane %v7898_v27, 1  ;;  %v8448_v41 = vpop.f32.mrf.mxu3  ;;  %v11957_v27 = vld [vmem:[#allocation10_spill] sm:$0xff]  ;;  %v11959_v19 = vld [vmem:[#allocation33_spill] sm:$0xff] }
 0x310   : > { %11943 = vst [vmem:[#allocation76_spill] sm:$0xff] %v8425_v25  ;;  %v3162_v26 = vrot.slane %v3130_v58, 1  ;;  %vm11951_vm7 = vnez %v11950_v11  ;;  %v11953_v37 = vrot.slane %v7918_v4, 1  ;;  %vm11954_vm10 = vcmp.lt.s32.totalorder %v6818_v32, 7  ;;  %v11961_v11 = vld [vmem:[#allocation68_spill] sm:$0xff] }
 0x311   : > { %11949 = vst [vmem:[#allocation81_spill] sm:$0xff] %v8442_v52  ;;  %v3132_v17 = vsel %vm11951_vm7, %v7973_v48, 0.0  ;;  %v8454_v28 = vrot.slane %v3128_v24, 1  ;;  %v2462_v44 = vrot.slane %v2430_v51, 1  ;;  %vm11956_vm1 = vnez %v11823_v15  ;;  %vm11963_vm2 = vmmov %vm11954_vm10  ;;  %v12027_v52 = vld [vmem:[#allocation19_spill] sm:$0xff] }
 0x312   : > { %11952 = vst [vmem:[#allocation105_spill] sm:$0xff] %v8448_v41  ;;  %v2503_v63 = vsel %vm11954_vm10, %v11953_v37, %v2460_v0  ;;  %v2432_v35 = vsel %vm11956_vm1, %v8026_v57, 0.0  ;;  %v8460_v20 = vadd.f32 %v2227_v46, %v11957_v27  ;;  %v8463_v58 = vadd.f32 %v2226_v9, %v11959_v19  ;;  %v11964_v37 = vld [vmem:[#allocation50_spill] sm:$0xff]  ;;  %vm11966_vm10 = vmmov %vm11963_vm2  ;;  %v11967_v9 = vld [vmem:[#allocation55_spill] sm:$0xff] }
 0x313   : > { %11955 = vst [vmem:[#allocation86_spill] sm:$0xff] %v8454_v28  ;;  %v2463_v48 = vrot.slane %v8016_v49, 1  ;;  %v3163_v4 = vrot.slane %v7958_v31, 1  ;;  %v8468_v14 = vadd.f32 %v2225_v8, %v11961_v11  ;;  %v2502_v24 = vsel %vm11963_vm2, %v2460_v0, %v2461_v10  ;;  %vm11969_vm7 = vmmov %vm11963_vm2  ;;  %v11976_v27 = vld [vmem:[#allocation35_spill] sm:$0xff] }
 0x314   : > { %11958 = vst [vmem:[#allocation80_spill] sm:$0xff] %v8460_v20  ;;  %v3164_v51 = vrot.slane %v3132_v17, 1  ;;  %v8473_v41 = vadd.f32 %v2224_v12, %v11964_v37  ;;  %v2523_v57 = vadd.f32 %v2503_v63, %v8271_v59  ;;  %v3221_v46 = vsel %vm11966_vm10, %v3161_v47, %v3162_v26  ;;  %v11970_v12 = vld [vmem:[#allocation43_spill] sm:$0xff]  ;;  %v8489_v17 = vpop.f32.mrf.mxu1  ;;  %v8491_v59 = vpop.f32.mrf.mxu0  ;;  %v11972_v63 = vld [vmem:[#allocation128_spill] sm:$0xff]  ;;  %vm11973_vm10 = vmmov %vm11963_vm2 }
 0x315   : > { %11960 = vst [vmem:[#allocation104_spill] sm:$0xff] %v8463_v58  ;;  %v2879_v49 = vsel %vm8107_vm4, %v11967_v9, 0.0  ;;  %v2464_v31 = vrot.slane %v2432_v35, 1  ;;  %v8484_v8 = vsel %vm11969_vm7, %v8454_v28, %v3161_v47  ;;  %v2501_v0 = vsel %vm11963_vm2, %v2461_v10, %v2462_v44  ;;  %vm11974_vm7 = vmmov %vm11963_vm2  ;;  %v11975_v9 = vld [vmem:[#allocation79_spill] sm:$0xff]  ;;  %v8525_v58 = vpop.f32.mrf.mxu2 }
 0x316   : > { %11962 = vst [vmem:[#allocation100_spill] sm:$0xff] %v8468_v14  ;;  %v3165_v11 = vrot.slane %v11970_v12, 1  ;;  %v8494_v19 = vadd.f32 %v11972_v63, %v2514_v13  ;;  %v2524_v37 = vadd.f32 %v2502_v24, %v8296_v55  ;;  %v2500_v35 = vsel %vm11973_vm10, %v2462_v44, %v2463_v48  ;;  %v11978_v12 = vld [vmem:[#allocation44_spill] sm:$0xff]  ;;  %vm11979_vm6 = vmmov %vm11974_vm7  ;;  %v11980_v63 = vld [vmem:[#allocation65_spill] sm:$0xff] }
 0x317   : > { %11965 = vst [vmem:[#allocation110_spill] sm:$0xff] %v8473_v41  ;;  %v3220_v47 = vsel %vm11974_vm7, %v3162_v26, %v3163_v4  ;;  %vm11977_vm2 = vnez %v11976_v27  ;;  %v8505_v28 = vadd.f32 %v3221_v46, %v11978_v12  ;;  %v2911_v41 = vrot.slane %v2879_v49, 7  ;;  %v11981_v14 = vld [vmem:[#allocation99_spill] sm:$0xff]  ;;  %v11983_v24 = vld [vmem:[#allocation52_spill] sm:$0xff]  ;;  %vm11984_vm10 = vmmov %vm11979_vm6 }
 0x318   : > { %11971 = vst [vmem:[#allocation85_spill] sm:$0xff] %v8491_v59  ;;  %v3134_v10 = vsel %vm11977_vm2, %v11975_v9, 0.0  ;;  %v3219_v13 = vsel %vm11979_vm6, %v3163_v4, %v3164_v51  ;;  %vm11982_vm4 = vnez %v11981_v14  ;;  %v2525_v44 = vadd.f32 %v2501_v0, %v8301_v2  ;;  %v11985_v27 = vld [vmem:[#allocation90_spill] sm:$0xff]  ;;  %v8517_v59 = vpop.f32.mrf.mxu3  ;;  %v11987_v49 = vld [vmem:[#allocation27_spill] sm:$0xff]  ;;  %v11989_v2 = vld [vmem:[#allocation53_spill] sm:$0xff] }
 0x319   : > { %v2434_v55 = vsel %vm11982_vm4, %v11980_v63, 0.0  ;;  %v2717_v50 = vadd.f32 %v11983_v24, %v2523_v57  ;;  %v2499_v26 = vsel %vm11984_vm10, %v2463_v48, %v2464_v31  ;;  %v2465_v9 = vrot.slane %v11985_v27, 1  ;;  %11986 = vst [vmem:[#allocation89_spill] sm:$0xff] %v8517_v59  ;;  %v11990_v0 = vld [vmem:[#allocation84_spill] sm:$0xff]  ;;  %v11991_v24 = vld [vmem:[#allocation82_spill] sm:$0xff]  ;;  %vm11997_vm10 = vmmov %vm11979_vm6 }
 0x31a   : > { %v2526_v46 = vadd.f32 %v2500_v35, %v8303_v6  ;;  %v8521_v12 = vadd.f32 %v3220_v47, %v11987_v49  ;;  %v3218_v4 = vsel %vm11979_vm6, %v3164_v51, %v3165_v11  ;;  %v3166_v63 = vrot.slane %v3134_v10, 1  ;;  %11988 = vst [vmem:[#allocation92_spill] sm:$0xff] %v8525_v58  ;;  %v11992_v35 = vld [vmem:[#allocation78_spill] sm:$0xff]  ;;  %vm12007_vm2 = vmmov %vm11979_vm6  ;;  %v12023_v58 = vld [vmem:[#allocation57_spill] sm:$0xff] }
 0x31b   : > { %v8528_v57 = vadd.f32 %v3219_v13, %v11989_v2  ;;  %v2718_v48 = vadd.f32 %v11990_v0, %v2524_v37  ;;  %v2881_v27 = vsel %vm8111_vm8, %v11991_v24, 0.0  ;;  %v2466_v59 = vrot.slane %v2434_v55, 1  ;;  %v11995_v13 = vld [vmem:[#allocation58_spill] sm:$0xff]  ;;  %v11996_v2 = vld [vmem:[#allocation16_spill] sm:$0xff] }
 0x31c   : > { %v8536_v6 = vmul.f32 %v8505_v28, %v8505_v28  ;;  %v11993_v47 = vrot.slane %v11992_v35, 7  ;;  %vm11994_vm7 = vcmp.lt.s32.totalorder %v6818_v32, 1  ;;  %v2527_v10 = vadd.f32 %v2499_v26, %v8305_v5  ;;  %v11998_v24 = vld [vmem:[#allocation74_spill] sm:$0xff]  ;;  %v12001_v26 = vld [vmem:[#allocation87_spill] sm:$0xff]  ;;  %v8576_v25 = vpop.f32.mrf.mxu1  ;;  %v8578_v54 = vpop.f32.mrf.mxu0 }
 0x31d   : > { %v3167_v49 = vrot.slane %v11995_v13, 1  ;;  %v2912_v37 = vrot.slane %v11996_v2, 7  ;;  %v2498_v0 = vsel %vm11997_vm10, %v2464_v31, %v2465_v9  ;;  %v8548_v55 = vadd.f32 %v3218_v4, %v11998_v24  ;;  %v12008_v24 = vld [vmem:[#allocation71_spill] sm:$0xff]  ;;  %12012 = vst [vmem:[#allocation103_spill] sm:$0xff] %v8578_v54 }
 0x31e   : > { %v2956_v51 = vsel %vm11994_vm7, %v11993_v47, %v2911_v41  ;;  %v2719_v29 = vadd.f32 %v12000_v33, %v2525_v44  ;;  %v8553_v35 = vmul.f32 %v8521_v12, %v8521_v12  ;;  %v2913_v20 = vrot.slane %v2881_v27, 7  ;;  %vm12003_vm7 = vmmov %vm11979_vm6  ;;  %v12004_v33 = vld [vmem:[#allocation17_spill] sm:$0xff]  ;;  %v12020_v54 = vld [vmem:[#allocation47_spill] sm:$0xff] }
 0x31f   : > { %11999 = vst [vmem:[#allocation94_spill] sm:$0xff] %v8548_v55  ;;  %v3217_v5 = vsel %vm11979_vm6, %v3165_v11, %v3166_v63  ;;  %v2720_v47 = vadd.f32 %v12001_v26, %v2526_v46  ;;  %v8558_v13 = vadd.f32 %v2956_v51, %v2717_v50  ;;  %v8562_v31 = vmul.f32 %v8528_v57, %v8528_v57  ;;  %v12005_v44 = vld [vmem:[#allocation73_spill] sm:$0xff]  ;;  %v12009_v50 = vld [vmem:[#allocation135_spill] sm:$0xff]  ;;  %v12010_v51 = vld [vmem:[#allocation12_spill] sm:$0xff] }
 0x320   : > { %v2497_v4 = vsel %vm12003_vm7, %v2465_v9, %v2466_v59  ;;  %vm12006_vm10 = vnez %v12005_v44  ;;  %v2528_v27 = vadd.f32 %v2498_v0, %v8307_v21  ;;  %v3216_v11 = vsel %vm12007_vm2, %v3166_v63, %v3167_v49  ;;  %v12015_v21 = vld [vmem:[#allocation39_spill] sm:$0xff] }
 0x321   : > { %12002 = vst [vmem:[#allocation97_spill] sm:$0xff] %v8562_v31  ;;  %v3136_v2 = vsel %vm12006_vm10, %v12004_v33, 0.0  ;;  %v2721_v46 = vadd.f32 %v12008_v24, %v2527_v10  ;;  %vm12011_vm6 = vnez %v12010_v51  ;;  %vm12013_vm7 = vcmp.lt.s32.totalorder %v6818_v32, 1  ;;  %v12017_v63 = vld [vmem:[#allocation131_spill] sm:$0xff]  ;;  %v8590_v24 = vpop.f32.mrf.mxu3  ;;  %v12025_v31 = vld [vmem:[#allocation60_spill] sm:$0xff] }
 0x322   : > { %v2436_v26 = vsel %vm12011_vm6, %v12009_v50, 0.0  ;;  %v2955_v9 = vsel %vm12013_vm7, %v2911_v41, %v2912_v37  ;;  %v8584_v33 = vmul.f32 %v8548_v55, %v8548_v55  ;;  %v8587_v0 = vadd.f32 %v3217_v5, %v12015_v21  ;;  %12018 = vst [vmem:[#allocation127_spill] sm:$0xff] %v8590_v24  ;;  %vm12019_vm2 = vmmov %vm12013_vm7  ;;  %v12021_v41 = vld [vmem:[#allocation14_spill] sm:$0xff]  ;;  %v12026_v55 = vld [vmem:[#allocation93_spill] sm:$0xff] }
 0x323   : > { %v2467_v10 = vrot.slane %v12017_v63, 1  ;;  %v2954_v50 = vsel %vm12019_vm2, %v2912_v37, %v2913_v20  ;;  %v2529_v44 = vadd.f32 %v2497_v4, %v8311_v53  ;;  %v2914_v62 = vrot.slane %v12020_v54, 7  ;;  %v12028_v4 = vld [vmem:[#allocation144_spill] sm:$0xff]  ;;  %v12029_v54 = vld [vmem:[#allocation15_spill] sm:$0xff] }
 0x324   : > { %12014 = vst [vmem:[#allocation123_spill] sm:$0xff] %v8584_v33  ;;  %v3168_v51 = vrot.slane %v3136_v2, 1  ;;  %v8597_v23 = vadd.f32 %v3216_v11, %v12021_v41  ;;  %v2883_v5 = vsel %vm8115_vm12, %v12023_v58, 0.0  ;;  %v2468_v21 = vrot.slane %v2436_v26, 1  ;;  %v8610_v11 = vpop.f32.mrf.mxu2  ;;  %v12040_v33 = vld [vmem:[#allocation51_spill] sm:$0xff] }
 0x325   : > { %12016 = vst [vmem:[#allocation13_spill] sm:$0xff] %v8587_v0  ;;  %v3138_v63 = vsel %vm11926_vm0, %v12025_v31, 0.0  ;;  %v2976_v24 = vadd.f32 %v2955_v9, %v2718_v48  ;;  %v2722_v37 = vadd.f32 %v12026_v55, %v2528_v27  ;;  %v3169_v53 = vrot.slane %v12027_v52, 1  ;;  %v12034_v48 = vld [vmem:[#allocation140_spill] sm:$0xff] }
 0x326   : > { %12022 = vst [vmem:[#allocation64_spill] sm:$0xff] %v8597_v23  ;;  %vm12030_vm7 = vnez %v12029_v54  ;;  %v8612_v41 = vadd.f32 %v2954_v50, %v2719_v29  ;;  %v8616_v58 = vmul.f32 %v8587_v0, %v8587_v0  ;;  %vm12033_vm2 = vcmp.lt.s32.totalorder %v6818_v32, 7 }
 0x327   : > { %v2438_v2 = vsel %vm12030_vm7, %v12028_v4, 0.0  ;;  %12031 = vst [vmem:[#allocation106_spill] sm:$0xff] %v8610_v11  ;;  %v2496_v31 = vsel %vm12033_vm2, %v2466_v59, %v2467_v10  ;;  %v2469_v26 = vrot.slane %v12034_v48, 1  ;;  %vm12035_vm0 = vcmp.lt.s32.totalorder %v6818_v32, 1  ;;  %vm12036_vm10 = vmmov %vm12033_vm2  ;;  %v12039_v4 = vld [vmem:[#allocation133_spill] sm:$0xff] }
 0x328   : > { %12032 = vst [vmem:[#allocation41_spill] sm:$0xff] %v8616_v58  ;;  %v2953_v52 = vsel %vm12035_vm0, %v2913_v20, %v2914_v62  ;;  %v2915_v55 = vrot.slane %v2883_v5, 7  ;;  %v3215_v27 = vsel %vm12036_vm10, %v3167_v49, %v3168_v51  ;;  %v3170_v9 = vrot.slane %v3138_v63, 1  ;;  %vm12038_vm12 = vmmov %vm12033_vm2  ;;  %v12042_v5 = vld [vmem:[#allocation66_spill] sm:$0xff] }
 0x329   : > { %v8627_v29 = vmul.f32 %v8597_v23, %v8597_v23  ;;  %v2495_v50 = vsel %vm12038_vm12, %v2467_v10, %v2468_v21  ;;  %v2723_v38 = vadd.f32 %v12039_v4, %v2529_v44  ;;  %v2470_v59 = vrot.slane %v2438_v2, 1  ;;  %vm12041_vm0 = vmmov %vm12033_vm2  ;;  %v12047_v10 = vld [vmem:[#allocation54_spill] sm:$0xff] }
 0x32a   : > { %v2530_v48 = vadd.f32 %v2496_v31, %v8345_v40  ;;  %v2916_v54 = vrot.slane %v12040_v33, 7  ;;  %v3214_v20 = vsel %vm12041_vm0, %v3168_v51, %v3169_v53  ;;  %v2885_v63 = vsel %vm7265_vm9, %v12042_v5, 0.0  ;;  %vm12046_vm12 = vmmov %vm12041_vm0  ;;  %v8647_v40 = vpop.f32.mrf.mxu3 }
 0x32b   : > { %12037 = vst [vmem:[#allocation108_spill] sm:$0xff] %v8627_v29  ;;  %v8639_v11 = vadd.f32 %v2953_v52, %v2720_v47  ;;  %v12044_v29 = vld [vmem:[#allocation42_spill] sm:$0xff]  ;;  %v2494_v44 = vsel %vm12046_vm12, %v2468_v21, %v2469_v26  ;;  %v3171_v2 = vrot.slane %v12047_v10, 1  ;;  %vm12049_vm10 = vcmp.lt.s32.totalorder %v6818_v32, 1  ;;  %vm12050_vm2 = vmmov %vm12041_vm0  ;;  %v12051_v47 = vld [vmem:[#allocation56_spill] sm:$0xff] }
 0x32c   : > { %v8642_v58 = vadd.f32 %v3215_v27, %v12044_v29  ;;  %12048 = vst [vmem:[#allocation111_spill] sm:$0xff] %v8647_v40  ;;  %v2952_v33 = vsel %vm12049_vm10, %v2914_v62, %v2915_v55  ;;  %v2531_v51 = vadd.f32 %v2495_v50, %v8351_v56  ;;  %v3213_v31 = vsel %vm12050_vm2, %v3169_v53, %v3170_v9  ;;  %v8657_v27 = vpop.f32.mrf.mxu1  ;;  %v8659_v29 = vpop.f32.mrf.mxu0  ;;  %v12053_v21 = vld [vmem:[#allocation49_spill] sm:$0xff]  ;;  %v12055_v56 = vld [vmem:[#allocation18_spill] sm:$0xff]  ;;  %vm12059_vm2 = vmmov %vm12041_vm0 }
 0x32d   : > { %v3140_v52 = vsel %vm11945_vm5, %v12051_v47, 0.0  ;;  %12052 = vst [vmem:[#allocation113_spill] sm:$0xff] %v8659_v29  ;;  %v8662_v4 = vadd.f32 %v3214_v20, %v12053_v21  ;;  %v2917_v5 = vrot.slane %v2885_v63, 7  ;;  %v2493_v62 = vsel %vm12041_vm0, %v2469_v26, %v2470_v59  ;;  %v12054_v10 = vld [vmem:[#allocation37_spill] sm:$0xff]  ;;  %v12058_v40 = vld [vmem:[#allocation70_spill] sm:$0xff]  ;;  %vm12061_vm0 = vmmov %vm12049_vm10 }
 0x32e   : > { %12045 = vst [vmem:[#allocation109_spill] sm:$0xff] %v8642_v58  ;;  %vm12056_vm12 = vnez %v12055_v56  ;;  %v2951_v53 = vsel %vm12049_vm10, %v2915_v55, %v2916_v54  ;;  %v2532_v47 = vadd.f32 %v2494_v44, %v8354_v39  ;;  %v2724_v49 = vadd.f32 %v12057_v18, %v2530_v48  ;;  %v12060_v39 = vld [vmem:[#allocation75_spill] sm:$0xff]  ;;  %v8689_v44 = vpop.f32.mrf.mxu2  ;;  %vm12064_vm10 = vmmov %vm12059_vm2  ;;  %v12071_v56 = vld [vmem:[#allocation134_spill] sm:$0xff] }
 0x32f   : > { %v2440_v50 = vsel %vm12056_vm12, %v12054_v10, 0.0  ;;  %v2471_v29 = vrot.slane %v12058_v40, 1  ;;  %v8676_v20 = vmul.f32 %v8642_v58, %v8642_v58  ;;  %v8679_v63 = vadd.f32 %v3213_v31, %v8558_v13  ;;  %v12063_v31 = vld [vmem:[#allocation20_spill] sm:$0xff] }
 0x330   : > { %v3212_v26 = vsel %vm12059_vm2, %v3170_v9, %v3171_v2  ;;  %v3172_v21 = vrot.slane %v3140_v52, 1  ;;  %v8683_v10 = vadd.f32 %v2952_v33, %v2721_v46  ;;  %v2533_v55 = vadd.f32 %v2493_v62, %v8357_v3  ;;  %v12062_v46 = vld [vmem:[#allocation142_spill] sm:$0xff] }
 0x331   : > { %v2887_v18 = vsel %vm7290_vm11, %v12060_v39, 0.0  ;;  %v2472_v48 = vrot.slane %v2440_v50, 1  ;;  %v8691_v40 = vadd.f32 %v2951_v53, %v2722_v37  ;;  %v8695_v13 = vmul.f32 %v8662_v4, %v8662_v4  ;;  %v12065_v50 = vld [vmem:[#allocation149_spill] sm:$0xff] }
 0x332   : > { %v2950_v9 = vsel %vm12061_vm0, %v2916_v54, %v2917_v5  ;;  %v2725_v33 = vadd.f32 %v12062_v46, %v2531_v51  ;;  %v2918_v3 = vrot.slane %v12063_v31, 7  ;;  %v2492_v52 = vsel %vm12064_vm10, %v2470_v59, %v2471_v29  ;;  %v2867_v46 = vpop.f32.mrf.mxu3  ;;  %vm12067_vm0 = vmmov %vm12059_vm2  ;;  %v12068_v59 = vld [vmem:[#allocation30_spill] sm:$0xff] }
 0x333   : > { %v8703_v62 = vadd.f32 %v3212_v26, %v2976_v24  ;;  %v8706_v39 = vadd.f32 %v12065_v50, %v2532_v47  ;;  %v8710_v37 = vmul.f32 %v8679_v63, %v8679_v63  ;;  %v2919_v53 = vrot.slane %v2887_v18, 7  ;;  %v12069_v18 = vld [vmem:[#allocation21_spill] sm:$0xff] }
 0x334   : > { %v3211_v54 = vsel %vm12059_vm2, %v3171_v2, %v3172_v21  ;;  %v3173_v51 = vrot.slane %v12066_v36, 1  ;;  %v8715_v31 = vadd.f32 %v2950_v9, %v2723_v38  ;;  %v2491_v24 = vsel %vm12067_vm0, %v2471_v29, %v2472_v48 }
 0x335   : > { %v8720_v26 = vadd.f32 %v12068_v59, %v2533_v55  ;;  %v2901_v47 = vsel %vm7615_vm3, %v2867_v46, 0.0  ;;  %v2534_v50 = vadd.f32 %v2492_v52, %v8360_v1  ;;  %vm12070_vm10 = vnez %v12069_v18  ;;  %v8743_v52 = vpop.f32.mrf.mxu1  ;;  %v12077_v59 = vld [vmem:[#allocation69_spill] sm:$0xff] }
 0x336   : > { %v2442_v2 = vsel %vm12070_vm10, %v8396_v45, 0.0  ;;  %v3142_v38 = vsel %vm11956_vm1, %v12071_v56, 0.0  ;;  %v8731_v36 = vrot.slane %v2901_v47, 7  ;;  %vm12072_vm2 = vcmp.lt.s32.totalorder %v6818_v32, 1  ;;  %v8745_v45 = vpop.f32.mrf.mxu0 }
 0x337   : > { %v2949_v29 = vsel %vm12072_vm2, %v2917_v5, %v2918_v3  ;;  %v8737_v55 = vmul.f32 %v8703_v62, %v8703_v62  ;;  %v8740_v9 = vadd.f32 %v3211_v54, %v8612_v41  ;;  %v2473_v1 = vrot.slane %v8309_v43, 1  ;;  %12074 = vst [vmem:[#allocation61_spill] sm:$0xff] %v8745_v45  ;;  %vm12075_vm0 = vmmov %vm12072_vm2  ;;  %v12080_v54 = vld [vmem:[#allocation136_spill] sm:$0xff] }
 0x338   : > { %v2948_v56 = vsel %vm12075_vm0, %v2918_v3, %v2919_v53  ;;  %v2535_v46 = vadd.f32 %v2491_v24, %v8372_v61  ;;  %vm12076_vm2 = vcmp.lt.s32.totalorder %v6818_v32, 7  ;;  %v12078_v47 = vrot.slane %v12077_v59, 7  ;;  %vm12079_vm1 = vmmov %vm12075_vm0  ;;  %v12081_v61 = vld [vmem:[#allocation132_spill] sm:$0xff]  ;;  %v12082_v59 = vld [vmem:[#allocation138_spill] sm:$0xff] }
 0x339   : > { %12073 = vst [vmem:[#allocation115_spill] sm:$0xff] %v8737_v55  ;;  %v3210_v5 = vsel %vm12076_vm2, %v3172_v21, %v3173_v51  ;;  %v2889_v43 = vsel %vm7337_vm13, %v12080_v54, 0.0  ;;  %v2474_v15 = vrot.slane %v2442_v2, 1  ;;  %v3174_v22 = vrot.slane %v3142_v38, 1  ;;  %v8776_v38 = vpop.f32.mrf.mxu2 }
 0x33a   : > { %v2965_v41 = vsel %vm12079_vm1, %v8731_v36, %v12078_v47  ;;  %v8761_v3 = vadd.f32 %v2949_v29, %v2724_v49  ;;  %v2920_v24 = vrot.slane %v12081_v61, 7  ;;  %v8765_v21 = vadd.f32 %v8254_v34, %v2534_v50  ;;  %vm12083_vm1 = vmmov %vm12076_vm2 }
 0x33b   : > { %v2966_v45 = vadd.f32 %v2965_v41, %v8494_v19  ;;  %v3175_v18 = vrot.slane %v12082_v59, 1  ;;  %v8768_v55 = vadd.f32 %v2948_v56, %v2725_v33  ;;  %v8772_v47 = vmul.f32 %v8740_v9, %v8740_v9  ;;  %v12084_v33 = vld [vmem:[#allocation141_spill] sm:$0xff]  ;;  %vm12085_vm0 = vmmov %vm12083_vm1 }
 0x33c   : > { %v2490_v2 = vsel %vm12083_vm1, %v2472_v48, %v2473_v1  ;;  %v8782_v49 = vadd.f32 %v3210_v5, %v8639_v11  ;;  %v2921_v34 = vrot.slane %v2889_v43, 7  ;;  %v8785_v50 = vadd.f32 %v8342_v60, %v2535_v46  ;;  %vm12086_vm2 = vmmov %vm12085_vm0  ;;  %v12089_v5 = vld [vmem:[#allocation25_spill] sm:$0xff] }
 0x33d   : > { %v8779_v19 = vadd.f32 %v8484_v8, %v2966_v45  ;;  %v3144_v29 = vsel %vm11982_vm4, %v12084_v33, 0.0  ;;  %v2489_v56 = vsel %vm12085_vm0, %v2473_v1, %v2474_v15  ;;  %v3209_v48 = vsel %vm12086_vm2, %v3173_v51, %v3174_v22  ;;  %vm12088_vm5 = vmmov %vm12085_vm0 }
 0x33e   : > { %vm12087_vm1 = vcmp.lt.s32.totalorder %v6818_v32, 1  ;;  %v2536_v45 = vadd.f32 %v2490_v2, %v8391_v16  ;;  %v3208_v46 = vsel %vm12088_vm5, %v3174_v22, %v3175_v18  ;;  %vm12090_vm0 = vnez %v12089_v5  ;;  %v8822_v2 = vpop.f32.mrf.mxu1  ;;  %v12156_v5 = vld [vmem:[#allocation110_spill] sm:$0xff] }
 0x33f   : > { %v3256_v8 = vadd.f32 %v8505_v28, %v8779_v19  ;;  %v3293_v11 = vmul.f32 %v8779_v19, %v8779_v19  ;;  %v2947_v60 = vsel %vm12087_vm1, %v2919_v53, %v2920_v24  ;;  %v2444_v1 = vsel %vm12090_vm0, %v8576_v25, 0.0  ;;  %vm12091_vm2 = vmmov %vm12087_vm1  ;;  %v12092_v25 = vld [vmem:[#allocation143_spill] sm:$0xff] }
 0x340   : > { %v2475_v51 = vrot.slane %v8489_v17, 1  ;;  %v3176_v41 = vrot.slane %v3144_v29, 1  ;;  %v8811_v61 = vmul.f32 %v8782_v49, %v8782_v49  ;;  %v2946_v16 = vsel %vm12091_vm2, %v2920_v24, %v2921_v34  ;;  %v8826_v29 = vpop.f32.mrf.mxu0  ;;  %vm12095_vm1 = vmmov %vm12088_vm5 }
 0x341   : > { %v3257_v54 = vadd.f32 %v3256_v8, %v8521_v12  ;;  %v3325_v43 = vadd.f32 %v8536_v6, %v3293_v11  ;;  %v2537_v22 = vadd.f32 %v2489_v56, %v8399_v30  ;;  %v8817_v53 = vadd.f32 %v3209_v48, %v8683_v10  ;;  %v12093_v30 = vld [vmem:[#allocation139_spill] sm:$0xff]  ;;  %v12094_v48 = vld [vmem:[#allocation81_spill] sm:$0xff]  ;;  %vm12099_vm2 = vmmov %vm12095_vm1 }
 0x342   : > { %v2891_v17 = vsel %vm7380_vm14, %v12092_v25, 0.0  ;;  %v2476_v59 = vrot.slane %v2444_v1, 1  ;;  %v8829_v24 = vadd.f32 %v2947_v60, %v8706_v39  ;;  %v2922_v56 = vrot.slane %v12093_v30, 7  ;;  %v12100_v30 = vld [vmem:[#allocation145_spill] sm:$0xff] }
 0x343   : > { %v3258_v6 = vadd.f32 %v3257_v54, %v8528_v57  ;;  %v3326_v33 = vadd.f32 %v3325_v43, %v8553_v35  ;;  %v8833_v10 = vadd.f32 %v3208_v46, %v8691_v40  ;;  %v2730_v8 = vadd.f32 %v12094_v48, %v2536_v45  ;;  %v12096_v54 = vld [vmem:[#allocation94_spill] sm:$0xff]  ;;  %v12097_v43 = vld [vmem:[#allocation97_spill] sm:$0xff]  ;;  %v12098_v46 = vld [vmem:[#allocation92_spill] sm:$0xff]  ;;  %v8855_v48 = vpop.f32.mrf.mxu2 }
 0x344   : > { %v2488_v11 = vsel %vm12088_vm5, %v2474_v15, %v2475_v51  ;;  %v3207_v1 = vsel %vm12095_vm1, %v3175_v18, %v3176_v41  ;;  %v8843_v39 = vadd.f32 %v2946_v16, %v8720_v26  ;;  %v8847_v60 = vmul.f32 %v8817_v53, %v8817_v53  ;;  %v12102_v16 = vld [vmem:[#allocation67_spill] sm:$0xff] }
 0x345   : > { %v3259_v35 = vadd.f32 %v3258_v6, %v12096_v54  ;;  %v3327_v25 = vadd.f32 %v3326_v33, %v12097_v43  ;;  %v2923_v40 = vrot.slane %v2891_v17, 7  ;;  %v8850_v45 = vadd.f32 %v12098_v46, %v2537_v22  ;;  %v12101_v33 = vld [vmem:[#allocation123_spill] sm:$0xff]  ;;  %v12103_v22 = vld [vmem:[#allocation24_spill] sm:$0xff] }
 0x346   : > { %v2487_v15 = vsel %vm12099_vm2, %v2475_v51, %v2476_v59  ;;  %v3177_v18 = vrot.slane %v12100_v30, 1  ;;  %v2538_v43 = vadd.f32 %v2488_v11, %v12102_v16  ;;  %v8861_v14 = vadd.f32 %v3207_v1, %v8715_v31  ;;  %v12108_v1 = vld [vmem:[#allocation46_spill] sm:$0xff] }
 0x347   : > { %v3260_v6 = vadd.f32 %v3259_v35, %v8587_v0  ;;  %v3328_v26 = vadd.f32 %v3327_v25, %v12101_v33  ;;  %v2477_v17 = vrot.slane %v8657_v27, 1  ;;  %v3146_v42 = vsel %vm12011_vm6, %v12103_v22, 0.0  ;;  %v12106_v25 = vld [vmem:[#allocation41_spill] sm:$0xff]  ;;  %v12109_v33 = vld [vmem:[#allocation22_spill] sm:$0xff]  ;;  %v12110_v22 = vld [vmem:[#allocation32_spill] sm:$0xff] }
 0x348   : > { %vm12105_vm5 = vcmp.lt.s32.totalorder %v6818_v32, 1  ;;  %v8871_v30 = vmul.f32 %v8833_v10, %v8833_v10  ;;  %v2539_v27 = vadd.f32 %v2487_v15, %v12108_v1  ;;  %v2924_v16 = vrot.slane %v12109_v33, 7  ;;  %v12116_v1 = vld [vmem:[#allocation29_spill] sm:$0xff]  ;;  %v2412_v33 = vpop.f32.mrf.mxu1 }
 0x349   : > { %v2945_v51 = vsel %vm12105_vm5, %v2921_v34, %v2922_v56  ;;  %v3261_v35 = vadd.f32 %v3260_v6, %v8597_v23  ;;  %v3329_v11 = vadd.f32 %v3328_v26, %v12106_v25  ;;  %vm12107_vm1 = vmmov %vm12105_vm5  ;;  %vm12111_vm2 = vnez %v12110_v22  ;;  %v12113_v6 = vld [vmem:[#allocation108_spill] sm:$0xff]  ;;  %v12115_v25 = vld [vmem:[#allocation106_spill] sm:$0xff] }
 0x34a   : > { %v2944_v31 = vsel %vm12107_vm1, %v2922_v56, %v2923_v40  ;;  %v2446_v46 = vsel %vm12111_vm2, %v8743_v52, 0.0  ;;  %vm12112_vm5 = vcmp.lt.s32.totalorder %v6818_v32, 7  ;;  %v3178_v7 = vrot.slane %v3146_v42, 1 }
 0x34b   : > { %v3206_v34 = vsel %vm12112_vm5, %v3176_v41, %v3177_v18  ;;  %v3262_v0 = vadd.f32 %v3261_v35, %v8642_v58  ;;  %v3330_v23 = vadd.f32 %v3329_v11, %v12113_v6  ;;  %v8887_v26 = vadd.f32 %v2945_v51, %v8765_v21  ;;  %vm12114_vm1 = vmmov %vm12112_vm5  ;;  %v8903_v51 = vpop.f32.mrf.mxu0  ;;  %v12122_v58 = vld [vmem:[#allocation83_spill] sm:$0xff] }
 0x34c   : > { %v8891_v56 = vmul.f32 %v8861_v14, %v8861_v14  ;;  %v2486_v15 = vsel %vm12114_vm1, %v2476_v59, %v2477_v17  ;;  %v8896_v52 = vadd.f32 %v12115_v25, %v2538_v43  ;;  %v2893_v42 = vsel %vm7415_vm15, %v12116_v1, 0.0  ;;  %vm12125_vm6 = vmmov %vm12114_vm1 }
 0x34d   : > { %v2478_v35 = vrot.slane %v2446_v46, 1  ;;  %v3263_v11 = vadd.f32 %v3262_v0, %v8662_v4  ;;  %v3331_v21 = vadd.f32 %v3330_v23, %v8676_v20  ;;  %v8906_v6 = vadd.f32 %v2944_v31, %v8785_v50  ;;  %v12119_v0 = vld [vmem:[#allocation77_spill] sm:$0xff]  ;;  %v12121_v31 = vld [vmem:[#allocation72_spill] sm:$0xff] }
 0x34e   : > { %vm12118_vm5 = vcmp.lt.s32.totalorder %v6818_v32, 1  ;;  %v8911_v43 = vadd.f32 %v3206_v34, %v8761_v3  ;;  %v8914_v25 = vadd.f32 %v8689_v44, %v2539_v27  ;;  %v3205_v46 = vsel %vm12114_vm1, %v3177_v18, %v3178_v7  ;;  %v12123_v34 = vld [vmem:[#allocation38_spill] sm:$0xff]  ;;  %v2696_v18 = vpop.f32.mrf.mxu2 }
 0x34f   : > { %v2943_v59 = vsel %vm12118_vm5, %v2923_v40, %v2924_v16  ;;  %v3148_v23 = vsel %vm12030_vm7, %v12119_v0, 0.0  ;;  %v3264_v20 = vadd.f32 %v3263_v11, %v8679_v63  ;;  %v3332_v50 = vadd.f32 %v3331_v21, %v8695_v13  ;;  %v3375_v13 = vld [vmem:[%s11231_s5 + $0x20] sm:$0xff] }
 0x350   : > { %v2540_v41 = vadd.f32 %v2486_v15, %v12121_v31  ;;  %v2925_v40 = vrot.slane %v2893_v42, 7  ;;  %v3179_v3 = vrot.slane %v12122_v58, 1  ;;  %vm12124_vm5 = vnez %v12123_v34  ;;  %3418 = vmatpush.msra.mxu2 %v3375_v13  ;;  %3398 = vmatpush.msrb.mxu1 %v3375_v13  ;;  %v12131_v31 = vld [vmem:[#allocation76_spill] sm:$0xff] }
 0x351   : > { %v2448_v44 = vsel %vm12124_vm5, %v2412_v33, 0.0  ;;  %v2485_v27 = vsel %vm12125_vm6, %v2477_v17, %v2478_v35  ;;  %v2479_v54 = vrot.slane %v8822_v2, 1  ;;  %v3265_v0 = vadd.f32 %v3264_v20, %v8703_v62  ;;  %v12126_v2 = vld [vmem:[#allocation95_spill] sm:$0xff]  ;;  %v12127_v33 = vld [vmem:[#allocation117_spill] sm:$0xff] }
 0x352   : > { %v3333_v11 = vadd.f32 %v3332_v50, %v8710_v37  ;;  %v8935_v15 = vadd.f32 %v2943_v59, %v2730_v8  ;;  %v8939_v58 = vmul.f32 %v8911_v43, %v8911_v43  ;;  %v8942_v42 = vadd.f32 %v3205_v46, %v8768_v55  ;;  %v12129_v50 = vld [vmem:[#allocation115_spill] sm:$0xff] }
 0x353   : > { %v3180_v17 = vrot.slane %v3148_v23, 1  ;;  %vm12128_vm6 = vnez %v12127_v33  ;;  %v2480_v21 = vrot.slane %v2448_v44, 1  ;;  %v3266_v20 = vadd.f32 %v3265_v0, %v8740_v9  ;;  %v12133_v23 = vld [vmem:[#allocation91_spill] sm:$0xff] }
 0x354   : > { %v2895_v37 = vsel %vm12128_vm6, %v12126_v2, 0.0  ;;  %v3334_v8 = vadd.f32 %v3333_v11, %v12129_v50  ;;  %vm12130_vm1 = vcmp.lt.s32.totalorder %v6818_v32, 1  ;;  %v2541_v1 = vadd.f32 %v2485_v27, %v12131_v31 }
 0x355   : > { %v2942_v59 = vsel %vm12130_vm1, %v2924_v16, %v2925_v40  ;;  %vm12132_vm7 = vcmp.lt.s32.totalorder %v6818_v32, 7  ;;  %v2734_v46 = vadd.f32 %v8776_v38, %v2540_v41  ;;  %v2926_v13 = vrot.slane %v12133_v23, 7  ;;  %v3374_v16 = vld [vmem:[%s11231_s5 + $0x18] sm:$0xff]  ;;  %v12136_v38 = vld [vmem:[#allocation59_spill] sm:$0xff] }
 0x356   : > { %v3204_v55 = vsel %vm12132_vm7, %v3178_v7, %v3179_v3  ;;  %vm12134_vm4 = vmmov %vm12132_vm7  ;;  %v3267_v44 = vadd.f32 %v3266_v20, %v8782_v49  ;;  %v3335_v0 = vadd.f32 %v3334_v8, %v8772_v47  ;;  %v3310_v27 = vmul.f32 %v8942_v42, %v8942_v42  ;;  %3419 = vmatpush.msra.mxu2 %v3374_v16  ;;  %v8975_v8 = vpop.f32.mrf.mxu0 }
 0x357   : > { %v2484_v2 = vsel %vm12134_vm4, %v2478_v35, %v2479_v54  ;;  %v2927_v11 = vrot.slane %v2895_v37, 7  ;;  %vm12135_vm7 = vmmov %vm12134_vm4  ;;  %v3181_v41 = vrot.slane %v12136_v38, 1  ;;  %3399 = vmatpush.msrb.mxu1 %v3374_v16  ;;  %v8969_v35 = vadd.f32 %v2942_v59, %v8850_v45  ;;  %v12137_v37 = vld [vmem:[#allocation80_spill] sm:$0xff]  ;;  %v12138_v16 = vld [vmem:[#allocation101_spill] sm:$0xff] }
 0x358   : > { %v3203_v7 = vsel %vm12135_vm7, %v3179_v3, %v3180_v17  ;;  %v2483_v47 = vsel %vm12134_vm4, %v2479_v54, %v2480_v21  ;;  %v3336_v20 = vadd.f32 %v3335_v0, %v8811_v61  ;;  %v3268_v50 = vadd.f32 %v3267_v44, %v8817_v53  ;;  %v2415_v44 = vpop.f32.mrf.mxu1  ;;  %vm12140_vm7 = vmmov %vm12130_vm1  ;;  %v12144_v45 = vld [vmem:[#allocation103_spill] sm:$0xff] }
 0x359   : > { %v2542_v31 = vadd.f32 %v2484_v2, %v12137_v37  ;;  %v8979_v3 = vadd.f32 %v3204_v55, %v8829_v24  ;;  %v8982_v23 = vadd.f32 %v8855_v48, %v2541_v1  ;;  %v3150_v59 = vsel %vm12056_vm12, %v12138_v16, 0.0  ;;  %v3373_v24 = vld [vmem:[%s11231_s5 + $0x10] sm:$0xff] }
 0x35a   : > { %v2941_v54 = vsel %vm12130_vm1, %v2925_v40, %v2926_v13  ;;  %v8990_v61 = vadd.f32 %v3203_v7, %v8843_v39  ;;  %v3269_v0 = vadd.f32 %v3268_v50, %v8833_v10  ;;  %v3337_v2 = vadd.f32 %v3336_v20, %v8847_v60  ;;  %v12141_v1 = vld [vmem:[#allocation104_spill] sm:$0xff]  ;;  %3420 = vmatpush.msra.mxu2 %v3373_v24  ;;  %v2699_v39 = vpop.f32.mrf.mxu2 }
 0x35b   : > { %v2940_v48 = vsel %vm12140_vm7, %v2926_v13, %v2927_v11  ;;  %v2543_v55 = vadd.f32 %v2483_v47, %v12141_v1  ;;  %v3202_v40 = vsel %vm12134_vm4, %v3180_v17, %v3181_v41  ;;  %3400 = vmatpush.msrb.mxu1 %v3373_v24  ;;  %v12142_v7 = vld [vmem:[#allocation96_spill] sm:$0xff]  ;;  %v3182_v50 = vrot.slane %v3150_v59, 1  ;;  %v12143_v1 = vld [vmem:[#allocation85_spill] sm:$0xff]  ;;  %vm12146_vm7 = vmmov %vm12134_vm4 }
 0x35c   : > { %v2928_v38 = vrot.slane %v12142_v7, 7  ;;  %v3270_v60 = vadd.f32 %v3269_v0, %v8861_v14  ;;  %v3338_v20 = vadd.f32 %v3337_v2, %v8871_v30  ;;  %v2990_v37 = vadd.f32 %v2941_v54, %v8896_v52  ;;  %v12147_v2 = vld [vmem:[#allocation63_spill] sm:$0xff] }
 0x35d   : > { %v3311_v13 = vmul.f32 %v8979_v3, %v8979_v3  ;;  %v2481_v16 = vrot.slane %v2415_v44, 1  ;;  %v9008_v47 = vadd.f32 %v2696_v18, %v2542_v31  ;;  %v3183_v17 = vrot.slane %v12143_v1, 1 }
 0x35e   : > { %v3152_v33 = vsel %vm12070_vm10, %v12144_v45, 0.0  ;;  %v3271_v59 = vadd.f32 %v3270_v60, %v8911_v43  ;;  %v3339_v0 = vadd.f32 %v3338_v20, %v8891_v56  ;;  %v2991_v30 = vadd.f32 %v2940_v48, %v8914_v25  ;;  %vm12148_vm10 = vmmov %vm12134_vm4  ;;  %v12149_v48 = vld [vmem:[#allocation105_spill] sm:$0xff] }
 0x35f   : > { %v3312_v52 = vmul.f32 %v8990_v61, %v8990_v61  ;;  %v9020_v54 = vadd.f32 %v3202_v40, %v8887_v26  ;;  %v9022_v18 = vadd.f32 %v2699_v39, %v2543_v55  ;;  %v2939_v31 = vsel %vm12130_vm1, %v2927_v11, %v2928_v38  ;;  %v12150_v55 = vld [vmem:[#allocation120_spill] sm:$0xff]  ;;  %vm12152_vm1 = vmmov %vm12134_vm4 }
 0x360   : > { %v3201_v45 = vsel %vm12146_vm7, %v3181_v41, %v3182_v50  ;;  %v3272_v44 = vadd.f32 %v3271_v59, %v8942_v42  ;;  %v3340_v56 = vadd.f32 %v3339_v0, %v8939_v58  ;;  %v2482_v25 = vsel %vm12134_vm4, %v2480_v21, %v2481_v16  ;;  %v12153_v41 = vld [vmem:[#allocation61_spill] sm:$0xff]  ;;  %v3122_v21 = vpop.f32.mrf.mxu0  ;;  %v12155_v0 = vld [vmem:[#allocation100_spill] sm:$0xff]  ;;  %vm12162_vm4 = vmmov %vm12152_vm1 }
 0x361   : > { %v2513_v26 = vsel %vm12148_vm10, %v2481_v16, %v12147_v2  ;;  %vm12151_vm12 = vnez %v12150_v55  ;;  %v3184_v39 = vrot.slane %v3152_v33, 1  ;;  %v3200_v11 = vsel %vm12152_vm1, %v3182_v50, %v3183_v17  ;;  %v12154_v59 = vld [vmem:[#allocation113_spill] sm:$0xff]  ;;  %vm12157_vm10 = vmmov %vm12152_vm1 }
 0x362   : > { %v2897_v40 = vsel %vm12151_vm12, %v12149_v48, 0.0  ;;  %v3154_v7 = vsel %vm12090_vm0, %v12153_v41, 0.0  ;;  %v3273_v58 = vadd.f32 %v3272_v44, %v8979_v3  ;;  %v3341_v60 = vadd.f32 %v3340_v56, %v3310_v27  ;;  %v12159_v56 = vld [vmem:[#allocation124_spill] sm:$0xff]  ;;  %v5509_v55 = vld [vmem:[#allocation6 + $0x438] sm:$0xff] }
 0x363   : > { %v2992_v20 = vadd.f32 %v2939_v31, %v2734_v46  ;;  %v3313_v16 = vmul.f32 %v9020_v54, %v9020_v54  ;;  %v9047_v1 = vadd.f32 %v3201_v45, %v8906_v6  ;;  %v3185_v33 = vrot.slane %v12154_v59, 1  ;;  %v2702_v31 = vpop.f32.mrf.mxu2  ;;  %v12158_v45 = vld [vmem:[#allocation127_spill] sm:$0xff] }
 0x364   : > { %v9051_v2 = vadd.f32 %v2482_v25, %v12155_v0  ;;  %v2929_v50 = vrot.slane %v2897_v40, 7  ;;  %v3274_v48 = vadd.f32 %v3273_v58, %v8990_v61  ;;  %v3342_v41 = vadd.f32 %v3341_v60, %v3311_v13  ;;  %v3371_v13 = vld [vmem:[%s11231_s5] sm:$0xff] }
 0x365   : > { %v9055_v44 = vadd.f32 %v2513_v26, %v12156_v5  ;;  %v9058_v46 = vadd.f32 %v3200_v11, %v8935_v15  ;;  %v3199_v27 = vsel %vm12157_vm10, %v3183_v17, %v3184_v39  ;;  %v3186_v6 = vrot.slane %v3154_v7, 1  ;;  %v3372_v15 = vld [vmem:[%s11231_s5 + $0x8] sm:$0xff]  ;;  %v12161_v26 = vld [vmem:[#allocation89_spill] sm:$0xff]  ;;  %vm12164_vm10 = vmmov %vm12162_vm4 }
 0x366   : > { %vm12160_vm7 = vnez %v12159_v56  ;;  %v3275_v40 = vadd.f32 %v3274_v48, %v9020_v54  ;;  %v3343_v59 = vadd.f32 %v3342_v41, %v3312_v52  ;;  %v3156_v5 = vsel %vm12111_vm2, %v8903_v51, 0.0  ;;  %3421 = vmatpush.msra.mxu2 %v3372_v15  ;;  %3401 = vmatpush.msrb.mxu1 %v3372_v15  ;;  %v5508_v56 = vld [vmem:[#allocation6 + $0x430] sm:$0xff] }
 0x367   : > { %v2899_v25 = vsel %vm12160_vm7, %v12158_v45, 0.0  ;;  %v3314_v17 = vmul.f32 %v9047_v1, %v9047_v1  ;;  %v2930_v11 = vrot.slane %v12161_v26, 7  ;;  %v3198_v52 = vsel %vm12162_vm4, %v3184_v39, %v3185_v33 }
 0x368   : > { %v3187_v7 = vrot.slane %v8826_v29, 1  ;;  %vm12163_vm1 = vcmp.lt.s32.totalorder %v6818_v32, 1  ;;  %v9084_v58 = vadd.f32 %v3199_v27, %v8969_v35  ;;  %v3276_v60 = vadd.f32 %v3275_v40, %v9047_v1  ;;  %3422 = vmatpush.msra.mxu2 %v3371_v13  ;;  %3402 = vmatpush.msrb.mxu1 %v3371_v13  ;;  %v12165_v27 = vld [vmem:[#allocation88_spill] sm:$0xff] }
 0x369   : > { %v2938_v51 = vsel %vm12163_vm1, %v2928_v38, %v2929_v50  ;;  %v3344_v0 = vadd.f32 %v3343_v59, %v3313_v16  ;;  %v3315_v48 = vmul.f32 %v9058_v46, %v9058_v46  ;;  %v2931_v41 = vrot.slane %v2899_v25, 7  ;;  %v12167_v25 = vld [vmem:[#allocation111_spill] sm:$0xff] }
 0x36a   : > { %v3197_v39 = vsel %vm12164_vm10, %v3185_v33, %v3186_v6  ;;  %v3188_v45 = vrot.slane %v3156_v5, 1  ;;  %v9091_v29 = vadd.f32 %v3198_v52, %v2990_v37  ;;  %v3277_v38 = vadd.f32 %v3276_v60, %v9058_v46 }
 0x36b   : > { %v3345_v15 = vadd.f32 %v3344_v0, %v3314_v17  ;;  %v3158_v35 = vsel %vm12124_vm5, %v3122_v21, 0.0  ;;  %vm12166_vm4 = vcmask 1043456   ;;  %v2937_v16 = vsel %vm12163_vm1, %v2929_v50, %v2930_v11  ;;  %v3125_v17 = vpop.f32.mrf.mxu0 }
 0x36c   : > { %6286 = vmatpush.msk.msra.mxu1 %vm12166_vm4, %v12165_v27  ;;  %v2932_v40 = vrot.slane %v12167_v25, 7  ;;  %v3196_v33 = vsel %vm12164_vm10, %v3186_v6, %v3187_v7  ;;  %v3189_v37 = vrot.slane %v8975_v8, 1  ;;  %v3316_v59 = vmul.f32 %v9084_v58, %v9084_v58  ;;  %vm12168_vm4 = vmmov %vm12163_vm1 }
 0x36d   : > { %v9106_v5 = vadd.f32 %v3197_v39, %v2991_v30  ;;  %v3278_v21 = vadd.f32 %v3277_v38, %v9084_v58  ;;  %v3346_v13 = vadd.f32 %v3345_v15, %v3315_v48  ;;  %v2993_v26 = vadd.f32 %v2938_v51, %v8982_v23  ;;  %vm12169_vm1 = vmmov %vm12164_vm10  ;;  %v2705_v39 = vpop.f32.mrf.mxu2 }
 0x36e   : > { %v2936_v50 = vsel %vm12168_vm4, %v2930_v11, %v2931_v41  ;;  %v3195_v52 = vsel %vm12169_vm1, %v3187_v7, %v3188_v45  ;;  %v3190_v6 = vrot.slane %v3158_v35, 1  ;;  %v3317_v8 = vmul.f32 %v9091_v29, %v9091_v29  ;;  %vm12170_vm10 = vmmov %vm12168_vm4 }
 0x36f   : > { %v3279_v60 = vadd.f32 %v3278_v21, %v9091_v29  ;;  %v3347_v30 = vadd.f32 %v3346_v13, %v3316_v59  ;;  %v9117_v0 = vadd.f32 %v3196_v33, %v2992_v20  ;;  %v2994_v48 = vadd.f32 %v2937_v16, %v9008_v47  ;;  %vm12171_vm5 = vmmov %vm12169_vm1  ;;  %v12173_v13 = vld [vmem:[#allocation86_spill] sm:$0xff] }
 0x370   : > { %v2935_v23 = vsel %vm12170_vm10, %v2931_v41, %v2932_v40  ;;  %v3194_v11 = vsel %vm12171_vm5, %v3188_v45, %v3189_v37  ;;  %v3191_v51 = vrot.slane %v3125_v17, 1  ;;  %v3318_v38 = vmul.f32 %v9106_v5, %v9106_v5  ;;  %vm12172_vm5 = vmmov %vm12169_vm1 }
 0x371   : > { %v3280_v7 = vadd.f32 %v3279_v60, %v9106_v5  ;;  %v3348_v15 = vadd.f32 %v3347_v30, %v3317_v8  ;;  %v9127_v35 = vadd.f32 %v3195_v52, %v2993_v26  ;;  %v2995_v20 = vadd.f32 %v2936_v50, %v9022_v18  ;;  %vm12174_vm10 = vmmov %vm12169_vm1 }
 0x372   : > { %v2738_v47 = vadd.f32 %v2702_v31, %v9051_v2  ;;  %v2934_v41 = vsel %vm12168_vm4, %v2932_v40, %v8731_v36  ;;  %v3193_v45 = vsel %vm12172_vm5, %v3189_v37, %v3190_v6  ;;  %v3319_v25 = vmul.f32 %v9117_v0, %v9117_v0 }
 0x373   : > { %v3349_v27 = vadd.f32 %v3348_v15, %v3318_v38  ;;  %v3281_v16 = vadd.f32 %v3280_v7, %v9117_v0  ;;  %v9139_v33 = vadd.f32 %v3194_v11, %v2994_v48  ;;  %v2739_v59 = vadd.f32 %v2705_v39, %v9055_v44 }
 0x374   : > { %v2996_v18 = vadd.f32 %v2935_v23, %v2738_v47  ;;  %v3192_v2 = vsel %vm12169_vm1, %v3190_v6, %v3191_v51  ;;  %v3320_v40 = vmul.f32 %v9127_v35, %v9127_v35  ;;  %v9147_v37 = vadd.f32 %v3193_v45, %v2995_v20 }
 0x375   : > { %v3350_v31 = vadd.f32 %v3349_v27, %v3319_v25  ;;  %v3282_v36 = vadd.f32 %v3281_v16, %v9127_v35  ;;  %v2997_v21 = vadd.f32 %v2934_v41, %v2739_v59  ;;  %v3223_v17 = vsel %vm12174_vm10, %v3191_v51, %v12173_v13  ;;  %v9171_v27 = vld [vmem:[%s11228_s2] sm:$0x1] }
 0x376   : > { %v3321_v50 = vmul.f32 %v9139_v33, %v9139_v33  ;;  %v9155_v52 = vadd.f32 %v3192_v2, %v2996_v18  ;;  %v3322_v60 = vmul.f32 %v9147_v37, %v9147_v37  ;;  %v3363_v59 = vmul.f32 256.0, %v9171_v27 }
 0x377   : > { %v3351_v26 = vadd.f32 %v3350_v31, %v3320_v40  ;;  %v3283_v44 = vadd.f32 %v3282_v36, %v9139_v33  ;;  %v9160_v30 = vadd.f32 %v3223_v17, %v2997_v21  ;;  %v3365_v31 = vmul.f32 2.0, %v9171_v27 }
 0x378   : > { %v3323_v11 = vmul.f32 %v9155_v52, %v9155_v52  ;;  %v3368_v36 = vmul.f32 %v9171_v27, %v9171_v27  ;;  %vm12175_vm4 = vcmask 31744   ;;  %vm12204_vm2 = vcmp.lt.s32.totalorder %v6818_v32, 1 }
 0x379   : > { %v3352_v6 = vadd.f32 %v3351_v26, %v3321_v50  ;;  %v3284_v8 = vadd.f32 %v3283_v44, %v9147_v37  ;;  %v3324_v39 = vmul.f32 %v9160_v30, %v9160_v30  ;;  %vm12215_vm0 = vcmp.lt.s32.totalorder %v6818_v32, 1 }
 0x37a   : > { %v3369_v44 = vmul.f32 256.0, %v3368_v36 }
 0x37b   : > { %v3353_v48 = vadd.f32 %v3352_v6, %v3322_v60  ;;  %v3285_v23 = vadd.f32 %v3284_v8, %v9155_v52  ;;  %v4387_v60 = vld [vmem:[#allocation6 + $0x278] sm:$0xff] }
 0x37c   : > { %4388 = vmatpush.msrb.mxu0 %v4387_v60  ;;  %v3751_v60 = vld [vmem:[#allocation6 + $0x40] sm:$0xff] }
 0x37d   : > { %v3286_v51 = vadd.f32 %v3285_v23, %v9160_v30  ;;  %v3354_v7 = vadd.f32 %v3353_v48, %v3323_v11  ;;  %v3758_v48 = vld [vmem:[#allocation6 + $0x78] sm:$0xff]  ;;  %v4386_v23 = vld [vmem:[#allocation6 + $0x270] sm:$0xff] }
 0x37e   : > { %3759 = vmatpush.msrb.mxu2 %v3758_v48  ;;  %v3757_v11 = vld [vmem:[#allocation6 + $0x70] sm:$0xff]  ;;  %4389 = vmatpush.msrb.mxu0 %v4386_v23  ;;  %v4094_v23 = vld [vmem:[#allocation6 + $0x160] sm:$0xff] }
 0x37f   : > { %v3287_v38 = vrot.slane %v3286_v51, 4  ;;  %v3355_v15 = vadd.f32 %v3354_v7, %v3324_v39  ;;  %v3756_v39 = vld [vmem:[#allocation6 + $0x68] sm:$0xff]  ;;  %v3741_v7 = vld [vmem:[#allocation6 + $0xf0] sm:$0xff] }
 0x380   : > { %3760 = vmatpush.msrb.mxu2 %v3757_v11  ;;  %v3737_v48 = vld [vmem:[#allocation6 + $0xd0] sm:$0xff]  ;;  %v3750_v11 = vld [vmem:[#allocation6 + $0x38] sm:$0xff] }
 0x381   : > { %v3288_v20 = vadd.f32 %v3287_v38, %v3286_v51  ;;  %v3356_v47 = vrot.slane %v3355_v15, 4  ;;  %v3742_v51 = vld [vmem:[#allocation6 + $0xf8] sm:$0xff]  ;;  %v3740_v38 = vld [vmem:[#allocation6 + $0xe8] sm:$0xff] }
 0x382   : > { %3968 = vmatpush.msra.mxu3 %v3742_v51  ;;  %3761 = vmatpush.msrb.mxu2 %v3756_v39  ;;  %v3736_v51 = vld [vmem:[#allocation6 + $0xc8] sm:$0xff]  ;;  %v4093_v39 = vld [vmem:[#allocation6 + $0x158] sm:$0xff] }
 0x383   : > { %v3289_v41 = vrot.slane %v3288_v20, 2  ;;  %v3357_v45 = vadd.f32 %v3356_v47, %v3355_v15  ;;  %v4097_v15 = vld [vmem:[#allocation6 + $0x178] sm:$0xff]  ;;  %v4096_v47 = vld [vmem:[#allocation6 + $0x170] sm:$0xff] }
 0x384   : > { %3969 = vmatpush.msra.mxu3 %v3741_v7  ;;  %v4385_v7 = vld [vmem:[#allocation6 + $0x268] sm:$0xff] }
 0x385   : > { %v3290_v16 = vadd.f32 %v3289_v41, %v3288_v20  ;;  %v3358_v25 = vrot.slane %v3357_v45, 2  ;;  %v3755_v20 = vld [vmem:[#allocation6 + $0x60] sm:$0xff]  ;;  %4390 = vmatpush.msrb.mxu0 %v4385_v7  ;;  %v4549_v7 = vld [vmem:[#allocation6 + $0x1f8] sm:$0xff] }
 0x386   : > { %v3739_v41 = vld [vmem:[#allocation6 + $0xe0] sm:$0xff]  ;;  %3970 = vmatpush.msra.mxu3 %v3740_v38  ;;  %3762 = vmatpush.msrb.mxu2 %v3755_v20  ;;  %v3749_v38 = vld [vmem:[#allocation6 + $0x30] sm:$0xff] }
 0x387   : > { %v3359_v18 = vadd.f32 %v3358_v25, %v3357_v45  ;;  %v3291_v2 = vrot.slane %v3290_v16, 1  ;;  %v4095_v45 = vld [vmem:[#allocation6 + $0x168] sm:$0xff]  ;;  %v3754_v25 = vld [vmem:[#allocation6 + $0x58] sm:$0xff]  ;;  %v4092_v20 = vld [vmem:[#allocation6 + $0x150] sm:$0xff] }
 0x388   : > { %3971 = vmatpush.msra.mxu3 %v3739_v41  ;;  %3763 = vmatpush.msrb.mxu2 %v3754_v25  ;;  %v3734_v41 = vld [vmem:[#allocation6 + $0xb8] sm:$0xff]  ;;  %v3733_v25 = vld [vmem:[#allocation6 + $0xb0] sm:$0xff] }
 0x389   : > { %v3292_v40 = vadd.f32 %v3291_v2, %v3290_v16  ;;  %v3360_v21 = vrot.slane %v3359_v18, 1 }
 0x38b   : > { %v3364_v13 = vadd.f32 %v3363_v59, %v3292_v40  ;;  %v3361_v17 = vadd.f32 %v3360_v21, %v3359_v18  ;;  %v3366_v26 = vmul.f32 %v3365_v31, %v3292_v40  ;;  %v3738_v18 = vld [vmem:[#allocation6 + $0xd8] sm:$0xff]  ;;  %v3753_v31 = vld [vmem:[#allocation6 + $0x50] sm:$0xff]  ;;  %v3752_v40 = vld [vmem:[#allocation6 + $0x48] sm:$0xff] }
 0x38c   : > { %3972 = vmatpush.msra.mxu3 %v3738_v18  ;;  %3764 = vmatpush.msrb.mxu2 %v3753_v31  ;;  %v3746_v18 = vld [vmem:[#allocation6 + $0x18] sm:$0xff] }
 0x38d   : > { %3403 = vmatmul.f32.vlgmr.msrb.gmra.mxu1 %v3364_v13  ;;  %v3367_v50 = vadd.f32 %v3366_v26, %v3361_v17  ;;  %v4089_v31 = vld [vmem:[#allocation6 + $0x138] sm:$0xff] }
 0x38e   : > { %4098 = vmatpush.msrb.mxu1 %v4097_v15  ;;  %3765 = vmatpush.msrb.mxu2 %v3752_v40  ;;  %v3735_v15 = vld [vmem:[#allocation6 + $0xc0] sm:$0xff]  ;;  %v3745_v40 = vld [vmem:[#allocation6 + $0x10] sm:$0xff] }
 0x38f   : > { %v3370_v6 = vadd.f32 %v3369_v44, %v3367_v50  ;;  %3973 = vmatpush.msra.mxu3 %v3737_v48  ;;  %v3729_v48 = vld [vmem:[#allocation6 + $0x90] sm:$0xff] }
 0x390   : > { %4099 = vmatpush.msrb.mxu1 %v4096_v47  ;;  %3766 = vmatpush.msrb.mxu2 %v3751_v60  ;;  %v3748_v47 = vld [vmem:[#allocation6 + $0x28] sm:$0xff]  ;;  %v3743_v60 = vld [vmem:[#allocation6] sm:$0xff] }
 0x391   : > { %3423 = vmatmul.f32.vlgmr.msra.gmra.mxu2 %v3370_v6  ;;  %3974 = vmatpush.msra.mxu3 %v3736_v51  ;;  %v4380_v51 = vld [vmem:[#allocation6 + $0x240] sm:$0xff] }
 0x392   : > { %4100 = vmatpush.msrb.mxu1 %v4095_v45  ;;  %3767 = vmatpush.msrb.mxu2 %v3750_v11  ;;  %v4091_v45 = vld [vmem:[#allocation6 + $0x148] sm:$0xff] }
 0x393   : > { %3975 = vmatpush.msra.mxu3 %v3735_v15  ;;  %v3728_v11 = vld [vmem:[#allocation6 + $0x88] sm:$0xff]  ;;  %v3727_v15 = vld [vmem:[#allocation6 + $0x80] sm:$0xff] }
 0x394   : > { %4101 = vmatpush.msrb.mxu1 %v4094_v23  ;;  %3768 = vmatpush.msrb.mxu2 %v3749_v38  ;;  %v4086_v23 = vld [vmem:[#allocation6 + $0x120] sm:$0xff] }
 0x395   : > { %3976 = vmatpush.msra.mxu3 %v3734_v41  ;;  %v6392_v38 = vld [vmem:[#allocation2] sm:$0xff]  ;;  %v4083_v41 = vld [vmem:[#allocation6 + $0x108] sm:$0xff] }
 0x396   : > { %4102 = vmatpush.msrb.mxu1 %v4093_v39  ;;  %3769 = vmatpush.msrb.mxu2 %v3748_v47  ;;  %v4085_v39 = vld [vmem:[#allocation6 + $0x118] sm:$0xff]  ;;  %v4084_v47 = vld [vmem:[#allocation6 + $0x110] sm:$0xff] }
 0x397   : > { %3977 = vmatpush.msra.mxu3 %v3733_v25  ;;  %v4377_v25 = vld [vmem:[#allocation6 + $0x228] sm:$0xff] }
 0x398   : > { %4103 = vmatpush.msrb.mxu1 %v4092_v20  ;;  %v4379_v20 = vld [vmem:[#allocation6 + $0x238] sm:$0xff] }
 0x39a   : > { %4104 = vmatpush.msrb.mxu1 %v4091_v45  ;;  %v4082_v45 = vld [vmem:[#allocation6 + $0x100] sm:$0xff] }
 0x40a   : > { %v3404_v8 = vpop.f32.mrf.mxu1 }
 0x40b   : > { %6285 = vmatmul.msk.f32.vlgmr.msrb.gmra.mxu3 %vm12175_vm4, %v3404_v8  ;;  %v3427_v16 = vmul.f32 %v3404_v8, %v3404_v8 }
 0x414   : > { %v3424_v59 = vpop.f32.mrf.mxu2 }
 0x415   : > { %v3428_v2 = vsub.f32 %v3424_v59, %v3427_v16  ;;  %v3747_v16 = vld [vmem:[#allocation6 + $0x20] sm:$0xff] }
 0x416   : > { %v4090_v59 = vld [vmem:[#allocation6 + $0x140] sm:$0xff]  ;;  %3770 = vmatpush.msrb.mxu2 %v3747_v16  ;;  %v4378_v16 = vld [vmem:[#allocation6 + $0x230] sm:$0xff] }
 0x417   : > { %v3429_v36 = vmax.f32 %v3428_v2, 0.0  ;;  %v3732_v2 = vld [vmem:[#allocation6 + $0xa8] sm:$0xff]  ;;  %4105 = vmatpush.msrb.mxu1 %v4090_v59 }
 0x418   : > { %3771 = vmatpush.msrb.mxu2 %v3746_v18  ;;  %3978 = vmatpush.msra.mxu3 %v3732_v2  ;;  %v3492_v18 = vld [vmem:[%s11229_s3] sm:$0x1] }
 0x419   : > { %v3430_v21 = vadd.f32 1e-05, %v3429_v36  ;;  %v4384_v36 = vld [vmem:[#allocation6 + $0x260] sm:$0xff]  ;;  %4106 = vmatpush.msrb.mxu1 %v4089_v31 }
 0x41a   : > { %4391 = vmatpush.msrb.mxu0 %v4384_v36  ;;  %3772 = vmatpush.msrb.mxu2 %v3745_v40  ;;  %v4376_v31 = vld [vmem:[#allocation6 + $0x220] sm:$0xff] }
 0x41b   : > { %6358 = vrsqrt.f32 %v3430_v21  ;;  %vm3437_vm1 = vweird.f32 %v3430_v21 }
 0x421   : > { %v6359_v13 = vpop.eup %6358 }
 0x422   : > { %v3432_v17 = vmul.f32 %v6359_v13, %v3430_v21  ;;  %vm3438_vm5 = vweird.f32 %v6359_v13  ;;  %v3731_v21 = vld [vmem:[#allocation6 + $0xa0] sm:$0xff] }
 0x423   : > { %vm3439_vm10 = vmor %vm3437_vm1, %vm3438_vm5  ;;  %3979 = vmatpush.msra.mxu3 %v3731_v21  ;;  %v3494_v21 = vld [vmem:[%s11230_s4] sm:$0x1] }
 0x424   : > { %v3433_v26 = vmul.f32 %v6359_v13, %v3432_v17  ;;  %v4088_v17 = vld [vmem:[#allocation6 + $0x130] sm:$0xff] }
 0x425   : > { %4107 = vmatpush.msrb.mxu1 %v4088_v17 }
 0x426   : > { %v3434_v44 = vmul.f32 0.5, %v3433_v26  ;;  %v4382_v26 = vld [vmem:[#allocation6 + $0x250] sm:$0xff] }
 0x428   : > { %v3435_v50 = vsub.f32 1.5, %v3434_v44  ;;  %v3744_v44 = vld [vmem:[#allocation6 + $0x8] sm:$0xff] }
 0x429   : > { %3773 = vmatpush.msrb.mxu2 %v3744_v44 }
 0x42a   : > { %v3436_v6 = vmul.f32 %v6359_v13, %v3435_v50  ;;  %v3730_v50 = vld [vmem:[#allocation6 + $0x98] sm:$0xff] }
 0x42b   : > { %3980 = vmatpush.msra.mxu3 %v3730_v50  ;;  %3774 = vmatpush.msrb.mxu2 %v3743_v60 }
 0x42c   : > { %v3440_v8 = vsel %vm3439_vm10, %v6359_v13, %v3436_v6  ;;  %v4383_v13 = vld [vmem:[#allocation6 + $0x258] sm:$0xff]  ;;  %v4087_v6 = vld [vmem:[#allocation6 + $0x128] sm:$0xff]  ;;  %3775 = vmatmul.f32.vlgmr.msrb.gmra.mxu2 %v6392_v38 }
 0x42d   : > { %6287 = vmatmul.msk.f32.vlgmr.msra.gmra.mxu1 %vm12175_vm4, %v3440_v8  ;;  %4392 = vmatpush.msrb.mxu0 %v4383_v13  ;;  %v4381_v8 = vld [vmem:[#allocation6 + $0x248] sm:$0xff]  ;;  %v4375_v13 = vld [vmem:[#allocation6 + $0x218] sm:$0xff] }
 0x42e   : > { %4108 = vmatpush.msrb.mxu1 %v4087_v6  ;;  %3981 = vmatpush.msra.mxu3 %v3729_v48  ;;  %v4373_v6 = vld [vmem:[#allocation6 + $0x208] sm:$0xff] }
 0x42f   : > { %4393 = vmatpush.msrb.mxu0 %v4382_v26  ;;  %4550 = vmatpush.msra.mxu2 %v4549_v7  ;;  %v4374_v26 = vld [vmem:[#allocation6 + $0x210] sm:$0xff] }
 0x430   : > { %4109 = vmatpush.msrb.mxu1 %v4086_v23  ;;  %3982 = vmatpush.msra.mxu3 %v3728_v11 }
 0x431   : > { %4394 = vmatpush.msrb.mxu0 %v4381_v8  ;;  %v4372_v8 = vld [vmem:[#allocation6 + $0x200] sm:$0xff] }
 0x432   : > { %4110 = vmatpush.msrb.mxu1 %v4085_v39  ;;  %3983 = vmatpush.msra.mxu3 %v3727_v15 }
 0x433   : > { %4395 = vmatpush.msrb.mxu0 %v4380_v51  ;;  %3984 = vmatmul.f32.vlgmr.msra.gmra.mxu3 %v6392_v38 }
 0x434   : > { %4111 = vmatpush.msrb.mxu1 %v4084_v47  ;;  %3778 = vmatmul.f32.gmra.mxu2 %v6392_v38 }
 0x435   : > { %4396 = vmatpush.msrb.mxu0 %v4379_v20 }
 0x436   : > { %4112 = vmatpush.msrb.mxu1 %v4083_v41 }
 0x437   : > { %4397 = vmatpush.msrb.mxu0 %v4378_v16 }
 0x438   : > { %4113 = vmatpush.msrb.mxu1 %v4082_v45 }
 0x439   : > { %4114 = vmatmul.f32.vlgmr.msrb.gmra.mxu1 %v6392_v38  ;;  %4398 = vmatpush.msrb.mxu0 %v4377_v25 }
 0x43b   : > { %3987 = vmatmul.f32.gmra.mxu3 %v6392_v38  ;;  %4399 = vmatpush.msrb.mxu0 %v4376_v31 }
 0x43d   : > { %4400 = vmatpush.msrb.mxu0 %v4375_v13 }
 0x43f   : > { %4401 = vmatpush.msrb.mxu0 %v4374_v26  ;;  %v4547_v26 = vld [vmem:[#allocation6 + $0x1e8] sm:$0xff] }
 0x441   : > { %4117 = vmatmul.f32.gmra.mxu1 %v6392_v38  ;;  %4402 = vmatpush.msrb.mxu0 %v4373_v6  ;;  %v4548_v38 = vld [vmem:[#allocation6 + $0x1f0] sm:$0xff] }
 0x442   : > { %4551 = vmatpush.msra.mxu2 %v4548_v38  ;;  %v12179_v38 = vld [vmem:[#allocation64_spill] sm:$0xff] }
 0x443   : > { %4403 = vmatpush.msrb.mxu0 %v4372_v8 }
 0x444   : > { %4552 = vmatpush.msra.mxu2 %v4547_v26 }
 0x48e   : > { %v3466_v59 = vpop.f32.mrf.mxu3 }
 0x48f   : > { %v3495_v36 = vsub.f32 %v9171_v27, %v3466_v59 }
 0x4aa   : > { %v3489_v2 = vpop.f32.mrf.mxu1 }
 0x4ab   : > { %v3493_v40 = vmul.f32 %v3492_v18, %v3489_v2 }
 0x4ad   : > { %v3496_v17 = vmul.f32 %v3495_v36, %v3493_v40  ;;  %v9186_v50 = vperm.slane %v3493_v40, 0 }
 0x4af   : > { %v3497_v44 = vadd.f32 %v3496_v17, %v3494_v21  ;;  %v3507_v27 = vmul.f32 %v9186_v50, %v8662_v4  ;;  %v3508_v48 = vmul.f32 %v9186_v50, %v8679_v63  ;;  %v3509_v23 = vmul.f32 %v9186_v50, %v8703_v62 }
 0x4b0   : > { %v3510_v11 = vmul.f32 %v9186_v50, %v8740_v9  ;;  %v3511_v51 = vmul.f32 %v9186_v50, %v8782_v49  ;;  %v3512_v39 = vmul.f32 %v9186_v50, %v8817_v53  ;;  %v3513_v7 = vmul.f32 %v9186_v50, %v8833_v10 }
 0x4b1   : > { %v9188_v60 = vperm.slane %v3497_v44, 0  ;;  %v3514_v4 = vmul.f32 %v9186_v50, %v8861_v14  ;;  %v3515_v63 = vmul.f32 %v9186_v50, %v8911_v43  ;;  %v3516_v62 = vmul.f32 %v9186_v50, %v8942_v42 }
 0x4b2   : > { %v3517_v9 = vmul.f32 %v9186_v50, %v8979_v3  ;;  %v3518_v49 = vmul.f32 %v9186_v50, %v8990_v61  ;;  %v3519_v53 = vmul.f32 %v9186_v50, %v9020_v54  ;;  %v3520_v10 = vmul.f32 %v9186_v50, %v9047_v1 }
 0x4b3   : > { %v3521_v14 = vmul.f32 %v9186_v50, %v9058_v46  ;;  %v3522_v43 = vmul.f32 %v9186_v50, %v9084_v58  ;;  %v3523_v42 = vmul.f32 %v9186_v50, %v9091_v29  ;;  %v3524_v3 = vmul.f32 %v9186_v50, %v9106_v5 }
 0x4b4   : > { %v3525_v61 = vmul.f32 %v9186_v50, %v9117_v0  ;;  %v3526_v54 = vmul.f32 %v9186_v50, %v9127_v35  ;;  %v3527_v1 = vmul.f32 %v9186_v50, %v9139_v33  ;;  %v3528_v46 = vmul.f32 %v9186_v50, %v9147_v37 }
 0x4b5   : > { %v9235_v58 = vadd.f32 %v9188_v60, %v3507_v27  ;;  %v9238_v29 = vadd.f32 %v9188_v60, %v3508_v48  ;;  %v9241_v5 = vadd.f32 %v9188_v60, %v3509_v23  ;;  %v9244_v0 = vadd.f32 %v9188_v60, %v3510_v11 }
 0x4b6   : > { %v9247_v35 = vadd.f32 %v9188_v60, %v3511_v51  ;;  %v9250_v33 = vadd.f32 %v9188_v60, %v3512_v39  ;;  %v9253_v37 = vadd.f32 %v9188_v60, %v3513_v7  ;;  %v9256_v15 = vadd.f32 %v9188_v60, %v3514_v4 }
 0x4b7   : > { %v9259_v20 = vadd.f32 %v9188_v60, %v3515_v63  ;;  %v9262_v47 = vadd.f32 %v9188_v60, %v3516_v62  ;;  %v9265_v41 = vadd.f32 %v9188_v60, %v3517_v9  ;;  %v9268_v45 = vadd.f32 %v9188_v60, %v3518_v49  ;;  %v4545_v9 = vld [vmem:[#allocation6 + $0x1d8] sm:$0xff] }
 0x4b8   : > { %v9271_v16 = vadd.f32 %v9188_v60, %v3519_v53  ;;  %v9274_v25 = vadd.f32 %v9188_v60, %v3520_v10  ;;  %v9277_v59 = vadd.f32 %v9188_v60, %v3521_v14  ;;  %v9280_v18 = vadd.f32 %v9188_v60, %v3522_v43  ;;  %v12176_v53 = vld [vmem:[#allocation94_spill] sm:$0xff] }
 0x4b9   : > { %v9283_v2 = vadd.f32 %v9188_v60, %v3523_v42  ;;  %v9286_v31 = vadd.f32 %v9188_v60, %v3524_v3  ;;  %v9289_v36 = vadd.f32 %v9188_v60, %v3525_v61  ;;  %v9292_v40 = vadd.f32 %v9188_v60, %v3526_v54  ;;  %v12177_v42 = vld [vmem:[#allocation13_spill] sm:$0xff] }
 0x4ba   : > { %v9295_v21 = vadd.f32 %v9188_v60, %v3527_v1  ;;  %v9298_v13 = vadd.f32 %v9188_v60, %v3528_v46  ;;  %v3499_v17 = vmul.f32 %v9186_v50, %v8779_v19  ;;  %v3529_v6 = vmul.f32 %v9186_v50, %v9155_v52  ;;  %v4544_v1 = vld [vmem:[#allocation6 + $0x1d0] sm:$0xff] }
 0x4bb   : > { %v3530_v8 = vmul.f32 %v9186_v50, %v9160_v30  ;;  %v3500_v27 = vmul.f32 %v9186_v50, %v8505_v28  ;;  %v4546_v28 = vld [vmem:[#allocation6 + $0x1e0] sm:$0xff]  ;;  %v3501_v30 = vmul.f32 %v9186_v50, %v8521_v12  ;;  %v3502_v63 = vmul.f32 %v9186_v50, %v8528_v57 }
 0x4bc   : > { %v3534_v44 = vadd.f32 %v9188_v60, %v3499_v17  ;;  %v9310_v23 = vadd.f32 %v9188_v60, %v3529_v6  ;;  %4553 = vmatpush.msra.mxu2 %v4546_v28  ;;  %v3503_v10 = vmul.f32 %v9186_v50, %v12176_v53  ;;  %v3504_v3 = vmul.f32 %v9186_v50, %v12177_v42  ;;  %v4543_v28 = vld [vmem:[#allocation6 + $0x1c8] sm:$0xff] }
 0x4bd   : > { %v9313_v19 = vadd.f32 %v9188_v60, %v3530_v8  ;;  %v3535_v51 = vadd.f32 %v9188_v60, %v3500_v27  ;;  %v3536_v39 = vadd.f32 %v9188_v60, %v3501_v30  ;;  %v3537_v62 = vadd.f32 %v9188_v60, %v3502_v63  ;;  %v12180_v8 = vld [vmem:[#allocation109_spill] sm:$0xff] }
 0x4be   : > { %vm3566_vm5 = vcmp.gt.f32.partialorder %v3534_v44, 0.0  ;;  %v3598_v48 = vmul.f32 0.01, %v3534_v44  ;;  %4554 = vmatpush.msra.mxu2 %v4545_v9  ;;  %v3538_v57 = vadd.f32 %v9188_v60, %v3503_v10  ;;  %v3539_v61 = vadd.f32 %v9188_v60, %v3504_v3  ;;  %v9447_v3 = vpop.f32.mrf.mxu3 }
 0x4bf   : > { %v3599_v52 = vmul.f32 0.01, %v3535_v51  ;;  %vm3567_vm1 = vcmp.gt.f32.partialorder %v3535_v51, 0.0  ;;  %v3600_v4 = vmul.f32 0.01, %v3536_v39  ;;  %vm3568_vm10 = vcmp.gt.f32.partialorder %v3536_v39, 0.0 }
 0x4c0   : > { %v9315_v11 = vsel %vm3566_vm5, %v3534_v44, %v3598_v48  ;;  %v3601_v49 = vmul.f32 0.01, %v3537_v62  ;;  %vm3569_vm4 = vcmp.gt.f32.partialorder %v3537_v62, 0.0  ;;  %v3602_v43 = vmul.f32 0.01, %v3538_v57  ;;  %4555 = vmatpush.msra.mxu2 %v4544_v1  ;;  %12186 = vst [vmem:[#allocation122_spill] sm:$0xff] %v9447_v3 }
 0x4c1   : > { %3781 = vmatmul.f32.gmra.mxu2 %v9315_v11  ;;  %3990 = vmatmul.f32.gmra.mxu3 %v9315_v11  ;;  %v9325_v7 = vsel %vm3567_vm1, %v3535_v51, %v3599_v52  ;;  %v9334_v12 = vsel %vm3568_vm10, %v3536_v39, %v3600_v4  ;;  %vm3570_vm5 = vcmp.gt.f32.partialorder %v3538_v57, 0.0  ;;  %v3603_v46 = vmul.f32 0.01, %v3539_v61  ;;  %v4542_v39 = vld [vmem:[#allocation6 + $0x1c0] sm:$0xff] }
 0x4c2   : > { %4120 = vmatmul.f32.gmra.mxu1 %v9315_v11  ;;  %4404 = vmatmul.f32.vlgmr.msrb.gmra.mxu0 %v9315_v11  ;;  %v9343_v14 = vsel %vm3569_vm4, %v3537_v62, %v3601_v49  ;;  %v9352_v54 = vsel %vm3570_vm5, %v3538_v57, %v3602_v43  ;;  %vm3571_vm1 = vcmp.gt.f32.partialorder %v3539_v61, 0.0  ;;  %v3505_v17 = vmul.f32 %v9186_v50, %v12179_v38 }
 0x4c3   : > { %12178 = vst [vmem:[#allocation26_spill] sm:$0xff] %v9352_v54  ;;  %v9361_v44 = vsel %vm3571_vm1, %v3539_v61, %v3603_v46  ;;  %v3506_v27 = vmul.f32 %v9186_v50, %v12180_v8  ;;  %4556 = vmatpush.msra.mxu2 %v4543_v28  ;;  %v3606_v50 = vmul.f32 0.01, %v9235_v58  ;;  %vm3574_vm5 = vcmp.gt.f32.partialorder %v9235_v58, 0.0  ;;  %v4539_v61 = vld [vmem:[#allocation6 + $0x1a8] sm:$0xff]  ;;  %v4538_v28 = vld [vmem:[#allocation6 + $0x1a0] sm:$0xff] }
 0x4c4   : > { %v3540_v26 = vadd.f32 %v9188_v60, %v3505_v17  ;;  %v3607_v4 = vmul.f32 0.01, %v9238_v29  ;;  %vm3575_vm1 = vcmp.gt.f32.partialorder %v9238_v29, 0.0  ;;  %v3609_v9 = vmul.f32 0.01, %v9244_v0 }
 0x4c5   : > { %v3541_v48 = vadd.f32 %v9188_v60, %v3506_v27  ;;  %v9385_v60 = vsel %vm3574_vm5, %v9235_v58, %v3606_v50  ;;  %4557 = vmatpush.msra.mxu2 %v4542_v39  ;;  %v3608_v58 = vmul.f32 0.01, %v9241_v5  ;;  %vm3578_vm5 = vcmp.gt.f32.partialorder %v9247_v35, 0.0  ;;  %v12191_v27 = vld [vmem:[#allocation125_spill] sm:$0xff] }
 0x4c6   : > { %v3604_v6 = vmul.f32 0.01, %v3540_v26  ;;  %vm3572_vm10 = vcmp.gt.f32.partialorder %v3540_v26, 0.0  ;;  %12182 = vst [vmem:[#allocation118_spill] sm:$0xff] %v9385_v60  ;;  %v9394_v63 = vsel %vm3575_vm1, %v9238_v29, %v3607_v4  ;;  %v4541_v29 = vld [vmem:[#allocation6 + $0x1b8] sm:$0xff]  ;;  %vm3579_vm1 = vcmp.gt.f32.partialorder %v9250_v33, 0.0 }
 0x4c7   : > { %v3605_v52 = vmul.f32 0.01, %v3541_v48  ;;  %vm3573_vm4 = vcmp.gt.f32.partialorder %v3541_v48, 0.0  ;;  %4558 = vmatpush.msra.mxu2 %v4541_v29  ;;  %v3611_v10 = vmul.f32 0.01, %v9250_v33 }
 0x4c8   : > { %v9370_v51 = vsel %vm3572_vm10, %v3540_v26, %v3604_v6  ;;  %vm3576_vm10 = vcmp.gt.f32.partialorder %v9241_v5, 0.0  ;;  %v3612_v43 = vmul.f32 0.01, %v9253_v37  ;;  %v3613_v1 = vmul.f32 0.01, %v9256_v15  ;;  %v9463_v26 = vpop.f32.mrf.mxu3 }
 0x4c9   : > { %3784 = vmatmul.f32.gmra.mxu2 %v9325_v7  ;;  %3993 = vmatmul.f32.gmra.mxu3 %v9325_v7  ;;  %12181 = vst [vmem:[#allocation116_spill] sm:$0xff] %v9370_v51  ;;  %v9376_v30 = vsel %vm3573_vm4, %v3541_v48, %v3605_v52  ;;  %v9403_v62 = vsel %vm3576_vm10, %v9241_v5, %v3608_v58  ;;  %vm3577_vm4 = vcmp.gt.f32.partialorder %v9244_v0, 0.0  ;;  %v3610_v5 = vmul.f32 0.01, %v9247_v35 }
 0x4ca   : > { %4123 = vmatmul.f32.gmra.mxu1 %v9325_v7  ;;  %4407 = vmatmul.f32.gmra.mxu0 %v9325_v7  ;;  %v9412_v49 = vsel %vm3577_vm4, %v9244_v0, %v3609_v9  ;;  %v4540_v0 = vld [vmem:[#allocation6 + $0x1b0] sm:$0xff]  ;;  %v9430_v57 = vsel %vm3579_vm1, %v9250_v33, %v3611_v10  ;;  %vm3580_vm10 = vcmp.gt.f32.partialorder %v9253_v37, 0.0  ;;  %v9445_v33 = vpop.f32.mrf.mxu2  ;;  %vm3581_vm4 = vcmp.gt.f32.partialorder %v9256_v15, 0.0 }
 0x4cb   : > { %v9421_v53 = vsel %vm3578_vm5, %v9247_v35, %v3610_v5  ;;  %4559 = vmatpush.msra.mxu2 %v4540_v0  ;;  %v9436_v35 = vpop.f32.mrf.mxu1  ;;  %v9441_v42 = vsel %vm3580_vm10, %v9253_v37, %v3612_v43  ;;  %12185 = vst [vmem:[#allocation121_spill] sm:$0xff] %v9445_v33  ;;  %v9456_v46 = vsel %vm3581_vm4, %v9256_v15, %v3613_v1  ;;  %v3614_v38 = vmul.f32 0.01, %v9259_v20  ;;  %v12195_v1 = vld [vmem:[#allocation31_spill] sm:$0xff] }
 0x4cc   : > { %12183 = vst [vmem:[#allocation36_spill] sm:$0xff] %v9436_v35  ;;  %vm3582_vm5 = vcmp.gt.f32.partialorder %v9259_v20, 0.0  ;;  %vm12192_vm1 = vnez %v12191_v27  ;;  %v3615_v52 = vmul.f32 0.01, %v9262_v47  ;;  %vm3583_vm10 = vcmp.gt.f32.partialorder %v9262_v47, 0.0 }
 0x4cd   : > { %12184 = vst [vmem:[#allocation119_spill] sm:$0xff] %v9441_v42  ;;  %4560 = vmatpush.msra.mxu2 %v4539_v61  ;;  %v9471_v15 = vsel %vm3582_vm5, %v9259_v20, %v3614_v38  ;;  %vm12193_vm4 = vcmp.lt.s32.totalorder %v6818_v32, 1  ;;  %v3616_v10 = vmul.f32 0.01, %v9265_v41  ;;  %vm3584_vm5 = vcmp.gt.f32.partialorder %v9265_v41, 0.0 }
 0x4ce   : > { %12188 = vst [vmem:[#allocation10_spill] sm:$0xff] %v9456_v46  ;;  %v9491_v5 = vsel %vm3583_vm10, %v9262_v47, %v3615_v52  ;;  %vm12198_vm10 = vcmp.lt.s32.totalorder %v6818_v32, 1 }
 0x4cf   : > { %12190 = vst [vmem:[#allocation68_spill] sm:$0xff] %v9471_v15  ;;  %4561 = vmatpush.msra.mxu2 %v4538_v28  ;;  %v9508_v28 = vsel %vm3584_vm5, %v9265_v41, %v3616_v10  ;;  %vm3585_vm5 = vcmp.gt.f32.partialorder %v9268_v45, 0.0 }
 0x4d0   : > { %12194 = vst [vmem:[#allocation50_spill] sm:$0xff] %v9491_v5 }
 0x4d1   : > { %3787 = vmatmul.f32.gmra.mxu2 %v9334_v12  ;;  %3996 = vmatmul.f32.gmra.mxu3 %v9334_v12  ;;  %12197 = vst [vmem:[#allocation55_spill] sm:$0xff] %v9508_v28 }
 0x4d2   : > { %4126 = vmatmul.f32.gmra.mxu1 %v9334_v12  ;;  %4410 = vmatmul.f32.gmra.mxu0 %v9334_v12  ;;  %v3779_v17 = vpop.f32.mrf.mxu2 }
 0x4d3   : > { %v9453_v37 = vpop.f32.mrf.mxu1  ;;  %v3873_v48 = vsel %vm12192_vm1, %v3779_v17, 0.0 }
 0x4d4   : > { %12187 = vst [vmem:[#allocation126_spill] sm:$0xff] %v9453_v37  ;;  %v9481_v20 = vrot.slane %v3873_v48, 7 }
 0x4d9   : > { %3790 = vmatmul.f32.gmra.mxu2 %v9343_v14  ;;  %3999 = vmatmul.f32.gmra.mxu3 %v9343_v14 }
 0x4da   : > { %4129 = vmatmul.f32.gmra.mxu1 %v9343_v14  ;;  %4413 = vmatmul.f32.gmra.mxu0 %v9343_v14 }
 0x4e1   : > { %3793 = vmatmul.f32.gmra.mxu2 %v9352_v54  ;;  %4002 = vmatmul.f32.gmra.mxu3 %v9352_v54 }
 0x4e2   : > { %4132 = vmatmul.f32.gmra.mxu1 %v9352_v54  ;;  %4416 = vmatmul.f32.gmra.mxu0 %v9352_v54 }
 0x4e9   : > { %3796 = vmatmul.f32.gmra.mxu2 %v9361_v44  ;;  %4005 = vmatmul.f32.gmra.mxu3 %v9361_v44 }
 0x4ea   : > { %4135 = vmatmul.f32.gmra.mxu1 %v9361_v44  ;;  %4419 = vmatmul.f32.gmra.mxu0 %v9361_v44 }
 0x4f1   : > { %3799 = vmatmul.f32.gmra.mxu2 %v9370_v51  ;;  %4008 = vmatmul.f32.gmra.mxu3 %v9370_v51 }
 0x4f2   : > { %4138 = vmatmul.f32.gmra.mxu1 %v9370_v51  ;;  %4422 = vmatmul.f32.gmra.mxu0 %v9370_v51 }
 0x4f9   : > { %3802 = vmatmul.f32.gmra.mxu2 %v9376_v30  ;;  %4011 = vmatmul.f32.gmra.mxu3 %v9376_v30 }
 0x4fa   : > { %4141 = vmatmul.f32.gmra.mxu1 %v9376_v30  ;;  %4425 = vmatmul.f32.gmra.mxu0 %v9376_v30 }
 0x501   : > { %3805 = vmatmul.f32.gmra.mxu2 %v9385_v60  ;;  %4014 = vmatmul.f32.gmra.mxu3 %v9385_v60 }
 0x502   : > { %4144 = vmatmul.f32.gmra.mxu1 %v9385_v60  ;;  %4428 = vmatmul.f32.gmra.mxu0 %v9385_v60 }
 0x509   : > { %3808 = vmatmul.f32.gmra.mxu2 %v9394_v63  ;;  %4017 = vmatmul.f32.gmra.mxu3 %v9394_v63 }
 0x50a   : > { %4147 = vmatmul.f32.gmra.mxu1 %v9394_v63  ;;  %4431 = vmatmul.f32.gmra.mxu0 %v9394_v63 }
 0x511   : > { %3811 = vmatmul.f32.gmra.mxu2 %v9403_v62  ;;  %4020 = vmatmul.f32.gmra.mxu3 %v9403_v62 }
 0x512   : > { %4150 = vmatmul.f32.gmra.mxu1 %v9403_v62  ;;  %4434 = vmatmul.f32.gmra.mxu0 %v9403_v62 }
 0x519   : > { %3814 = vmatmul.f32.gmra.mxu2 %v9412_v49  ;;  %4023 = vmatmul.f32.gmra.mxu3 %v9412_v49 }
 0x51a   : > { %4153 = vmatmul.f32.gmra.mxu1 %v9412_v49  ;;  %4437 = vmatmul.f32.gmra.mxu0 %v9412_v49 }
 0x521   : > { %3817 = vmatmul.f32.gmra.mxu2 %v9421_v53  ;;  %4026 = vmatmul.f32.gmra.mxu3 %v9421_v53 }
 0x522   : > { %4156 = vmatmul.f32.gmra.mxu1 %v9421_v53  ;;  %4440 = vmatmul.f32.gmra.mxu0 %v9421_v53 }
 0x529   : > { %3820 = vmatmul.f32.gmra.mxu2 %v9430_v57  ;;  %4029 = vmatmul.f32.gmra.mxu3 %v9430_v57 }
 0x52a   : > { %4159 = vmatmul.f32.gmra.mxu1 %v9430_v57  ;;  %4443 = vmatmul.f32.gmra.mxu0 %v9430_v57 }
 0x531   : > { %3823 = vmatmul.f32.gmra.mxu2 %v9441_v42  ;;  %4032 = vmatmul.f32.gmra.mxu3 %v9441_v42 }
 0x532   : > { %4162 = vmatmul.f32.gmra.mxu1 %v9441_v42  ;;  %4446 = vmatmul.f32.gmra.mxu0 %v9441_v42 }
 0x539   : > { %3826 = vmatmul.f32.gmra.mxu2 %v9456_v46  ;;  %4035 = vmatmul.f32.gmra.mxu3 %v9456_v46 }
 0x53a   : > { %4165 = vmatmul.f32.gmra.mxu1 %v9456_v46  ;;  %4449 = vmatmul.f32.gmra.mxu0 %v9456_v46 }
 0x53f   : > { %v9466_v6 = vpop.f32.mrf.mxu1  ;;  %v9468_v8 = vpop.f32.mrf.mxu0 }
 0x540   : > { %12189 = vst [vmem:[#allocation33_spill] sm:$0xff] %v9468_v8 }
 0x541   : > { %3829 = vmatmul.f32.gmra.mxu2 %v9471_v15  ;;  %4038 = vmatmul.f32.gmra.mxu3 %v9471_v15 }
 0x542   : > { %4168 = vmatmul.f32.gmra.mxu1 %v9471_v15  ;;  %4452 = vmatmul.f32.gmra.mxu0 %v9471_v15 }
 0x544   : > { %v3782_v50 = vpop.f32.mrf.mxu2  ;;  %v3991_v39 = vpop.f32.mrf.mxu3 }
 0x545   : > { %v3906_v4 = vrot.slane %v3782_v50, 7 }
 0x547   : > { %v3965_v58 = vsel %vm12193_vm4, %v9481_v20, %v3906_v4  ;;  %v9486_v29 = vpop.f32.mrf.mxu1  ;;  %v9488_v9 = vpop.f32.mrf.mxu0  ;;  %vm12196_vm4 = vnez %v12195_v1 }
 0x548   : > { %v9493_v0 = vadd.f32 %v3991_v39, %v3965_v58  ;;  %v4537_v39 = vld [vmem:[#allocation6 + $0x198] sm:$0xff]  ;;  %v3617_v58 = vmul.f32 0.01, %v9268_v45 }
 0x549   : > { %3832 = vmatmul.f32.gmra.mxu2 %v9491_v5  ;;  %4041 = vmatmul.f32.gmra.mxu3 %v9491_v5 }
 0x54a   : > { %4171 = vmatmul.f32.gmra.mxu1 %v9491_v5  ;;  %4455 = vmatmul.f32.gmra.mxu0 %v9491_v5 }
 0x54b   : > { %4562 = vmatpush.msra.mxu2 %v4537_v39  ;;  %v5259_v39 = vld [vmem:[#allocation6 + $0x378] sm:$0xff] }
 0x54c   : > { %v3785_v43 = vpop.f32.mrf.mxu2  ;;  %v3994_v61 = vpop.f32.mrf.mxu3  ;;  %5260 = vmatpush.msra.mxu0 %v5259_v39 }
 0x54d   : > { %v3875_v47 = vsel %vm12196_vm4, %v3785_v43, 0.0 }
 0x54e   : > { %v3907_v38 = vrot.slane %v3875_v47, 7 }
 0x54f   : > { %v9503_v17 = vpop.f32.mrf.mxu1  ;;  %v9505_v48 = vpop.f32.mrf.mxu0 }
 0x550   : > { %v3964_v52 = vsel %vm12198_vm10, %v3906_v4, %v3907_v38 }
 0x551   : > { %v9512_v50 = vadd.f32 %v3994_v61, %v3964_v52  ;;  %3835 = vmatmul.f32.gmra.mxu2 %v9508_v28  ;;  %4044 = vmatmul.f32.gmra.mxu3 %v9508_v28  ;;  %v9527_v52 = vsel %vm3585_vm5, %v9268_v45, %v3617_v58  ;;  %v12200_v45 = vld [vmem:[#allocation40_spill] sm:$0xff] }
 0x552   : > { %4174 = vmatmul.f32.gmra.mxu1 %v9508_v28  ;;  %4458 = vmatmul.f32.gmra.mxu0 %v9508_v28  ;;  %vm12201_vm5 = vnez %v12200_v45 }
 0x554   : > { %v3788_v43 = vpop.f32.mrf.mxu2  ;;  %v3997_v41 = vpop.f32.mrf.mxu3 }
 0x555   : > { %v3908_v10 = vrot.slane %v3788_v43, 7 }
 0x557   : > { %v3963_v4 = vsel %vm12198_vm10, %v3907_v38, %v3908_v10  ;;  %v9522_v61 = vpop.f32.mrf.mxu1  ;;  %v9524_v47 = vpop.f32.mrf.mxu0  ;;  %v3618_v38 = vmul.f32 0.01, %v9271_v16  ;;  %vm3586_vm10 = vcmp.gt.f32.partialorder %v9271_v16, 0.0 }
 0x558   : > { %v9529_v8 = vadd.f32 %v3997_v41, %v3963_v4 }
 0x559   : > { %3838 = vmatmul.f32.gmra.mxu2 %v9527_v52  ;;  %4047 = vmatmul.f32.gmra.mxu3 %v9527_v52  ;;  %v9544_v34 = vsel %vm3586_vm10, %v9271_v16, %v3618_v38  ;;  %vm3587_vm10 = vcmp.gt.f32.partialorder %v9274_v25, 0.0 }
 0x55a   : > { %12199 = vst [vmem:[#allocation43_spill] sm:$0xff] %v9529_v8  ;;  %4177 = vmatmul.f32.gmra.mxu1 %v9527_v52  ;;  %4461 = vmatmul.f32.gmra.mxu0 %v9527_v52 }
 0x55c   : > { %v3791_v43 = vpop.f32.mrf.mxu2  ;;  %v4000_v3 = vpop.f32.mrf.mxu3 }
 0x55d   : > { %v3877_v58 = vsel %vm12201_vm5, %v3791_v43, 0.0  ;;  %v4536_v43 = vld [vmem:[#allocation6 + $0x190] sm:$0xff] }
 0x55e   : > { %v3909_v41 = vrot.slane %v3877_v58, 7  ;;  %4563 = vmatpush.msra.mxu2 %v4536_v43  ;;  %v3619_v58 = vmul.f32 0.01, %v9274_v25 }
 0x55f   : > { %v9539_v4 = vpop.f32.mrf.mxu1  ;;  %v9541_v35 = vpop.f32.mrf.mxu0 }
 0x560   : > { %12202 = vst [vmem:[#allocation128_spill] sm:$0xff] %v9539_v4  ;;  %v3962_v39 = vsel %vm12204_vm2, %v3908_v10, %v3909_v41  ;;  %v9563_v45 = vsel %vm3587_vm10, %v9274_v25, %v3619_v58  ;;  %v12210_v25 = vld [vmem:[#allocation45_spill] sm:$0xff] }
 0x561   : > { %12203 = vst [vmem:[#allocation79_spill] sm:$0xff] %v9541_v35  ;;  %v9548_v22 = vadd.f32 %v4000_v3, %v3962_v39  ;;  %3841 = vmatmul.f32.gmra.mxu2 %v9544_v34  ;;  %4050 = vmatmul.f32.gmra.mxu3 %v9544_v34  ;;  %vm12211_vm10 = vnez %v12210_v25  ;;  %v5097_v25 = vld [vmem:[#allocation6 + $0x3f8] sm:$0xff] }
 0x562   : > { %4180 = vmatmul.f32.gmra.mxu1 %v9544_v34  ;;  %4464 = vmatmul.f32.gmra.mxu0 %v9544_v34  ;;  %12208 = vst [vmem:[#allocation90_spill] sm:$0xff] %v9563_v45 }
 0x563   : > { %12205 = vst [vmem:[#allocation44_spill] sm:$0xff] %v9548_v22  ;;  %5098 = vmatpush.msra.mxu1 %v5097_v25 }
 0x564   : > { %v3794_v24 = vpop.f32.mrf.mxu2  ;;  %v4003_v16 = vpop.f32.mrf.mxu3 }
 0x565   : > { %v3910_v38 = vrot.slane %v3794_v24, 7  ;;  %v5258_v24 = vld [vmem:[#allocation6 + $0x370] sm:$0xff] }
 0x566   : > { %5261 = vmatpush.msra.mxu0 %v5258_v24 }
 0x567   : > { %v3961_v3 = vsel %vm12204_vm2, %v3909_v41, %v3910_v38  ;;  %v9558_v10 = vpop.f32.mrf.mxu1  ;;  %v9560_v39 = vpop.f32.mrf.mxu0  ;;  %v3620_v41 = vmul.f32 0.01, %v9277_v59  ;;  %vm3588_vm2 = vcmp.gt.f32.partialorder %v9277_v59, 0.0 }
 0x568   : > { %12206 = vst [vmem:[#allocation65_spill] sm:$0xff] %v9558_v10  ;;  %v9565_v22 = vadd.f32 %v4003_v16, %v3961_v3 }
 0x569   : > { %12207 = vst [vmem:[#allocation52_spill] sm:$0xff] %v9560_v39  ;;  %3844 = vmatmul.f32.gmra.mxu2 %v9563_v45  ;;  %4053 = vmatmul.f32.gmra.mxu3 %v9563_v45  ;;  %v9580_v39 = vsel %vm3588_vm2, %v9277_v59, %v3620_v41  ;;  %v3621_v59 = vmul.f32 0.01, %v9280_v18  ;;  %vm12217_vm2 = vcmp.lt.s32.totalorder %v6818_v32, 1 }
 0x56a   : > { %12209 = vst [vmem:[#allocation27_spill] sm:$0xff] %v9565_v22  ;;  %4183 = vmatmul.f32.gmra.mxu1 %v9563_v45  ;;  %4467 = vmatmul.f32.gmra.mxu0 %v9563_v45 }
 0x56b   : > { %12214 = vst [vmem:[#allocation82_spill] sm:$0xff] %v9580_v39 }
 0x56c   : > { %v3797_v43 = vpop.f32.mrf.mxu2  ;;  %v4006_v10 = vpop.f32.mrf.mxu3 }
 0x56d   : > { %v3879_v58 = vsel %vm12211_vm10, %v3797_v43, 0.0  ;;  %v4535_v43 = vld [vmem:[#allocation6 + $0x188] sm:$0xff]  ;;  %vm12227_vm10 = vcmp.lt.s32.totalorder %v6818_v32, 1 }
 0x56e   : > { %v3911_v16 = vrot.slane %v3879_v58, 7  ;;  %v4807_v58 = vld [vmem:[#allocation6 + $0x2f8] sm:$0xff]  ;;  %4564 = vmatpush.msra.mxu2 %v4535_v43  ;;  %v4805_v43 = vld [vmem:[#allocation6 + $0x2e8] sm:$0xff] }
 0x56f   : > { %v9575_v3 = vpop.f32.mrf.mxu1  ;;  %v9577_v22 = vpop.f32.mrf.mxu0  ;;  %4808 = vmatpush.msrb.mxu3 %v4807_v58  ;;  %v5095_v58 = vld [vmem:[#allocation6 + $0x3e8] sm:$0xff] }
 0x570   : > { %12212 = vst [vmem:[#allocation53_spill] sm:$0xff] %v9575_v3  ;;  %v3960_v24 = vsel %vm12215_vm0, %v3910_v38, %v3911_v16  ;;  %vm3589_vm0 = vcmp.gt.f32.partialorder %v9280_v18, 0.0 }
 0x571   : > { %12213 = vst [vmem:[#allocation84_spill] sm:$0xff] %v9577_v22  ;;  %v9584_v35 = vadd.f32 %v4006_v10, %v3960_v24  ;;  %3847 = vmatmul.f32.gmra.mxu2 %v9580_v39  ;;  %4056 = vmatmul.f32.gmra.mxu3 %v9580_v39  ;;  %v4806_v10 = vld [vmem:[#allocation6 + $0x2f0] sm:$0xff]  ;;  %v9599_v4 = vsel %vm3589_vm0, %v9280_v18, %v3621_v59  ;;  %vm3590_vm0 = vcmp.gt.f32.partialorder %v9283_v2, 0.0  ;;  %v12222_v59 = vld [vmem:[#allocation146_spill] sm:$0xff] }
 0x572   : > { %4186 = vmatmul.f32.gmra.mxu1 %v9580_v39  ;;  %4470 = vmatmul.f32.gmra.mxu0 %v9580_v39  ;;  %v5096_v24 = vld [vmem:[#allocation6 + $0x3f0] sm:$0xff]  ;;  %12220 = vst [vmem:[#allocation74_spill] sm:$0xff] %v9599_v4  ;;  %v5094_v39 = vld [vmem:[#allocation6 + $0x3e0] sm:$0xff] }
 0x573   : > { %12216 = vst [vmem:[#allocation78_spill] sm:$0xff] %v9584_v35  ;;  %4809 = vmatpush.msrb.mxu3 %v4806_v10  ;;  %5099 = vmatpush.msra.mxu1 %v5096_v24  ;;  %v5093_v10 = vld [vmem:[#allocation6 + $0x3d8] sm:$0xff]  ;;  %v5257_v24 = vld [vmem:[#allocation6 + $0x368] sm:$0xff] }
 0x574   : > { %v3800_v41 = vpop.f32.mrf.mxu2  ;;  %v4009_v22 = vpop.f32.mrf.mxu3  ;;  %5262 = vmatpush.msra.mxu0 %v5257_v24  ;;  %v4801_v24 = vld [vmem:[#allocation6 + $0x2c8] sm:$0xff] }
 0x575   : > { %v3912_v38 = vrot.slane %v3800_v41, 7  ;;  %4810 = vmatpush.msrb.mxu3 %v4805_v43  ;;  %5100 = vmatpush.msra.mxu1 %v5095_v58  ;;  %v4804_v41 = vld [vmem:[#allocation6 + $0x2e0] sm:$0xff]  ;;  %v4802_v58 = vld [vmem:[#allocation6 + $0x2d0] sm:$0xff] }
 0x577   : > { %v3959_v35 = vsel %vm12217_vm2, %v3911_v16, %v3912_v38  ;;  %v9594_v3 = vpop.f32.mrf.mxu1  ;;  %v9596_v8 = vpop.f32.mrf.mxu0  ;;  %v4803_v16 = vld [vmem:[#allocation6 + $0x2d8] sm:$0xff]  ;;  %4811 = vmatpush.msrb.mxu3 %v4804_v41  ;;  %5101 = vmatpush.msra.mxu1 %v5094_v39  ;;  %vm12223_vm2 = vnez %v12222_v59  ;;  %v5091_v59 = vld [vmem:[#allocation6 + $0x3c8] sm:$0xff] }
 0x578   : > { %12218 = vst [vmem:[#allocation58_spill] sm:$0xff] %v9594_v3  ;;  %v9601_v25 = vadd.f32 %v4009_v22, %v3959_v35  ;;  %v3622_v22 = vmul.f32 0.01, %v9283_v2 }
 0x579   : > { %12219 = vst [vmem:[#allocation16_spill] sm:$0xff] %v9596_v8  ;;  %3850 = vmatmul.f32.gmra.mxu2 %v9599_v4  ;;  %4059 = vmatmul.f32.gmra.mxu3 %v9599_v4 }
 0x57a   : > { %12221 = vst [vmem:[#allocation62_spill] sm:$0xff] %v9601_v25  ;;  %4189 = vmatmul.f32.gmra.mxu1 %v9599_v4  ;;  %4473 = vmatmul.f32.gmra.mxu0 %v9599_v4  ;;  %v5092_v25 = vld [vmem:[#allocation6 + $0x3d0] sm:$0xff]  ;;  %v9616_v39 = vsel %vm3590_vm0, %v9283_v2, %v3622_v22  ;;  %v3623_v2 = vmul.f32 0.01, %v9286_v31  ;;  %vm12229_vm0 = vcmp.lt.s32.totalorder %v6818_v32, 1 }
 0x57b   : > { %4812 = vmatpush.msrb.mxu3 %v4803_v16  ;;  %5102 = vmatpush.msra.mxu1 %v5093_v10  ;;  %12226 = vst [vmem:[#allocation71_spill] sm:$0xff] %v9616_v39  ;;  %v4800_v16 = vld [vmem:[#allocation6 + $0x2c0] sm:$0xff] }
 0x57c   : > { %v3803_v18 = vpop.f32.mrf.mxu2  ;;  %v4012_v35 = vpop.f32.mrf.mxu3  ;;  %v4534_v10 = vld [vmem:[#allocation6 + $0x180] sm:$0xff] }
 0x57d   : > { %v3881_v43 = vsel %vm12223_vm2, %v3803_v18, 0.0  ;;  %4813 = vmatpush.msrb.mxu3 %v4802_v58  ;;  %5103 = vmatpush.msra.mxu1 %v5092_v25  ;;  %v5090_v25 = vld [vmem:[#allocation6 + $0x3c0] sm:$0xff] }
 0x57e   : > { %v3913_v8 = vrot.slane %v3881_v43, 7  ;;  %4565 = vmatpush.msra.mxu2 %v4534_v10  ;;  %v5089_v43 = vld [vmem:[#allocation6 + $0x3b8] sm:$0xff]  ;;  %v4798_v10 = vld [vmem:[#allocation6 + $0x2b0] sm:$0xff] }
 0x57f   : > { %v9611_v3 = vpop.f32.mrf.mxu1  ;;  %v9613_v4 = vpop.f32.mrf.mxu0  ;;  %4814 = vmatpush.msrb.mxu3 %v4801_v24  ;;  %5104 = vmatpush.msra.mxu1 %v5091_v59 }
 0x580   : > { %12224 = vst [vmem:[#allocation87_spill] sm:$0xff] %v9611_v3  ;;  %v3958_v41 = vsel %vm12227_vm10, %v3912_v38, %v3913_v8  ;;  %vm3591_vm10 = vcmp.gt.f32.partialorder %v9286_v31, 0.0  ;;  %v5088_v3 = vld [vmem:[#allocation6 + $0x3b0] sm:$0xff] }
 0x581   : > { %12225 = vst [vmem:[#allocation17_spill] sm:$0xff] %v9613_v4  ;;  %v9620_v18 = vadd.f32 %v4012_v35, %v3958_v41  ;;  %3853 = vmatmul.f32.gmra.mxu2 %v9616_v39  ;;  %4062 = vmatmul.f32.gmra.mxu3 %v9616_v39  ;;  %v4799_v35 = vld [vmem:[#allocation6 + $0x2b8] sm:$0xff]  ;;  %v9635_v59 = vsel %vm3591_vm10, %v9286_v31, %v3623_v2  ;;  %v3624_v31 = vmul.f32 0.01, %v9289_v36  ;;  %vm3592_vm10 = vcmp.gt.f32.partialorder %v9289_v36, 0.0 }
 0x582   : > { %4192 = vmatmul.f32.gmra.mxu1 %v9616_v39  ;;  %4476 = vmatmul.f32.gmra.mxu0 %v9616_v39  ;;  %12232 = vst [vmem:[#allocation47_spill] sm:$0xff] %v9635_v59  ;;  %v4795_v39 = vld [vmem:[#allocation6 + $0x298] sm:$0xff] }
 0x583   : > { %12228 = vst [vmem:[#allocation135_spill] sm:$0xff] %v9620_v18  ;;  %4815 = vmatpush.msrb.mxu3 %v4800_v16  ;;  %5105 = vmatpush.msra.mxu1 %v5090_v25  ;;  %v5256_v16 = vld [vmem:[#allocation6 + $0x360] sm:$0xff]  ;;  %v5087_v25 = vld [vmem:[#allocation6 + $0x3a8] sm:$0xff] }
 0x584   : > { %v3806_v38 = vpop.f32.mrf.mxu2  ;;  %v4015_v22 = vpop.f32.mrf.mxu3  ;;  %5263 = vmatpush.msra.mxu0 %v5256_v16 }
 0x585   : > { %v3914_v58 = vrot.slane %v3806_v38, 7  ;;  %4816 = vmatpush.msrb.mxu3 %v4799_v35  ;;  %5106 = vmatpush.msra.mxu1 %v5089_v43  ;;  %v5255_v38 = vld [vmem:[#allocation6 + $0x358] sm:$0xff]  ;;  %v4796_v35 = vld [vmem:[#allocation6 + $0x2a0] sm:$0xff] }
 0x586   : > { %v5086_v43 = vld [vmem:[#allocation6 + $0x3a0] sm:$0xff]  ;;  %5264 = vmatpush.msra.mxu0 %v5255_v38  ;;  %v5517_v38 = vld [vmem:[#allocation6 + $0x478] sm:$0xff] }
 0x587   : > { %v3957_v41 = vsel %vm12229_vm0, %v3913_v8, %v3914_v58  ;;  %v9630_v18 = vpop.f32.mrf.mxu1  ;;  %v9632_v4 = vpop.f32.mrf.mxu0  ;;  %v4797_v8 = vld [vmem:[#allocation6 + $0x2a8] sm:$0xff]  ;;  %4817 = vmatpush.msrb.mxu3 %v4798_v10  ;;  %5107 = vmatpush.msra.mxu1 %v5088_v3 }
 0x588   : > { %12230 = vst [vmem:[#allocation39_spill] sm:$0xff] %v9630_v18  ;;  %v9637_v24 = vadd.f32 %v4015_v22, %v3957_v41  ;;  %v5085_v41 = vld [vmem:[#allocation6 + $0x398] sm:$0xff]  ;;  %5518 = vmatpush.msrb.mxu2 %v5517_v38  ;;  %v4792_v38 = vld [vmem:[#allocation6 + $0x280] sm:$0xff] }
 0x589   : > { %12231 = vst [vmem:[#allocation131_spill] sm:$0xff] %v9632_v4  ;;  %3856 = vmatmul.f32.gmra.mxu2 %v9635_v59  ;;  %4065 = vmatmul.f32.gmra.mxu3 %v9635_v59  ;;  %v5254_v4 = vld [vmem:[#allocation6 + $0x350] sm:$0xff] }
 0x58a   : > { %12233 = vst [vmem:[#allocation14_spill] sm:$0xff] %v9637_v24  ;;  %4195 = vmatmul.f32.gmra.mxu1 %v9635_v59  ;;  %4479 = vmatmul.f32.gmra.mxu0 %v9635_v59  ;;  %v9652_v59 = vsel %vm3592_vm10, %v9289_v36, %v3624_v31  ;;  %v5084_v36 = vld [vmem:[#allocation6 + $0x390] sm:$0xff]  ;;  %v3625_v31 = vmul.f32 0.01, %v9292_v40  ;;  %vm3593_vm10 = vcmp.gt.f32.partialorder %v9292_v40, 0.0 }
 0x58b   : > { %4818 = vmatpush.msrb.mxu3 %v4797_v8  ;;  %5108 = vmatpush.msra.mxu1 %v5087_v25  ;;  %12236 = vst [vmem:[#allocation60_spill] sm:$0xff] %v9652_v59  ;;  %v4794_v25 = vld [vmem:[#allocation6 + $0x290] sm:$0xff] }
 0x58c   : > { %v3809_v2 = vpop.f32.mrf.mxu2  ;;  %v4018_v22 = vpop.f32.mrf.mxu3  ;;  %5265 = vmatpush.msra.mxu0 %v5254_v4 }
 0x58d   : > { %v3883_v24 = vsel %vm8111_vm8, %v3809_v2, 0.0  ;;  %4819 = vmatpush.msrb.mxu3 %v4796_v35  ;;  %5109 = vmatpush.msra.mxu1 %v5086_v43  ;;  %v5083_v35 = vld [vmem:[#allocation6 + $0x388] sm:$0xff]  ;;  %vm12241_vm8 = vcmp.lt.s32.totalorder %v6818_v32, 1 }
 0x58e   : > { %v3915_v18 = vrot.slane %v3883_v24, 7  ;;  %v5253_v24 = vld [vmem:[#allocation6 + $0x348] sm:$0xff] }
 0x58f   : > { %v9647_v10 = vpop.f32.mrf.mxu1  ;;  %v9649_v3 = vpop.f32.mrf.mxu0  ;;  %4820 = vmatpush.msrb.mxu3 %v4795_v39  ;;  %5110 = vmatpush.msra.mxu1 %v5085_v41 }
 0x590   : > { %12235 = vst [vmem:[#allocation57_spill] sm:$0xff] %v9649_v3  ;;  %v3956_v16 = vsel %vm12229_vm0, %v3914_v58, %v3915_v18  ;;  %v5252_v58 = vld [vmem:[#allocation6 + $0x340] sm:$0xff]  ;;  %5266 = vmatpush.msra.mxu0 %v5253_v24  ;;  %v9671_v3 = vsel %vm3593_vm10, %v9292_v40, %v3625_v31  ;;  %v3626_v40 = vmul.f32 0.01, %v9295_v21  ;;  %vm3594_vm10 = vcmp.gt.f32.partialorder %v9295_v21, 0.0  ;;  %v12239_v31 = vld [vmem:[#allocation148_spill] sm:$0xff] }
 0x591   : > { %v9656_v8 = vadd.f32 %v4018_v22, %v3956_v16  ;;  %3859 = vmatmul.f32.gmra.mxu2 %v9652_v59  ;;  %4068 = vmatmul.f32.gmra.mxu3 %v9652_v59  ;;  %v4793_v22 = vld [vmem:[#allocation6 + $0x288] sm:$0xff]  ;;  %v5251_v16 = vld [vmem:[#allocation6 + $0x338] sm:$0xff] }
 0x592   : > { %4198 = vmatmul.f32.gmra.mxu1 %v9652_v59  ;;  %4482 = vmatmul.f32.gmra.mxu0 %v9652_v59 }
 0x593   : > { %12237 = vst [vmem:[#allocation93_spill] sm:$0xff] %v9656_v8  ;;  %4821 = vmatpush.msrb.mxu3 %v4794_v25  ;;  %5111 = vmatpush.msra.mxu1 %v5084_v36  ;;  %v5250_v25 = vld [vmem:[#allocation6 + $0x330] sm:$0xff] }
 0x594   : > { %v3812_v4 = vpop.f32.mrf.mxu2  ;;  %v4021_v2 = vpop.f32.mrf.mxu3  ;;  %5267 = vmatpush.msra.mxu0 %v5252_v58 }
 0x595   : > { %v3916_v43 = vrot.slane %v3812_v4, 7  ;;  %4822 = vmatpush.msrb.mxu3 %v4793_v22  ;;  %5112 = vmatpush.msra.mxu1 %v5083_v35  ;;  %v5082_v4 = vld [vmem:[#allocation6 + $0x380] sm:$0xff] }
 0x596   : > { %5268 = vmatpush.msra.mxu0 %v5251_v16  ;;  %v5248_v22 = vld [vmem:[#allocation6 + $0x320] sm:$0xff] }
 0x597   : > { %v3955_v39 = vsel %vm12229_vm0, %v3915_v18, %v3916_v43  ;;  %v9666_v41 = vpop.f32.mrf.mxu1  ;;  %v9668_v8 = vpop.f32.mrf.mxu0  ;;  %4823 = vmatpush.msrb.mxu3 %v4792_v38  ;;  %5113 = vmatpush.msra.mxu1 %v5082_v4  ;;  %v5249_v18 = vld [vmem:[#allocation6 + $0x328] sm:$0xff]  ;;  %vm12240_vm0 = vnez %v12239_v31  ;;  %v9688_v38 = vsel %vm3594_vm10, %v9295_v21, %v3626_v40  ;;  %v3627_v21 = vmul.f32 0.01, %v9298_v13 }
 0x598   : > { %v9673_v24 = vadd.f32 %v4021_v2, %v3955_v39  ;;  %5269 = vmatpush.msra.mxu0 %v5250_v25  ;;  %v5247_v25 = vld [vmem:[#allocation6 + $0x318] sm:$0xff]  ;;  %vm12243_vm10 = vcmp.lt.s32.totalorder %v6818_v32, 1 }
 0x599   : > { %3862 = vmatmul.f32.gmra.mxu2 %v9671_v3  ;;  %4071 = vmatmul.f32.gmra.mxu3 %v9671_v3 }
 0x59a   : > { %12238 = vst [vmem:[#allocation19_spill] sm:$0xff] %v9673_v24  ;;  %4201 = vmatmul.f32.gmra.mxu1 %v9671_v3  ;;  %4485 = vmatmul.f32.gmra.mxu0 %v9671_v3 }
 0x59b   : > { %5270 = vmatpush.msra.mxu0 %v5249_v18  ;;  %v5246_v18 = vld [vmem:[#allocation6 + $0x310] sm:$0xff] }
 0x59c   : > { %v3815_v36 = vpop.f32.mrf.mxu2  ;;  %v4024_v58 = vpop.f32.mrf.mxu3 }
 0x59d   : > { %v3885_v2 = vsel %vm12240_vm0, %v3815_v36, 0.0  ;;  %5271 = vmatpush.msra.mxu0 %v5248_v22  ;;  %v5516_v36 = vld [vmem:[#allocation6 + $0x470] sm:$0xff] }
 0x59e   : > { %v3917_v35 = vrot.slane %v3885_v2, 7  ;;  %5519 = vmatpush.msrb.mxu2 %v5516_v36  ;;  %v5245_v2 = vld [vmem:[#allocation6 + $0x308] sm:$0xff] }
 0x59f   : > { %v9683_v16 = vpop.f32.mrf.mxu1  ;;  %v9685_v39 = vpop.f32.mrf.mxu0  ;;  %5272 = vmatpush.msra.mxu0 %v5247_v25 }
 0x5a0   : > { %v3954_v4 = vsel %vm12241_vm8, %v3916_v43, %v3917_v35  ;;  %vm3595_vm8 = vcmp.gt.f32.partialorder %v9298_v13, 0.0 }
 0x5a1   : > { %v9692_v24 = vadd.f32 %v4024_v58, %v3954_v4  ;;  %3865 = vmatmul.f32.gmra.mxu2 %v9688_v38  ;;  %4074 = vmatmul.f32.gmra.mxu3 %v9688_v38  ;;  %v9707_v25 = vsel %vm3595_vm8, %v9298_v13, %v3627_v21  ;;  %v3628_v13 = vmul.f32 0.01, %v9310_v23  ;;  %vm3596_vm8 = vcmp.gt.f32.partialorder %v9310_v23, 0.0 }
 0x5a2   : > { %4204 = vmatmul.f32.gmra.mxu1 %v9688_v38  ;;  %4488 = vmatmul.f32.gmra.mxu0 %v9688_v38 }
 0x5a3   : > { %12242 = vst [vmem:[#allocation144_spill] sm:$0xff] %v9692_v24  ;;  %5273 = vmatpush.msra.mxu0 %v5246_v18  ;;  %v5244_v24 = vld [vmem:[#allocation6 + $0x300] sm:$0xff] }
 0x5a4   : > { %v3818_v40 = vpop.f32.mrf.mxu2  ;;  %v4027_v43 = vpop.f32.mrf.mxu3 }
 0x5a5   : > { %v3918_v58 = vrot.slane %v3818_v40, 7  ;;  %5274 = vmatpush.msra.mxu0 %v5245_v2 }
 0x5a7   : > { %v3953_v22 = vsel %vm12243_vm10, %v3917_v35, %v3918_v58  ;;  %v9702_v4 = vpop.f32.mrf.mxu1  ;;  %v9704_v31 = vpop.f32.mrf.mxu0  ;;  %5275 = vmatpush.msra.mxu0 %v5244_v24  ;;  %v9728_v24 = vsel %vm3596_vm8, %v9310_v23, %v3628_v13  ;;  %vm12249_vm8 = vcmp.lt.s32.totalorder %v6818_v32, 1 }
 0x5a8   : > { %12244 = vst [vmem:[#allocation140_spill] sm:$0xff] %v9704_v31  ;;  %v9709_v36 = vadd.f32 %v4027_v43, %v3953_v22 }
 0x5a9   : > { %3868 = vmatmul.f32.gmra.mxu2 %v9707_v25  ;;  %4077 = vmatmul.f32.gmra.mxu3 %v9707_v25 }
 0x5aa   : > { %12245 = vst [vmem:[#allocation133_spill] sm:$0xff] %v9709_v36  ;;  %4207 = vmatmul.f32.gmra.mxu1 %v9707_v25  ;;  %4491 = vmatmul.f32.gmra.mxu0 %v9707_v25 }
 0x5ac   : > { %v3821_v35 = vpop.f32.mrf.mxu2  ;;  %v4030_v18 = vpop.f32.mrf.mxu3 }
 0x5ad   : > { %v3887_v2 = vsel %vm7265_vm9, %v3821_v35, 0.0  ;;  %v5515_v35 = vld [vmem:[#allocation6 + $0x468] sm:$0xff] }
 0x5ae   : > { %v3919_v21 = vrot.slane %v3887_v2, 7  ;;  %5520 = vmatpush.msrb.mxu2 %v5515_v35 }
 0x5af   : > { %v9719_v43 = vpop.f32.mrf.mxu1  ;;  %v9721_v22 = vpop.f32.mrf.mxu0 }
 0x5b0   : > { %12247 = vst [vmem:[#allocation51_spill] sm:$0xff] %v9721_v22  ;;  %v3952_v36 = vsel %vm12243_vm10, %v3918_v58, %v3919_v21  ;;  %v3629_v58 = vmul.f32 0.01, %v9313_v19  ;;  %vm3597_vm10 = vcmp.gt.f32.partialorder %v9313_v19, 0.0 }
 0x5b1   : > { %v9725_v31 = vadd.f32 %v4030_v18, %v3952_v36  ;;  %4566 = vmatmul.f32.vlgmr.msra.gmra.mxu2 %v9315_v11  ;;  %4824 = vmatmul.f32.vlgmr.msrb.gmra.mxu3 %v9315_v11 }
 0x5b2   : > { %4494 = vmatmul.f32.gmra.mxu0 %v9728_v24  ;;  %5114 = vmatmul.f32.vlgmr.msra.gmra.mxu1 %v9334_v12  ;;  %v9745_v13 = vsel %vm3597_vm10, %v9313_v19, %v3629_v58  ;;  %vm12255_vm10 = vmmov %vm12249_vm8 }
 0x5b3   : > { %12248 = vst [vmem:[#allocation66_spill] sm:$0xff] %v9725_v31 }
 0x5b4   : > { %v3824_v2 = vpop.f32.mrf.mxu2  ;;  %v4033_v40 = vpop.f32.mrf.mxu3 }
 0x5b5   : > { %v3920_v22 = vrot.slane %v3824_v2, 7 }
 0x5b7   : > { %v3951_v23 = vsel %vm12249_vm8, %v3919_v21, %v3920_v22  ;;  %v9738_v36 = vpop.f32.mrf.mxu1  ;;  %v9740_v18 = vpop.f32.mrf.mxu0 }
 0x5b8   : > { %12250 = vst [vmem:[#allocation42_spill] sm:$0xff] %v9738_v36  ;;  %v9742_v11 = vadd.f32 %v4033_v40, %v3951_v23 }
 0x5b9   : > { %12251 = vst [vmem:[#allocation54_spill] sm:$0xff] %v9740_v18  ;;  %4569 = vmatmul.f32.gmra.mxu2 %v9325_v7  ;;  %4827 = vmatmul.f32.gmra.mxu3 %v9325_v7  ;;  %v5514_v7 = vld [vmem:[#allocation6 + $0x460] sm:$0xff] }
 0x5ba   : > { %12252 = vst [vmem:[#allocation56_spill] sm:$0xff] %v9742_v11  ;;  %4497 = vmatmul.f32.gmra.mxu0 %v9745_v13  ;;  %5117 = vmatmul.f32.gmra.mxu1 %v9343_v14 }
 0x5bb   : > { %5521 = vmatpush.msrb.mxu2 %v5514_v7 }
 0x5bc   : > { %v3827_v35 = vpop.f32.mrf.mxu2  ;;  %v4036_v2 = vpop.f32.mrf.mxu3 }
 0x5bd   : > { %v3889_v36 = vsel %vm7290_vm11, %v3827_v35, 0.0 }
 0x5be   : > { %v3921_v31 = vrot.slane %v3889_v36, 7 }
 0x5bf   : > { %v9753_v18 = vpop.f32.mrf.mxu1  ;;  %v9755_v40 = vpop.f32.mrf.mxu0 }
 0x5c0   : > { %12254 = vst [vmem:[#allocation49_spill] sm:$0xff] %v9755_v40  ;;  %v3950_v19 = vsel %vm12255_vm10, %v3920_v22, %v3921_v31  ;;  %vm12262_vm10 = vmmov %vm12249_vm8 }
 0x5c1   : > { %v9759_v58 = vadd.f32 %v4036_v2, %v3950_v19  ;;  %4572 = vmatmul.f32.gmra.mxu2 %v9334_v12  ;;  %4830 = vmatmul.f32.gmra.mxu3 %v9334_v12 }
 0x5c2   : > { %5120 = vmatmul.f32.gmra.mxu1 %v9352_v54  ;;  %5276 = vmatmul.f32.vlgmr.msra.gmra.mxu0 %v9334_v12 }
 0x5c3   : > { %12256 = vst [vmem:[#allocation37_spill] sm:$0xff] %v9759_v58 }
 0x5c4   : > { %v3830_v23 = vpop.f32.mrf.mxu2  ;;  %v4039_v36 = vpop.f32.mrf.mxu3 }
 0x5c5   : > { %v3922_v35 = vrot.slane %v3830_v23, 7  ;;  %v5513_v23 = vld [vmem:[#allocation6 + $0x458] sm:$0xff] }
 0x5c6   : > { %5522 = vmatpush.msrb.mxu2 %v5513_v23 }
 0x5c7   : > { %v3949_v21 = vsel %vm12249_vm8, %v3921_v31, %v3922_v35  ;;  %v9767_v40 = vpop.f32.mrf.mxu1  ;;  %v9769_v22 = vpop.f32.mrf.mxu0 }
 0x5c8   : > { %12257 = vst [vmem:[#allocation137_spill] sm:$0xff] %v9767_v40  ;;  %v9771_v2 = vadd.f32 %v4039_v36, %v3949_v21 }
 0x5c9   : > { %4575 = vmatmul.f32.gmra.mxu2 %v9343_v14  ;;  %4833 = vmatmul.f32.gmra.mxu3 %v9343_v14 }
 0x5ca   : > { %12258 = vst [vmem:[#allocation70_spill] sm:$0xff] %v9771_v2  ;;  %5123 = vmatmul.f32.gmra.mxu1 %v9361_v44  ;;  %5279 = vmatmul.f32.gmra.mxu0 %v9343_v14 }
 0x5cc   : > { %v3833_v19 = vpop.f32.mrf.mxu2  ;;  %v4042_v7 = vpop.f32.mrf.mxu3 }
 0x5cd   : > { %v3891_v58 = vsel %vm7337_vm13, %v3833_v19, 0.0 }
 0x5ce   : > { %v3923_v31 = vrot.slane %v3891_v58, 7 }
 0x5cf   : > { %v9779_v11 = vpop.f32.mrf.mxu1  ;;  %v9781_v40 = vpop.f32.mrf.mxu0 }
 0x5d0   : > { %12260 = vst [vmem:[#allocation75_spill] sm:$0xff] %v9779_v11  ;;  %v3948_v21 = vsel %vm12262_vm10, %v3922_v35, %v3923_v31  ;;  %vm12269_vm10 = vmmov %vm12249_vm8 }
 0x5d1   : > { %12261 = vst [vmem:[#allocation142_spill] sm:$0xff] %v9781_v40  ;;  %v9785_v36 = vadd.f32 %v4042_v7, %v3948_v21  ;;  %4578 = vmatmul.f32.gmra.mxu2 %v9352_v54  ;;  %4836 = vmatmul.f32.gmra.mxu3 %v9352_v54 }
 0x5d2   : > { %5126 = vmatmul.f32.gmra.mxu1 %v9370_v51  ;;  %5282 = vmatmul.f32.gmra.mxu0 %v9352_v54 }
 0x5d3   : > { %12263 = vst [vmem:[#allocation20_spill] sm:$0xff] %v9785_v36 }
 0x5d4   : > { %v3836_v58 = vpop.f32.mrf.mxu2  ;;  %v4045_v19 = vpop.f32.mrf.mxu3 }
 0x5d5   : > { %v3924_v2 = vrot.slane %v3836_v58, 7  ;;  %v5512_v58 = vld [vmem:[#allocation6 + $0x450] sm:$0xff] }
 0x5d6   : > { %5523 = vmatpush.msrb.mxu2 %v5512_v58 }
 0x5d7   : > { %v3947_v40 = vsel %vm12249_vm8, %v3923_v31, %v3924_v2  ;;  %v9793_v11 = vpop.f32.mrf.mxu1  ;;  %v9795_v35 = vpop.f32.mrf.mxu0 }
 0x5d8   : > { %12264 = vst [vmem:[#allocation149_spill] sm:$0xff] %v9793_v11  ;;  %v9797_v7 = vadd.f32 %v4045_v19, %v3947_v40 }
 0x5d9   : > { %4581 = vmatmul.f32.gmra.mxu2 %v9361_v44  ;;  %4839 = vmatmul.f32.gmra.mxu3 %v9361_v44 }
 0x5da   : > { %12265 = vst [vmem:[#allocation130_spill] sm:$0xff] %v9797_v7  ;;  %5129 = vmatmul.f32.gmra.mxu1 %v9376_v30  ;;  %5285 = vmatmul.f32.gmra.mxu0 %v9361_v44 }
 0x5dc   : > { %v3839_v23 = vpop.f32.mrf.mxu2  ;;  %v4048_v21 = vpop.f32.mrf.mxu3 }
 0x5dd   : > { %v3893_v36 = vsel %vm7380_vm14, %v3839_v23, 0.0 }
 0x5de   : > { %v3925_v31 = vrot.slane %v3893_v36, 7 }
 0x5df   : > { %v9805_v54 = vpop.f32.mrf.mxu1  ;;  %v9807_v11 = vpop.f32.mrf.mxu0 }
 0x5e0   : > { %12267 = vst [vmem:[#allocation30_spill] sm:$0xff] %v9805_v54  ;;  %v3946_v40 = vsel %vm12269_vm10, %v3924_v2, %v3925_v31  ;;  %vm12276_vm10 = vmmov %vm12249_vm8 }
 0x5e1   : > { %12268 = vst [vmem:[#allocation134_spill] sm:$0xff] %v9807_v11  ;;  %v9811_v19 = vadd.f32 %v4048_v21, %v3946_v40  ;;  %4584 = vmatmul.f32.gmra.mxu2 %v9370_v51  ;;  %4842 = vmatmul.f32.gmra.mxu3 %v9370_v51 }
 0x5e2   : > { %5132 = vmatmul.f32.gmra.mxu1 %v9385_v60  ;;  %5288 = vmatmul.f32.gmra.mxu0 %v9370_v51 }
 0x5e3   : > { %12270 = vst [vmem:[#allocation69_spill] sm:$0xff] %v9811_v19 }
 0x5e4   : > { %v3842_v36 = vpop.f32.mrf.mxu2  ;;  %v4051_v23 = vpop.f32.mrf.mxu3 }
 0x5e5   : > { %v3926_v7 = vrot.slane %v3842_v36, 7  ;;  %v5511_v36 = vld [vmem:[#allocation6 + $0x448] sm:$0xff] }
 0x5e6   : > { %5524 = vmatpush.msrb.mxu2 %v5511_v36 }
 0x5e7   : > { %v3945_v11 = vsel %vm12249_vm8, %v3925_v31, %v3926_v7  ;;  %v9819_v54 = vpop.f32.mrf.mxu1  ;;  %v9821_v2 = vpop.f32.mrf.mxu0 }
 0x5e8   : > { %12271 = vst [vmem:[#allocation136_spill] sm:$0xff] %v9819_v54  ;;  %v9823_v21 = vadd.f32 %v4051_v23, %v3945_v11 }
 0x5e9   : > { %4587 = vmatmul.f32.gmra.mxu2 %v9376_v30  ;;  %4845 = vmatmul.f32.gmra.mxu3 %v9376_v30 }
 0x5ea   : > { %12272 = vst [vmem:[#allocation132_spill] sm:$0xff] %v9823_v21  ;;  %5135 = vmatmul.f32.gmra.mxu1 %v9394_v63  ;;  %5291 = vmatmul.f32.gmra.mxu0 %v9376_v30 }
 0x5ec   : > { %v3845_v58 = vpop.f32.mrf.mxu2  ;;  %v4054_v40 = vpop.f32.mrf.mxu3 }
 0x5ed   : > { %v3895_v19 = vsel %vm7415_vm15, %v3845_v58, 0.0 }
 0x5ee   : > { %v3927_v31 = vrot.slane %v3895_v19, 7 }
 0x5ef   : > { %v9831_v51 = vpop.f32.mrf.mxu1  ;;  %v9833_v54 = vpop.f32.mrf.mxu0 }
 0x5f0   : > { %12274 = vst [vmem:[#allocation138_spill] sm:$0xff] %v9831_v51  ;;  %v3944_v11 = vsel %vm12276_vm10, %v3926_v7, %v3927_v31  ;;  %vm12283_vm10 = vmmov %vm12249_vm8 }
 0x5f1   : > { %12275 = vst [vmem:[#allocation141_spill] sm:$0xff] %v9833_v54  ;;  %v9837_v23 = vadd.f32 %v4054_v40, %v3944_v11  ;;  %4590 = vmatmul.f32.gmra.mxu2 %v9385_v60  ;;  %4848 = vmatmul.f32.gmra.mxu3 %v9385_v60 }
 0x5f2   : > { %5138 = vmatmul.f32.gmra.mxu1 %v9403_v62  ;;  %5294 = vmatmul.f32.gmra.mxu0 %v9385_v60 }
 0x5f3   : > { %12277 = vst [vmem:[#allocation143_spill] sm:$0xff] %v9837_v23 }
 0x5f4   : > { %v3848_v19 = vpop.f32.mrf.mxu2  ;;  %v4057_v58 = vpop.f32.mrf.mxu3 }
 0x5f5   : > { %v3928_v21 = vrot.slane %v3848_v19, 7  ;;  %v5510_v19 = vld [vmem:[#allocation6 + $0x440] sm:$0xff] }
 0x5f6   : > { %5525 = vmatpush.msrb.mxu2 %v5510_v19 }
 0x5f7   : > { %v3943_v54 = vsel %vm12249_vm8, %v3927_v31, %v3928_v21  ;;  %v9845_v51 = vpop.f32.mrf.mxu1  ;;  %v9847_v7 = vpop.f32.mrf.mxu0 }
 0x5f8   : > { %12278 = vst [vmem:[#allocation139_spill] sm:$0xff] %v9845_v51  ;;  %v9849_v40 = vadd.f32 %v4057_v58, %v3943_v54  ;;  %5526 = vmatpush.msrb.mxu2 %v5509_v55 }
 0x5f9   : > { %4593 = vmatmul.f32.gmra.mxu2 %v9394_v63  ;;  %4851 = vmatmul.f32.gmra.mxu3 %v9394_v63 }
 0x5fa   : > { %12279 = vst [vmem:[#allocation81_spill] sm:$0xff] %v9849_v40  ;;  %5141 = vmatmul.f32.gmra.mxu1 %v9412_v49  ;;  %5297 = vmatmul.f32.gmra.mxu0 %v9394_v63 }
 0x5fb   : > { %5527 = vmatpush.msrb.mxu2 %v5508_v56 }
 0x5fc   : > { %v3851_v36 = vpop.f32.mrf.mxu2  ;;  %v4060_v11 = vpop.f32.mrf.mxu3 }
 0x5fd   : > { %v3897_v23 = vsel %vm12128_vm6, %v3851_v36, 0.0 }
 0x5fe   : > { %v3929_v31 = vrot.slane %v3897_v23, 7 }
 0x5ff   : > { %v9857_v60 = vpop.f32.mrf.mxu1  ;;  %v9859_v51 = vpop.f32.mrf.mxu0 }
 0x600   : > { %12281 = vst [vmem:[#allocation97_spill] sm:$0xff] %v9857_v60  ;;  %v3942_v54 = vsel %vm12283_vm10, %v3928_v21, %v3929_v31  ;;  %vm12289_vm10 = vmmov %vm12249_vm8 }
 0x601   : > { %12282 = vst [vmem:[#allocation92_spill] sm:$0xff] %v9859_v51  ;;  %v9863_v58 = vadd.f32 %v4060_v11, %v3942_v54  ;;  %4596 = vmatmul.f32.gmra.mxu2 %v9403_v62  ;;  %4854 = vmatmul.f32.gmra.mxu3 %v9403_v62 }
 0x602   : > { %5144 = vmatmul.f32.gmra.mxu1 %v9421_v53  ;;  %5300 = vmatmul.f32.gmra.mxu0 %v9403_v62 }
 0x603   : > { %12284 = vst [vmem:[#allocation145_spill] sm:$0xff] %v9863_v58 }
 0x604   : > { %v3854_v23 = vpop.f32.mrf.mxu2  ;;  %v4063_v36 = vpop.f32.mrf.mxu3 }
 0x605   : > { %v3930_v40 = vrot.slane %v3854_v23, 7 }
 0x607   : > { %v3941_v51 = vsel %vm12249_vm8, %v3929_v31, %v3930_v40  ;;  %v9871_v60 = vpop.f32.mrf.mxu1  ;;  %v9873_v21 = vpop.f32.mrf.mxu0 }
 0x608   : > { %12285 = vst [vmem:[#allocation123_spill] sm:$0xff] %v9871_v60  ;;  %v9875_v11 = vadd.f32 %v4063_v36, %v3941_v51 }
 0x609   : > { %4599 = vmatmul.f32.gmra.mxu2 %v9412_v49  ;;  %4857 = vmatmul.f32.gmra.mxu3 %v9412_v49 }
 0x60a   : > { %12286 = vst [vmem:[#allocation67_spill] sm:$0xff] %v9875_v11  ;;  %5147 = vmatmul.f32.gmra.mxu1 %v9430_v57  ;;  %5303 = vmatmul.f32.gmra.mxu0 %v9412_v49 }
 0x60c   : > { %v3857_v19 = vpop.f32.mrf.mxu2  ;;  %v4066_v54 = vpop.f32.mrf.mxu3 }
 0x60d   : > { %v3899_v23 = vsel %vm12151_vm12, %v3857_v19, 0.0 }
 0x60e   : > { %v3931_v31 = vrot.slane %v3899_v23, 7 }
 0x60f   : > { %v9883_v58 = vpop.f32.mrf.mxu1  ;;  %v9885_v60 = vpop.f32.mrf.mxu0 }
 0x610   : > { %12287 = vst [vmem:[#allocation24_spill] sm:$0xff] %v9883_v58  ;;  %v3940_v51 = vsel %vm12289_vm10, %v3930_v40, %v3931_v31  ;;  %vm12295_vm10 = vmmov %vm12249_vm8 }
 0x611   : > { %12288 = vst [vmem:[#allocation41_spill] sm:$0xff] %v9885_v60  ;;  %v9889_v36 = vadd.f32 %v4066_v54, %v3940_v51  ;;  %4602 = vmatmul.f32.gmra.mxu2 %v9421_v53  ;;  %4860 = vmatmul.f32.gmra.mxu3 %v9421_v53 }
 0x612   : > { %5150 = vmatmul.f32.gmra.mxu1 %v9441_v42  ;;  %5306 = vmatmul.f32.gmra.mxu0 %v9421_v53 }
 0x613   : > { %12290 = vst [vmem:[#allocation46_spill] sm:$0xff] %v9889_v36 }
 0x614   : > { %v3860_v19 = vpop.f32.mrf.mxu2  ;;  %v4069_v23 = vpop.f32.mrf.mxu3 }
 0x615   : > { %v3932_v11 = vrot.slane %v3860_v19, 7 }
 0x617   : > { %v3939_v60 = vsel %vm12249_vm8, %v3931_v31, %v3932_v11  ;;  %v9897_v58 = vpop.f32.mrf.mxu1  ;;  %v9899_v40 = vpop.f32.mrf.mxu0 }
 0x618   : > { %12291 = vst [vmem:[#allocation22_spill] sm:$0xff] %v9897_v58  ;;  %v9901_v54 = vadd.f32 %v4069_v23, %v3939_v60 }
 0x619   : > { %4605 = vmatmul.f32.gmra.mxu2 %v9430_v57  ;;  %4863 = vmatmul.f32.gmra.mxu3 %v9430_v57 }
 0x61a   : > { %12292 = vst [vmem:[#allocation108_spill] sm:$0xff] %v9901_v54  ;;  %5153 = vmatmul.f32.gmra.mxu1 %v9456_v46  ;;  %5309 = vmatmul.f32.gmra.mxu0 %v9430_v57 }
 0x61c   : > { %v3863_v51 = vpop.f32.mrf.mxu2  ;;  %v4072_v55 = vpop.f32.mrf.mxu3 }
 0x61d   : > { %v3901_v19 = vsel %vm12160_vm7, %v3863_v51, 0.0 }
 0x61e   : > { %v3933_v31 = vrot.slane %v3901_v19, 7 }
 0x61f   : > { %v9909_v36 = vpop.f32.mrf.mxu1  ;;  %v9911_v58 = vpop.f32.mrf.mxu0 }
 0x620   : > { %12293 = vst [vmem:[#allocation106_spill] sm:$0xff] %v9909_v36  ;;  %v3938_v60 = vsel %vm12295_vm10, %v3932_v11, %v3933_v31  ;;  %vm12304_vm10 = vmmov %vm12249_vm8 }
 0x621   : > { %12294 = vst [vmem:[#allocation29_spill] sm:$0xff] %v9911_v58  ;;  %v9915_v23 = vadd.f32 %v4072_v55, %v3938_v60  ;;  %4608 = vmatmul.f32.gmra.mxu2 %v9441_v42  ;;  %4866 = vmatmul.f32.gmra.mxu3 %v9441_v42 }
 0x622   : > { %5156 = vmatmul.f32.gmra.mxu1 %v9471_v15  ;;  %5312 = vmatmul.f32.gmra.mxu0 %v9441_v42 }
 0x623   : > { %12296 = vst [vmem:[#allocation77_spill] sm:$0xff] %v9915_v23 }
 0x624   : > { %v3866_v51 = vpop.f32.mrf.mxu2  ;;  %v4075_v19 = vpop.f32.mrf.mxu3 }
 0x625   : > { %v3934_v54 = vrot.slane %v3866_v51, 7  ;;  %v5507_v51 = vld [vmem:[#allocation6 + $0x428] sm:$0xff] }
 0x626   : > { %5528 = vmatpush.msrb.mxu2 %v5507_v51 }
 0x627   : > { %v3937_v58 = vsel %vm12249_vm8, %v3933_v31, %v3934_v54  ;;  %v9923_v36 = vpop.f32.mrf.mxu1  ;;  %v9925_v11 = vpop.f32.mrf.mxu0 }
 0x628   : > { %12297 = vst [vmem:[#allocation72_spill] sm:$0xff] %v9923_v36  ;;  %v9927_v55 = vadd.f32 %v4075_v19, %v3937_v58 }
 0x629   : > { %12298 = vst [vmem:[#allocation83_spill] sm:$0xff] %v9925_v11  ;;  %4611 = vmatmul.f32.gmra.mxu2 %v9456_v46  ;;  %4869 = vmatmul.f32.gmra.mxu3 %v9456_v46 }
 0x62a   : > { %12299 = vst [vmem:[#allocation95_spill] sm:$0xff] %v9927_v55  ;;  %5159 = vmatmul.f32.gmra.mxu1 %v9491_v5  ;;  %5315 = vmatmul.f32.gmra.mxu0 %v9456_v46 }
 0x62c   : > { %v3869_v56 = vpop.f32.mrf.mxu2  ;;  %v4078_v60 = vpop.f32.mrf.mxu3 }
 0x62d   : > { %v3903_v23 = vsel %vm7615_vm3, %v3869_v56, 0.0  ;;  %vm12314_vm3 = vcmp.lt.s32.totalorder %v6818_v32, 1 }
 0x62e   : > { %v9935_v31 = vrot.slane %v3903_v23, 7 }
 0x62f   : > { %v9937_v36 = vpop.f32.mrf.mxu0  ;;  %v9939_v11 = vpop.f32.mrf.mxu1 }
 0x630   : > { %12301 = vst [vmem:[#allocation115_spill] sm:$0xff] %v9935_v31  ;;  %v3936_v58 = vsel %vm12304_vm10, %v3934_v54, %v9935_v31  ;;  %v12308_v54 = vld [vmem:[#allocation129_spill] sm:$0xff] }
 0x631   : > { %12302 = vst [vmem:[#allocation76_spill] sm:$0xff] %v9937_v36  ;;  %v9944_v19 = vadd.f32 %v4078_v60, %v3936_v58  ;;  %4614 = vmatmul.f32.gmra.mxu2 %v9471_v15  ;;  %4872 = vmatmul.f32.gmra.mxu3 %v9471_v15  ;;  %vm12309_vm8 = vnez %v12308_v54 }
 0x632   : > { %12303 = vst [vmem:[#allocation91_spill] sm:$0xff] %v9939_v11  ;;  %5162 = vmatmul.f32.gmra.mxu1 %v9508_v28  ;;  %5318 = vmatmul.f32.gmra.mxu0 %v9471_v15  ;;  %v4213_v60 = vsel %vm12309_vm8, %v9466_v6, 0.0  ;;  %v4246_v6 = vrot.slane %v9486_v29, 1 }
 0x633   : > { %12305 = vst [vmem:[#allocation59_spill] sm:$0xff] %v9944_v19  ;;  %v12310_v19 = vld [vmem:[#allocation23_spill] sm:$0xff] }
 0x634   : > { %v9950_v23 = vpop.f32.mrf.mxu2  ;;  %v4825_v56 = vpop.f32.mrf.mxu3  ;;  %vm12311_vm10 = vnez %v12310_v19 }
 0x635   : > { %12306 = vst [vmem:[#allocation80_spill] sm:$0xff] %v9950_v23  ;;  %v4921_v55 = vsel %vm12311_vm10, %v4825_v56, 0.0  ;;  %v12313_v56 = vrot.slane %v9445_v33, 7  ;;  %vm12315_vm10 = vcmp.lt.s32.totalorder %v6818_v32, 7 }
 0x636   : > { %v9966_v46 = vrot.slane %v4921_v55, 1 }
 0x637   : > { %v9952_v11 = vpop.f32.mrf.mxu0  ;;  %v5118_v36 = vpop.f32.mrf.mxu1  ;;  %v3966_v19 = vsel %vm12314_vm3, %v12313_v56, %v9481_v20 }
 0x638   : > { %12307 = vst [vmem:[#allocation101_spill] sm:$0xff] %v9952_v11  ;;  %v4245_v11 = vrot.slane %v4213_v60, 1 }
 0x639   : > { %4617 = vmatmul.f32.gmra.mxu2 %v9491_v5  ;;  %4875 = vmatmul.f32.gmra.mxu3 %v9491_v5  ;;  %12312 = vst [vmem:[#allocation104_spill] sm:$0xff] %v9966_v46 }
 0x63a   : > { %5165 = vmatmul.f32.gmra.mxu1 %v9527_v52  ;;  %5321 = vmatmul.f32.gmra.mxu0 %v9491_v5  ;;  %v11437_v5 = vrot.slane %v9950_v23, 7 }
 0x63c   : > { %v4570_v31 = vpop.f32.mrf.mxu2  ;;  %v4828_v15 = vpop.f32.mrf.mxu3 }
 0x63d   : > { %v4664_v42 = vsel %vm12192_vm1, %v4570_v31, 0.0  ;;  %v4954_v58 = vrot.slane %v4828_v15, 1  ;;  %v12318_v31 = vrot.slane %v9453_v37, 1  ;;  %vm12319_vm1 = vmmov %vm12315_vm10 }
 0x63e   : > { %v4696_v51 = vrot.slane %v4664_v42, 7  ;;  %v3989_v42 = vadd.f32 %v9463_v26, %v3966_v19  ;;  %vm12320_vm7 = vmmov %vm12319_vm1  ;;  %v5506_v19 = vld [vmem:[#allocation6 + $0x420] sm:$0xff] }
 0x63f   : > { %v9979_v60 = vsel %vm12315_vm10, %v9966_v46, %v4954_v58  ;;  %v5121_v29 = vpop.f32.mrf.mxu1  ;;  %v9981_v55 = vpop.f32.mrf.mxu0  ;;  %v4304_v15 = vsel %vm12319_vm1, %v12318_v31, %v4245_v11  ;;  %v4303_v56 = vsel %vm12320_vm7, %v4245_v11, %v4246_v6  ;;  %v12321_v31 = vld [vmem:[#allocation11_spill] sm:$0xff]  ;;  %5529 = vmatpush.msrb.mxu2 %v5506_v19  ;;  %vm12323_vm7 = vmmov %vm12314_vm3 }
 0x640   : > { %12316 = vst [vmem:[#allocation96_spill] sm:$0xff] %v9979_v60  ;;  %v4757_v20 = vsel %vm12314_vm3, %v11437_v5, %v4696_v51  ;;  %v4308_v27 = vadd.f32 %v4304_v15, %v3989_v42  ;;  %vm12322_vm1 = vnez %v12321_v31  ;;  %v4309_v5 = vadd.f32 %v4303_v56, %v9493_v0  ;;  %vm12324_vm3 = vmmov %vm12315_vm10  ;;  %v12341_v31 = vld [vmem:[#allocation52_spill] sm:$0xff] }
 0x641   : > { %12317 = vst [vmem:[#allocation85_spill] sm:$0xff] %v9981_v55  ;;  %4620 = vmatmul.f32.gmra.mxu2 %v9508_v28  ;;  %4878 = vmatmul.f32.gmra.mxu3 %v9508_v28  ;;  %v4215_v55 = vsel %vm12322_vm1, %v9503_v17, 0.0 }
 0x642   : > { %5168 = vmatmul.f32.gmra.mxu1 %v9544_v34  ;;  %5324 = vmatmul.f32.gmra.mxu0 %v9508_v28  ;;  %v4502_v11 = vadd.f32 %v9488_v9, %v4308_v27  ;;  %v4247_v37 = vrot.slane %v4215_v55, 1  ;;  %v4503_v28 = vadd.f32 %v9505_v48, %v4309_v5 }
 0x644   : > { %v4573_v60 = vpop.f32.mrf.mxu2  ;;  %v4831_v26 = vpop.f32.mrf.mxu3  ;;  %v4760_v42 = vadd.f32 %v4757_v20, %v4502_v11  ;;  %v4302_v5 = vsel %vm12324_vm3, %v4246_v6, %v4247_v37 }
 0x645   : > { %v4697_v46 = vrot.slane %v4573_v60, 7  ;;  %v4923_v23 = vsel %vm12309_vm8, %v4831_v26, 0.0 }
 0x646   : > { %v4955_v15 = vrot.slane %v4923_v23, 1 }
 0x647   : > { %v4756_v17 = vsel %vm12323_vm7, %v4696_v51, %v4697_v46  ;;  %v5124_v33 = vpop.f32.mrf.mxu1  ;;  %v10008_v0 = vpop.f32.mrf.mxu0  ;;  %vm12325_vm7 = vmmov %vm12324_vm3 }
 0x648   : > { %v4761_v56 = vadd.f32 %v4756_v17, %v4503_v28  ;;  %v5014_v27 = vsel %vm12315_vm10, %v4954_v58, %v4955_v15  ;;  %v4248_v28 = vrot.slane %v9522_v61, 1  ;;  %v4310_v58 = vadd.f32 %v4302_v5, %v9512_v50 }
 0x649   : > { %v5018_v9 = vadd.f32 %v5014_v27, %v4760_v42  ;;  %4623 = vmatmul.f32.gmra.mxu2 %v9527_v52  ;;  %4881 = vmatmul.f32.gmra.mxu3 %v9527_v52  ;;  %vm12326_vm10 = vcmp.lt.s32.totalorder %v6818_v32, 1  ;;  %v12330_v27 = vld [vmem:[#allocation35_spill] sm:$0xff] }
 0x64a   : > { %5171 = vmatmul.f32.gmra.mxu1 %v9563_v45  ;;  %5327 = vmatmul.f32.gmra.mxu0 %v9527_v52  ;;  %v4504_v26 = vadd.f32 %v9524_v47, %v4310_v58  ;;  %v4301_v50 = vsel %vm12324_vm3, %v4247_v37, %v4248_v28  ;;  %v12328_v47 = vld [vmem:[#allocation82_spill] sm:$0xff]  ;;  %v5505_v37 = vld [vmem:[#allocation6 + $0x418] sm:$0xff] }
 0x64b   : > { %v10018_v48 = vadd.f32 %v5118_v36, %v5018_v9  ;;  %5530 = vmatpush.msrb.mxu2 %v5505_v37  ;;  %v12338_v37 = vld [vmem:[#allocation65_spill] sm:$0xff] }
 0x64c   : > { %v4576_v23 = vpop.f32.mrf.mxu2  ;;  %v4834_v51 = vpop.f32.mrf.mxu3 }
 0x64d   : > { %v4666_v60 = vsel %vm12196_vm4, %v4576_v23, 0.0  ;;  %v4956_v55 = vrot.slane %v4834_v51, 1 }
 0x64e   : > { %v4698_v20 = vrot.slane %v4666_v60, 7  ;;  %v12333_v60 = vld [vmem:[#allocation79_spill] sm:$0xff] }
 0x64f   : > { %v5013_v6 = vsel %vm12325_vm7, %v4955_v15, %v4956_v55  ;;  %v5127_v19 = vpop.f32.mrf.mxu1  ;;  %v10027_v11 = vpop.f32.mrf.mxu0  ;;  %v12329_v15 = vld [vmem:[#allocation128_spill] sm:$0xff]  ;;  %vm12331_vm7 = vnez %v12330_v27 }
 0x650   : > { %v4755_v36 = vsel %vm12326_vm10, %v4697_v46, %v4698_v20  ;;  %v5019_v42 = vadd.f32 %v5013_v6, %v4761_v56  ;;  %v4217_v9 = vsel %vm12331_vm7, %v12329_v15, 0.0  ;;  %v12332_v46 = vld [vmem:[#allocation43_spill] sm:$0xff]  ;;  %v12359_v27 = vld [vmem:[#allocation16_spill] sm:$0xff] }
 0x651   : > { %v4762_v61 = vadd.f32 %v4755_v36, %v4504_v26  ;;  %4626 = vmatmul.f32.gmra.mxu2 %v9544_v34  ;;  %4884 = vmatmul.f32.gmra.mxu3 %v9544_v34  ;;  %v4311_v56 = vadd.f32 %v4301_v50, %v12332_v46 }
 0x652   : > { %v10035_v17 = vadd.f32 %v5121_v29, %v5019_v42  ;;  %5174 = vmatmul.f32.gmra.mxu1 %v12328_v47  ;;  %5330 = vmatmul.f32.gmra.mxu0 %v9544_v34  ;;  %v4249_v29 = vrot.slane %v4217_v9, 1 }
 0x653   : > { %v4505_v26 = vadd.f32 %v12333_v60, %v4311_v56  ;;  %v12336_v56 = vld [vmem:[#allocation74_spill] sm:$0xff]  ;;  %v12339_v60 = vld [vmem:[#allocation44_spill] sm:$0xff] }
 0x654   : > { %12327 = vst [vmem:[#allocation103_spill] sm:$0xff] %v10035_v17  ;;  %v4579_v5 = vpop.f32.mrf.mxu2  ;;  %v4837_v23 = vpop.f32.mrf.mxu3 }
 0x655   : > { %v4699_v51 = vrot.slane %v4579_v5, 7  ;;  %v4925_v58 = vsel %vm12322_vm1, %v4837_v23, 0.0  ;;  %vm12335_vm1 = vmmov %vm12324_vm3 }
 0x656   : > { %v4957_v6 = vrot.slane %v4925_v58, 1  ;;  %v4300_v9 = vsel %vm12335_vm1, %v4248_v28, %v4249_v29  ;;  %v4250_v58 = vrot.slane %v12338_v37, 1 }
 0x657   : > { %v4754_v36 = vsel %vm12326_vm10, %v4698_v20, %v4699_v51  ;;  %v5130_v42 = vpop.f32.mrf.mxu1  ;;  %v10048_v1 = vpop.f32.mrf.mxu0 }
 0x658   : > { %12334 = vst [vmem:[#allocation63_spill] sm:$0xff] %v10048_v1  ;;  %v4763_v15 = vadd.f32 %v4754_v36, %v4505_v26  ;;  %v5012_v50 = vsel %vm12324_vm3, %v4956_v55, %v4957_v6  ;;  %v4312_v55 = vadd.f32 %v4300_v9, %v12339_v60  ;;  %vm12343_vm3 = vmmov %vm12335_vm1 }
 0x659   : > { %v5020_v46 = vadd.f32 %v5012_v50, %v4762_v61  ;;  %4629 = vmatmul.f32.gmra.mxu2 %v9563_v45  ;;  %4887 = vmatmul.f32.gmra.mxu3 %v9563_v45  ;;  %v4299_v9 = vsel %vm12343_vm3, %v4249_v29, %v4250_v58  ;;  %v5504_v29 = vld [vmem:[#allocation6 + $0x410] sm:$0xff] }
 0x65a   : > { %5177 = vmatmul.f32.gmra.mxu1 %v12336_v56  ;;  %5333 = vmatmul.f32.gmra.mxu0 %v9563_v45  ;;  %v4506_v1 = vadd.f32 %v12341_v31, %v4312_v55  ;;  %v12345_v31 = vld [vmem:[#allocation71_spill] sm:$0xff] }
 0x65b   : > { %v10058_v20 = vadd.f32 %v5124_v33, %v5020_v46  ;;  %5531 = vmatpush.msrb.mxu2 %v5504_v29 }
 0x65c   : > { %v4582_v5 = vpop.f32.mrf.mxu2  ;;  %v4840_v23 = vpop.f32.mrf.mxu3 }
 0x65d   : > { %12337 = vst [vmem:[#allocation105_spill] sm:$0xff] %v10058_v20  ;;  %v4668_v26 = vsel %vm12201_vm5, %v4582_v5, 0.0  ;;  %v4958_v36 = vrot.slane %v4840_v23, 1  ;;  %v12347_v23 = vld [vmem:[#allocation73_spill] sm:$0xff] }
 0x65e   : > { %v4700_v50 = vrot.slane %v4668_v26, 7 }
 0x65f   : > { %v5011_v28 = vsel %vm12335_vm1, %v4957_v6, %v4958_v36  ;;  %v5133_v17 = vpop.f32.mrf.mxu1  ;;  %v10067_v45 = vpop.f32.mrf.mxu0  ;;  %v12346_v6 = vld [vmem:[#allocation53_spill] sm:$0xff]  ;;  %vm12348_vm1 = vnez %v12347_v23 }
 0x660   : > { %12342 = vst [vmem:[#allocation61_spill] sm:$0xff] %v10067_v45  ;;  %v4753_v33 = vsel %vm12326_vm10, %v4699_v51, %v4700_v50  ;;  %v5021_v46 = vadd.f32 %v5011_v28, %v4763_v15  ;;  %v4219_v60 = vsel %vm12348_vm1, %v12346_v6, 0.0  ;;  %v12349_v51 = vld [vmem:[#allocation27_spill] sm:$0xff] }
 0x661   : > { %v4764_v37 = vadd.f32 %v4753_v33, %v4506_v1  ;;  %4632 = vmatmul.f32.gmra.mxu2 %v12328_v47  ;;  %4890 = vmatmul.f32.gmra.mxu3 %v12328_v47  ;;  %v4313_v15 = vadd.f32 %v4299_v9, %v12349_v51  ;;  %v12350_v33 = vld [vmem:[#allocation84_spill] sm:$0xff] }
 0x662   : > { %v10075_v5 = vadd.f32 %v5127_v19, %v5021_v46  ;;  %5180 = vmatmul.f32.gmra.mxu1 %v12345_v31  ;;  %5336 = vmatmul.f32.gmra.mxu0 %v12328_v47  ;;  %v4251_v19 = vrot.slane %v4219_v60, 1 }
 0x663   : > { %v4507_v46 = vadd.f32 %v12350_v33, %v4313_v15  ;;  %v12353_v15 = vld [vmem:[#allocation47_spill] sm:$0xff] }
 0x664   : > { %12344 = vst [vmem:[#allocation113_spill] sm:$0xff] %v10075_v5  ;;  %v4585_v55 = vpop.f32.mrf.mxu2  ;;  %v4843_v26 = vpop.f32.mrf.mxu3 }
 0x665   : > { %v4701_v1 = vrot.slane %v4585_v55, 7  ;;  %v4927_v28 = vsel %vm12331_vm7, %v4843_v26, 0.0  ;;  %vm12352_vm7 = vmmov %vm12343_vm3 }
 0x666   : > { %v4959_v61 = vrot.slane %v4927_v28, 1  ;;  %v4298_v60 = vsel %vm12352_vm7, %v4250_v58, %v4251_v19  ;;  %v12356_v28 = vld [vmem:[#allocation78_spill] sm:$0xff]  ;;  %vm12360_vm7 = vmmov %vm12343_vm3 }
 0x667   : > { %v4752_v5 = vsel %vm12326_vm10, %v4700_v50, %v4701_v1  ;;  %v5136_v45 = vpop.f32.mrf.mxu1  ;;  %v10088_v20 = vpop.f32.mrf.mxu0  ;;  %vm12363_vm5 = vmmov %vm12360_vm7 }
 0x668   : > { %12351 = vst [vmem:[#allocation100_spill] sm:$0xff] %v10088_v20  ;;  %v4765_v6 = vadd.f32 %v4752_v5, %v4507_v46  ;;  %v5010_v9 = vsel %vm12343_vm3, %v4958_v36, %v4959_v61  ;;  %v12355_v5 = vld [vmem:[#allocation58_spill] sm:$0xff]  ;;  %v4314_v36 = vadd.f32 %v4298_v60, %v12356_v28  ;;  %vm12362_vm3 = vcmp.lt.s32.totalorder %v6818_v32, 1 }
 0x669   : > { %v5022_v51 = vadd.f32 %v5010_v9, %v4764_v37  ;;  %4635 = vmatmul.f32.gmra.mxu2 %v12336_v56  ;;  %4893 = vmatmul.f32.gmra.mxu3 %v12336_v56  ;;  %v4252_v29 = vrot.slane %v12355_v5, 1  ;;  %v12357_v37 = vld [vmem:[#allocation45_spill] sm:$0xff] }
 0x66a   : > { %5183 = vmatmul.f32.gmra.mxu1 %v12353_v15  ;;  %5339 = vmatmul.f32.gmra.mxu0 %v12336_v56  ;;  %vm12358_vm10 = vnez %v12357_v37  ;;  %v4508_v20 = vadd.f32 %v12359_v27, %v4314_v36  ;;  %v12365_v27 = vld [vmem:[#allocation87_spill] sm:$0xff] }
 0x66b   : > { %v10098_v50 = vadd.f32 %v5130_v42, %v5022_v51  ;;  %v4297_v60 = vsel %vm12363_vm5, %v4251_v19, %v4252_v29  ;;  %v5503_v19 = vld [vmem:[#allocation6 + $0x408] sm:$0xff]  ;;  %vm12370_vm5 = vmmov %vm12362_vm3 }
 0x66c   : > { %v4588_v55 = vpop.f32.mrf.mxu2  ;;  %v4846_v26 = vpop.f32.mrf.mxu3  ;;  %5532 = vmatpush.msrb.mxu2 %v5503_v19  ;;  %v12375_v19 = vld [vmem:[#allocation135_spill] sm:$0xff] }
 0x66d   : > { %12354 = vst [vmem:[#allocation110_spill] sm:$0xff] %v10098_v50  ;;  %v4670_v33 = vsel %vm12358_vm10, %v4588_v55, 0.0  ;;  %v4960_v46 = vrot.slane %v4846_v26, 1 }
 0x66e   : > { %v4702_v9 = vrot.slane %v4670_v33, 7 }
 0x66f   : > { %v5009_v58 = vsel %vm12360_vm7, %v4959_v61, %v4960_v46  ;;  %v5139_v47 = vpop.f32.mrf.mxu1  ;;  %v10107_v56 = vpop.f32.mrf.mxu0  ;;  %v12366_v61 = vld [vmem:[#allocation150_spill] sm:$0xff] }
 0x670   : > { %12361 = vst [vmem:[#allocation127_spill] sm:$0xff] %v10107_v56  ;;  %v4751_v42 = vsel %vm12362_vm3, %v4701_v1, %v4702_v9  ;;  %v5023_v51 = vadd.f32 %v5009_v58, %v4765_v6  ;;  %vm12367_vm7 = vnez %v12366_v61  ;;  %v12368_v1 = vld [vmem:[#allocation62_spill] sm:$0xff]  ;;  %v12369_v58 = vld [vmem:[#allocation17_spill] sm:$0xff]  ;;  %vm12371_vm3 = vcmp.lt.s32.totalorder %v6818_v32, 7 }
 0x671   : > { %v4766_v5 = vadd.f32 %v4751_v42, %v4508_v20  ;;  %4638 = vmatmul.f32.gmra.mxu2 %v12345_v31  ;;  %4896 = vmatmul.f32.gmra.mxu3 %v12345_v31  ;;  %v4221_v26 = vsel %vm12367_vm7, %v12365_v27, 0.0  ;;  %v4315_v6 = vadd.f32 %v4297_v60, %v12368_v1 }
 0x672   : > { %v10115_v55 = vadd.f32 %v5133_v17, %v5023_v51  ;;  %5186 = vmatmul.f32.gmra.mxu1 %v9652_v59  ;;  %5342 = vmatmul.f32.gmra.mxu0 %v12345_v31  ;;  %v4253_v17 = vrot.slane %v4221_v26, 1 }
 0x673   : > { %v4509_v42 = vadd.f32 %v12369_v58, %v4315_v6 }
 0x674   : > { %12364 = vst [vmem:[#allocation89_spill] sm:$0xff] %v10115_v55  ;;  %v4591_v28 = vpop.f32.mrf.mxu2  ;;  %v4849_v36 = vpop.f32.mrf.mxu3 }
 0x675   : > { %v4703_v20 = vrot.slane %v4591_v28, 7  ;;  %v4929_v33 = vsel %vm12348_vm1, %v4849_v36, 0.0  ;;  %vm12372_vm1 = vmmov %vm12371_vm3 }
 0x676   : > { %v4961_v51 = vrot.slane %v4929_v33, 1  ;;  %v4296_v26 = vsel %vm12372_vm1, %v4252_v29, %v4253_v17 }
 0x677   : > { %v4750_v55 = vsel %vm12370_vm5, %v4702_v9, %v4703_v20  ;;  %v5142_v56 = vpop.f32.mrf.mxu1  ;;  %v5298_v50 = vpop.f32.mrf.mxu0 }
 0x678   : > { %v4767_v27 = vadd.f32 %v4750_v55, %v4509_v42  ;;  %v5008_v60 = vsel %vm12371_vm3, %v4960_v46, %v4961_v51  ;;  %v12374_v55 = vld [vmem:[#allocation39_spill] sm:$0xff]  ;;  %v4316_v46 = vadd.f32 %v4296_v26, %v12375_v19  ;;  %v5380_v42 = vsel %vm12358_vm10, %v5298_v50, 0.0  ;;  %vm12378_vm3 = vmmov %vm12372_vm1  ;;  %v12380_v50 = vld [vmem:[#allocation28_spill] sm:$0xff] }
 0x679   : > { %v5024_v1 = vadd.f32 %v5008_v60, %v4766_v5  ;;  %4641 = vmatmul.f32.gmra.mxu2 %v12353_v15  ;;  %4899 = vmatmul.f32.gmra.mxu3 %v12353_v15  ;;  %v4254_v36 = vrot.slane %v12374_v55, 1  ;;  %v12377_v60 = vld [vmem:[#allocation131_spill] sm:$0xff]  ;;  %vm12381_vm10 = vnez %v12380_v50 }
 0x67a   : > { %5189 = vmatmul.f32.gmra.mxu1 %v9671_v3  ;;  %5345 = vmatmul.f32.gmra.mxu0 %v12353_v15  ;;  %v4510_v23 = vadd.f32 %v12377_v60, %v4316_v46 }
 0x67b   : > { %v10136_v6 = vadd.f32 %v5136_v45, %v5024_v1 }
 0x67c   : > { %v4594_v9 = vpop.f32.mrf.mxu2  ;;  %v4852_v28 = vpop.f32.mrf.mxu3 }
 0x67d   : > { %12373 = vst [vmem:[#allocation88_spill] sm:$0xff] %v10136_v6  ;;  %v4672_v33 = vsel %vm12223_vm2, %v4594_v9, 0.0  ;;  %v4962_v58 = vrot.slane %v4852_v28, 1  ;;  %v4295_v9 = vsel %vm12378_vm3, %v4253_v17, %v4254_v36  ;;  %v10151_v28 = vrot.slane %v5380_v42, 7  ;;  %v12383_v17 = vld [vmem:[#allocation14_spill] sm:$0xff] }
 0x67e   : > { %v4704_v29 = vrot.slane %v4672_v33, 7  ;;  %v5502_v33 = vld [vmem:[#allocation6 + $0x400] sm:$0xff] }
 0x67f   : > { %v5007_v45 = vsel %vm12372_vm1, %v4961_v51, %v4962_v58  ;;  %v5145_v1 = vpop.f32.mrf.mxu1  ;;  %v5301_v6 = vpop.f32.mrf.mxu0  ;;  %12379 = vst [vmem:[#allocation111_spill] sm:$0xff] %v10151_v28  ;;  %v4223_v51 = vsel %vm12381_vm10, %v9647_v10, 0.0  ;;  %vm12382_vm1 = vmmov %vm12370_vm5  ;;  %5533 = vmatpush.msrb.mxu2 %v5502_v33  ;;  %v12388_v33 = vld [vmem:[#allocation147_spill] sm:$0xff] }
 0x680   : > { %v4749_v55 = vsel %vm12370_vm5, %v4703_v20, %v4704_v29  ;;  %v5025_v15 = vadd.f32 %v5007_v45, %v4767_v27  ;;  %v5413_v26 = vrot.slane %v5301_v6, 7  ;;  %v4317_v27 = vadd.f32 %v4295_v9, %v12383_v17  ;;  %vm12385_vm5 = vmmov %vm12382_vm1 }
 0x681   : > { %v4768_v37 = vadd.f32 %v4749_v55, %v4510_v23  ;;  %4644 = vmatmul.f32.gmra.mxu2 %v9652_v59  ;;  %4902 = vmatmul.f32.gmra.mxu3 %v9652_v59  ;;  %v4255_v42 = vrot.slane %v4223_v51, 1 }
 0x682   : > { %v5219_v19 = vadd.f32 %v5139_v47, %v5025_v15  ;;  %5192 = vmatmul.f32.gmra.mxu1 %v9688_v38  ;;  %5348 = vmatmul.f32.gmra.mxu0 %v9652_v59  ;;  %v5460_v20 = vsel %vm12382_vm1, %v10151_v28, %v5413_v26  ;;  %v12384_v47 = vld [vmem:[#allocation57_spill] sm:$0xff]  ;;  %vm12386_vm1 = vmmov %vm12378_vm3 }
 0x683   : > { %v4511_v15 = vadd.f32 %v12384_v47, %v4317_v27  ;;  %v12387_v27 = vld [vmem:[#allocation93_spill] sm:$0xff] }
 0x684   : > { %v10164_v23 = vadd.f32 %v5460_v20, %v5219_v19  ;;  %v4597_v6 = vpop.f32.mrf.mxu2  ;;  %v4855_v46 = vpop.f32.mrf.mxu3  ;;  %v4294_v20 = vsel %vm12386_vm1, %v4254_v36, %v4255_v42  ;;  %v4256_v36 = vrot.slane %v9666_v41, 1 }
 0x685   : > { %v4705_v60 = vrot.slane %v4597_v6, 7  ;;  %v4931_v10 = vsel %vm12367_vm7, %v4855_v46, 0.0  ;;  %v4318_v5 = vadd.f32 %v4294_v20, %v12387_v27 }
 0x686   : > { %v4963_v45 = vrot.slane %v4931_v10, 1 }
 0x687   : > { %v4748_v55 = vsel %vm12385_vm5, %v4704_v29, %v4705_v60  ;;  %v5148_v28 = vpop.f32.mrf.mxu1  ;;  %v5304_v59 = vpop.f32.mrf.mxu0 }
 0x688   : > { %v4769_v9 = vadd.f32 %v4748_v55, %v4511_v15  ;;  %v5006_v19 = vsel %vm12378_vm3, %v4962_v58, %v4963_v45  ;;  %v5382_v51 = vsel %vm12223_vm2, %v5304_v59, 0.0  ;;  %vm12389_vm2 = vnez %v12388_v33  ;;  %vm12390_vm3 = vmmov %vm12386_vm1 }
 0x689   : > { %v5026_v17 = vadd.f32 %v5006_v19, %v4768_v37  ;;  %v5414_v6 = vrot.slane %v5382_v51, 7  ;;  %4647 = vmatmul.f32.gmra.mxu2 %v9671_v3  ;;  %4905 = vmatmul.f32.gmra.mxu3 %v9671_v3  ;;  %v4512_v55 = vadd.f32 %v9668_v8, %v4318_v5  ;;  %vm12391_vm1 = vmmov %vm12385_vm5  ;;  %v12393_v8 = vld [vmem:[#allocation34_spill] sm:$0xff] }
 0x68a   : > { %5195 = vmatmul.f32.gmra.mxu1 %v9707_v25  ;;  %5351 = vmatmul.f32.gmra.mxu0 %v9671_v3  ;;  %vm12394_vm7 = vnez %v12393_v8 }
 0x68b   : > { %v5220_v29 = vadd.f32 %v5142_v56, %v5026_v17  ;;  %v5459_v58 = vsel %vm12385_vm5, %v5413_v26, %v5414_v6  ;;  %vm12392_vm5 = vmmov %vm12390_vm3 }
 0x68c   : > { %v4600_v59 = vpop.f32.mrf.mxu2  ;;  %v4858_v46 = vpop.f32.mrf.mxu3  ;;  %v4293_v41 = vsel %vm12392_vm5, %v4255_v42, %v4256_v36 }
 0x68d   : > { %v10185_v37 = vadd.f32 %v5459_v58, %v5220_v29  ;;  %v4674_v10 = vsel %vm12389_vm2, %v4600_v59, 0.0  ;;  %v4964_v47 = vrot.slane %v4858_v46, 1  ;;  %v4225_v58 = vsel %vm12394_vm7, %v9683_v16, 0.0 }
 0x68e   : > { %v4706_v15 = vrot.slane %v4674_v10, 7  ;;  %v4257_v46 = vrot.slane %v4225_v58, 1 }
 0x68f   : > { %v5005_v56 = vsel %vm12390_vm3, %v4963_v45, %v4964_v47  ;;  %v5151_v19 = vpop.f32.mrf.mxu1  ;;  %v5307_v26 = vpop.f32.mrf.mxu0  ;;  %vm12395_vm3 = vmmov %vm12391_vm1 }
 0x690   : > { %v4747_v51 = vsel %vm12391_vm1, %v4705_v60, %v4706_v15  ;;  %v5027_v20 = vadd.f32 %v5005_v56, %v4769_v9  ;;  %v5415_v17 = vrot.slane %v5307_v26, 7  ;;  %v12396_v60 = vld [vmem:[#allocation19_spill] sm:$0xff] }
 0x691   : > { %v4770_v29 = vadd.f32 %v4747_v51, %v4512_v55  ;;  %4650 = vmatmul.f32.gmra.mxu2 %v9688_v38  ;;  %4908 = vmatmul.f32.gmra.mxu3 %v9688_v38  ;;  %v4319_v9 = vadd.f32 %v4293_v41, %v12396_v60 }
 0x692   : > { %v5221_v45 = vadd.f32 %v5145_v1, %v5027_v20  ;;  %v5458_v27 = vsel %vm12395_vm3, %v5414_v6, %v5415_v17  ;;  %5198 = vmatmul.f32.gmra.mxu1 %v9728_v24  ;;  %5354 = vmatmul.f32.gmra.mxu0 %v9688_v38  ;;  %vm12397_vm3 = vmmov %vm12392_vm5 }
 0x693   : > { %v4513_v16 = vadd.f32 %v9685_v39, %v4319_v9  ;;  %v4292_v58 = vsel %vm12397_vm3, %v4256_v36, %v4257_v46  ;;  %v4258_v36 = vrot.slane %v9702_v4, 1 }
 0x694   : > { %v10206_v42 = vadd.f32 %v5458_v27, %v5221_v45  ;;  %v4603_v5 = vpop.f32.mrf.mxu2  ;;  %v4861_v59 = vpop.f32.mrf.mxu3 }
 0x695   : > { %v4707_v10 = vrot.slane %v4603_v5, 7  ;;  %v4933_v55 = vsel %vm12381_vm10, %v4861_v59, 0.0 }
 0x696   : > { %v4965_v1 = vrot.slane %v4933_v55, 1 }
 0x697   : > { %v4746_v6 = vsel %vm12391_vm1, %v4706_v15, %v4707_v10  ;;  %v5154_v56 = vpop.f32.mrf.mxu1  ;;  %v5310_v26 = vpop.f32.mrf.mxu0  ;;  %v12398_v15 = vld [vmem:[#allocation144_spill] sm:$0xff] }
 0x698   : > { %v4771_v51 = vadd.f32 %v4746_v6, %v4513_v16  ;;  %v5004_v20 = vsel %vm12392_vm5, %v4964_v47, %v4965_v1  ;;  %v5384_v41 = vsel %vm12389_vm2, %v5310_v26, 0.0  ;;  %v4320_v33 = vadd.f32 %v4292_v58, %v12398_v15  ;;  %v12401_v6 = vld [vmem:[#allocation140_spill] sm:$0xff]  ;;  %vm12402_vm2 = vmmov %vm12397_vm3 }
 0x699   : > { %v5028_v45 = vadd.f32 %v5004_v20, %v4770_v29  ;;  %v5416_v27 = vrot.slane %v5384_v41, 7  ;;  %4653 = vmatmul.f32.gmra.mxu2 %v9707_v25  ;;  %4911 = vmatmul.f32.gmra.mxu3 %v9707_v25  ;;  %vm12403_vm5 = vmmov %vm12391_vm1 }
 0x69a   : > { %5201 = vmatmul.f32.gmra.mxu1 %v9745_v13  ;;  %5357 = vmatmul.f32.gmra.mxu0 %v9707_v25  ;;  %v4514_v26 = vadd.f32 %v12401_v6, %v4320_v33  ;;  %vm12404_vm3 = vmmov %vm12402_vm2 }
 0x69b   : > { %v5222_v39 = vadd.f32 %v5148_v28, %v5028_v45  ;;  %v5457_v47 = vsel %vm12391_vm1, %v5415_v17, %v5416_v27  ;;  %v4291_v4 = vsel %vm12404_vm3, %v4257_v46, %v4258_v36  ;;  %v12408_v46 = vld [vmem:[#allocation133_spill] sm:$0xff] }
 0x69c   : > { %v4606_v60 = vpop.f32.mrf.mxu2  ;;  %v4864_v9 = vpop.f32.mrf.mxu3 }
 0x69d   : > { %v10227_v29 = vadd.f32 %v5457_v47, %v5222_v39  ;;  %v4676_v59 = vsel %vm12240_vm0, %v4606_v60, 0.0  ;;  %v4966_v55 = vrot.slane %v4864_v9, 1  ;;  %v12405_v47 = vld [vmem:[#allocation99_spill] sm:$0xff] }
 0x69e   : > { %v4708_v16 = vrot.slane %v4676_v59, 7  ;;  %vm12406_vm1 = vnez %v12405_v47 }
 0x69f   : > { %12399 = vst [vmem:[#allocation86_spill] sm:$0xff] %v10227_v29  ;;  %v5003_v28 = vsel %vm12402_vm2, %v4965_v1, %v4966_v55  ;;  %v5157_v20 = vpop.f32.mrf.mxu1  ;;  %v5313_v17 = vpop.f32.mrf.mxu0  ;;  %v4227_v15 = vsel %vm12406_vm1, %v9719_v43, 0.0  ;;  %vm12407_vm2 = vmmov %vm12403_vm5 }
 0x6a0   : > { %v4745_v41 = vsel %vm12403_vm5, %v4707_v10, %v4708_v16  ;;  %v5029_v58 = vadd.f32 %v5003_v28, %v4771_v51  ;;  %v5417_v45 = vrot.slane %v5313_v17, 7  ;;  %v10246_v10 = vld [vmem:[#allocation2] sm:$0xff]  ;;  %v4321_v51 = vadd.f32 %v4291_v4, %v12408_v46  ;;  %vm12410_vm5 = vmmov %vm12407_vm2 }
 0x6a1   : > { %v4772_v39 = vadd.f32 %v4745_v41, %v4514_v26  ;;  %4656 = vmatmul.f32.gmra.mxu2 %v9728_v24  ;;  %4914 = vmatmul.f32.gmra.mxu3 %v9728_v24  ;;  %v4259_v6 = vrot.slane %v4227_v15, 1 }
 0x6a2   : > { %v5223_v1 = vadd.f32 %v5151_v19, %v5029_v58  ;;  %v5456_v33 = vsel %vm12407_vm2, %v5416_v27, %v5417_v45  ;;  %5360 = vmatmul.f32.gmra.mxu0 %v9728_v24  ;;  %5204 = vmatmul.f32.gmra.mxu1 %v10246_v10  ;;  %v12409_v19 = vld [vmem:[#allocation51_spill] sm:$0xff]  ;;  %vm12411_vm2 = vmmov %vm12404_vm3 }
 0x6a3   : > { %v4515_v28 = vadd.f32 %v12409_v19, %v4321_v51  ;;  %v4290_v15 = vsel %vm12411_vm2, %v4258_v36, %v4259_v6  ;;  %v12412_v51 = vld [vmem:[#allocation66_spill] sm:$0xff] }
 0x6a4   : > { %v10250_v60 = vadd.f32 %v5456_v33, %v5223_v1  ;;  %v4609_v9 = vpop.f32.mrf.mxu2  ;;  %v4867_v59 = vpop.f32.mrf.mxu3  ;;  %v4322_v5 = vadd.f32 %v4290_v15, %v12412_v51 }
 0x6a5   : > { %v4709_v26 = vrot.slane %v4609_v9, 7  ;;  %v4935_v43 = vsel %vm12394_vm7, %v4867_v59, 0.0 }
 0x6a6   : > { %v4967_v27 = vrot.slane %v4935_v43, 1  ;;  %v12413_v43 = vld [vmem:[#allocation42_spill] sm:$0xff] }
 0x6a7   : > { %v4744_v17 = vsel %vm12410_vm5, %v4708_v16, %v4709_v26  ;;  %v5160_v41 = vpop.f32.mrf.mxu1  ;;  %v5316_v58 = vpop.f32.mrf.mxu0  ;;  %v4260_v36 = vrot.slane %v12413_v43, 1  ;;  %v12422_v43 = vld [vmem:[#allocation56_spill] sm:$0xff] }
 0x6a8   : > { %v4773_v29 = vadd.f32 %v4744_v17, %v4515_v28  ;;  %v5002_v4 = vsel %vm12404_vm3, %v4966_v55, %v4967_v27  ;;  %v5386_v1 = vsel %vm12240_vm0, %v5316_v58, 0.0  ;;  %vm12416_vm0 = vmmov %vm12411_vm2 }
 0x6a9   : > { %v5030_v33 = vadd.f32 %v5002_v4, %v4772_v39  ;;  %v5418_v46 = vrot.slane %v5386_v1, 7  ;;  %4659 = vmatmul.f32.gmra.mxu2 %v9745_v13  ;;  %4917 = vmatmul.f32.gmra.mxu3 %v9745_v13  ;;  %v12415_v4 = vld [vmem:[#allocation54_spill] sm:$0xff]  ;;  %vm12417_vm3 = vmmov %vm12410_vm5 }
 0x6aa   : > { %5363 = vmatmul.f32.gmra.mxu0 %v9745_v13  ;;  %5207 = vmatmul.f32.gmra.mxu1 %v10246_v10  ;;  %v4516_v1 = vadd.f32 %v12415_v4, %v4322_v5  ;;  %vm12418_vm2 = vmmov %vm12416_vm0 }
 0x6ab   : > { %v5224_v16 = vadd.f32 %v5154_v56, %v5030_v33  ;;  %v5455_v55 = vsel %vm12410_vm5, %v5417_v45, %v5418_v46 }
 0x6ac   : > { %v4612_v9 = vpop.f32.mrf.mxu2  ;;  %v4870_v59 = vpop.f32.mrf.mxu3 }
 0x6ad   : > { %v10271_v39 = vadd.f32 %v5455_v55, %v5224_v16  ;;  %v4678_v28 = vsel %vm7265_vm9, %v4612_v9, 0.0  ;;  %v4968_v17 = vrot.slane %v4870_v59, 1  ;;  %v4289_v16 = vsel %vm12418_vm2, %v4259_v6, %v4260_v36  ;;  %v12419_v9 = vld [vmem:[#allocation12_spill] sm:$0xff] }
 0x6ae   : > { %v4710_v58 = vrot.slane %v4678_v28, 7  ;;  %vm12420_vm5 = vnez %v12419_v9 }
 0x6af   : > { %v5001_v56 = vsel %vm12416_vm0, %v4967_v27, %v4968_v17  ;;  %v5163_v33 = vpop.f32.mrf.mxu1  ;;  %v5319_v45 = vpop.f32.mrf.mxu0  ;;  %v4229_v5 = vsel %vm12420_vm5, %v9753_v18, 0.0  ;;  %vm12421_vm0 = vmmov %vm12417_vm3 }
 0x6b0   : > { %v4743_v15 = vsel %vm12417_vm3, %v4709_v26, %v4710_v58  ;;  %v5031_v51 = vadd.f32 %v5001_v56, %v4773_v29  ;;  %v5419_v8 = vrot.slane %v5319_v45, 7  ;;  %v4323_v26 = vadd.f32 %v4289_v16, %v12422_v43  ;;  %v12423_v56 = vld [vmem:[#allocation49_spill] sm:$0xff]  ;;  %vm12424_vm3 = vmmov %vm12421_vm0 }
 0x6b1   : > { %v4774_v55 = vadd.f32 %v4743_v15, %v4516_v1  ;;  %5534 = vmatmul.f32.vlgmr.msrb.gmra.mxu2 %v9334_v12  ;;  %v4261_v6 = vrot.slane %v4229_v5, 1 }
 0x6b2   : > { %v5225_v59 = vadd.f32 %v5157_v20, %v5031_v51  ;;  %v5454_v27 = vsel %vm12421_vm0, %v5418_v46, %v5419_v8  ;;  %5366 = vmatmul.f32.gmra.mxu0 %v10246_v10  ;;  %v4517_v45 = vadd.f32 %v12423_v56, %v4323_v26  ;;  %vm12425_vm0 = vmmov %vm12418_vm2  ;;  %v12427_v56 = vld [vmem:[#allocation137_spill] sm:$0xff] }
 0x6b3   : > { %v4288_v5 = vsel %vm12425_vm0, %v4260_v36, %v4261_v6  ;;  %v4262_v19 = vrot.slane %v12427_v56, 1 }
 0x6b4   : > { %v10290_v29 = vadd.f32 %v5454_v27, %v5225_v59  ;;  %v4615_v28 = vpop.f32.mrf.mxu2  ;;  %v4873_v4 = vpop.f32.mrf.mxu3 }
 0x6b5   : > { %v4711_v1 = vrot.slane %v4615_v28, 7  ;;  %v4937_v12 = vsel %vm12406_vm1, %v4873_v4, 0.0  ;;  %v12426_v28 = vld [vmem:[#allocation37_spill] sm:$0xff] }
 0x6b6   : > { %v4969_v18 = vrot.slane %v4937_v12, 1  ;;  %v4324_v4 = vadd.f32 %v4288_v5, %v12426_v28  ;;  %v12432_v28 = vld [vmem:[#allocation75_spill] sm:$0xff] }
 0x6b7   : > { %v4742_v20 = vsel %vm12424_vm3, %v4710_v58, %v4711_v1  ;;  %v5166_v46 = vpop.f32.mrf.mxu1  ;;  %v5322_v15 = vpop.f32.mrf.mxu0 }
 0x6b8   : > { %v4775_v51 = vadd.f32 %v4742_v20, %v4517_v45  ;;  %v5000_v16 = vsel %vm12418_vm2, %v4968_v17, %v4969_v18  ;;  %v5388_v59 = vsel %vm7265_vm9, %v5322_v15, 0.0  ;;  %vm12429_vm9 = vmmov %vm12425_vm0 }
 0x6b9   : > { %v5032_v27 = vadd.f32 %v5000_v16, %v4774_v55  ;;  %v5420_v43 = vrot.slane %v5388_v59, 7  ;;  %5537 = vmatmul.f32.gmra.mxu2 %v9343_v14  ;;  %v4518_v14 = vadd.f32 %v9769_v22, %v4324_v4  ;;  %vm12430_vm2 = vmmov %vm12424_vm3 }
 0x6ba   : > { %5369 = vmatmul.f32.gmra.mxu0 %v10246_v10 }
 0x6bb   : > { %v5226_v26 = vadd.f32 %v5160_v41, %v5032_v27  ;;  %v5453_v58 = vsel %vm12424_vm3, %v5419_v8, %v5420_v43  ;;  %v4287_v27 = vsel %vm12425_vm0, %v4261_v6, %v4262_v19 }
 0x6bc   : > { %v4618_v12 = vpop.f32.mrf.mxu2  ;;  %v4876_v17 = vpop.f32.mrf.mxu3 }
 0x6bd   : > { %v10309_v45 = vadd.f32 %v5453_v58, %v5226_v26  ;;  %v4680_v36 = vsel %vm7290_vm11, %v4618_v12, 0.0  ;;  %v4970_v55 = vrot.slane %v4876_v17, 1  ;;  %v12431_v58 = vld [vmem:[#allocation26_spill] sm:$0xff]  ;;  %v12433_v12 = vld [vmem:[#allocation15_spill] sm:$0xff] }
 0x6be   : > { %v4712_v15 = vrot.slane %v4680_v36, 7  ;;  %vm12434_vm3 = vnez %v12433_v12  ;;  %v12436_v17 = vld [vmem:[#allocation70_spill] sm:$0xff] }
 0x6bf   : > { %v4999_v10 = vsel %vm12429_vm9, %v4969_v18, %v4970_v55  ;;  %v5169_v41 = vpop.f32.mrf.mxu1  ;;  %v5325_v8 = vpop.f32.mrf.mxu0  ;;  %v4231_v22 = vsel %vm12434_vm3, %v12432_v28, 0.0  ;;  %vm12435_vm9 = vmmov %vm12430_vm2  ;;  %v4325_v56 = vadd.f32 %v4287_v27, %v12436_v17 }
 0x6c0   : > { %v4741_v16 = vsel %vm12430_vm2, %v4711_v1, %v4712_v15  ;;  %v5033_v59 = vadd.f32 %v4999_v10, %v4775_v51  ;;  %v5421_v5 = vrot.slane %v5325_v8, 7  ;;  %v4263_v10 = vrot.slane %v4231_v22, 1 }
 0x6c1   : > { %v4776_v26 = vadd.f32 %v4741_v16, %v4518_v14  ;;  %5540 = vmatmul.f32.gmra.mxu2 %v12431_v58  ;;  %v12437_v14 = vld [vmem:[#allocation142_spill] sm:$0xff] }
 0x6c2   : > { %v5227_v4 = vadd.f32 %v5163_v33, %v5033_v59  ;;  %v5452_v18 = vsel %vm12435_vm9, %v5420_v43, %v5421_v5  ;;  %v4519_v16 = vadd.f32 %v12437_v14, %v4325_v56  ;;  %vm12438_vm9 = vmmov %vm12425_vm0 }
 0x6c3   : > { %v4286_v22 = vsel %vm12438_vm9, %v4262_v19, %v4263_v10 }
 0x6c4   : > { %v10327_v36 = vadd.f32 %v5452_v18, %v5227_v4  ;;  %v4621_v1 = vpop.f32.mrf.mxu2  ;;  %v4879_v51 = vpop.f32.mrf.mxu3 }
 0x6c5   : > { %v4713_v8 = vrot.slane %v4621_v1, 7  ;;  %v4939_v6 = vsel %vm12420_vm5, %v4879_v51, 0.0  ;;  %vm12439_vm5 = vmmov %vm12430_vm2  ;;  %v12440_v1 = vld [vmem:[#allocation20_spill] sm:$0xff] }
 0x6c6   : > { %v4971_v58 = vrot.slane %v4939_v6, 1  ;;  %v4326_v51 = vadd.f32 %v4286_v22, %v12440_v1  ;;  %v12447_v1 = vld [vmem:[#allocation116_spill] sm:$0xff] }
 0x6c7   : > { %v4740_v33 = vsel %vm12430_vm2, %v4712_v15, %v4713_v8  ;;  %v5172_v59 = vpop.f32.mrf.mxu1  ;;  %v5328_v28 = vpop.f32.mrf.mxu0 }
 0x6c8   : > { %v4777_v43 = vadd.f32 %v4740_v33, %v4519_v16  ;;  %v4998_v27 = vsel %vm12425_vm0, %v4970_v55, %v4971_v58  ;;  %v5390_v4 = vsel %vm7290_vm11, %v5328_v28, 0.0  ;;  %v12441_v16 = vld [vmem:[#allocation149_spill] sm:$0xff]  ;;  %vm12444_vm11 = vmmov %vm12425_vm0 }
 0x6c9   : > { %v5034_v18 = vadd.f32 %v4998_v27, %v4776_v26  ;;  %v5422_v17 = vrot.slane %v5390_v4, 7  ;;  %5543 = vmatmul.f32.gmra.mxu2 %v9361_v44  ;;  %v4264_v55 = vrot.slane %v12441_v16, 1  ;;  %v4520_v27 = vadd.f32 %v9795_v35, %v4326_v51  ;;  %v12452_v16 = vld [vmem:[#allocation130_spill] sm:$0xff] }
 0x6cb   : > { %v5228_v56 = vadd.f32 %v5166_v46, %v5034_v18  ;;  %v5451_v15 = vsel %vm12439_vm5, %v5421_v5, %v5422_v17  ;;  %vm12445_vm5 = vmmov %vm12430_vm2 }
 0x6cc   : > { %v4624_v6 = vpop.f32.mrf.mxu2  ;;  %v4882_v14 = vpop.f32.mrf.mxu3  ;;  %vm12446_vm2 = vmmov %vm12425_vm0 }
 0x6cd   : > { %v10345_v33 = vadd.f32 %v5451_v15, %v5228_v56  ;;  %v4682_v28 = vsel %vm7337_vm13, %v4624_v6, 0.0  ;;  %v4972_v19 = vrot.slane %v4882_v14, 1  ;;  %v4285_v56 = vsel %vm12446_vm2, %v4263_v10, %v4264_v55  ;;  %v12448_v6 = vld [vmem:[#allocation30_spill] sm:$0xff]  ;;  %vm12451_vm9 = vmmov %vm12445_vm5 }
 0x6ce   : > { %v4714_v26 = vrot.slane %v4682_v28, 7  ;;  %v12449_v14 = vld [vmem:[#allocation18_spill] sm:$0xff]  ;;  %v4327_v28 = vadd.f32 %v4285_v56, %v12452_v16 }
 0x6cf   : > { %12442 = vst [vmem:[#allocation94_spill] sm:$0xff] %v10345_v33  ;;  %v4997_v44 = vsel %vm12444_vm11, %v4971_v58, %v4972_v19  ;;  %v5175_v46 = vpop.f32.mrf.mxu1  ;;  %v5331_v5 = vpop.f32.mrf.mxu0  ;;  %vm12450_vm0 = vnez %v12449_v14  ;;  %vm12454_vm11 = vmmov %vm12445_vm5 }
 0x6d0   : > { %v4739_v4 = vsel %vm12445_vm5, %v4713_v8, %v4714_v26  ;;  %v5035_v22 = vadd.f32 %v4997_v44, %v4777_v43  ;;  %v5423_v18 = vrot.slane %v5331_v5, 7  ;;  %v4233_v35 = vsel %vm12450_vm0, %v12448_v6, 0.0  ;;  %vm12455_vm5 = vmmov %vm12446_vm2 }
 0x6d1   : > { %v4778_v15 = vadd.f32 %v4739_v4, %v4520_v27  ;;  %5546 = vmatmul.f32.gmra.mxu2 %v12447_v1  ;;  %v4265_v44 = vrot.slane %v4233_v35, 1  ;;  %v12453_v27 = vld [vmem:[#allocation134_spill] sm:$0xff] }
 0x6d2   : > { %v5229_v51 = vadd.f32 %v5169_v41, %v5035_v22  ;;  %v5450_v58 = vsel %vm12451_vm9, %v5422_v17, %v5423_v18  ;;  %v4521_v4 = vadd.f32 %v12453_v27, %v4327_v28 }
 0x6d3   : > { %v4284_v35 = vsel %vm12446_vm2, %v4264_v55, %v4265_v44 }
 0x6d4   : > { %v10363_v33 = vadd.f32 %v5450_v58, %v5229_v51  ;;  %v4627_v8 = vpop.f32.mrf.mxu2  ;;  %v4885_v43 = vpop.f32.mrf.mxu3 }
 0x6d5   : > { %v4715_v5 = vrot.slane %v4627_v8, 7  ;;  %v4941_v10 = vsel %vm12434_vm3, %v4885_v43, 0.0  ;;  %v12456_v8 = vld [vmem:[#allocation69_spill] sm:$0xff] }
 0x6d6   : > { %v4973_v1 = vrot.slane %v4941_v10, 1  ;;  %v4328_v43 = vadd.f32 %v4284_v35, %v12456_v8  ;;  %v12463_v8 = vld [vmem:[#allocation118_spill] sm:$0xff] }
 0x6d7   : > { %v4738_v41 = vsel %vm12454_vm11, %v4714_v26, %v4715_v5  ;;  %v5178_v22 = vpop.f32.mrf.mxu1  ;;  %v5334_v6 = vpop.f32.mrf.mxu0  ;;  %vm12461_vm11 = vmmov %vm12451_vm9 }
 0x6d8   : > { %v4779_v17 = vadd.f32 %v4738_v41, %v4521_v4  ;;  %v4996_v56 = vsel %vm12455_vm5, %v4972_v19, %v4973_v1  ;;  %v5392_v51 = vsel %vm7337_vm13, %v5334_v6, 0.0  ;;  %v12457_v4 = vld [vmem:[#allocation136_spill] sm:$0xff]  ;;  %vm12460_vm13 = vmmov %vm12446_vm2 }
 0x6d9   : > { %v5036_v58 = vadd.f32 %v4996_v56, %v4778_v15  ;;  %v5424_v16 = vrot.slane %v5392_v51, 7  ;;  %5549 = vmatmul.f32.gmra.mxu2 %v9376_v30  ;;  %v4266_v19 = vrot.slane %v12457_v4, 1  ;;  %v4522_v56 = vadd.f32 %v9821_v2, %v4328_v43  ;;  %vm12462_vm5 = vmmov %vm12446_vm2  ;;  %v12467_v4 = vld [vmem:[#allocation132_spill] sm:$0xff] }
 0x6db   : > { %v5230_v28 = vadd.f32 %v5172_v59, %v5036_v58  ;;  %v5449_v26 = vsel %vm12451_vm9, %v5423_v18, %v5424_v16 }
 0x6dc   : > { %v4630_v10 = vpop.f32.mrf.mxu2  ;;  %v4888_v27 = vpop.f32.mrf.mxu3 }
 0x6dd   : > { %v10381_v41 = vadd.f32 %v5449_v26, %v5230_v28  ;;  %v4684_v6 = vsel %vm7380_vm14, %v4630_v10, 0.0  ;;  %v4974_v55 = vrot.slane %v4888_v27, 1  ;;  %v4283_v28 = vsel %vm12462_vm5, %v4265_v44, %v4266_v19  ;;  %v12464_v10 = vld [vmem:[#allocation138_spill] sm:$0xff]  ;;  %v12465_v27 = vld [vmem:[#allocation21_spill] sm:$0xff] }
 0x6de   : > { %v4716_v15 = vrot.slane %v4684_v6, 7  ;;  %vm12466_vm2 = vnez %v12465_v27  ;;  %v4329_v6 = vadd.f32 %v4283_v28, %v12467_v4 }
 0x6df   : > { %12458 = vst [vmem:[#allocation13_spill] sm:$0xff] %v10381_v41  ;;  %v4995_v30 = vsel %vm12460_vm13, %v4973_v1, %v4974_v55  ;;  %v5181_v59 = vpop.f32.mrf.mxu1  ;;  %v5337_v18 = vpop.f32.mrf.mxu0  ;;  %v4235_v2 = vsel %vm12466_vm2, %v12464_v10, 0.0  ;;  %vm12469_vm13 = vmmov %vm12451_vm9 }
 0x6e0   : > { %v4737_v51 = vsel %vm12461_vm11, %v4715_v5, %v4716_v15  ;;  %v5037_v35 = vadd.f32 %v4995_v30, %v4779_v17  ;;  %v5425_v58 = vrot.slane %v5337_v18, 7  ;;  %v4267_v30 = vrot.slane %v4235_v2, 1  ;;  %vm12470_vm11 = vmmov %vm12462_vm5 }
 0x6e1   : > { %v4780_v26 = vadd.f32 %v4737_v51, %v4522_v56  ;;  %5552 = vmatmul.f32.gmra.mxu2 %v12463_v8  ;;  %v12468_v56 = vld [vmem:[#allocation141_spill] sm:$0xff] }
 0x6e2   : > { %v5231_v43 = vadd.f32 %v5175_v46, %v5037_v35  ;;  %v5448_v1 = vsel %vm12451_vm9, %v5424_v16, %v5425_v58  ;;  %v4523_v51 = vadd.f32 %v12468_v56, %v4329_v6  ;;  %v4282_v2 = vsel %vm12462_vm5, %v4266_v19, %v4267_v30 }
 0x6e4   : > { %v10399_v41 = vadd.f32 %v5448_v1, %v5231_v43  ;;  %v4633_v5 = vpop.f32.mrf.mxu2  ;;  %v4891_v17 = vpop.f32.mrf.mxu3 }
 0x6e5   : > { %v4717_v18 = vrot.slane %v4633_v5, 7  ;;  %v4943_v44 = vsel %vm12450_vm0, %v4891_v17, 0.0  ;;  %v12471_v5 = vld [vmem:[#allocation143_spill] sm:$0xff] }
 0x6e6   : > { %v4975_v8 = vrot.slane %v4943_v44, 1  ;;  %v4330_v17 = vadd.f32 %v4282_v2, %v12471_v5  ;;  %v12478_v5 = vld [vmem:[#allocation25_spill] sm:$0xff] }
 0x6e7   : > { %v4736_v46 = vsel %vm12469_vm13, %v4716_v15, %v4717_v18  ;;  %v5340_v35 = vpop.f32.mrf.mxu0  ;;  %v5184_v1 = vpop.f32.mrf.mxu1  ;;  %vm12475_vm13 = vmmov %vm12451_vm9 }
 0x6e8   : > { %v4781_v10 = vadd.f32 %v4736_v46, %v4523_v51  ;;  %v4994_v16 = vsel %vm12470_vm11, %v4974_v55, %v4975_v8  ;;  %v5394_v28 = vsel %vm7380_vm14, %v5340_v35, 0.0  ;;  %v12472_v55 = vld [vmem:[#allocation139_spill] sm:$0xff]  ;;  %vm12474_vm14 = vmmov %vm12462_vm5 }
 0x6e9   : > { %v5038_v43 = vadd.f32 %v4994_v16, %v4780_v26  ;;  %v5426_v4 = vrot.slane %v5394_v28, 7  ;;  %5555 = vmatmul.f32.gmra.mxu2 %v9394_v63  ;;  %v4268_v51 = vrot.slane %v12472_v55, 1  ;;  %v4524_v16 = vadd.f32 %v9847_v7, %v4330_v17  ;;  %vm12476_vm11 = vmmov %vm12462_vm5 }
 0x6ea   : > { %vm12479_vm5 = vnez %v12478_v5 }
 0x6eb   : > { %v5232_v6 = vadd.f32 %v5178_v22, %v5038_v43  ;;  %v5447_v15 = vsel %vm12451_vm9, %v5425_v58, %v5426_v4  ;;  %v4281_v43 = vsel %vm12476_vm11, %v4267_v30, %v4268_v51 }
 0x6ec   : > { %v4636_v44 = vpop.f32.mrf.mxu2  ;;  %v4894_v56 = vpop.f32.mrf.mxu3 }
 0x6ed   : > { %v10417_v20 = vadd.f32 %v5447_v15, %v5232_v6  ;;  %v4686_v19 = vsel %vm7415_vm15, %v4636_v44, 0.0  ;;  %v4976_v26 = vrot.slane %v4894_v56, 1  ;;  %v12477_v15 = vld [vmem:[#allocation97_spill] sm:$0xff] }
 0x6ee   : > { %v4718_v35 = vrot.slane %v4686_v19, 7  ;;  %v4237_v44 = vsel %vm12479_vm5, %v12477_v15, 0.0  ;;  %v12480_v56 = vld [vmem:[#allocation81_spill] sm:$0xff] }
 0x6ef   : > { %v4993_v63 = vsel %vm12474_vm14, %v4975_v8, %v4976_v26  ;;  %v5343_v22 = vpop.f32.mrf.mxu0  ;;  %v5187_v17 = vpop.f32.mrf.mxu1  ;;  %v4331_v55 = vadd.f32 %v4281_v43, %v12480_v56  ;;  %vm12482_vm14 = vmmov %vm12451_vm9 }
 0x6f0   : > { %v4735_v58 = vsel %vm12475_vm13, %v4717_v18, %v4718_v35  ;;  %v5039_v28 = vadd.f32 %v4993_v63, %v4781_v10  ;;  %v5427_v2 = vrot.slane %v5343_v22, 7  ;;  %v4269_v63 = vrot.slane %v4237_v44, 1  ;;  %vm12483_vm13 = vmmov %vm12476_vm11 }
 0x6f1   : > { %v4782_v6 = vadd.f32 %v4735_v58, %v4524_v16  ;;  %5558 = vmatmul.f32.gmra.mxu2 %v9403_v62  ;;  %v12481_v16 = vld [vmem:[#allocation92_spill] sm:$0xff] }
 0x6f2   : > { %v5233_v7 = vadd.f32 %v5181_v59, %v5039_v28  ;;  %v5446_v8 = vsel %vm12451_vm9, %v5426_v4, %v5427_v2  ;;  %v4525_v22 = vadd.f32 %v12481_v16, %v4331_v55  ;;  %v4280_v44 = vsel %vm12476_vm11, %v4268_v51, %v4269_v63  ;;  %v12485_v16 = vld [vmem:[#allocation123_spill] sm:$0xff] }
 0x6f4   : > { %v10435_v18 = vadd.f32 %v5446_v8, %v5233_v7  ;;  %v4639_v10 = vpop.f32.mrf.mxu2  ;;  %v4897_v19 = vpop.f32.mrf.mxu3 }
 0x6f5   : > { %v4719_v30 = vrot.slane %v4639_v10, 7  ;;  %v4945_v62 = vsel %vm12466_vm2, %v4897_v19, 0.0 }
 0x6f6   : > { %v4977_v58 = vrot.slane %v4945_v62, 1 }
 0x6f7   : > { %v4734_v59 = vsel %vm12482_vm14, %v4718_v35, %v4719_v30  ;;  %v5346_v28 = vpop.f32.mrf.mxu0  ;;  %v12484_v35 = vld [vmem:[#allocation145_spill] sm:$0xff]  ;;  %vm12489_vm14 = vmmov %vm12451_vm9 }
 0x6f8   : > { %v4783_v4 = vadd.f32 %v4734_v59, %v4525_v22  ;;  %v4992_v43 = vsel %vm12483_vm13, %v4976_v26, %v4977_v58  ;;  %v5396_v15 = vsel %vm7415_vm15, %v5346_v28, 0.0  ;;  %v4332_v10 = vadd.f32 %v4280_v44, %v12484_v35  ;;  %v5190_v22 = vpop.f32.mrf.mxu1  ;;  %vm12488_vm15 = vmmov %vm12476_vm11  ;;  %v12492_v35 = vld [vmem:[#allocation32_spill] sm:$0xff] }
 0x6f9   : > { %v5040_v7 = vadd.f32 %v4992_v43, %v4782_v6  ;;  %v5428_v8 = vrot.slane %v5396_v15, 7  ;;  %5561 = vmatmul.f32.gmra.mxu2 %v9412_v49  ;;  %v4270_v26 = vrot.slane %v12485_v16, 1  ;;  %vm12490_vm13 = vmmov %vm12476_vm11  ;;  %vm12493_vm11 = vnez %v12492_v35 }
 0x6fa   : > { %v4526_v49 = vadd.f32 %v9873_v21, %v4332_v10  ;;  %v12494_v10 = vld [vmem:[#allocation67_spill] sm:$0xff] }
 0x6fb   : > { %v5234_v56 = vadd.f32 %v5184_v1, %v5040_v7  ;;  %v5445_v55 = vsel %vm12451_vm9, %v5427_v2, %v5428_v8  ;;  %v4279_v7 = vsel %vm12490_vm13, %v4269_v63, %v4270_v26 }
 0x6fc   : > { %v4642_v19 = vpop.f32.mrf.mxu2  ;;  %v4900_v62 = vpop.f32.mrf.mxu3 }
 0x6fd   : > { %v10453_v46 = vadd.f32 %v5445_v55, %v5234_v56  ;;  %v4688_v51 = vsel %vm12128_vm6, %v4642_v19, 0.0  ;;  %v4978_v6 = vrot.slane %v4900_v62, 1  ;;  %v12491_v55 = vld [vmem:[#allocation24_spill] sm:$0xff]  ;;  %v4333_v62 = vadd.f32 %v4279_v7, %v12494_v10 }
 0x6fe   : > { %v4720_v28 = vrot.slane %v4688_v51, 7  ;;  %v4239_v19 = vsel %vm12493_vm11, %v12491_v55, 0.0 }
 0x6ff   : > { %12486 = vst [vmem:[#allocation64_spill] sm:$0xff] %v10453_v46  ;;  %v4991_v1 = vsel %vm12488_vm15, %v4977_v58, %v4978_v6  ;;  %v5349_v2 = vpop.f32.mrf.mxu0  ;;  %v4271_v51 = vrot.slane %v4239_v19, 1  ;;  %vm12497_vm15 = vmmov %vm12451_vm9 }
 0x700   : > { %v4733_v43 = vsel %vm12489_vm14, %v4719_v30, %v4720_v28  ;;  %v5041_v15 = vadd.f32 %v4991_v1, %v4783_v4  ;;  %v5429_v44 = vrot.slane %v5349_v2, 7  ;;  %vm12498_vm14 = vmmov %vm12490_vm13 }
 0x701   : > { %v4784_v56 = vadd.f32 %v4733_v43, %v4526_v49  ;;  %5564 = vmatmul.f32.gmra.mxu2 %v9421_v53  ;;  %v12496_v53 = vld [vmem:[#allocation41_spill] sm:$0xff]  ;;  %v5193_v43 = vpop.f32.mrf.mxu1  ;;  %v4278_v19 = vsel %vm12490_vm13, %v4270_v26, %v4271_v51 }
 0x702   : > { %v5235_v21 = vadd.f32 %v5187_v17, %v5041_v15  ;;  %v5444_v58 = vsel %vm12451_vm9, %v5428_v8, %v5429_v44  ;;  %v4527_v49 = vadd.f32 %v12496_v53, %v4333_v62  ;;  %v12500_v53 = vld [vmem:[#allocation22_spill] sm:$0xff] }
 0x704   : > { %v10471_v16 = vadd.f32 %v5444_v58, %v5235_v21  ;;  %v4645_v30 = vpop.f32.mrf.mxu2  ;;  %v4903_v4 = vpop.f32.mrf.mxu3 }
 0x705   : > { %v4721_v1 = vrot.slane %v4645_v30, 7  ;;  %v4947_v63 = vsel %vm12479_vm5, %v4903_v4, 0.0 }
 0x706   : > { %12495 = vst [vmem:[#allocation109_spill] sm:$0xff] %v10471_v16  ;;  %v4979_v2 = vrot.slane %v4947_v63, 1 }
 0x707   : > { %v4732_v17 = vsel %vm12497_vm15, %v4720_v28, %v4721_v1  ;;  %v5352_v15 = vpop.f32.mrf.mxu0  ;;  %v12499_v28 = vld [vmem:[#allocation46_spill] sm:$0xff]  ;;  %vm12504_vm15 = vmmov %vm12451_vm9 }
 0x708   : > { %v4785_v8 = vadd.f32 %v4732_v17, %v4527_v49  ;;  %v4990_v7 = vsel %vm12498_vm14, %v4978_v6, %v4979_v2  ;;  %v5398_v55 = vsel %vm12128_vm6, %v5352_v15, 0.0  ;;  %v4334_v30 = vadd.f32 %v4278_v19, %v12499_v28  ;;  %vm12503_vm6 = vmmov %vm12490_vm13  ;;  %v12507_v28 = vld [vmem:[#allocation106_spill] sm:$0xff] }
 0x709   : > { %v5042_v21 = vadd.f32 %v4990_v7, %v4784_v56  ;;  %v5430_v58 = vrot.slane %v5398_v55, 7  ;;  %5567 = vmatmul.f32.gmra.mxu2 %v9430_v57  ;;  %v4272_v6 = vrot.slane %v12500_v53, 1  ;;  %vm12505_vm14 = vmmov %vm12503_vm6 }
 0x70a   : > { %v4528_v15 = vadd.f32 %v9899_v40, %v4334_v30 }
 0x70b   : > { %v5236_v10 = vadd.f32 %v5190_v22, %v5042_v21  ;;  %v5443_v62 = vsel %vm12451_vm9, %v5429_v44, %v5430_v58  ;;  %v4277_v19 = vsel %vm12505_vm14, %v4271_v51, %v4272_v6  ;;  %v5196_v21 = vpop.f32.mrf.mxu1 }
 0x70c   : > { %v4648_v4 = vpop.f32.mrf.mxu2  ;;  %v4906_v63 = vpop.f32.mrf.mxu3 }
 0x70d   : > { %v10489_v49 = vadd.f32 %v5443_v62, %v5236_v10  ;;  %v4690_v17 = vsel %vm12151_vm12, %v4648_v4, 0.0  ;;  %v4980_v26 = vrot.slane %v4906_v63, 1  ;;  %v12506_v62 = vld [vmem:[#allocation119_spill] sm:$0xff]  ;;  %v12508_v4 = vld [vmem:[#allocation38_spill] sm:$0xff]  ;;  %v12510_v63 = vld [vmem:[#allocation108_spill] sm:$0xff] }
 0x70e   : > { %v4722_v56 = vrot.slane %v4690_v17, 7  ;;  %vm12509_vm13 = vnez %v12508_v4  ;;  %v4335_v53 = vadd.f32 %v4277_v19, %v12510_v63  ;;  %v12515_v63 = vld [vmem:[#allocation10_spill] sm:$0xff] }
 0x70f   : > { %12501 = vst [vmem:[#allocation129_spill] sm:$0xff] %v10489_v49  ;;  %v4989_v57 = vsel %vm12503_vm6, %v4979_v2, %v4980_v26  ;;  %v5355_v22 = vpop.f32.mrf.mxu0  ;;  %v4241_v40 = vsel %vm12509_vm13, %v12507_v28, 0.0  ;;  %vm12513_vm6 = vmmov %vm12451_vm9 }
 0x710   : > { %v4731_v44 = vsel %vm12504_vm15, %v4721_v1, %v4722_v56  ;;  %v5043_v7 = vadd.f32 %v4989_v57, %v4785_v8  ;;  %v5431_v55 = vrot.slane %v5355_v22, 7  ;;  %v4273_v57 = vrot.slane %v4241_v40, 1  ;;  %v12512_v22 = vld [vmem:[#allocation29_spill] sm:$0xff]  ;;  %vm12514_vm15 = vmmov %vm12505_vm14 }
 0x711   : > { %v4786_v10 = vadd.f32 %v4731_v44, %v4528_v15  ;;  %5570 = vmatmul.f32.gmra.mxu2 %v12506_v62  ;;  %v4529_v44 = vadd.f32 %v12512_v22, %v4335_v53 }
 0x712   : > { %v5237_v30 = vadd.f32 %v5193_v43, %v5043_v7  ;;  %v5442_v2 = vsel %vm12451_vm9, %v5430_v58, %v5431_v55  ;;  %v4276_v40 = vsel %vm12505_vm14, %v4272_v6, %v4273_v57  ;;  %vm12516_vm9 = vmmov %vm12513_vm6 }
 0x713   : > { %v5199_v53 = vpop.f32.mrf.mxu1 }
 0x714   : > { %v10507_v1 = vadd.f32 %v5442_v2, %v5237_v30  ;;  %v4651_v8 = vpop.f32.mrf.mxu2  ;;  %v4909_v17 = vpop.f32.mrf.mxu3 }
 0x715   : > { %v4723_v51 = vrot.slane %v4651_v8, 7  ;;  %v4949_v15 = vsel %vm12493_vm11, %v4909_v17, 0.0  ;;  %v12517_v17 = vld [vmem:[#allocation77_spill] sm:$0xff] }
 0x716   : > { %12511 = vst [vmem:[#allocation128_spill] sm:$0xff] %v10507_v1  ;;  %v4981_v62 = vrot.slane %v4949_v15, 1  ;;  %v4336_v15 = vadd.f32 %v4276_v40, %v12517_v17  ;;  %v12532_v1 = vld [vmem:[#allocation115_spill] sm:$0xff] }
 0x717   : > { %v4730_v43 = vsel %vm12513_vm6, %v4722_v56, %v4723_v51  ;;  %v5358_v7 = vpop.f32.mrf.mxu0  ;;  %vm12523_vm6 = vmmov %vm12505_vm14 }
 0x718   : > { %v4787_v28 = vadd.f32 %v4730_v43, %v4529_v44  ;;  %v4988_v58 = vsel %vm12514_vm15, %v4980_v26, %v4981_v62  ;;  %v5400_v19 = vsel %vm12151_vm12, %v5358_v7, 0.0  ;;  %v12518_v26 = vld [vmem:[#allocation72_spill] sm:$0xff]  ;;  %vm12524_vm15 = vmmov %vm12516_vm9 }
 0x719   : > { %v5044_v30 = vadd.f32 %v4988_v58, %v4786_v10  ;;  %v5432_v2 = vrot.slane %v5400_v19, 7  ;;  %5573 = vmatmul.f32.gmra.mxu2 %v12515_v63  ;;  %v4274_v43 = vrot.slane %v12518_v26, 1  ;;  %v12520_v7 = vld [vmem:[#allocation124_spill] sm:$0xff]  ;;  %v12522_v19 = vld [vmem:[#allocation83_spill] sm:$0xff]  ;;  %vm12525_vm14 = vmmov %vm12523_vm6 }
 0x71a   : > { %vm12521_vm12 = vnez %v12520_v7  ;;  %v4530_v63 = vadd.f32 %v12522_v19, %v4336_v15  ;;  %v12526_v26 = vld [vmem:[#allocation68_spill] sm:$0xff]  ;;  %v12530_v19 = vld [vmem:[#allocation121_spill] sm:$0xff] }
 0x71b   : > { %v5238_v8 = vadd.f32 %v5196_v21, %v5044_v30  ;;  %v5441_v56 = vsel %vm12516_vm9, %v5431_v55, %v5432_v2  ;;  %v12527_v15 = vld [vmem:[#allocation36_spill] sm:$0xff] }
 0x71c   : > { %v4654_v22 = vpop.f32.mrf.mxu2  ;;  %v4912_v44 = vpop.f32.mrf.mxu3 }
 0x71d   : > { %v10525_v59 = vadd.f32 %v5441_v56, %v5238_v8  ;;  %v4692_v6 = vsel %vm12521_vm12, %v4654_v22, 0.0  ;;  %v4982_v10 = vrot.slane %v4912_v44, 1  ;;  %v4275_v8 = vsel %vm12525_vm14, %v4273_v57, %v4274_v43 }
 0x71e   : > { %v4724_v58 = vrot.slane %v4692_v6, 7  ;;  %v12528_v6 = vld [vmem:[#allocation23_spill] sm:$0xff] }
 0x71f   : > { %12519 = vst [vmem:[#allocation43_spill] sm:$0xff] %v10525_v59  ;;  %v4987_v21 = vsel %vm12523_vm6, %v4981_v62, %v4982_v10  ;;  %v5361_v30 = vpop.f32.mrf.mxu0  ;;  %vm12529_vm11 = vnez %v12528_v6  ;;  %v12531_v59 = vrot.slane %v12530_v19, 7  ;;  %vm12533_vm6 = vmmov %vm12516_vm9  ;;  %v12537_v19 = vld [vmem:[#allocation122_spill] sm:$0xff] }
 0x720   : > { %v4729_v55 = vsel %vm12524_vm15, %v4723_v51, %v4724_v58  ;;  %v5045_v40 = vadd.f32 %v4987_v21, %v4787_v28  ;;  %v5433_v17 = vrot.slane %v5361_v30, 7  ;;  %v4211_v62 = vsel %vm12529_vm11, %v12527_v15, 0.0  ;;  %v12534_v28 = vld [vmem:[#allocation95_spill] sm:$0xff]  ;;  %vm12538_vm15 = vmmov %vm12533_vm6 }
 0x721   : > { %v4788_v56 = vadd.f32 %v4729_v55, %v4530_v63  ;;  %5576 = vmatmul.f32.gmra.mxu2 %v12526_v26  ;;  %v3967_v51 = vsel %vm12533_vm6, %v12532_v1, %v12531_v59  ;;  %v4337_v21 = vadd.f32 %v4275_v8, %v12534_v28  ;;  %v12536_v26 = vld [vmem:[#allocation76_spill] sm:$0xff]  ;;  %v12539_v59 = vld [vmem:[#allocation126_spill] sm:$0xff] }
 0x722   : > { %v5239_v22 = vadd.f32 %v5199_v53, %v5045_v40  ;;  %v5440_v44 = vsel %vm12516_vm9, %v5432_v2, %v5433_v17  ;;  %v5202_v53 = vpop.f32.mrf.mxu1  ;;  %v4243_v40 = vrot.slane %v4211_v62, 1  ;;  %v3986_v16 = vadd.f32 %v12537_v19, %v3967_v51  ;;  %vm12541_vm9 = vmmov %vm12525_vm14 }
 0x723   : > { %v4531_v15 = vadd.f32 %v12536_v26, %v4337_v21  ;;  %v12540_v8 = vrot.slane %v12539_v59, 1 }
 0x724   : > { %v10548_v57 = vadd.f32 %v5440_v44, %v5239_v22  ;;  %v4657_v63 = vpop.f32.mrf.mxu2  ;;  %v4915_v30 = vpop.f32.mrf.mxu3 }
 0x725   : > { %v4725_v55 = vrot.slane %v4657_v63, 7  ;;  %v4951_v2 = vsel %vm12509_vm13, %v4915_v30, 0.0  ;;  %v4305_v22 = vsel %vm12525_vm14, %v4243_v40, %v12540_v8  ;;  %v12542_v30 = vld [vmem:[#allocation50_spill] sm:$0xff]  ;;  %v12544_v8 = vld [vmem:[#allocation59_spill] sm:$0xff]  ;;  %vm12549_vm14 = vmmov %vm12541_vm9 }
 0x726   : > { %12535 = vst [vmem:[#allocation79_spill] sm:$0xff] %v10548_v57  ;;  %v4983_v49 = vrot.slane %v4951_v2, 1  ;;  %v4307_v51 = vadd.f32 %v4305_v22, %v3986_v16  ;;  %v5889_v16 = vld [vmem:[%s11237_s11 + $0x78] sm:$0xff] }
 0x727   : > { %v5364_v46 = vpop.f32.mrf.mxu0  ;;  %v4728_v1 = vsel %vm12538_vm15, %v4724_v58, %v4725_v55  ;;  %vm12543_vm15 = vmmov %vm12541_vm9  ;;  %5890 = vmatpush.msra.mxu3 %v5889_v16  ;;  %5910 = vmatpush.msrb.mxu1 %v5889_v16  ;;  %v12556_v16 = vld [vmem:[#allocation96_spill] sm:$0xff] }
 0x728   : > { %v4986_v44 = vsel %vm12541_vm9, %v4982_v10, %v4983_v49  ;;  %v5402_v62 = vsel %vm12521_vm12, %v5364_v46, 0.0  ;;  %v4789_v28 = vadd.f32 %v4728_v1, %v4531_v15  ;;  %v4306_v26 = vsel %vm12543_vm15, %v4274_v43, %v4243_v40  ;;  %v12545_v46 = vld [vmem:[#allocation48_spill] sm:$0xff]  ;;  %v12548_v40 = vld [vmem:[#allocation33_spill] sm:$0xff]  ;;  %vm12552_vm9 = vmmov %vm12533_vm6 }
 0x729   : > { %v5046_v21 = vadd.f32 %v4986_v44, %v4788_v56  ;;  %v5434_v63 = vrot.slane %v5402_v62, 7  ;;  %5579 = vmatmul.f32.gmra.mxu2 %v12542_v30  ;;  %v4338_v10 = vadd.f32 %v4306_v26, %v12544_v8  ;;  %vm12546_vm12 = vnez %v12545_v46  ;;  %v12550_v62 = vld [vmem:[#allocation80_spill] sm:$0xff]  ;;  %vm12554_vm15 = vmmov %vm12533_vm6 }
 0x72a   : > { %v5205_v15 = vpop.f32.mrf.mxu1  ;;  %v4501_v1 = vadd.f32 %v12548_v40, %v4307_v51 }
 0x72b   : > { %v5240_v2 = vadd.f32 %v5202_v53, %v5046_v21  ;;  %v5439_v58 = vsel %vm12533_vm6, %v5433_v17, %v5434_v63  ;;  %v12547_v17 = vld [vmem:[#allocation101_spill] sm:$0xff]  ;;  %v12551_v21 = vrot.slane %v12550_v62, 7 }
 0x72c   : > { %v4660_v19 = vpop.f32.mrf.mxu2  ;;  %v4918_v59 = vpop.f32.mrf.mxu3  ;;  %v4532_v43 = vadd.f32 %v12547_v17, %v4338_v10 }
 0x72d   : > { %v10570_v57 = vadd.f32 %v5439_v58, %v5240_v2  ;;  %v4694_v7 = vsel %vm12546_vm12, %v4660_v19, 0.0  ;;  %v4984_v56 = vrot.slane %v4918_v59, 1  ;;  %v12553_v59 = vld [vmem:[#allocation55_spill] sm:$0xff] }
 0x72e   : > { %v4726_v53 = vrot.slane %v4694_v7, 7 }
 0x72f   : > { %v4985_v22 = vsel %vm12549_vm14, %v4983_v49, %v4984_v56  ;;  %v5367_v44 = vpop.f32.mrf.mxu0  ;;  %v12555_v49 = vld [vmem:[#allocation104_spill] sm:$0xff] }
 0x730   : > { %v4758_v30 = vsel %vm12552_vm9, %v4726_v53, %v12551_v21  ;;  %v5047_v2 = vadd.f32 %v4985_v22, %v4789_v28  ;;  %v5435_v58 = vrot.slane %v5367_v44, 7  ;;  %v4727_v26 = vsel %vm12533_vm6, %v4725_v55, %v4726_v53  ;;  %vm12558_vm9 = vmmov %vm12533_vm6 }
 0x731   : > { %v4759_v19 = vadd.f32 %v4758_v30, %v4501_v1  ;;  %5582 = vmatmul.f32.gmra.mxu2 %v12553_v59  ;;  %v4790_v8 = vadd.f32 %v4727_v26, %v4532_v43  ;;  %v5016_v7 = vsel %vm12549_vm14, %v4984_v56, %v12555_v49  ;;  %v12557_v43 = vld [vmem:[#allocation85_spill] sm:$0xff]  ;;  %v12559_v30 = vld [vmem:[#allocation91_spill] sm:$0xff] }
 0x732   : > { %v5241_v10 = vadd.f32 %v5205_v15, %v5047_v2  ;;  %v5438_v51 = vsel %vm12554_vm15, %v5434_v63, %v5435_v58  ;;  %v5208_v44 = vpop.f32.mrf.mxu1  ;;  %v5405_v15 = vrot.slane %v12557_v43, 7  ;;  %vm12563_vm15 = vmmov %vm12533_vm6 }
 0x733   : > { %v5017_v17 = vadd.f32 %v12556_v16, %v4759_v19  ;;  %v5048_v40 = vadd.f32 %v5016_v7, %v4790_v8 }
 0x734   : > { %v10594_v28 = vadd.f32 %v5438_v51, %v5241_v10  ;;  %v5535_v22 = vpop.f32.mrf.mxu2 }
 0x735   : > { %v5242_v63 = vadd.f32 %v5208_v44, %v5048_v40  ;;  %v5631_v56 = vsel %vm12529_vm11, %v5535_v22, 0.0  ;;  %v5211_v2 = vadd.f32 %v12559_v30, %v5017_v17  ;;  %v5407_v44 = vrot.slane %v10027_v11, 7  ;;  %v12571_v30 = vld [vmem:[#allocation82_spill] sm:$0xff] }
 0x736   : > { %v10609_v19 = vrot.slane %v5631_v56, 1 }
 0x737   : > { %v5370_v55 = vpop.f32.mrf.mxu0 }
 0x738   : > { %v5404_v53 = vsel %vm12546_vm12, %v5370_v55, 0.0  ;;  %vm12562_vm12 = vmmov %vm12549_vm14 }
 0x739   : > { %v5436_v1 = vrot.slane %v5404_v53, 7  ;;  %5585 = vmatmul.f32.gmra.mxu2 %v9527_v52  ;;  %v5888_v52 = vld [vmem:[%s11237_s11 + $0x70] sm:$0xff]  ;;  %vm12564_vm14 = vmmov %vm12562_vm12  ;;  %v12565_v53 = vld [vmem:[#allocation90_spill] sm:$0xff] }
 0x73a   : > { %5891 = vmatpush.msra.mxu3 %v5888_v52  ;;  %5911 = vmatpush.msrb.mxu1 %v5888_v52 }
 0x73b   : > { %v5437_v62 = vsel %vm12558_vm9, %v5435_v58, %v5436_v1  ;;  %v5468_v21 = vsel %vm12533_vm6, %v5436_v1, %v5405_v15  ;;  %v12560_v58 = vld [vmem:[#allocation125_spill] sm:$0xff]  ;;  %vm12566_vm9 = vmmov %vm12533_vm6  ;;  %v12567_v1 = vld [vmem:[#allocation103_spill] sm:$0xff] }
 0x73c   : > { %v10607_v26 = vadd.f32 %v5437_v62, %v5242_v63  ;;  %v5538_v46 = vpop.f32.mrf.mxu2  ;;  %v5469_v6 = vadd.f32 %v5468_v21, %v5211_v2  ;;  %vm12561_vm11 = vnez %v12560_v58  ;;  %v12568_v63 = vld [vmem:[#allocation63_spill] sm:$0xff] }
 0x73d   : > { %v5664_v59 = vrot.slane %v5538_v46, 1  ;;  %v5374_v8 = vsel %vm12561_vm11, %v10008_v0, 0.0  ;;  %v5376_v11 = vsel %vm12196_vm4, %v12568_v63, 0.0  ;;  %vm12574_vm11 = vmmov %vm12566_vm9 }
 0x73e   : > { %v5406_v49 = vrot.slane %v5374_v8, 7  ;;  %v5408_v2 = vrot.slane %v5376_v11, 7  ;;  %v12575_v8 = vld [vmem:[#allocation105_spill] sm:$0xff] }
 0x73f   : > { %v5725_v10 = vsel %vm12562_vm12, %v10609_v19, %v5664_v59 }
 0x740   : > { %v10620_v51 = vadd.f32 %v5725_v10, %v5469_v6  ;;  %v5467_v17 = vsel %vm12563_vm15, %v5405_v15, %v5406_v49  ;;  %v5466_v54 = vsel %vm12566_vm9, %v5406_v49, %v5407_v44  ;;  %v5887_v15 = vld [vmem:[%s11237_s11 + $0x68] sm:$0xff]  ;;  %v5465_v6 = vsel %vm12574_vm11, %v5407_v44, %v5408_v2  ;;  %v5886_v44 = vld [vmem:[%s11237_s11 + $0x60] sm:$0xff] }
 0x741   : > { %5588 = vmatmul.f32.gmra.mxu2 %v9544_v34  ;;  %v5470_v22 = vadd.f32 %v5467_v17, %v10018_v48  ;;  %v5471_v48 = vadd.f32 %v5466_v54, %v12567_v1  ;;  %5892 = vmatpush.msra.mxu3 %v5887_v15  ;;  %v5472_v10 = vadd.f32 %v5465_v6, %v12575_v8  ;;  %v12590_v8 = vld [vmem:[#allocation127_spill] sm:$0xff] }
 0x742   : > { %5912 = vmatpush.msrb.mxu1 %v5887_v15  ;;  %v12582_v15 = vld [vmem:[#allocation40_spill] sm:$0xff] }
 0x743   : > { %5893 = vmatpush.msra.mxu3 %v5886_v44  ;;  %vm12583_vm15 = vnez %v12582_v15 }
 0x744   : > { %v5541_v7 = vpop.f32.mrf.mxu2  ;;  %5913 = vmatpush.msrb.mxu1 %v5886_v44 }
 0x745   : > { %v5633_v16 = vsel %vm12309_vm8, %v5541_v7, 0.0  ;;  %vm12570_vm8 = vmmov %vm12562_vm12  ;;  %v12577_v7 = vld [vmem:[#allocation61_spill] sm:$0xff] }
 0x746   : > { %v5665_v40 = vrot.slane %v5633_v16, 1  ;;  %vm12576_vm4 = vmmov %vm12570_vm8  ;;  %v5409_v16 = vrot.slane %v12577_v7, 7 }
 0x747   : > { %vm12579_vm12 = vmmov %vm12566_vm9 }
 0x748   : > { %v5724_v0 = vsel %vm12564_vm14, %v5664_v59, %v5665_v40  ;;  %v12572_v59 = vld [vmem:[#allocation11_spill] sm:$0xff]  ;;  %vm12584_vm14 = vmmov %vm12576_vm4 }
 0x749   : > { %v10631_v55 = vadd.f32 %v5724_v0, %v5470_v22  ;;  %5591 = vmatmul.f32.gmra.mxu2 %v12565_v53  ;;  %vm12573_vm6 = vnez %v12572_v59  ;;  %v5464_v0 = vsel %vm12579_vm12, %v5408_v2, %v5409_v16  ;;  %v12588_v59 = vld [vmem:[#allocation110_spill] sm:$0xff] }
 0x74c   : > { %v5544_v34 = vpop.f32.mrf.mxu2 }
 0x74d   : > { %v5666_v43 = vrot.slane %v5544_v34, 1  ;;  %v12580_v34 = vld [vmem:[#allocation113_spill] sm:$0xff] }
 0x74e   : > { %v5473_v54 = vadd.f32 %v5464_v0, %v12580_v34  ;;  %v12594_v34 = vld [vmem:[#allocation60_spill] sm:$0xff] }
 0x74f   : > { %v5723_v62 = vsel %vm12570_vm8, %v5665_v40, %v5666_v43  ;;  %v12578_v40 = vld [vmem:[#allocation74_spill] sm:$0xff]  ;;  %vm12587_vm8 = vmmov %vm12574_vm11 }
 0x750   : > { %v10645_v21 = vadd.f32 %v5723_v62, %v5471_v48  ;;  %v12585_v62 = vld [vmem:[#allocation35_spill] sm:$0xff]  ;;  %vm12592_vm11 = vmmov %vm12587_vm8 }
 0x751   : > { %5594 = vmatmul.f32.gmra.mxu2 %v12571_v30  ;;  %vm12586_vm9 = vnez %v12585_v62 }
 0x754   : > { %v5547_v46 = vpop.f32.mrf.mxu2 }
 0x755   : > { %v5635_v52 = vsel %vm12573_vm6, %v5547_v46, 0.0  ;;  %vm12589_vm6 = vmmov %vm12576_vm4 }
 0x756   : > { %v5667_v58 = vrot.slane %v5635_v52, 1 }
 0x758   : > { %v5722_v49 = vsel %vm12576_vm4, %v5666_v43, %v5667_v58  ;;  %v12581_v43 = vld [vmem:[#allocation100_spill] sm:$0xff] }
 0x759   : > { %v10656_v17 = vadd.f32 %v5722_v49, %v5472_v10  ;;  %5597 = vmatmul.f32.gmra.mxu2 %v12578_v40  ;;  %v5378_v1 = vsel %vm12583_vm15, %v12581_v43, 0.0  ;;  %v12591_v49 = vld [vmem:[#allocation47_spill] sm:$0xff]  ;;  %v12595_v43 = vld [vmem:[#allocation73_spill] sm:$0xff]  ;;  %vm12598_vm15 = vmmov %vm12587_vm8 }
 0x75a   : > { %v5410_v56 = vrot.slane %v5378_v1, 7  ;;  %vm12596_vm12 = vnez %v12595_v43  ;;  %v12597_v1 = vld [vmem:[#allocation111_spill] sm:$0xff] }
 0x75c   : > { %v5550_v22 = vpop.f32.mrf.mxu2  ;;  %v5463_v2 = vsel %vm12587_vm8, %v5409_v16, %v5410_v56  ;;  %v5885_v16 = vld [vmem:[%s11237_s11 + $0x58] sm:$0xff]  ;;  %vm12602_vm8 = vnez %v12366_v61 }
 0x75d   : > { %v5668_v53 = vrot.slane %v5550_v22, 1  ;;  %v5474_v52 = vadd.f32 %v5463_v2, %v12588_v59  ;;  %v12593_v22 = vld [vmem:[#allocation89_spill] sm:$0xff]  ;;  %5894 = vmatpush.msra.mxu3 %v5885_v16  ;;  %5914 = vmatpush.msrb.mxu1 %v5885_v16 }
 0x75f   : > { %v5721_v48 = vsel %vm12584_vm14, %v5667_v58, %v5668_v53  ;;  %v5411_v58 = vrot.slane %v12590_v8, 7  ;;  %vm12600_vm14 = vmmov %vm12576_vm4 }
 0x760   : > { %v10670_v63 = vadd.f32 %v5721_v48, %v5473_v54 }
 0x761   : > { %5600 = vmatmul.f32.gmra.mxu2 %v12345_v31  ;;  %v5462_v7 = vsel %vm12592_vm11, %v5410_v56, %v5411_v58  ;;  %v5461_v48 = vsel %vm12598_vm15, %v5411_v58, %v12597_v1  ;;  %vm12604_vm11 = vmmov %vm12576_vm4 }
 0x762   : > { %v5475_v0 = vadd.f32 %v5462_v7, %v12593_v22  ;;  %vm12609_vm15 = vmmov %vm12576_vm4 }
 0x764   : > { %v5553_v11 = vpop.f32.mrf.mxu2 }
 0x765   : > { %v5637_v30 = vsel %vm12586_vm9, %v5553_v11, 0.0  ;;  %v12599_v11 = vld [vmem:[#allocation88_spill] sm:$0xff]  ;;  %vm12601_vm9 = vmmov %vm12576_vm4 }
 0x766   : > { %v5669_v46 = vrot.slane %v5637_v30, 1  ;;  %v5476_v62 = vadd.f32 %v5461_v48, %v12599_v11 }
 0x768   : > { %v5720_v6 = vsel %vm12589_vm6, %v5668_v53, %v5669_v46  ;;  %vm12603_vm6 = vmmov %vm12576_vm4 }
 0x769   : > { %v10681_v10 = vadd.f32 %v5720_v6, %v5474_v52  ;;  %5603 = vmatmul.f32.gmra.mxu2 %v12591_v49  ;;  %v5884_v52 = vld [vmem:[%s11237_s11 + $0x50] sm:$0xff] }
 0x76a   : > { %5895 = vmatpush.msra.mxu3 %v5884_v52  ;;  %5915 = vmatpush.msrb.mxu1 %v5884_v52 }
 0x76c   : > { %v5556_v31 = vpop.f32.mrf.mxu2 }
 0x76d   : > { %v5670_v40 = vrot.slane %v5556_v31, 1 }
 0x76f   : > { %v5719_v53 = vsel %vm12576_vm4, %v5669_v46, %v5670_v40 }
 0x770   : > { %v10692_v44 = vadd.f32 %v5719_v53, %v5475_v0  ;;  %v12605_v53 = vld [vmem:[#allocation86_spill] sm:$0xff] }
 0x771   : > { %5606 = vmatmul.f32.gmra.mxu2 %v12594_v34 }
 0x774   : > { %v5559_v54 = vpop.f32.mrf.mxu2 }
 0x775   : > { %v5639_v15 = vsel %vm12596_vm12, %v5559_v54, 0.0  ;;  %vm12606_vm12 = vmmov %vm12576_vm4 }
 0x776   : > { %v5671_v56 = vrot.slane %v5639_v15, 1  ;;  %v6394_v15 = vld [vmem:[#allocation2] sm:$0xff] }
 0x778   : > { %v5718_v30 = vsel %vm12600_vm14, %v5670_v40, %v5671_v56  ;;  %vm12611_vm14 = vmmov %vm12576_vm4 }
 0x779   : > { %v10703_v2 = vadd.f32 %v5718_v30, %v5476_v62  ;;  %5609 = vmatmul.f32.gmra.mxu2 %v9671_v3 }
 0x77c   : > { %v5562_v46 = vpop.f32.mrf.mxu2 }
 0x77d   : > { %v5672_v59 = vrot.slane %v5562_v46, 1 }
 0x77f   : > { %v5717_v6 = vsel %vm12601_vm9, %v5671_v56, %v5672_v59  ;;  %vm12613_vm9 = vmmov %vm12576_vm4 }
 0x780   : > { %v10712_v8 = vadd.f32 %v5717_v6, %v10164_v23  ;;  %v5883_v23 = vld [vmem:[%s11237_s11 + $0x48] sm:$0xff] }
 0x781   : > { %5612 = vmatmul.f32.gmra.mxu2 %v9688_v38  ;;  %5896 = vmatpush.msra.mxu3 %v5883_v23 }
 0x782   : > { %5916 = vmatpush.msrb.mxu1 %v5883_v23 }
 0x784   : > { %v5565_v58 = vpop.f32.mrf.mxu2 }
 0x785   : > { %v5641_v3 = vsel %vm12602_vm8, %v5565_v58, 0.0  ;;  %vm12615_vm8 = vmmov %vm12576_vm4 }
 0x786   : > { %v5673_v49 = vrot.slane %v5641_v3, 1 }
 0x788   : > { %v5716_v31 = vsel %vm12603_vm6, %v5672_v59, %v5673_v49  ;;  %vm12616_vm6 = vmmov %vm12576_vm4 }
 0x789   : > { %v10720_v7 = vadd.f32 %v5716_v31, %v10185_v37  ;;  %5615 = vmatmul.f32.gmra.mxu2 %v9707_v25 }
 0x78c   : > { %v5568_v40 = vpop.f32.mrf.mxu2 }
 0x78d   : > { %v5674_v16 = vrot.slane %v5568_v40, 1 }
 0x78f   : > { %v5715_v38 = vsel %vm12604_vm11, %v5673_v49, %v5674_v16 }
 0x790   : > { %v10729_v61 = vadd.f32 %v5715_v38, %v10206_v42  ;;  %v5882_v42 = vld [vmem:[%s11237_s11 + $0x40] sm:$0xff] }
 0x791   : > { %5618 = vmatmul.f32.gmra.mxu2 %v9728_v24  ;;  %5897 = vmatpush.msra.mxu3 %v5882_v42 }
 0x792   : > { %5917 = vmatpush.msrb.mxu1 %v5882_v42 }
 0x794   : > { %v5571_v37 = vpop.f32.mrf.mxu2 }
 0x795   : > { %v5643_v25 = vsel %vm12381_vm10, %v5571_v37, 0.0  ;;  %vm12608_vm10 = vmmov %vm12576_vm4 }
 0x796   : > { %v5675_v22 = vrot.slane %v5643_v25, 1  ;;  %v12614_v25 = vld [vmem:[#allocation94_spill] sm:$0xff] }
 0x798   : > { %v5714_v0 = vsel %vm12576_vm4, %v5674_v16, %v5675_v22  ;;  %v5880_v16 = vld [vmem:[%s11237_s11 + $0x30] sm:$0xff] }
 0x799   : > { %v10737_v34 = vadd.f32 %v5714_v0, %v12605_v53  ;;  %5621 = vmatmul.f32.gmra.mxu2 %v9745_v13 }
 0x79c   : > { %v5574_v54 = vpop.f32.mrf.mxu2 }
 0x79d   : > { %v5676_v43 = vrot.slane %v5574_v54, 1  ;;  %v5879_v54 = vld [vmem:[%s11237_s11 + $0x28] sm:$0xff] }
 0x79f   : > { %v5713_v24 = vsel %vm12606_vm12, %v5675_v22, %v5676_v43 }
 0x7a0   : > { %v10746_v50 = vadd.f32 %v5713_v24, %v10250_v60  ;;  %v5881_v60 = vld [vmem:[%s11237_s11 + $0x38] sm:$0xff] }
 0x7a1   : > { %5624 = vmatmul.f32.gmra.mxu2 %v6394_v15  ;;  %5898 = vmatpush.msra.mxu3 %v5881_v60 }
 0x7a2   : > { %5918 = vmatpush.msrb.mxu1 %v5881_v60  ;;  %v5877_v60 = vld [vmem:[%s11237_s11 + $0x18] sm:$0xff] }
 0x7a3   : > { %5899 = vmatpush.msra.mxu3 %v5880_v16 }
 0x7a4   : > { %v5577_v1 = vpop.f32.mrf.mxu2  ;;  %5919 = vmatpush.msrb.mxu1 %v5880_v16 }
 0x7a5   : > { %v5645_v13 = vsel %vm12394_vm7, %v5577_v1, 0.0  ;;  %vm12610_vm7 = vmmov %vm12576_vm4  ;;  %5900 = vmatpush.msra.mxu3 %v5879_v54  ;;  %v12617_v1 = vld [vmem:[#allocation13_spill] sm:$0xff] }
 0x7a6   : > { %v5677_v56 = vrot.slane %v5645_v13, 1  ;;  %5920 = vmatpush.msrb.mxu1 %v5879_v54  ;;  %v5876_v54 = vld [vmem:[%s11237_s11 + $0x10] sm:$0xff] }
 0x7a8   : > { %v5712_v11 = vsel %vm12608_vm10, %v5676_v43, %v5677_v56 }
 0x7a9   : > { %v10753_v62 = vadd.f32 %v5712_v11, %v10271_v39  ;;  %5627 = vmatmul.f32.gmra.mxu2 %v6394_v15 }
 0x7ac   : > { %v5580_v30 = vpop.f32.mrf.mxu2 }
 0x7ad   : > { %v5678_v46 = vrot.slane %v5580_v30, 1 }
 0x7af   : > { %v5711_v59 = vsel %vm12609_vm15, %v5677_v56, %v5678_v46 }
 0x7b0   : > { %v10761_v52 = vadd.f32 %v5711_v59, %v10290_v29  ;;  %v5797_v59 = vmul.f32 %v10631_v55, %v10631_v55 }
 0x7b4   : > { %v5583_v6 = vpop.f32.mrf.mxu2 }
 0x7b5   : > { %v5647_v39 = vsel %vm12406_vm1, %v5583_v6, 0.0  ;;  %vm12612_vm1 = vnez %v12419_v9 }
 0x7b6   : > { %v5679_v58 = vrot.slane %v5647_v39, 1  ;;  %v5796_v39 = vmul.f32 %v10620_v51, %v10620_v51 }
 0x7b8   : > { %v5710_v3 = vsel %vm12610_vm7, %v5678_v46, %v5679_v58 }
 0x7b9   : > { %v10768_v49 = vadd.f32 %v5710_v3, %v10309_v45  ;;  %v5828_v3 = vadd.f32 %v5797_v59, %v5796_v39 }
 0x7bc   : > { %v5586_v31 = vpop.f32.mrf.mxu2 }
 0x7bd   : > { %v5680_v40 = vrot.slane %v5586_v31, 1  ;;  %v5799_v31 = vmul.f32 %v10656_v17, %v10656_v17 }
 0x7bf   : > { %v5709_v29 = vsel %vm12611_vm14, %v5679_v58, %v5680_v40  ;;  %v5759_v58 = vadd.f32 %v10631_v55, %v10620_v51 }
 0x7c0   : > { %v10776_v47 = vadd.f32 %v5709_v29, %v10327_v36  ;;  %v5800_v29 = vmul.f32 %v10670_v63, %v10670_v63 }
 0x7c4   : > { %v5589_v23 = vpop.f32.mrf.mxu2 }
 0x7c5   : > { %v5649_v38 = vsel %vm12612_vm1, %v5589_v23, 0.0 }
 0x7c6   : > { %v5681_v45 = vrot.slane %v5649_v38, 1 }
 0x7c8   : > { %v5708_v37 = vsel %vm12613_vm9, %v5680_v40, %v5681_v45  ;;  %v5760_v40 = vadd.f32 %v5759_v58, %v10645_v21  ;;  %v5806_v58 = vmul.f32 %v10729_v61, %v10729_v61  ;;  %vm5945_vm9 = vcmask 64512  }
 0x7c9   : > { %v10783_v22 = vadd.f32 %v5708_v37, %v12614_v25 }
 0x7ca   : > { %v5761_v23 = vadd.f32 %v5760_v40, %v10656_v17  ;;  %v5807_v40 = vmul.f32 %v10737_v34, %v10737_v34 }
 0x7cc   : > { %v5592_v0 = vpop.f32.mrf.mxu2  ;;  %v5762_v25 = vadd.f32 %v5761_v23, %v10670_v63  ;;  %v5808_v23 = vmul.f32 %v10746_v50, %v10746_v50 }
 0x7cd   : > { %v5682_v53 = vrot.slane %v5592_v0, 1 }
 0x7cf   : > { %v5707_v36 = vsel %vm12615_vm8, %v5681_v45, %v5682_v53  ;;  %v5801_v45 = vmul.f32 %v10681_v10, %v10681_v10 }
 0x7d0   : > { %v10791_v9 = vadd.f32 %v5707_v36, %v10363_v33  ;;  %v5878_v33 = vld [vmem:[%s11237_s11 + $0x20] sm:$0xff]  ;;  %v5763_v36 = vadd.f32 %v5762_v25, %v10681_v10  ;;  %v5809_v25 = vmul.f32 %v10753_v62, %v10753_v62 }
 0x7d1   : > { %5901 = vmatpush.msra.mxu3 %v5878_v33  ;;  %5921 = vmatpush.msrb.mxu1 %v5878_v33 }
 0x7d3   : > { %5902 = vmatpush.msra.mxu3 %v5877_v60  ;;  %5922 = vmatpush.msrb.mxu1 %v5877_v60  ;;  %v5805_v60 = vmul.f32 %v10720_v7, %v10720_v7 }
 0x7d4   : > { %v5595_v43 = vpop.f32.mrf.mxu2 }
 0x7d5   : > { %v5651_v42 = vsel %vm12434_vm3, %v5595_v43, 0.0  ;;  %vm12618_vm3 = vmmov %vm12576_vm4  ;;  %5903 = vmatpush.msra.mxu3 %v5876_v54  ;;  %5923 = vmatpush.msrb.mxu1 %v5876_v54  ;;  %vm12623_vm4 = vnez %v12492_v35 }
 0x7d6   : > { %v5683_v24 = vrot.slane %v5651_v42, 1  ;;  %v5803_v42 = vmul.f32 %v10703_v2, %v10703_v2 }
 0x7d8   : > { %v5706_v15 = vsel %vm12616_vm6, %v5682_v53, %v5683_v24  ;;  %v5802_v53 = vmul.f32 %v10692_v44, %v10692_v44 }
 0x7d9   : > { %v10798_v48 = vadd.f32 %v5706_v15, %v12617_v1  ;;  %v5804_v1 = vmul.f32 %v10712_v8, %v10712_v8 }
 0x7db   : > { %v5815_v27 = vmul.f32 %v10798_v48, %v10798_v48 }
 0x7dc   : > { %v10800_v13 = vpop.f32.mrf.mxu2 }
 0x7dd   : > { %v5684_v56 = vrot.slane %v10800_v13, 1 }
 0x7df   : > { %v5705_v12 = vsel %vm12618_vm3, %v5683_v24, %v5684_v56  ;;  %v5764_v24 = vadd.f32 %v5763_v36, %v10692_v44  ;;  %v5810_v36 = vmul.f32 %v10761_v52, %v10761_v52 }
 0x7e0   : > { %v10811_v11 = vadd.f32 %v5705_v12, %v10399_v41  ;;  %v5798_v41 = vmul.f32 %v10645_v21, %v10645_v21 }
 0x7e1   : > { %v5765_v33 = vadd.f32 %v5764_v24, %v10703_v2 }
 0x7e2   : > { %v5829_v16 = vadd.f32 %v5828_v3, %v5798_v41 }
 0x7e3   : > { %v5766_v39 = vadd.f32 %v5765_v33, %v10712_v8 }
 0x7e4   : > { %v5601_v30 = vpop.f32.mrf.mxu2  ;;  %v5830_v38 = vadd.f32 %v5829_v16, %v5799_v31 }
 0x7e5   : > { %v5767_v3 = vadd.f32 %v5766_v39, %v10720_v7 }
 0x7e6   : > { %v5831_v0 = vadd.f32 %v5830_v38, %v5800_v29 }
 0x7e7   : > { %v5768_v16 = vadd.f32 %v5767_v3, %v10729_v61  ;;  %v5813_v3 = vmul.f32 %v10783_v22, %v10783_v22 }
 0x7e8   : > { %v5832_v43 = vadd.f32 %v5831_v0, %v5801_v45 }
 0x7e9   : > { %v5769_v38 = vadd.f32 %v5768_v16, %v10737_v34 }
 0x7ea   : > { %v5833_v15 = vadd.f32 %v5832_v43, %v5802_v53  ;;  %v5875_v43 = vld [vmem:[%s11237_s11 + $0x8] sm:$0xff] }
 0x7eb   : > { %v5770_v53 = vadd.f32 %v5769_v38, %v10746_v50  ;;  %5904 = vmatpush.msra.mxu3 %v5875_v43  ;;  %5924 = vmatpush.msrb.mxu1 %v5875_v43 }
 0x7ec   : > { %v10813_v46 = vpop.f32.mrf.mxu2  ;;  %v5834_v12 = vadd.f32 %v5833_v15, %v5803_v42  ;;  %v5811_v15 = vmul.f32 %v10768_v49, %v10768_v49 }
 0x7ed   : > { %v5771_v42 = vadd.f32 %v5770_v53, %v10753_v62  ;;  %v5686_v14 = vrot.slane %v10813_v46, 1 }
 0x7ee   : > { %v5835_v41 = vadd.f32 %v5834_v12, %v5804_v1  ;;  %v5653_v1 = vsel %vm12450_vm0, %v5601_v30, 0.0  ;;  %vm12619_vm0 = vmmov %vm12618_vm3 }
 0x7ef   : > { %v5772_v33 = vadd.f32 %v5771_v42, %v10761_v52  ;;  %v5685_v39 = vrot.slane %v5653_v1, 1  ;;  %vm12621_vm11 = vmmov %vm12619_vm0 }
 0x7f0   : > { %v5836_v31 = vadd.f32 %v5835_v41, %v5805_v60  ;;  %v5812_v60 = vmul.f32 %v10776_v47, %v10776_v47  ;;  %vm12626_vm12 = vmmov %vm12619_vm0 }
 0x7f1   : > { %v5773_v41 = vadd.f32 %v5772_v33, %v10768_v49  ;;  %v12624_v33 = vld [vmem:[#allocation64_spill] sm:$0xff]  ;;  %vm12627_vm10 = vmmov %vm12619_vm0 }
 0x7f2   : > { %v5837_v29 = vadd.f32 %v5836_v31, %v5806_v58  ;;  %vm12629_vm15 = vmmov %vm12619_vm0 }
 0x7f3   : > { %vm12631_vm7 = vmmov %vm12619_vm0 }
 0x7f4   : > { %v10820_v6 = vpop.f32.mrf.mxu2  ;;  %v5838_v45 = vadd.f32 %v5837_v29, %v5807_v40  ;;  %v5774_v40 = vadd.f32 %v5773_v41, %v10776_v47  ;;  %v5814_v29 = vmul.f32 %v10791_v9, %v10791_v9  ;;  %vm12635_vm14 = vmmov %vm12619_vm0 }
 0x7f5   : > { %v5655_v31 = vsel %vm12466_vm2, %v10820_v6, 0.0  ;;  %vm12620_vm2 = vmmov %vm12619_vm0 }
 0x7f6   : > { %v5839_v54 = vadd.f32 %v5838_v45, %v5808_v23  ;;  %v5704_v23 = vsel %vm12619_vm0, %v5684_v56, %v5685_v39  ;;  %v5687_v38 = vrot.slane %v5655_v31, 1  ;;  %v5775_v45 = vadd.f32 %v5774_v40, %v10783_v22  ;;  %vm12636_vm1 = vmmov %vm12619_vm0 }
 0x7f7   : > { %v5703_v46 = vsel %vm12620_vm2, %v5685_v39, %v5686_v14  ;;  %v10904_v13 = vadd.f32 %v5704_v23, %v10417_v20 }
 0x7f8   : > { %v5840_v24 = vadd.f32 %v5839_v54, %v5809_v25  ;;  %v5776_v56 = vadd.f32 %v5775_v45, %v10791_v9  ;;  %v5702_v43 = vsel %vm12621_vm11, %v5686_v14, %v5687_v38  ;;  %v10912_v42 = vadd.f32 %v5703_v46, %v10435_v18 }
 0x7f9   : > { %v5817_v1 = vmul.f32 %v10904_v13, %v10904_v13 }
 0x7fa   : > { %v5841_v12 = vadd.f32 %v5840_v24, %v5810_v36  ;;  %v5816_v36 = vmul.f32 %v10811_v11, %v10811_v11  ;;  %v5818_v41 = vmul.f32 %v10912_v42, %v10912_v42 }
 0x7fc   : > { %v10836_v37 = vpop.f32.mrf.mxu2  ;;  %v5842_v58 = vadd.f32 %v5841_v12, %v5811_v15  ;;  %v10922_v12 = vadd.f32 %v5702_v43, %v12624_v33 }
 0x7fd   : > { %v5688_v6 = vrot.slane %v10836_v37, 1  ;;  %v5777_v37 = vadd.f32 %v5776_v56, %v10798_v48 }
 0x7fe   : > { %v5843_v16 = vadd.f32 %v5842_v58, %v5812_v60  ;;  %v12625_v58 = vld [vmem:[#allocation109_spill] sm:$0xff]  ;;  %v5819_v40 = vmul.f32 %v10922_v12, %v10922_v12 }
 0x7ff   : > { %v5778_v60 = vadd.f32 %v5777_v37, %v10811_v11 }
 0x800   : > { %v5844_v25 = vadd.f32 %v5843_v16, %v5813_v3 }
 0x801   : > { %v5779_v14 = vadd.f32 %v5778_v60, %v10904_v13  ;;  %v12633_v60 = vld [vmem:[#allocation79_spill] sm:$0xff] }
 0x802   : > { %v5845_v54 = vadd.f32 %v5844_v25, %v5814_v29 }
 0x803   : > { %v5780_v23 = vadd.f32 %v5779_v14, %v10912_v42 }
 0x804   : > { %v5613_v59 = vpop.f32.mrf.mxu2  ;;  %v5846_v5 = vadd.f32 %v5845_v54, %v5815_v27 }
 0x805   : > { %v5657_v53 = vsel %vm12479_vm5, %v5613_v59, 0.0  ;;  %vm12622_vm5 = vmmov %vm12619_vm0 }
 0x806   : > { %v5689_v24 = vrot.slane %v5657_v53, 1  ;;  %v5701_v20 = vsel %vm12622_vm5, %v5687_v38, %v5688_v6  ;;  %v5847_v39 = vadd.f32 %v5846_v5, %v5816_v36  ;;  %v12628_v38 = vld [vmem:[#allocation129_spill] sm:$0xff]  ;;  %v12630_v53 = vld [vmem:[#allocation128_spill] sm:$0xff] }
 0x807   : > { %v10929_v3 = vadd.f32 %v5701_v20, %v12625_v58  ;;  %v12632_v20 = vld [vmem:[#allocation43_spill] sm:$0xff] }
 0x808   : > { %v5700_v35 = vsel %vm12626_vm12, %v5688_v6, %v5689_v24  ;;  %v5781_v6 = vadd.f32 %v5780_v23, %v10922_v12 }
 0x809   : > { %v10943_v45 = vadd.f32 %v5700_v35, %v12628_v38  ;;  %v5820_v27 = vmul.f32 %v10929_v3, %v10929_v3 }
 0x80a   : > { %v5782_v37 = vadd.f32 %v5781_v6, %v10929_v3 }
 0x80b   : > { %v5821_v5 = vmul.f32 %v10943_v45, %v10943_v45 }
 0x80c   : > { %v10865_v0 = vpop.f32.mrf.mxu2  ;;  %v5783_v33 = vadd.f32 %v5782_v37, %v10943_v45 }
 0x80d   : > { %v5690_v18 = vrot.slane %v10865_v0, 1  ;;  %v5848_v0 = vadd.f32 %v5847_v39, %v5817_v1 }
 0x80f   : > { %v5699_v16 = vsel %vm12627_vm10, %v5689_v24, %v5690_v18  ;;  %v5849_v25 = vadd.f32 %v5848_v0, %v5818_v41 }
 0x810   : > { %v10951_v56 = vadd.f32 %v5699_v16, %v12630_v53 }
 0x811   : > { %v5850_v36 = vadd.f32 %v5849_v25, %v5819_v40 }
 0x812   : > { %v5784_v58 = vadd.f32 %v5783_v33, %v10951_v56 }
 0x813   : > { %v5851_v1 = vadd.f32 %v5850_v36, %v5820_v27 }
 0x814   : > { %v5619_v30 = vpop.f32.mrf.mxu2 }
 0x815   : > { %v5659_v59 = vsel %vm12623_vm4, %v5619_v30, 0.0  ;;  %v5874_v30 = vld [vmem:[%s11237_s11] sm:$0xff]  ;;  %v5852_v41 = vadd.f32 %v5851_v1, %v5821_v5 }
 0x816   : > { %v5691_v31 = vrot.slane %v5659_v59, 1  ;;  %5905 = vmatpush.msra.mxu3 %v5874_v30  ;;  %5925 = vmatpush.msrb.mxu1 %v5874_v30 }
 0x818   : > { %v5698_v46 = vsel %vm12629_vm15, %v5690_v18, %v5691_v31  ;;  %v5822_v18 = vmul.f32 %v10951_v56, %v10951_v56 }
 0x819   : > { %v10961_v59 = vadd.f32 %v5698_v46, %v12632_v20 }
 0x81a   : > { %v5853_v14 = vadd.f32 %v5852_v41, %v5822_v18 }
 0x81b   : > { %v5823_v35 = vmul.f32 %v10961_v59, %v10961_v59  ;;  %v5785_v30 = vadd.f32 %v5784_v58, %v10961_v59 }
 0x81c   : > { %v5622_v15 = vpop.f32.mrf.mxu2 }
 0x81d   : > { %v5692_v29 = vrot.slane %v5622_v15, 1  ;;  %v5854_v23 = vadd.f32 %v5853_v14, %v5823_v35 }
 0x81f   : > { %v5697_v43 = vsel %vm12631_vm7, %v5691_v31, %v5692_v29 }
 0x820   : > { %v10967_v39 = vadd.f32 %v5697_v43, %v12633_v60 }
 0x822   : > { %v5824_v0 = vmul.f32 %v10967_v39, %v10967_v39 }
 0x824   : > { %v5625_v54 = vpop.f32.mrf.mxu2  ;;  %v5855_v27 = vadd.f32 %v5854_v23, %v5824_v0 }
 0x825   : > { %v5661_v24 = vsel %vm12509_vm13, %v5625_v54, 0.0  ;;  %vm12634_vm13 = vmmov %vm12619_vm0 }
 0x826   : > { %v5693_v15 = vrot.slane %v5661_v24, 1 }
 0x828   : > { %v5696_v4 = vsel %vm12634_vm13, %v5692_v29, %v5693_v15  ;;  %v5786_v29 = vadd.f32 %v5785_v30, %v10967_v39 }
 0x829   : > { %v10975_v31 = vadd.f32 %v5696_v4, %v10570_v57 }
 0x82b   : > { %v5825_v38 = vmul.f32 %v10975_v31, %v10975_v31  ;;  %v5787_v46 = vadd.f32 %v5786_v29, %v10975_v31 }
 0x82c   : > { %v5628_v40 = vpop.f32.mrf.mxu2 }
 0x82d   : > { %v5694_v16 = vrot.slane %v5628_v40, 1  ;;  %v5856_v54 = vadd.f32 %v5855_v27, %v5825_v38 }
 0x82f   : > { %v5695_v25 = vsel %vm12635_vm14, %v5693_v15, %v5694_v16  ;;  %v5726_v57 = vsel %vm12636_vm1, %v5694_v16, %v10609_v19 }
 0x830   : > { %v10990_v6 = vadd.f32 %v5695_v25, %v10594_v28  ;;  %v10993_v53 = vadd.f32 %v5726_v57, %v10607_v26  ;;  %v5865_v26 = vld [vmem:[%s11234_s8] sm:$0x1] }
 0x831   : > { %v5866_v60 = vmul.f32 256.0, %v5865_v26  ;;  %v5868_v58 = vmul.f32 2.0, %v5865_v26  ;;  %v5871_v35 = vmul.f32 %v5865_v26, %v5865_v26  ;;  %v5944_v25 = vld [vmem:[%s11238_s12] sm:$0xff] }
 0x832   : > { %v5788_v36 = vadd.f32 %v5787_v46, %v10990_v6  ;;  %v5826_v43 = vmul.f32 %v10990_v6, %v10990_v6  ;;  %v5827_v32 = vmul.f32 %v10993_v53, %v10993_v53  ;;  %5964 = vmatpush.msrb.mxu3 %v5944_v25  ;;  %5987 = vmatpush.msra.mxu1 %v5944_v25 }
 0x833   : > { %v5872_v23 = vmul.f32 256.0, %v5871_v35 }
 0x834   : > { %v5789_v24 = vadd.f32 %v5788_v36, %v10993_v53  ;;  %v5857_v19 = vadd.f32 %v5856_v54, %v5826_v43 }
 0x836   : > { %v5790_v37 = vrot.slane %v5789_v24, 4  ;;  %v5858_v5 = vadd.f32 %v5857_v19, %v5827_v32 }
 0x838   : > { %v5791_v20 = vadd.f32 %v5790_v37, %v5789_v24  ;;  %v5859_v28 = vrot.slane %v5858_v5, 4 }
 0x83a   : > { %v5792_v15 = vrot.slane %v5791_v20, 2  ;;  %v5860_v1 = vadd.f32 %v5859_v28, %v5858_v5 }
 0x83c   : > { %v5793_v33 = vadd.f32 %v5792_v15, %v5791_v20  ;;  %v5861_v18 = vrot.slane %v5860_v1, 2 }
 0x83e   : > { %v5794_v4 = vrot.slane %v5793_v33, 1  ;;  %v5862_v41 = vadd.f32 %v5861_v18, %v5860_v1  ;;  %v5992_v1 = vld [vmem:[%s11235_s9] sm:$0x1] }
 0x840   : > { %v5863_v14 = vrot.slane %v5862_v41, 1  ;;  %v5795_v30 = vadd.f32 %v5794_v4, %v5793_v33 }
 0x842   : > { %v5867_v0 = vadd.f32 %v5866_v60, %v5795_v30  ;;  %v5864_v40 = vadd.f32 %v5863_v14, %v5862_v41  ;;  %v5869_v16 = vmul.f32 %v5868_v58, %v5795_v30  ;;  %v5994_v41 = vld [vmem:[%s11236_s10] sm:$0x1] }
 0x844   : > { %5906 = vmatmul.f32.vlgmr.msra.gmra.mxu3 %v5867_v0  ;;  %v5870_v29 = vadd.f32 %v5869_v16, %v5864_v40 }
 0x846   : > { %v5873_v38 = vadd.f32 %v5872_v23, %v5870_v29 }
 0x848   : > { %5926 = vmatmul.f32.vlgmr.msrb.gmra.mxu1 %v5873_v38 }
 0x8c5   : > { %v5927_v46 = vpop.f32.mrf.mxu1 }
 0x8c7   : > { %v5907_v57 = vpop.f32.mrf.mxu3 }
 0x8c8   : > { %v5930_v27 = vmul.f32 %v5907_v57, %v5907_v57  ;;  %6288 = vmatmul.msk.f32.vlgmr.msrb.gmra.mxu3 %vm5945_vm9, %v5907_v57 }
 0x8ca   : > { %v5931_v54 = vsub.f32 %v5927_v46, %v5930_v27 }
 0x8cc   : > { %v5932_v36 = vmax.f32 %v5931_v54, 0.0 }
 0x8ce   : > { %v5933_v43 = vadd.f32 1e-05, %v5932_v36 }
 0x8d0   : > { %6360 = vrsqrt.f32 %v5933_v43  ;;  %vm5940_vm6 = vweird.f32 %v5933_v43 }
 0x8d6   : > { %v6361_v24 = vpop.eup %6360 }
 0x8d7   : > { %v5935_v32 = vmul.f32 %v6361_v24, %v5933_v43  ;;  %vm5941_vm8 = vweird.f32 %v6361_v24 }
 0x8d8   : > { %vm5942_vm3 = vmor %vm5940_vm6, %vm5941_vm8 }
 0x8d9   : > { %v5936_v19 = vmul.f32 %v6361_v24, %v5935_v32 }
 0x8db   : > { %v5937_v37 = vmul.f32 0.5, %v5936_v19 }
 0x8dd   : > { %v5938_v5 = vsub.f32 1.5, %v5937_v37 }
 0x8df   : > { %v5939_v20 = vmul.f32 %v6361_v24, %v5938_v5 }
 0x8e1   : > { %v5943_v28 = vsel %vm5942_vm3, %v6361_v24, %v5939_v20 }
 0x8e2   : > { %6289 = vmatmul.msk.f32.vlgmr.msra.gmra.mxu1 %vm5945_vm9, %v5943_v28 }
 0x94b   : > { %v5966_v33 = vpop.f32.mrf.mxu3 }
 0x94c   : > { %v5995_v60 = vsub.f32 %v5865_v26, %v5966_v33 }
 0x95f   : > { %v5989_v15 = vpop.f32.mrf.mxu1 }
 0x960   : > { %v5993_v18 = vmul.f32 %v5992_v1, %v5989_v15 }
 0x962   : > { %v5996_v4 = vmul.f32 %v5995_v60, %v5993_v18  ;;  %v5998_v35 = vperm.slane %v5993_v18, 0 }
 0x964   : > { %v5997_v58 = vadd.f32 %v5996_v4, %v5994_v41  ;;  %v5999_v14 = vmul.f32 %v5998_v35, %v10620_v51  ;;  %v6000_v30 = vmul.f32 %v5998_v35, %v10631_v55  ;;  %v6001_v0 = vmul.f32 %v5998_v35, %v10645_v21 }
 0x965   : > { %v6002_v16 = vmul.f32 %v5998_v35, %v10656_v17  ;;  %v6003_v23 = vmul.f32 %v5998_v35, %v10670_v63  ;;  %v6004_v26 = vmul.f32 %v5998_v35, %v10681_v10  ;;  %v6005_v29 = vmul.f32 %v5998_v35, %v10692_v44 }
 0x966   : > { %v11018_v40 = vperm.slane %v5997_v58, 0  ;;  %v6006_v38 = vmul.f32 %v5998_v35, %v10703_v2  ;;  %v6007_v25 = vmul.f32 %v5998_v35, %v10712_v8  ;;  %v6008_v51 = vmul.f32 %v5998_v35, %v10720_v7 }
 0x967   : > { %v6009_v55 = vmul.f32 %v5998_v35, %v10729_v61  ;;  %v6010_v21 = vmul.f32 %v5998_v35, %v10737_v34  ;;  %v6011_v57 = vmul.f32 %v5998_v35, %v10746_v50  ;;  %v6012_v17 = vmul.f32 %v5998_v35, %v10753_v62 }
 0x968   : > { %v6013_v63 = vmul.f32 %v5998_v35, %v10761_v52  ;;  %v11033_v10 = vmul.f32 %v5998_v35, %v10768_v49  ;;  %v11036_v44 = vmul.f32 %v5998_v35, %v10776_v47  ;;  %v11039_v2 = vmul.f32 %v5998_v35, %v10783_v22 }
 0x969   : > { %v6034_v8 = vadd.f32 %v11018_v40, %v5999_v14  ;;  %v11043_v7 = vmul.f32 %v5998_v35, %v10791_v9  ;;  %v11046_v61 = vmul.f32 %v5998_v35, %v10798_v48  ;;  %v11049_v34 = vmul.f32 %v5998_v35, %v10811_v11 }
 0x96a   : > { %v6035_v50 = vadd.f32 %v11018_v40, %v6000_v30  ;;  %v11053_v62 = vmul.f32 %v5998_v35, %v10904_v13  ;;  %v11056_v52 = vmul.f32 %v5998_v35, %v10912_v42  ;;  %v11059_v49 = vmul.f32 %v5998_v35, %v10922_v12 }
 0x96b   : > { %v6036_v47 = vadd.f32 %v11018_v40, %v6001_v0  ;;  %v11063_v22 = vmul.f32 %v5998_v35, %v10929_v3  ;;  %v11066_v9 = vmul.f32 %v5998_v35, %v10943_v45  ;;  %v11069_v48 = vmul.f32 %v5998_v35, %v10951_v56 }
 0x96c   : > { %v6037_v11 = vadd.f32 %v11018_v40, %v6002_v16  ;;  %v11073_v13 = vmul.f32 %v5998_v35, %v10961_v59  ;;  %v11076_v42 = vmul.f32 %v5998_v35, %v10967_v39  ;;  %v6038_v12 = vadd.f32 %v11018_v40, %v6003_v23 }
 0x96d   : > { %v6098_v27 = vmul.f32 0.01, %v6034_v8  ;;  %v11080_v3 = vmul.f32 %v5998_v35, %v10975_v31  ;;  %v6039_v45 = vadd.f32 %v11018_v40, %v6004_v26  ;;  %vm6066_vm0 = vcmp.gt.f32.partialorder %v6034_v8, 0.0 }
 0x96e   : > { %v6099_v56 = vmul.f32 0.01, %v6035_v50  ;;  %v11084_v46 = vmul.f32 %v5998_v35, %v10990_v6  ;;  %v6040_v59 = vadd.f32 %v11018_v40, %v6005_v29  ;;  %vm6067_vm2 = vcmp.gt.f32.partialorder %v6035_v50, 0.0 }
 0x96f   : > { %v6100_v54 = vmul.f32 0.01, %v6036_v47  ;;  %v11088_v39 = vmul.f32 %v5998_v35, %v10993_v53  ;;  %v6041_v36 = vadd.f32 %v11018_v40, %v6006_v38  ;;  %vm6068_vm11 = vcmp.gt.f32.partialorder %v6036_v47, 0.0 }
 0x970   : > { %v6101_v43 = vmul.f32 0.01, %v6037_v11  ;;  %v6042_v31 = vadd.f32 %v11018_v40, %v6007_v25  ;;  %vm6069_vm5 = vcmp.gt.f32.partialorder %v6037_v11, 0.0  ;;  %v6102_v6 = vmul.f32 0.01, %v6038_v12 }
 0x971   : > { %v6130_v24 = vsel %vm6066_vm0, %v6034_v8, %v6098_v27  ;;  %v6043_v32 = vadd.f32 %v11018_v40, %v6008_v51  ;;  %vm6070_vm4 = vcmp.gt.f32.partialorder %v6038_v12, 0.0  ;;  %v6103_v53 = vmul.f32 0.01, %v6039_v45 }
 0x972   : > { %v6131_v19 = vsel %vm6067_vm2, %v6035_v50, %v6099_v56  ;;  %v6044_v37 = vadd.f32 %v11018_v40, %v6009_v55  ;;  %vm6071_vm12 = vcmp.gt.f32.partialorder %v6039_v45, 0.0  ;;  %v6104_v5 = vmul.f32 0.01, %v6040_v59  ;;  %6162 = vst.msk [vmem:[%s11096_s26] sm:$0xff] %vm5945_vm9, %v6130_v24 }
 0x973   : > { %v6132_v20 = vsel %vm6068_vm11, %v6036_v47, %v6100_v54  ;;  %v6045_v28 = vadd.f32 %v11018_v40, %v6010_v21  ;;  %vm6072_vm10 = vcmp.gt.f32.partialorder %v6040_v59, 0.0  ;;  %v6105_v15 = vmul.f32 0.01, %v6041_v36  ;;  %6163 = vst.msk [vmem:[%s11096_s26 + $0x8] sm:$0xff] %vm5945_vm9, %v6131_v19 }
 0x974   : > { %v6133_v1 = vsel %vm6069_vm5, %v6037_v11, %v6101_v43  ;;  %v6046_v33 = vadd.f32 %v11018_v40, %v6011_v57  ;;  %vm6073_vm15 = vcmp.gt.f32.partialorder %v6041_v36, 0.0  ;;  %v6106_v18 = vmul.f32 0.01, %v6042_v31  ;;  %6164 = vst.msk [vmem:[%s11096_s26 + $0x10] sm:$0xff] %vm5945_vm9, %v6132_v20 }
 0x975   : > { %v6134_v60 = vsel %vm6070_vm4, %v6038_v12, %v6102_v6  ;;  %v6047_v4 = vadd.f32 %v11018_v40, %v6012_v17  ;;  %vm6074_vm7 = vcmp.gt.f32.partialorder %v6042_v31, 0.0  ;;  %v6107_v41 = vmul.f32 0.01, %v6043_v32  ;;  %6165 = vst.msk [vmem:[%s11096_s26 + $0x18] sm:$0xff] %vm5945_vm9, %v6133_v1 }
 0x976   : > { %v6135_v58 = vsel %vm6071_vm12, %v6039_v45, %v6103_v53  ;;  %v6048_v35 = vadd.f32 %v11018_v40, %v6013_v63  ;;  %vm6075_vm13 = vcmp.gt.f32.partialorder %v6043_v32, 0.0  ;;  %v6108_v14 = vmul.f32 0.01, %v6044_v37  ;;  %6166 = vst.msk [vmem:[%s11096_s26 + $0x20] sm:$0xff] %vm5945_vm9, %v6134_v60 }
 0x977   : > { %v6136_v30 = vsel %vm6072_vm10, %v6040_v59, %v6104_v5  ;;  %v6049_v0 = vadd.f32 %v11018_v40, %v11033_v10  ;;  %vm6076_vm14 = vcmp.gt.f32.partialorder %v6044_v37, 0.0  ;;  %v6109_v16 = vmul.f32 0.01, %v6045_v28  ;;  %6167 = vst.msk [vmem:[%s11096_s26 + $0x28] sm:$0xff] %vm5945_vm9, %v6135_v58 }
 0x978   : > { %v6137_v23 = vsel %vm6073_vm15, %v6041_v36, %v6105_v15  ;;  %v6050_v26 = vadd.f32 %v11018_v40, %v11036_v44  ;;  %vm6077_vm1 = vcmp.gt.f32.partialorder %v6045_v28, 0.0  ;;  %v6110_v29 = vmul.f32 0.01, %v6046_v33  ;;  %6168 = vst.msk [vmem:[%s11096_s26 + $0x30] sm:$0xff] %vm5945_vm9, %v6136_v30 }
 0x979   : > { %v6138_v38 = vsel %vm6074_vm7, %v6042_v31, %v6106_v18  ;;  %v6051_v25 = vadd.f32 %v11018_v40, %v11039_v2  ;;  %vm6078_vm8 = vcmp.gt.f32.partialorder %v6046_v33, 0.0  ;;  %v6111_v51 = vmul.f32 0.01, %v6047_v4  ;;  %6169 = vst.msk [vmem:[%s11096_s26 + $0x38] sm:$0xff] %vm5945_vm9, %v6137_v23 }
 0x97a   : > { %v6139_v55 = vsel %vm6075_vm13, %v6043_v32, %v6107_v41  ;;  %v6052_v21 = vadd.f32 %v11018_v40, %v11043_v7  ;;  %vm6079_vm6 = vcmp.gt.f32.partialorder %v6047_v4, 0.0  ;;  %v6112_v57 = vmul.f32 0.01, %v6048_v35  ;;  %6170 = vst.msk [vmem:[%s11096_s26 + $0x40] sm:$0xff] %vm5945_vm9, %v6138_v38 }
 0x97b   : > { %v6140_v17 = vsel %vm6076_vm14, %v6044_v37, %v6108_v14  ;;  %v6053_v63 = vadd.f32 %v11018_v40, %v11046_v61  ;;  %vm6080_vm3 = vcmp.gt.f32.partialorder %v6048_v35, 0.0  ;;  %v6113_v10 = vmul.f32 0.01, %v6049_v0  ;;  %6171 = vst.msk [vmem:[%s11096_s26 + $0x48] sm:$0xff] %vm5945_vm9, %v6139_v55 }
 0x97c   : > { %v6141_v44 = vsel %vm6077_vm1, %v6045_v28, %v6109_v16  ;;  %v6054_v2 = vadd.f32 %v11018_v40, %v11049_v34  ;;  %vm6081_vm0 = vcmp.gt.f32.partialorder %v6049_v0, 0.0  ;;  %v6114_v8 = vmul.f32 0.01, %v6050_v26  ;;  %6172 = vst.msk [vmem:[%s11096_s26 + $0x50] sm:$0xff] %vm5945_vm9, %v6140_v17 }
 0x97d   : > { %v6142_v7 = vsel %vm6078_vm8, %v6046_v33, %v6110_v29  ;;  %v6055_v61 = vadd.f32 %v11018_v40, %v11053_v62  ;;  %vm6082_vm2 = vcmp.gt.f32.partialorder %v6050_v26, 0.0  ;;  %v6115_v50 = vmul.f32 0.01, %v6051_v25  ;;  %6173 = vst.msk [vmem:[%s11096_s26 + $0x58] sm:$0xff] %vm5945_vm9, %v6141_v44 }
 0x97e   : > { %v6143_v47 = vsel %vm6079_vm6, %v6047_v4, %v6111_v51  ;;  %v6056_v34 = vadd.f32 %v11018_v40, %v11056_v52  ;;  %vm6083_vm11 = vcmp.gt.f32.partialorder %v6051_v25, 0.0  ;;  %v6116_v11 = vmul.f32 0.01, %v6052_v21  ;;  %6174 = vst.msk [vmem:[%s11096_s26 + $0x60] sm:$0xff] %vm5945_vm9, %v6142_v7 }
 0x97f   : > { %v6144_v12 = vsel %vm6080_vm3, %v6048_v35, %v6112_v57  ;;  %v6057_v62 = vadd.f32 %v11018_v40, %v11059_v49  ;;  %vm6084_vm5 = vcmp.gt.f32.partialorder %v6052_v21, 0.0  ;;  %v6117_v27 = vmul.f32 0.01, %v6053_v63  ;;  %6175 = vst.msk [vmem:[%s11096_s26 + $0x68] sm:$0xff] %vm5945_vm9, %v6143_v47 }
 0x980   : > { %v6145_v45 = vsel %vm6081_vm0, %v6049_v0, %v6113_v10  ;;  %v6058_v52 = vadd.f32 %v11018_v40, %v11063_v22  ;;  %vm6085_vm4 = vcmp.gt.f32.partialorder %v6053_v63, 0.0  ;;  %v6118_v56 = vmul.f32 0.01, %v6054_v2  ;;  %6176 = vst.msk [vmem:[%s11096_s26 + $0x70] sm:$0xff] %vm5945_vm9, %v6144_v12 }
 0x981   : > { %v6146_v59 = vsel %vm6082_vm2, %v6050_v26, %v6114_v8  ;;  %v6059_v49 = vadd.f32 %v11018_v40, %v11066_v9  ;;  %vm6086_vm12 = vcmp.gt.f32.partialorder %v6054_v2, 0.0  ;;  %v6119_v54 = vmul.f32 0.01, %v6055_v61  ;;  %6177 = vst.msk [vmem:[%s11096_s26 + $0x78] sm:$0xff] %vm5945_vm9, %v6145_v45 }
 0x982   : > { %v6147_v36 = vsel %vm6083_vm11, %v6051_v25, %v6115_v50  ;;  %v6060_v22 = vadd.f32 %v11018_v40, %v11069_v48  ;;  %vm6087_vm10 = vcmp.gt.f32.partialorder %v6055_v61, 0.0  ;;  %v6120_v43 = vmul.f32 0.01, %v6056_v34  ;;  %6178 = vst.msk [vmem:[%s11096_s26 + $0x80] sm:$0xff] %vm5945_vm9, %v6146_v59 }
 0x983   : > { %v6148_v31 = vsel %vm6084_vm5, %v6052_v21, %v6116_v11  ;;  %v6061_v9 = vadd.f32 %v11018_v40, %v11073_v13  ;;  %vm6088_vm15 = vcmp.gt.f32.partialorder %v6056_v34, 0.0  ;;  %v6121_v6 = vmul.f32 0.01, %v6057_v62  ;;  %6179 = vst.msk [vmem:[%s11096_s26 + $0x88] sm:$0xff] %vm5945_vm9, %v6147_v36 }
 0x984   : > { %v6149_v24 = vsel %vm6085_vm4, %v6053_v63, %v6117_v27  ;;  %v6062_v48 = vadd.f32 %v11018_v40, %v11076_v42  ;;  %vm6089_vm7 = vcmp.gt.f32.partialorder %v6057_v62, 0.0  ;;  %v6122_v32 = vmul.f32 0.01, %v6058_v52  ;;  %6180 = vst.msk [vmem:[%s11096_s26 + $0x90] sm:$0xff] %vm5945_vm9, %v6148_v31 }
 0x985   : > { %v6150_v53 = vsel %vm6086_vm12, %v6054_v2, %v6118_v56  ;;  %v6063_v13 = vadd.f32 %v11018_v40, %v11080_v3  ;;  %vm6090_vm13 = vcmp.gt.f32.partialorder %v6058_v52, 0.0  ;;  %v6123_v19 = vmul.f32 0.01, %v6059_v49  ;;  %6181 = vst.msk [vmem:[%s11096_s26 + $0x98] sm:$0xff] %vm5945_vm9, %v6149_v24 }
 0x986   : > { %v6151_v37 = vsel %vm6087_vm10, %v6055_v61, %v6119_v54  ;;  %v6064_v42 = vadd.f32 %v11018_v40, %v11084_v46  ;;  %vm6091_vm14 = vcmp.gt.f32.partialorder %v6059_v49, 0.0  ;;  %v6124_v5 = vmul.f32 0.01, %v6060_v22  ;;  %6182 = vst.msk [vmem:[%s11096_s26 + $0xa0] sm:$0xff] %vm5945_vm9, %v6150_v53 }
 0x987   : > { %v6152_v20 = vsel %vm6088_vm15, %v6056_v34, %v6120_v43  ;;  %v6065_v3 = vadd.f32 %v11018_v40, %v11088_v39  ;;  %vm6092_vm1 = vcmp.gt.f32.partialorder %v6060_v22, 0.0  ;;  %v6125_v28 = vmul.f32 0.01, %v6061_v9  ;;  %6183 = vst.msk [vmem:[%s11096_s26 + $0xa8] sm:$0xff] %vm5945_vm9, %v6151_v37 }
 0x988   : > { %v6153_v15 = vsel %vm6089_vm7, %v6057_v62, %v6121_v6  ;;  %vm6093_vm8 = vcmp.gt.f32.partialorder %v6061_v9, 0.0  ;;  %v6126_v46 = vmul.f32 0.01, %v6062_v48  ;;  %v6154_v1 = vsel %vm6090_vm13, %v6058_v52, %v6122_v32  ;;  %6184 = vst.msk [vmem:[%s11096_s26 + $0xb0] sm:$0xff] %vm5945_vm9, %v6152_v20 }
 0x989   : > { %vm6094_vm6 = vcmp.gt.f32.partialorder %v6062_v48, 0.0  ;;  %v6127_v33 = vmul.f32 0.01, %v6063_v13  ;;  %v6155_v18 = vsel %vm6091_vm14, %v6059_v49, %v6123_v19  ;;  %vm6095_vm3 = vcmp.gt.f32.partialorder %v6063_v13, 0.0  ;;  %6185 = vst.msk [vmem:[%s11096_s26 + $0xb8] sm:$0xff] %vm5945_vm9, %v6153_v15 }
 0x98a   : > { %v6128_v40 = vmul.f32 0.01, %v6064_v42  ;;  %v6156_v39 = vsel %vm6092_vm1, %v6060_v22, %v6124_v5  ;;  %vm6096_vm0 = vcmp.gt.f32.partialorder %v6064_v42, 0.0  ;;  %v6129_v60 = vmul.f32 0.01, %v6065_v3  ;;  %6186 = vst.msk [vmem:[%s11096_s26 + $0xc0] sm:$0xff] %vm5945_vm9, %v6154_v1 }
 0x98b   : > { %v6157_v4 = vsel %vm6093_vm8, %v6061_v9, %v6125_v28  ;;  %vm6097_vm2 = vcmp.gt.f32.partialorder %v6065_v3, 0.0  ;;  %v6158_v41 = vsel %vm6094_vm6, %v6062_v48, %v6126_v46  ;;  %6187 = vst.msk [vmem:[%s11096_s26 + $0xc8] sm:$0xff] %vm5945_vm9, %v6155_v18  ;;  %v6159_v58 = vsel %vm6095_vm3, %v6063_v13, %v6127_v33 }
 0x98c   : > { %6188 = vst.msk [vmem:[%s11096_s26 + $0xd0] sm:$0xff] %vm5945_vm9, %v6156_v39  ;;  %v6160_v35 = vsel %vm6096_vm0, %v6064_v42, %v6128_v40  ;;  %v6161_v14 = vsel %vm6097_vm2, %v6065_v3, %v6129_v60 }
 0x98d   : > { %6189 = vst.msk [vmem:[%s11096_s26 + $0xd8] sm:$0xff] %vm5945_vm9, %v6157_v4 }
 0x98e   : > { %6190 = vst.msk [vmem:[%s11096_s26 + $0xe0] sm:$0xff] %vm5945_vm9, %v6158_v41 }
 0x98f   : > { %6191 = vst.msk [vmem:[%s11096_s26 + $0xe8] sm:$0xff] %vm5945_vm9, %v6159_v58 }
 0x990   : > { %6192 = vst.msk [vmem:[%s11096_s26 + $0xf0] sm:$0xff] %vm5945_vm9, %v6160_v35 }
 0x991   : > { %6193 = vst.msk [vmem:[%s11096_s26 + $0xf8] sm:$0xff] %vm5945_vm9, %v6161_v14 }
 0x992 PF: > { %s25_s25 = sadd.s32 1, %s6469_s25  }
 0x993   : > { %p22_p7 = scmp.ge.s32.totalorder %s25_s25, 4  }
 0x995   :  { %24 = sbr.rel (!%p22_p7) target bundleno = 2 (0x2), region = 127 }
 0x99a   :  { %6215 = vsyncpa [#allocation5], 1 }
 0x99b   :  { %6217 = vsyncpa [#allocation5 + $0x1], 1 }
 0x99c   :  { %6218 = vsyncpa [#allocation7], 1 }

</bundles_post_ra>
